<compile_context>
chip_gen: v7x
topology: tpu7x:2x2x1
jax: 0.10.0
libtpu: 0.0.40
codegen_flags: <defaults>
</compile_context>

<pallas_src>
import functools

import jax
import jax.numpy as jnp
from jax.experimental import pallas as pl
from jax.experimental.pallas import tpu as pltpu


# ----------------------------- fused kernel -----------------------------

def _block_kernel(x_ref, ctx_ref,
                  g1_ref, b1_ref, g2_ref, b2_ref, g3_ref, b3_ref,
                  wq1_ref, wk1_ref, wv1_ref, wo1_ref, bo1_ref,
                  wq2_ref, wk2_ref, wv2_ref, wo2_ref, bo2_ref,
                  wf1_ref, bf1_ref, wf2_ref, bf2_ref, wfo_ref, bfo_ref,
                  o_ref,
                  k1_ref, v1_ref, k2_ref, v2_ref, q_scr, o_scr,
                  *, heads, dim_head, scale, q_block):
    f32 = jnp.float32
    cdt = q_scr.dtype          # matmul-operand / attention-scratch dtype (f32 or bf16)
    dh = dim_head
    qi = pl.program_id(1)      # q-tile index within the current batch

    def layer_norm(x, g_ref, b_ref):
        # One-pass statistics in f32; biased variance, eps=1e-5 (nn.LayerNorm).
        n = x.shape[-1]
        s = jnp.sum(x, axis=-1, keepdims=True)
        ss = jnp.sum(x * x, axis=-1, keepdims=True)
        mean = s * (1.0 / n)
        var = ss * (1.0 / n) - mean * mean
        return (x - mean) * jax.lax.rsqrt(var + 1e-5) * g_ref[...] + b_ref[...]

    def split_heads_into(dst_ref, t2d):
        # (L, heads*dim_head) -> dst_ref (heads, L, dim_head) via static lane slices.
        for h in range(heads):
            dst_ref[h] = t2d[:, h * dh:(h + 1) * dh].astype(dst_ref.dtype)

    # ---- once per batch: cache K/V for both attentions in VMEM scratch ----
    # Depends on the q-tile axis staying "arbitrary" (sequential) with b outer.
    @pl.when(qi == 0)
    def _compute_kv():
        xn1_full = layer_norm(x_ref[0].astype(f32), g1_ref, b1_ref).astype(cdt)
        split_heads_into(k1_ref, jnp.dot(xn1_full, wk1_ref[...],
                                         preferred_element_type=f32))
        split_heads_into(v1_ref, jnp.dot(xn1_full, wv1_ref[...],
                                         preferred_element_type=f32))
        ctx = ctx_ref[0]                    # context is NOT layer-normed (as in ref)
        split_heads_into(k2_ref, jnp.dot(ctx, wk2_ref[...],
                                         preferred_element_type=f32))
        split_heads_into(v2_ref, jnp.dot(ctx, wv2_ref[...],
                                         preferred_element_type=f32))

    def mha(x_norm, wq_ref, k_ref, v_ref, wo_ref, bo_ref):
        # Q projection; attention scale folded into Q (small tensor), not scores.
        q2d = jnp.dot(x_norm.astype(cdt), wq_ref[...],
                      preferred_element_type=f32) * scale                # (tq, inner)
        split_heads_into(q_scr, q2d)
        s = jnp.einsum('hqd,hkd->hqk', q_scr[...], k_ref[...],
                       preferred_element_type=f32)                       # (H, tq, kv) f32
        m = jnp.max(s, axis=-1, keepdims=True)
        e = jnp.exp(s - m)
        p = e * pl.reciprocal(jnp.sum(e, axis=-1, keepdims=True), approx=True)
        o = jnp.einsum('hqk,hkd->hqd', p.astype(cdt), v_ref[...],
                       preferred_element_type=f32)                       # (H, tq, dh)
        # Pack heads to (tq, inner) and do ONE full-contraction output projection.
        for h in range(heads):
            o_scr[:, h * dh:(h + 1) * dh] = o[h].astype(o_scr.dtype)
        return jnp.dot(o_scr[...], wo_ref[...],
                       preferred_element_type=f32) + bo_ref[...]

    # ---- per q-tile: attn1 + attn2 + GEGLU FF, residuals kept in f32 VMEM ----
    i0 = pl.multiple_of(qi * q_block, q_block)
    x_t = x_ref[0, pl.ds(i0, q_block), :].astype(f32)                    # (tq, D)
    h1 = x_t + mha(layer_norm(x_t, g1_ref, b1_ref),
                   wq1_ref, k1_ref, v1_ref, wo1_ref, bo1_ref)
    h2 = h1 + mha(layer_norm(h1, g2_ref, b2_ref),
                  wq2_ref, k2_ref, v2_ref, wo2_ref, bo2_ref)
    xn3 = layer_norm(h2, g3_ref, b3_ref)
    xn3c = xn3.astype(cdt)
    a = jnp.dot(xn3c, wf1_ref[...], preferred_element_type=f32) + bf1_ref[...]
    g = jnp.dot(xn3c, wf2_ref[...], preferred_element_type=f32) + bf2_ref[...]
    hid = a * (0.5 * g * (1.0 + jax.lax.erf(g * (2.0 ** -0.5))))   # exact GELU (f32)
    ff = jnp.dot(hid.astype(cdt), wfo_ref[...],
                 preferred_element_type=f32) + bfo_ref[...]
    o_ref[0] = (h2 + ff).astype(o_ref.dtype)


# ----------------------------- wrapper -----------------------------

def basic_transformer_block(x, context, params, n_heads, d_head,
                            q_block=None, compute_dtype=jnp.float32):
    B, S, D = x.shape
    _, T, Dc = context.shape
    inner = n_heads * d_head
    f32 = jnp.float32
    cdt = jnp.dtype(compute_dtype)

    wq1, wk1, wv1, wo1, bo1 = params["attn1"]
    wq2, wk2, wv2, wo2, bo2 = params["attn2"]
    wf1, bf1, wf2, bf2, wfo, bfo = params["ff"]
    ff_inner = wf1.shape[1]

    # Tile selection: one tile per batch for small S (avoid per-step overhead),
    # 512/256/128 tiles for long sequences (keeps the MXU fed, amortizes launch).
    if q_block is None:
        q_block = S
        if S > 512:
            for cand in (512, 256, 128):
                if S % cand == 0:
                    q_block = cand
                    break
    assert S % q_block == 0

    def cw(w):  # matmul weight -> compute dtype at the call boundary
        return w.astype(cdt)

    args = (
        x, context.astype(cdt),
        params["norm1_g"].reshape(1, D).astype(f32),
        params["norm1_b"].reshape(1, D).astype(f32),
        params["norm2_g"].reshape(1, D).astype(f32),
        params["norm2_b"].reshape(1, D).astype(f32),
        params["norm3_g"].reshape(1, D).astype(f32),
        params["norm3_b"].reshape(1, D).astype(f32),
        cw(wq1), cw(wk1), cw(wv1), cw(wo1), bo1.reshape(1, D).astype(f32),
        cw(wq2), cw(wk2), cw(wv2), cw(wo2), bo2.reshape(1, D).astype(f32),
        cw(wf1), bf1.reshape(1, ff_inner).astype(f32),
        cw(wf2), bf2.reshape(1, ff_inner).astype(f32),
        cw(wfo), bfo.reshape(1, D).astype(f32),
    )

    # --- VMEM budget & cost estimate -----------------------------------------
    const_bytes = sum(int(a.size) * a.dtype.itemsize for a in args[2:])
    scratch_bytes = (2 * n_heads * S * d_head + 2 * n_heads * T * d_head
                     + n_heads * q_block * d_head + q_block * inner) * cdt.itemsize
    stream_bytes = 2 * (S * D * 4 + T * Dc * cdt.itemsize + q_block * D * 4)
    temp_bytes = (n_heads * q_block * max(S, T) * 4 * 2
                  + 3 * q_block * ff_inner * 4 + (4 << 20))
    est = 2 * const_bytes + scratch_bytes + stream_bytes + temp_bytes
    try:
        vmem_cap = int(pltpu.get_tpu_info().vmem_capacity_bytes)
    except Exception:
        vmem_cap = 64 << 20
    vmem_limit = int(min(int(0.75 * vmem_cap), max(32 << 20, int(1.5 * est))))

    flops = 2 * B * (2 * S * D * inner        # K,V (self)
                     + 2 * T * Dc * inner     # K,V (cross)
                     + 2 * S * D * inner      # Q (both attns)
                     + 2 * S * S * inner      # scores + PV (self)
                     + 2 * S * T * inner      # scores + PV (cross)
                     + 2 * S * inner * D      # output proj (both attns)
                     + 3 * S * D * ff_inner)  # GEGLU FF
    transcendentals = B * (n_heads * S * (S + T) + S * ff_inner + 8 * S)
    bytes_accessed = int(B * (2 * S * D * 4 + T * Dc * cdt.itemsize) + const_bytes)
    cost = pl.CostEstimate(flops=int(flops), transcendentals=int(transcendentals),
                           bytes_accessed=bytes_accessed)

    kern = functools.partial(_block_kernel, heads=n_heads, dim_head=d_head,
                             scale=d_head ** (-0.5), q_block=q_block)

    def build_call(single_buffer_consts):
        def _const(shape):
            nd = len(shape)
            idx = lambda b, i, _nd=nd: (0,) * _nd
            if single_buffer_consts:
                try:
                    # Grid-invariant: one buffer is enough; default double-buffer
                    # is pure VMEM waste for these operands.
                    return pl.BlockSpec(shape, idx, pipeline_mode=pl.Buffered(1))
                except Exception:
                    pass
            return pl.BlockSpec(shape, idx)

        in_specs = [
            pl.BlockSpec((1, S, D), lambda b, i: (b, 0, 0)),    # x (full seq per batch)
            pl.BlockSpec((1, T, Dc), lambda b, i: (b, 0, 0)),   # context
            _const((1, D)), _const((1, D)),                     # norm1 g, b
            _const((1, D)), _const((1, D)),                     # norm2 g, b
            _const((1, D)), _const((1, D)),                     # norm3 g, b
            _const((D, inner)), _const((D, inner)), _const((D, inner)),
            _const((inner, D)), _const((1, D)),                 # attn1
            _const((D, inner)), _const((Dc, inner)), _const((Dc, inner)),
            _const((inner, D)), _const((1, D)),                 # attn2
            _const((D, ff_inner)), _const((1, ff_inner)),
            _const((D, ff_inner)), _const((1, ff_inner)),
            _const((ff_inner, D)), _const((1, D)),              # ff
        ]

        scratch_shapes = [
            pltpu.VMEM((n_heads, S, d_head), cdt),        # K (self-attn)
            pltpu.VMEM((n_heads, S, d_head), cdt),        # V (self-attn)
            pltpu.VMEM((n_heads, T, d_head), cdt),        # K (cross-attn)
            pltpu.VMEM((n_heads, T, d_head), cdt),        # V (cross-attn)
            pltpu.VMEM((n_heads, q_block, d_head), cdt),  # head-split Q (per tile)
            pltpu.VMEM((q_block, inner), cdt),            # packed attn out (per tile)
        ]

        return pl.pallas_call(
            kern,
            out_shape=jax.ShapeDtypeStruct((B, S, D), x.dtype),
            grid=(B, S // q_block),
            in_specs=in_specs,
            out_specs=pl.BlockSpec((1, q_block, D), lambda b, i: (b, i, 0)),
            scratch_shapes=scratch_shapes,
            compiler_params=pltpu.CompilerParams(
                # q-tile axis MUST stay "arbitrary": the K/V scratch cached at
                # qi==0 is reused by later tiles of the same batch.
                dimension_semantics=("parallel", "arbitrary"),
                vmem_limit_bytes=vmem_limit),
            cost_estimate=cost,
        )

    try:
        return jax.block_until_ready(build_call(True)(*args))
    except Exception:
        # Fallback: default double-buffering for constant operands.
        return jax.block_until_ready(build_call(False)(*args))


# ----------------------------- parameter init -----------------------------

def init_params(key, dim, n_heads, d_head, context_dim, ff_mult=4):
    inner = n_heads * d_head
    ff_inner = dim * ff_mult
    ks = jax.random.split(key, 22)

    def w(k, shape, scale=0.2):
        return (scale * jax.random.normal(k, shape)).astype(jnp.float32)

    return {
        # LN params perturbed away from (1, 0) so the test actually exercises them.
        "norm1_g": 1.0 + 0.1 * jax.random.normal(ks[16], (dim,)),
        "norm1_b": 0.1 * jax.random.normal(ks[17], (dim,)),
        "norm2_g": 1.0 + 0.1 * jax.random.normal(ks[18], (dim,)),
        "norm2_b": 0.1 * jax.random.normal(ks[19], (dim,)),
        "norm3_g": 1.0 + 0.1 * jax.random.normal(ks[20], (dim,)),
        "norm3_b": 0.1 * jax.random.normal(ks[21], (dim,)),
        # attn1: self-attention (keys/values come from query_dim)
        "attn1": (w(ks[0], (dim, inner)),        # to_q
                  w(ks[1], (dim, inner)),        # to_k
                  w(ks[2], (dim, inner)),        # to_v
                  w(ks[3], (inner, dim)),        # to_out weight
                  w(ks[4], (dim,))),             # to_out bias
        # attn2: cross-attention (keys/values come from context_dim)
        "attn2": (w(ks[5], (dim, inner)),
                  w(ks[6], (context_dim, inner)),
                  w(ks[7], (context_dim, inner)),
                  w(ks[8], (inner, dim)),
                  w(ks[9], (dim,))),
        # GEGLU feed-forward
        "ff": (w(ks[10], (dim, ff_inner)),       # proj1 weight
               w(ks[11], (ff_inner,)),           # proj1 bias
               w(ks[12], (dim, ff_inner)),       # proj2 weight
               w(ks[13], (ff_inner,)),           # proj2 bias
               w(ks[14], (ff_inner, dim)),       # out weight
               w(ks[15], (dim,))),               # out bias
    }


# ----------------------------- pure-JAX reference -----------------------------

def _ref_block(x, context, params, n_heads, d_head):
    def ln(x, g, b):
        m = x.mean(-1, keepdims=True)
        v = ((x - m) ** 2).mean(-1, keepdims=True)
        return (x - m) / jnp.sqrt(v + 1e-5) * g + b

    def attn(xq, xc, p):
        wq, wk, wv, wo, bo = p
        q = xq @ wq
        k = xc @ wk
        v = xc @ wv
        B, S, _ = q.shape
        T = k.shape[1]
        q = q.reshape(B, S, n_heads, d_head).transpose(0, 2, 1, 3)
        k = k.reshape(B, T, n_heads, d_head).transpose(0, 2, 1, 3)
        v = v.reshape(B, T, n_heads, d_head).transpose(0, 2, 1, 3)
        s = jnp.einsum("bhsd,bhtd->bhst", q, k) * (d_head ** -0.5)
        pr = jax.nn.softmax(s, axis=-1)
        o = jnp.einsum("bhst,bhtd->bhsd", pr, v)
        o = o.transpose(0, 2, 1, 3).reshape(B, S, n_heads * d_head)
        return o @ wo + bo

    def ff(x, p):
        w1, b1, w2, b2, wo, bo = p
        a = x @ w1 + b1
        g = x @ w2 + b2
        gelu_g = 0.5 * g * (1.0 + jax.lax.erf(g / jnp.sqrt(2.0)))
        return (a * gelu_g) @ wo + bo

    xn1 = ln(x, params["norm1_g"], params["norm1_b"])
    x = attn(xn1, xn1, params["attn1"]) + x
    xn2 = ln(x, params["norm2_g"], params["norm2_b"])
    x = attn(xn2, context, params["attn2"]) + x
    xn3 = ln(x, params["norm3_g"], params["norm3_b"])
    x = ff(xn3, params["ff"]) + x
    return x


# ----------------------------- main -----------------------------

if __name__ == "__main__":
    # Small shapes consistent with the module:
    #   dim=32, n_heads=4, d_head=8 (inner_dim = 32), ff inner = 4*32 = 128
    B, S, DIM = 2, 16, 32
    N_HEADS, D_HEAD = 4, 8
    T, CTX_DIM = 8, 16

    key = jax.random.PRNGKey(0)
    k_x, k_ctx, k_p = jax.random.split(key, 3)

    hidden_states = jax.random.normal(k_x, (B, S, DIM), jnp.float32)
    context = jax.random.normal(k_ctx, (B, T, CTX_DIM), jnp.float32)
    params = init_params(k_p, DIM, N_HEADS, D_HEAD, CTX_DIM)

    ref = jax.block_until_ready(_ref_block(hidden_states, context, params,
                                           N_HEADS, D_HEAD))

    # 1) f32 matmul path, collapsed grid (q_block = S): tight parity check.
    out_f32 = basic_transformer_block(hidden_states, context, params,
                                      N_HEADS, D_HEAD,
                                      compute_dtype=jnp.float32)
    out_f32 = jax.block_until_ready(out_f32)
    assert out_f32.shape == (B, S, DIM), out_f32.shape
    assert bool(jnp.all(jnp.isfinite(out_f32)))
    err_f32 = float(jnp.max(jnp.abs(out_f32 - ref)))
    assert bool(jnp.allclose(out_f32, ref, rtol=1e-2, atol=1e-2)), err_f32

    # 2) bf16 matmul operands + bf16 K/V scratch (v6e/v7x recipe), q_block=8:
    #    exercises the per-batch K/V scratch-reuse path across multiple q-tiles.
    out_bf16 = basic_transformer_block(hidden_states, context, params,
                                       N_HEADS, D_HEAD,
                                       q_block=8, compute_dtype=jnp.bfloat16)
    out_bf16 = jax.block_until_ready(out_bf16)
    assert out_bf16.shape == (B, S, DIM), out_bf16.shape
    assert bool(jnp.all(jnp.isfinite(out_bf16)))
    err_bf16 = float(jnp.max(jnp.abs(out_bf16 - ref)))
    assert bool(jnp.allclose(out_bf16, ref, rtol=5e-2, atol=1e-1)), err_bf16

    print("KERNEL_OK")
</pallas_src>

<mosaic_0001>
module attributes {stable_mosaic.version = 11 : i64} {
  func.func @_block_kernel(%arg0: i32, %arg1: i32, %arg2: memref<1x16x32xf32, #tpu.memory_space<vmem>>, %arg3: memref<1x8x16xf32, #tpu.memory_space<vmem>>, %arg4: memref<1x32xf32, #tpu.memory_space<vmem>>, %arg5: memref<1x32xf32, #tpu.memory_space<vmem>>, %arg6: memref<1x32xf32, #tpu.memory_space<vmem>>, %arg7: memref<1x32xf32, #tpu.memory_space<vmem>>, %arg8: memref<1x32xf32, #tpu.memory_space<vmem>>, %arg9: memref<1x32xf32, #tpu.memory_space<vmem>>, %arg10: memref<32x32xf32, #tpu.memory_space<vmem>>, %arg11: memref<32x32xf32, #tpu.memory_space<vmem>>, %arg12: memref<32x32xf32, #tpu.memory_space<vmem>>, %arg13: memref<32x32xf32, #tpu.memory_space<vmem>>, %arg14: memref<1x32xf32, #tpu.memory_space<vmem>>, %arg15: memref<32x32xf32, #tpu.memory_space<vmem>>, %arg16: memref<16x32xf32, #tpu.memory_space<vmem>>, %arg17: memref<16x32xf32, #tpu.memory_space<vmem>>, %arg18: memref<32x32xf32, #tpu.memory_space<vmem>>, %arg19: memref<1x32xf32, #tpu.memory_space<vmem>>, %arg20: memref<32x128xf32, #tpu.memory_space<vmem>>, %arg21: memref<1x128xf32, #tpu.memory_space<vmem>>, %arg22: memref<32x128xf32, #tpu.memory_space<vmem>>, %arg23: memref<1x128xf32, #tpu.memory_space<vmem>>, %arg24: memref<128x32xf32, #tpu.memory_space<vmem>>, %arg25: memref<1x32xf32, #tpu.memory_space<vmem>>, %arg26: memref<1x16x32xf32, #tpu.memory_space<vmem>>, %arg27: memref<4x16x8xf32, #tpu.memory_space<vmem>>, %arg28: memref<4x16x8xf32, #tpu.memory_space<vmem>>, %arg29: memref<4x8x8xf32, #tpu.memory_space<vmem>>, %arg30: memref<4x8x8xf32, #tpu.memory_space<vmem>>, %arg31: memref<4x16x8xf32, #tpu.memory_space<vmem>>, %arg32: memref<16x32xf32, #tpu.memory_space<vmem>>) attributes {dimension_semantics = [#tpu.dimension_semantics<parallel>, #tpu.dimension_semantics<arbitrary>], iteration_bounds = array<i64: 2, 1>, scalar_prefetch = 0 : i64, scratch_operands = 6 : i64, tpu.core_type = #tpu.core_type<tc>, window_params = [{transform_indices = @transform_0, window_bounds = array<i64: 1, 16, 32>}, {transform_indices = @transform_1, window_bounds = array<i64: 1, 8, 16>}, {pipeline_mode = #tpu.pipeline_mode<synchronous>, transform_indices = @transform_2, window_bounds = array<i64: 1, 32>}, {pipeline_mode = #tpu.pipeline_mode<synchronous>, transform_indices = @transform_3, window_bounds = array<i64: 1, 32>}, {pipeline_mode = #tpu.pipeline_mode<synchronous>, transform_indices = @transform_4, window_bounds = array<i64: 1, 32>}, {pipeline_mode = #tpu.pipeline_mode<synchronous>, transform_indices = @transform_5, window_bounds = array<i64: 1, 32>}, {pipeline_mode = #tpu.pipeline_mode<synchronous>, transform_indices = @transform_6, window_bounds = array<i64: 1, 32>}, {pipeline_mode = #tpu.pipeline_mode<synchronous>, transform_indices = @transform_7, window_bounds = array<i64: 1, 32>}, {pipeline_mode = #tpu.pipeline_mode<synchronous>, transform_indices = @transform_8, window_bounds = array<i64: 32, 32>}, {pipeline_mode = #tpu.pipeline_mode<synchronous>, transform_indices = @transform_9, window_bounds = array<i64: 32, 32>}, {pipeline_mode = #tpu.pipeline_mode<synchronous>, transform_indices = @transform_10, window_bounds = array<i64: 32, 32>}, {pipeline_mode = #tpu.pipeline_mode<synchronous>, transform_indices = @transform_11, window_bounds = array<i64: 32, 32>}, {pipeline_mode = #tpu.pipeline_mode<synchronous>, transform_indices = @transform_12, window_bounds = array<i64: 1, 32>}, {pipeline_mode = #tpu.pipeline_mode<synchronous>, transform_indices = @transform_13, window_bounds = array<i64: 32, 32>}, {pipeline_mode = #tpu.pipeline_mode<synchronous>, transform_indices = @transform_14, window_bounds = array<i64: 16, 32>}, {pipeline_mode = #tpu.pipeline_mode<synchronous>, transform_indices = @transform_15, window_bounds = array<i64: 16, 32>}, {pipeline_mode = #tpu.pipeline_mode<synchronous>, transform_indices = @transform_16, window_bounds = array<i64: 32, 32>}, {pipeline_mode = #tpu.pipeline_mode<synchronous>, transform_indices = @transform_17, window_bounds = array<i64: 1, 32>}, {pipeline_mode = #tpu.pipeline_mode<synchronous>, transform_indices = @transform_18, window_bounds = array<i64: 32, 128>}, {pipeline_mode = #tpu.pipeline_mode<synchronous>, transform_indices = @transform_19, window_bounds = array<i64: 1, 128>}, {pipeline_mode = #tpu.pipeline_mode<synchronous>, transform_indices = @transform_20, window_bounds = array<i64: 32, 128>}, {pipeline_mode = #tpu.pipeline_mode<synchronous>, transform_indices = @transform_21, window_bounds = array<i64: 1, 128>}, {pipeline_mode = #tpu.pipeline_mode<synchronous>, transform_indices = @transform_22, window_bounds = array<i64: 128, 32>}, {pipeline_mode = #tpu.pipeline_mode<synchronous>, transform_indices = @transform_23, window_bounds = array<i64: 1, 32>}, {transform_indices = @transform_24, window_bounds = array<i64: 1, 16, 32>}]} {
    %c0_i32 = arith.constant 0 : i32
    %0 = arith.cmpi eq, %arg1, %c0_i32 : i32
    %1 = arith.extui %0 : i1 to i32
    %c0_i32_0 = arith.constant 0 : i32
    %2 = arith.cmpi ne, %1, %c0_i32_0 : i32
    scf.if %2 {
      %c0_131 = arith.constant 0 : index
      %c0_132 = arith.constant 0 : index
      %c0_133 = arith.constant 0 : index
      %216 = vector.load %arg2[%c0_131, %c0_132, %c0_133] : memref<1x16x32xf32, #tpu.memory_space<vmem>>, vector<1x16x32xf32>
      %217 = vector.shape_cast %216 : vector<1x16x32xf32> to vector<16x32xf32>
      %cst_134 = arith.constant dense<0.000000e+00> : vector<16xf32>
      %218 = vector.multi_reduction <add>, %217, %cst_134 [1] : vector<16x32xf32> to vector<16xf32>
      %219 = vector.shape_cast %218 : vector<16xf32> to vector<16x1xf32>
      %220 = arith.mulf %217, %217 : vector<16x32xf32>
      %cst_135 = arith.constant dense<0.000000e+00> : vector<16xf32>
      %221 = vector.multi_reduction <add>, %220, %cst_135 [1] : vector<16x32xf32> to vector<16xf32>
      %222 = vector.shape_cast %221 : vector<16xf32> to vector<16x1xf32>
      %cst_136 = arith.constant 3.125000e-02 : f32
      %223 = vector.broadcast %cst_136 : f32 to vector<16x1xf32>
      %224 = arith.mulf %219, %223 : vector<16x1xf32>
      %cst_137 = arith.constant 3.125000e-02 : f32
      %225 = vector.broadcast %cst_137 : f32 to vector<16x1xf32>
      %226 = arith.mulf %222, %225 : vector<16x1xf32>
      %227 = arith.mulf %224, %224 : vector<16x1xf32>
      %228 = arith.subf %226, %227 : vector<16x1xf32>
      %229 = vector.broadcast %224 : vector<16x1xf32> to vector<16x32xf32>
      %230 = arith.subf %217, %229 : vector<16x32xf32>
      %cst_138 = arith.constant 9.99999974E-6 : f32
      %231 = vector.broadcast %cst_138 : f32 to vector<16x1xf32>
      %232 = arith.addf %228, %231 : vector<16x1xf32>
      %233 = math.rsqrt %232 : vector<16x1xf32>
      %234 = vector.broadcast %233 : vector<16x1xf32> to vector<16x32xf32>
      %235 = arith.mulf %230, %234 : vector<16x32xf32>
      %c0_139 = arith.constant 0 : index
      %c0_140 = arith.constant 0 : index
      %236 = vector.load %arg4[%c0_139, %c0_140] : memref<1x32xf32, #tpu.memory_space<vmem>>, vector<1x32xf32>
      %237 = vector.broadcast %236 : vector<1x32xf32> to vector<16x32xf32>
      %238 = arith.mulf %235, %237 : vector<16x32xf32>
      %c0_141 = arith.constant 0 : index
      %c0_142 = arith.constant 0 : index
      %239 = vector.load %arg5[%c0_141, %c0_142] : memref<1x32xf32, #tpu.memory_space<vmem>>, vector<1x32xf32>
      %240 = vector.broadcast %239 : vector<1x32xf32> to vector<16x32xf32>
      %241 = arith.addf %238, %240 : vector<16x32xf32>
      %c0_143 = arith.constant 0 : index
      %c0_144 = arith.constant 0 : index
      %242 = vector.load %arg11[%c0_143, %c0_144] : memref<32x32xf32, #tpu.memory_space<vmem>>, vector<32x32xf32>
      %cst_145 = arith.constant dense<0.000000e+00> : vector<16x32xf32>
      %243 = tpu.matmul %241, %242, %cst_145 {dimension_numbers = #tpu.dot_dimension_numbers<[1], [0], [0], [1], [0, 0, 1, 1], [], []>} : vector<16x32xf32>, vector<32x32xf32>, vector<16x32xf32> -> vector<16x32xf32>
      %244 = vector.extract_strided_slice %243 {offsets = [0, 0], sizes = [16, 8], strides = [1, 1]} : vector<16x32xf32> to vector<16x8xf32>
      %c0_146 = arith.constant 0 : index
      %c0_147 = arith.constant 0 : index
      %c0_148 = arith.constant 0 : index
      %245 = vector.load %arg27[%c0_146, %c0_147, %c0_148] : memref<4x16x8xf32, #tpu.memory_space<vmem>>, vector<1x16x8xf32>
      %246 = vector.shape_cast %245 : vector<1x16x8xf32> to vector<16x8xf32>
      %247 = vector.shape_cast %244 : vector<16x8xf32> to vector<1x16x8xf32>
      tpu.vector_store %arg27[%c0_146, %c0_147, %c0_148], %247 {strides = array<i32>} : memref<4x16x8xf32, #tpu.memory_space<vmem>>, vector<1x16x8xf32>,
      %248 = vector.extract_strided_slice %243 {offsets = [0, 8], sizes = [16, 8], strides = [1, 1]} : vector<16x32xf32> to vector<16x8xf32>
      %c1_149 = arith.constant 1 : index
      %c0_150 = arith.constant 0 : index
      %c0_151 = arith.constant 0 : index
      %249 = vector.load %arg27[%c1_149, %c0_150, %c0_151] : memref<4x16x8xf32, #tpu.memory_space<vmem>>, vector<1x16x8xf32>
      %250 = vector.shape_cast %249 : vector<1x16x8xf32> to vector<16x8xf32>
      %251 = vector.shape_cast %248 : vector<16x8xf32> to vector<1x16x8xf32>
      tpu.vector_store %arg27[%c1_149, %c0_150, %c0_151], %251 {strides = array<i32>} : memref<4x16x8xf32, #tpu.memory_space<vmem>>, vector<1x16x8xf32>,
      %252 = vector.extract_strided_slice %243 {offsets = [0, 16], sizes = [16, 8], strides = [1, 1]} : vector<16x32xf32> to vector<16x8xf32>
      %c2_152 = arith.constant 2 : index
      %c0_153 = arith.constant 0 : index
      %c0_154 = arith.constant 0 : index
      %253 = vector.load %arg27[%c2_152, %c0_153, %c0_154] : memref<4x16x8xf32, #tpu.memory_space<vmem>>, vector<1x16x8xf32>
      %254 = vector.shape_cast %253 : vector<1x16x8xf32> to vector<16x8xf32>
      %255 = vector.shape_cast %252 : vector<16x8xf32> to vector<1x16x8xf32>
      tpu.vector_store %arg27[%c2_152, %c0_153, %c0_154], %255 {strides = array<i32>} : memref<4x16x8xf32, #tpu.memory_space<vmem>>, vector<1x16x8xf32>,
      %256 = vector.extract_strided_slice %243 {offsets = [0, 24], sizes = [16, 8], strides = [1, 1]} : vector<16x32xf32> to vector<16x8xf32>
      %c3_155 = arith.constant 3 : index
      %c0_156 = arith.constant 0 : index
      %c0_157 = arith.constant 0 : index
      %257 = vector.load %arg27[%c3_155, %c0_156, %c0_157] : memref<4x16x8xf32, #tpu.memory_space<vmem>>, vector<1x16x8xf32>
      %258 = vector.shape_cast %257 : vector<1x16x8xf32> to vector<16x8xf32>
      %259 = vector.shape_cast %256 : vector<16x8xf32> to vector<1x16x8xf32>
      tpu.vector_store %arg27[%c3_155, %c0_156, %c0_157], %259 {strides = array<i32>} : memref<4x16x8xf32, #tpu.memory_space<vmem>>, vector<1x16x8xf32>,
      %c0_158 = arith.constant 0 : index
      %c0_159 = arith.constant 0 : index
      %260 = vector.load %arg12[%c0_158, %c0_159] : memref<32x32xf32, #tpu.memory_space<vmem>>, vector<32x32xf32>
      %cst_160 = arith.constant dense<0.000000e+00> : vector<16x32xf32>
      %261 = tpu.matmul %241, %260, %cst_160 {dimension_numbers = #tpu.dot_dimension_numbers<[1], [0], [0], [1], [0, 0, 1, 1], [], []>} : vector<16x32xf32>, vector<32x32xf32>, vector<16x32xf32> -> vector<16x32xf32>
      %262 = vector.extract_strided_slice %261 {offsets = [0, 0], sizes = [16, 8], strides = [1, 1]} : vector<16x32xf32> to vector<16x8xf32>
      %c0_161 = arith.constant 0 : index
      %c0_162 = arith.constant 0 : index
      %c0_163 = arith.constant 0 : index
      %263 = vector.load %arg28[%c0_161, %c0_162, %c0_163] : memref<4x16x8xf32, #tpu.memory_space<vmem>>, vector<1x16x8xf32>
      %264 = vector.shape_cast %263 : vector<1x16x8xf32> to vector<16x8xf32>
      %265 = vector.shape_cast %262 : vector<16x8xf32> to vector<1x16x8xf32>
      tpu.vector_store %arg28[%c0_161, %c0_162, %c0_163], %265 {strides = array<i32>} : memref<4x16x8xf32, #tpu.memory_space<vmem>>, vector<1x16x8xf32>,
      %266 = vector.extract_strided_slice %261 {offsets = [0, 8], sizes = [16, 8], strides = [1, 1]} : vector<16x32xf32> to vector<16x8xf32>
      %c1_164 = arith.constant 1 : index
      %c0_165 = arith.constant 0 : index
      %c0_166 = arith.constant 0 : index
      %267 = vector.load %arg28[%c1_164, %c0_165, %c0_166] : memref<4x16x8xf32, #tpu.memory_space<vmem>>, vector<1x16x8xf32>
      %268 = vector.shape_cast %267 : vector<1x16x8xf32> to vector<16x8xf32>
      %269 = vector.shape_cast %266 : vector<16x8xf32> to vector<1x16x8xf32>
      tpu.vector_store %arg28[%c1_164, %c0_165, %c0_166], %269 {strides = array<i32>} : memref<4x16x8xf32, #tpu.memory_space<vmem>>, vector<1x16x8xf32>,
      %270 = vector.extract_strided_slice %261 {offsets = [0, 16], sizes = [16, 8], strides = [1, 1]} : vector<16x32xf32> to vector<16x8xf32>
      %c2_167 = arith.constant 2 : index
      %c0_168 = arith.constant 0 : index
      %c0_169 = arith.constant 0 : index
      %271 = vector.load %arg28[%c2_167, %c0_168, %c0_169] : memref<4x16x8xf32, #tpu.memory_space<vmem>>, vector<1x16x8xf32>
      %272 = vector.shape_cast %271 : vector<1x16x8xf32> to vector<16x8xf32>
      %273 = vector.shape_cast %270 : vector<16x8xf32> to vector<1x16x8xf32>
      tpu.vector_store %arg28[%c2_167, %c0_168, %c0_169], %273 {strides = array<i32>} : memref<4x16x8xf32, #tpu.memory_space<vmem>>, vector<1x16x8xf32>,
      %274 = vector.extract_strided_slice %261 {offsets = [0, 24], sizes = [16, 8], strides = [1, 1]} : vector<16x32xf32> to vector<16x8xf32>
      %c3_170 = arith.constant 3 : index
      %c0_171 = arith.constant 0 : index
      %c0_172 = arith.constant 0 : index
      %275 = vector.load %arg28[%c3_170, %c0_171, %c0_172] : memref<4x16x8xf32, #tpu.memory_space<vmem>>, vector<1x16x8xf32>
      %276 = vector.shape_cast %275 : vector<1x16x8xf32> to vector<16x8xf32>
      %277 = vector.shape_cast %274 : vector<16x8xf32> to vector<1x16x8xf32>
      tpu.vector_store %arg28[%c3_170, %c0_171, %c0_172], %277 {strides = array<i32>} : memref<4x16x8xf32, #tpu.memory_space<vmem>>, vector<1x16x8xf32>,
      %c0_173 = arith.constant 0 : index
      %c0_174 = arith.constant 0 : index
      %c0_175 = arith.constant 0 : index
      %278 = vector.load %arg3[%c0_173, %c0_174, %c0_175] : memref<1x8x16xf32, #tpu.memory_space<vmem>>, vector<1x8x16xf32>
      %279 = vector.shape_cast %278 : vector<1x8x16xf32> to vector<8x16xf32>
      %c0_176 = arith.constant 0 : index
      %c0_177 = arith.constant 0 : index
      %280 = vector.load %arg16[%c0_176, %c0_177] : memref<16x32xf32, #tpu.memory_space<vmem>>, vector<16x32xf32>
      %cst_178 = arith.constant dense<0.000000e+00> : vector<8x32xf32>
      %281 = tpu.matmul %279, %280, %cst_178 {dimension_numbers = #tpu.dot_dimension_numbers<[1], [0], [0], [1], [0, 0, 1, 1], [], []>} : vector<8x16xf32>, vector<16x32xf32>, vector<8x32xf32> -> vector<8x32xf32>
      %282 = vector.extract_strided_slice %281 {offsets = [0, 0], sizes = [8, 8], strides = [1, 1]} : vector<8x32xf32> to vector<8x8xf32>
      %c0_179 = arith.constant 0 : index
      %c0_180 = arith.constant 0 : index
      %c0_181 = arith.constant 0 : index
      %283 = vector.load %arg29[%c0_179, %c0_180, %c0_181] : memref<4x8x8xf32, #tpu.memory_space<vmem>>, vector<1x8x8xf32>
      %284 = vector.shape_cast %283 : vector<1x8x8xf32> to vector<8x8xf32>
      %285 = vector.shape_cast %282 : vector<8x8xf32> to vector<1x8x8xf32>
      tpu.vector_store %arg29[%c0_179, %c0_180, %c0_181], %285 {strides = array<i32>} : memref<4x8x8xf32, #tpu.memory_space<vmem>>, vector<1x8x8xf32>,
      %286 = vector.extract_strided_slice %281 {offsets = [0, 8], sizes = [8, 8], strides = [1, 1]} : vector<8x32xf32> to vector<8x8xf32>
      %c1_182 = arith.constant 1 : index
      %c0_183 = arith.constant 0 : index
      %c0_184 = arith.constant 0 : index
      %287 = vector.load %arg29[%c1_182, %c0_183, %c0_184] : memref<4x8x8xf32, #tpu.memory_space<vmem>>, vector<1x8x8xf32>
      %288 = vector.shape_cast %287 : vector<1x8x8xf32> to vector<8x8xf32>
      %289 = vector.shape_cast %286 : vector<8x8xf32> to vector<1x8x8xf32>
      tpu.vector_store %arg29[%c1_182, %c0_183, %c0_184], %289 {strides = array<i32>} : memref<4x8x8xf32, #tpu.memory_space<vmem>>, vector<1x8x8xf32>,
      %290 = vector.extract_strided_slice %281 {offsets = [0, 16], sizes = [8, 8], strides = [1, 1]} : vector<8x32xf32> to vector<8x8xf32>
      %c2_185 = arith.constant 2 : index
      %c0_186 = arith.constant 0 : index
      %c0_187 = arith.constant 0 : index
      %291 = vector.load %arg29[%c2_185, %c0_186, %c0_187] : memref<4x8x8xf32, #tpu.memory_space<vmem>>, vector<1x8x8xf32>
      %292 = vector.shape_cast %291 : vector<1x8x8xf32> to vector<8x8xf32>
      %293 = vector.shape_cast %290 : vector<8x8xf32> to vector<1x8x8xf32>
      tpu.vector_store %arg29[%c2_185, %c0_186, %c0_187], %293 {strides = array<i32>} : memref<4x8x8xf32, #tpu.memory_space<vmem>>, vector<1x8x8xf32>,
      %294 = vector.extract_strided_slice %281 {offsets = [0, 24], sizes = [8, 8], strides = [1, 1]} : vector<8x32xf32> to vector<8x8xf32>
      %c3_188 = arith.constant 3 : index
      %c0_189 = arith.constant 0 : index
      %c0_190 = arith.constant 0 : index
      %295 = vector.load %arg29[%c3_188, %c0_189, %c0_190] : memref<4x8x8xf32, #tpu.memory_space<vmem>>, vector<1x8x8xf32>
      %296 = vector.shape_cast %295 : vector<1x8x8xf32> to vector<8x8xf32>
      %297 = vector.shape_cast %294 : vector<8x8xf32> to vector<1x8x8xf32>
      tpu.vector_store %arg29[%c3_188, %c0_189, %c0_190], %297 {strides = array<i32>} : memref<4x8x8xf32, #tpu.memory_space<vmem>>, vector<1x8x8xf32>,
      %c0_191 = arith.constant 0 : index
      %c0_192 = arith.constant 0 : index
      %298 = vector.load %arg17[%c0_191, %c0_192] : memref<16x32xf32, #tpu.memory_space<vmem>>, vector<16x32xf32>
      %cst_193 = arith.constant dense<0.000000e+00> : vector<8x32xf32>
      %299 = tpu.matmul %279, %298, %cst_193 {dimension_numbers = #tpu.dot_dimension_numbers<[1], [0], [0], [1], [0, 0, 1, 1], [], []>} : vector<8x16xf32>, vector<16x32xf32>, vector<8x32xf32> -> vector<8x32xf32>
      %300 = vector.extract_strided_slice %299 {offsets = [0, 0], sizes = [8, 8], strides = [1, 1]} : vector<8x32xf32> to vector<8x8xf32>
      %c0_194 = arith.constant 0 : index
      %c0_195 = arith.constant 0 : index
      %c0_196 = arith.constant 0 : index
      %301 = vector.load %arg30[%c0_194, %c0_195, %c0_196] : memref<4x8x8xf32, #tpu.memory_space<vmem>>, vector<1x8x8xf32>
      %302 = vector.shape_cast %301 : vector<1x8x8xf32> to vector<8x8xf32>
      %303 = vector.shape_cast %300 : vector<8x8xf32> to vector<1x8x8xf32>
      tpu.vector_store %arg30[%c0_194, %c0_195, %c0_196], %303 {strides = array<i32>} : memref<4x8x8xf32, #tpu.memory_space<vmem>>, vector<1x8x8xf32>,
      %304 = vector.extract_strided_slice %299 {offsets = [0, 8], sizes = [8, 8], strides = [1, 1]} : vector<8x32xf32> to vector<8x8xf32>
      %c1_197 = arith.constant 1 : index
      %c0_198 = arith.constant 0 : index
      %c0_199 = arith.constant 0 : index
      %305 = vector.load %arg30[%c1_197, %c0_198, %c0_199] : memref<4x8x8xf32, #tpu.memory_space<vmem>>, vector<1x8x8xf32>
      %306 = vector.shape_cast %305 : vector<1x8x8xf32> to vector<8x8xf32>
      %307 = vector.shape_cast %304 : vector<8x8xf32> to vector<1x8x8xf32>
      tpu.vector_store %arg30[%c1_197, %c0_198, %c0_199], %307 {strides = array<i32>} : memref<4x8x8xf32, #tpu.memory_space<vmem>>, vector<1x8x8xf32>,
      %308 = vector.extract_strided_slice %299 {offsets = [0, 16], sizes = [8, 8], strides = [1, 1]} : vector<8x32xf32> to vector<8x8xf32>
      %c2_200 = arith.constant 2 : index
      %c0_201 = arith.constant 0 : index
      %c0_202 = arith.constant 0 : index
      %309 = vector.load %arg30[%c2_200, %c0_201, %c0_202] : memref<4x8x8xf32, #tpu.memory_space<vmem>>, vector<1x8x8xf32>
      %310 = vector.shape_cast %309 : vector<1x8x8xf32> to vector<8x8xf32>
      %311 = vector.shape_cast %308 : vector<8x8xf32> to vector<1x8x8xf32>
      tpu.vector_store %arg30[%c2_200, %c0_201, %c0_202], %311 {strides = array<i32>} : memref<4x8x8xf32, #tpu.memory_space<vmem>>, vector<1x8x8xf32>,
      %312 = vector.extract_strided_slice %299 {offsets = [0, 24], sizes = [8, 8], strides = [1, 1]} : vector<8x32xf32> to vector<8x8xf32>
      %c3_203 = arith.constant 3 : index
      %c0_204 = arith.constant 0 : index
      %c0_205 = arith.constant 0 : index
      %313 = vector.load %arg30[%c3_203, %c0_204, %c0_205] : memref<4x8x8xf32, #tpu.memory_space<vmem>>, vector<1x8x8xf32>
      %314 = vector.shape_cast %313 : vector<1x8x8xf32> to vector<8x8xf32>
      %315 = vector.shape_cast %312 : vector<8x8xf32> to vector<1x8x8xf32>
      tpu.vector_store %arg30[%c3_203, %c0_204, %c0_205], %315 {strides = array<i32>} : memref<4x8x8xf32, #tpu.memory_space<vmem>>, vector<1x8x8xf32>,
    } else {
    }
    %c16_i32 = arith.constant 16 : i32
    %3 = arith.muli %arg1, %c16_i32 : i32
    %4 = tpu.assume_multiple %3, 16 : i32
    %c0 = arith.constant 0 : index
    %5 = arith.index_cast %4 : i32 to index
    %c0_1 = arith.constant 0 : index
    %6 = vector.load %arg2[%c0, %5, %c0_1] : memref<1x16x32xf32, #tpu.memory_space<vmem>>, vector<1x16x32xf32>
    %7 = vector.shape_cast %6 : vector<1x16x32xf32> to vector<16x32xf32>
    %cst = arith.constant dense<0.000000e+00> : vector<16xf32>
    %8 = vector.multi_reduction <add>, %7, %cst [1] : vector<16x32xf32> to vector<16xf32>
    %9 = vector.shape_cast %8 : vector<16xf32> to vector<16x1xf32>
    %10 = arith.mulf %7, %7 : vector<16x32xf32>
    %cst_2 = arith.constant dense<0.000000e+00> : vector<16xf32>
    %11 = vector.multi_reduction <add>, %10, %cst_2 [1] : vector<16x32xf32> to vector<16xf32>
    %12 = vector.shape_cast %11 : vector<16xf32> to vector<16x1xf32>
    %cst_3 = arith.constant 3.125000e-02 : f32
    %13 = vector.broadcast %cst_3 : f32 to vector<16x1xf32>
    %14 = arith.mulf %9, %13 : vector<16x1xf32>
    %cst_4 = arith.constant 3.125000e-02 : f32
    %15 = vector.broadcast %cst_4 : f32 to vector<16x1xf32>
    %16 = arith.mulf %12, %15 : vector<16x1xf32>
    %17 = arith.mulf %14, %14 : vector<16x1xf32>
    %18 = arith.subf %16, %17 : vector<16x1xf32>
    %19 = vector.broadcast %14 : vector<16x1xf32> to vector<16x32xf32>
    %20 = arith.subf %7, %19 : vector<16x32xf32>
    %cst_5 = arith.constant 9.99999974E-6 : f32
    %21 = vector.broadcast %cst_5 : f32 to vector<16x1xf32>
    %22 = arith.addf %18, %21 : vector<16x1xf32>
    %23 = math.rsqrt %22 : vector<16x1xf32>
    %24 = vector.broadcast %23 : vector<16x1xf32> to vector<16x32xf32>
    %25 = arith.mulf %20, %24 : vector<16x32xf32>
    %c0_6 = arith.constant 0 : index
    %c0_7 = arith.constant 0 : index
    %26 = vector.load %arg4[%c0_6, %c0_7] : memref<1x32xf32, #tpu.memory_space<vmem>>, vector<1x32xf32>
    %27 = vector.broadcast %26 : vector<1x32xf32> to vector<16x32xf32>
    %28 = arith.mulf %25, %27 : vector<16x32xf32>
    %c0_8 = arith.constant 0 : index
    %c0_9 = arith.constant 0 : index
    %29 = vector.load %arg5[%c0_8, %c0_9] : memref<1x32xf32, #tpu.memory_space<vmem>>, vector<1x32xf32>
    %30 = vector.broadcast %29 : vector<1x32xf32> to vector<16x32xf32>
    %31 = arith.addf %28, %30 : vector<16x32xf32>
    %c0_10 = arith.constant 0 : index
    %c0_11 = arith.constant 0 : index
    %32 = vector.load %arg10[%c0_10, %c0_11] : memref<32x32xf32, #tpu.memory_space<vmem>>, vector<32x32xf32>
    %cst_12 = arith.constant dense<0.000000e+00> : vector<16x32xf32>
    %33 = tpu.matmul %31, %32, %cst_12 {dimension_numbers = #tpu.dot_dimension_numbers<[1], [0], [0], [1], [0, 0, 1, 1], [], []>} : vector<16x32xf32>, vector<32x32xf32>, vector<16x32xf32> -> vector<16x32xf32>
    %cst_13 = arith.constant 0.353553385 : f32
    %34 = vector.broadcast %cst_13 : f32 to vector<16x32xf32>
    %35 = arith.mulf %33, %34 : vector<16x32xf32>
    %36 = vector.extract_strided_slice %35 {offsets = [0, 0], sizes = [16, 8], strides = [1, 1]} : vector<16x32xf32> to vector<16x8xf32>
    %c0_14 = arith.constant 0 : index
    %c0_15 = arith.constant 0 : index
    %c0_16 = arith.constant 0 : index
    %37 = vector.load %arg31[%c0_14, %c0_15, %c0_16] : memref<4x16x8xf32, #tpu.memory_space<vmem>>, vector<1x16x8xf32>
    %38 = vector.shape_cast %37 : vector<1x16x8xf32> to vector<16x8xf32>
    %39 = vector.shape_cast %36 : vector<16x8xf32> to vector<1x16x8xf32>
    tpu.vector_store %arg31[%c0_14, %c0_15, %c0_16], %39 {strides = array<i32>} : memref<4x16x8xf32, #tpu.memory_space<vmem>>, vector<1x16x8xf32>,
    %40 = vector.extract_strided_slice %35 {offsets = [0, 8], sizes = [16, 8], strides = [1, 1]} : vector<16x32xf32> to vector<16x8xf32>
    %c1 = arith.constant 1 : index
    %c0_17 = arith.constant 0 : index
    %c0_18 = arith.constant 0 : index
    %41 = vector.load %arg31[%c1, %c0_17, %c0_18] : memref<4x16x8xf32, #tpu.memory_space<vmem>>, vector<1x16x8xf32>
    %42 = vector.shape_cast %41 : vector<1x16x8xf32> to vector<16x8xf32>
    %43 = vector.shape_cast %40 : vector<16x8xf32> to vector<1x16x8xf32>
    tpu.vector_store %arg31[%c1, %c0_17, %c0_18], %43 {strides = array<i32>} : memref<4x16x8xf32, #tpu.memory_space<vmem>>, vector<1x16x8xf32>,
    %44 = vector.extract_strided_slice %35 {offsets = [0, 16], sizes = [16, 8], strides = [1, 1]} : vector<16x32xf32> to vector<16x8xf32>
    %c2 = arith.constant 2 : index
    %c0_19 = arith.constant 0 : index
    %c0_20 = arith.constant 0 : index
    %45 = vector.load %arg31[%c2, %c0_19, %c0_20] : memref<4x16x8xf32, #tpu.memory_space<vmem>>, vector<1x16x8xf32>
    %46 = vector.shape_cast %45 : vector<1x16x8xf32> to vector<16x8xf32>
    %47 = vector.shape_cast %44 : vector<16x8xf32> to vector<1x16x8xf32>
    tpu.vector_store %arg31[%c2, %c0_19, %c0_20], %47 {strides = array<i32>} : memref<4x16x8xf32, #tpu.memory_space<vmem>>, vector<1x16x8xf32>,
    %48 = vector.extract_strided_slice %35 {offsets = [0, 24], sizes = [16, 8], strides = [1, 1]} : vector<16x32xf32> to vector<16x8xf32>
    %c3 = arith.constant 3 : index
    %c0_21 = arith.constant 0 : index
    %c0_22 = arith.constant 0 : index
    %49 = vector.load %arg31[%c3, %c0_21, %c0_22] : memref<4x16x8xf32, #tpu.memory_space<vmem>>, vector<1x16x8xf32>
    %50 = vector.shape_cast %49 : vector<1x16x8xf32> to vector<16x8xf32>
    %51 = vector.shape_cast %48 : vector<16x8xf32> to vector<1x16x8xf32>
    tpu.vector_store %arg31[%c3, %c0_21, %c0_22], %51 {strides = array<i32>} : memref<4x16x8xf32, #tpu.memory_space<vmem>>, vector<1x16x8xf32>,
    %c0_23 = arith.constant 0 : index
    %c0_24 = arith.constant 0 : index
    %c0_25 = arith.constant 0 : index
    %52 = vector.load %arg31[%c0_23, %c0_24, %c0_25] : memref<4x16x8xf32, #tpu.memory_space<vmem>>, vector<4x16x8xf32>
    %c0_26 = arith.constant 0 : index
    %c0_27 = arith.constant 0 : index
    %c0_28 = arith.constant 0 : index
    %53 = vector.load %arg27[%c0_26, %c0_27, %c0_28] : memref<4x16x8xf32, #tpu.memory_space<vmem>>, vector<4x16x8xf32>
    "tpu.trace_start"() <{level = 10 : i32, message = "hqd,hkd->hqk"}> : () -> ()
    %cst_29 = arith.constant dense<0.000000e+00> : vector<4x16x16xf32>
    %54 = tpu.matmul %52, %53, %cst_29 {dimension_numbers = #tpu.dot_dimension_numbers<[2], [2], [1], [1], [0, 0, 0, 1, 1, 1], [0], [0]>} : vector<4x16x8xf32>, vector<4x16x8xf32>, vector<4x16x16xf32> -> vector<4x16x16xf32>
    "tpu.trace_stop"() : () -> ()
    %cst_30 = arith.constant dense<0xFF800000> : vector<4x16xf32>
    %55 = vector.multi_reduction <maximumf>, %54, %cst_30 [2] : vector<4x16x16xf32> to vector<4x16xf32>
    %56 = vector.shape_cast %55 : vector<4x16xf32> to vector<4x16x1xf32>
    %57 = vector.broadcast %56 : vector<4x16x1xf32> to vector<4x16x16xf32>
    %58 = arith.subf %54, %57 : vector<4x16x16xf32>
    %59 = math.exp %58 : vector<4x16x16xf32>
    %cst_31 = arith.constant dense<0.000000e+00> : vector<4x16xf32>
    %60 = vector.multi_reduction <add>, %59, %cst_31 [2] : vector<4x16x16xf32> to vector<4x16xf32>
    %61 = vector.shape_cast %60 : vector<4x16xf32> to vector<4x16x1xf32>
    %62 = tpu.reciprocal %61 {approx = true} : vector<4x16x1xf32> -> vector<4x16x1xf32>
    %63 = vector.broadcast %62 : vector<4x16x1xf32> to vector<4x16x16xf32>
    %64 = arith.mulf %59, %63 : vector<4x16x16xf32>
    %c0_32 = arith.constant 0 : index
    %c0_33 = arith.constant 0 : index
    %c0_34 = arith.constant 0 : index
    %65 = vector.load %arg28[%c0_32, %c0_33, %c0_34] : memref<4x16x8xf32, #tpu.memory_space<vmem>>, vector<4x16x8xf32>
    "tpu.trace_start"() <{level = 10 : i32, message = "hqk,hkd->hqd"}> : () -> ()
    %cst_35 = arith.constant dense<0.000000e+00> : vector<4x16x8xf32>
    %66 = tpu.matmul %64, %65, %cst_35 {dimension_numbers = #tpu.dot_dimension_numbers<[2], [1], [1], [2], [0, 0, 0, 1, 1, 2], [0], [0]>} : vector<4x16x16xf32>, vector<4x16x8xf32>, vector<4x16x8xf32> -> vector<4x16x8xf32>
    "tpu.trace_stop"() : () -> ()
    %67 = vector.extract_strided_slice %66 {offsets = [0, 0, 0], sizes = [1, 16, 8], strides = [1, 1, 1]} : vector<4x16x8xf32> to vector<1x16x8xf32>
    %68 = vector.shape_cast %67 : vector<1x16x8xf32> to vector<16x8xf32>
    %c0_36 = arith.constant 0 : index
    %c0_37 = arith.constant 0 : index
    %69 = vector.load %arg32[%c0_36, %c0_37] : memref<16x32xf32, #tpu.memory_space<vmem>>, vector<16x8xf32>
    tpu.vector_store %arg32[%c0_36, %c0_37], %68 {strides = array<i32>} : memref<16x32xf32, #tpu.memory_space<vmem>>, vector<16x8xf32>,
    %70 = vector.extract_strided_slice %66 {offsets = [1, 0, 0], sizes = [1, 16, 8], strides = [1, 1, 1]} : vector<4x16x8xf32> to vector<1x16x8xf32>
    %71 = vector.shape_cast %70 : vector<1x16x8xf32> to vector<16x8xf32>
    %c0_38 = arith.constant 0 : index
    %c8 = arith.constant 8 : index
    %72 = vector.load %arg32[%c0_38, %c8] : memref<16x32xf32, #tpu.memory_space<vmem>>, vector<16x8xf32>
    tpu.vector_store %arg32[%c0_38, %c8], %71 {strides = array<i32>} : memref<16x32xf32, #tpu.memory_space<vmem>>, vector<16x8xf32>,
    %73 = vector.extract_strided_slice %66 {offsets = [2, 0, 0], sizes = [1, 16, 8], strides = [1, 1, 1]} : vector<4x16x8xf32> to vector<1x16x8xf32>
    %74 = vector.shape_cast %73 : vector<1x16x8xf32> to vector<16x8xf32>
    %c0_39 = arith.constant 0 : index
    %c16 = arith.constant 16 : index
    %75 = vector.load %arg32[%c0_39, %c16] : memref<16x32xf32, #tpu.memory_space<vmem>>, vector<16x8xf32>
    tpu.vector_store %arg32[%c0_39, %c16], %74 {strides = array<i32>} : memref<16x32xf32, #tpu.memory_space<vmem>>, vector<16x8xf32>,
    %76 = vector.extract_strided_slice %66 {offsets = [3, 0, 0], sizes = [1, 16, 8], strides = [1, 1, 1]} : vector<4x16x8xf32> to vector<1x16x8xf32>
    %77 = vector.shape_cast %76 : vector<1x16x8xf32> to vector<16x8xf32>
    %c0_40 = arith.constant 0 : index
    %c24 = arith.constant 24 : index
    %78 = vector.load %arg32[%c0_40, %c24] : memref<16x32xf32, #tpu.memory_space<vmem>>, vector<16x8xf32>
    tpu.vector_store %arg32[%c0_40, %c24], %77 {strides = array<i32>} : memref<16x32xf32, #tpu.memory_space<vmem>>, vector<16x8xf32>,
    %c0_41 = arith.constant 0 : index
    %c0_42 = arith.constant 0 : index
    %79 = vector.load %arg32[%c0_41, %c0_42] : memref<16x32xf32, #tpu.memory_space<vmem>>, vector<16x32xf32>
    %c0_43 = arith.constant 0 : index
    %c0_44 = arith.constant 0 : index
    %80 = vector.load %arg13[%c0_43, %c0_44] : memref<32x32xf32, #tpu.memory_space<vmem>>, vector<32x32xf32>
    %cst_45 = arith.constant dense<0.000000e+00> : vector<16x32xf32>
    %81 = tpu.matmul %79, %80, %cst_45 {dimension_numbers = #tpu.dot_dimension_numbers<[1], [0], [0], [1], [0, 0, 1, 1], [], []>} : vector<16x32xf32>, vector<32x32xf32>, vector<16x32xf32> -> vector<16x32xf32>
    %c0_46 = arith.constant 0 : index
    %c0_47 = arith.constant 0 : index
    %82 = vector.load %arg14[%c0_46, %c0_47] : memref<1x32xf32, #tpu.memory_space<vmem>>, vector<1x32xf32>
    %83 = vector.broadcast %82 : vector<1x32xf32> to vector<16x32xf32>
    %84 = arith.addf %81, %83 : vector<16x32xf32>
    %85 = arith.addf %7, %84 : vector<16x32xf32>
    %cst_48 = arith.constant dense<0.000000e+00> : vector<16xf32>
    %86 = vector.multi_reduction <add>, %85, %cst_48 [1] : vector<16x32xf32> to vector<16xf32>
    %87 = vector.shape_cast %86 : vector<16xf32> to vector<16x1xf32>
    %88 = arith.mulf %85, %85 : vector<16x32xf32>
    %cst_49 = arith.constant dense<0.000000e+00> : vector<16xf32>
    %89 = vector.multi_reduction <add>, %88, %cst_49 [1] : vector<16x32xf32> to vector<16xf32>
    %90 = vector.shape_cast %89 : vector<16xf32> to vector<16x1xf32>
    %cst_50 = arith.constant 3.125000e-02 : f32
    %91 = vector.broadcast %cst_50 : f32 to vector<16x1xf32>
    %92 = arith.mulf %87, %91 : vector<16x1xf32>
    %cst_51 = arith.constant 3.125000e-02 : f32
    %93 = vector.broadcast %cst_51 : f32 to vector<16x1xf32>
    %94 = arith.mulf %90, %93 : vector<16x1xf32>
    %95 = arith.mulf %92, %92 : vector<16x1xf32>
    %96 = arith.subf %94, %95 : vector<16x1xf32>
    %97 = vector.broadcast %92 : vector<16x1xf32> to vector<16x32xf32>
    %98 = arith.subf %85, %97 : vector<16x32xf32>
    %cst_52 = arith.constant 9.99999974E-6 : f32
    %99 = vector.broadcast %cst_52 : f32 to vector<16x1xf32>
    %100 = arith.addf %96, %99 : vector<16x1xf32>
    %101 = math.rsqrt %100 : vector<16x1xf32>
    %102 = vector.broadcast %101 : vector<16x1xf32> to vector<16x32xf32>
    %103 = arith.mulf %98, %102 : vector<16x32xf32>
    %c0_53 = arith.constant 0 : index
    %c0_54 = arith.constant 0 : index
    %104 = vector.load %arg6[%c0_53, %c0_54] : memref<1x32xf32, #tpu.memory_space<vmem>>, vector<1x32xf32>
    %105 = vector.broadcast %104 : vector<1x32xf32> to vector<16x32xf32>
    %106 = arith.mulf %103, %105 : vector<16x32xf32>
    %c0_55 = arith.constant 0 : index
    %c0_56 = arith.constant 0 : index
    %107 = vector.load %arg7[%c0_55, %c0_56] : memref<1x32xf32, #tpu.memory_space<vmem>>, vector<1x32xf32>
    %108 = vector.broadcast %107 : vector<1x32xf32> to vector<16x32xf32>
    %109 = arith.addf %106, %108 : vector<16x32xf32>
    %c0_57 = arith.constant 0 : index
    %c0_58 = arith.constant 0 : index
    %110 = vector.load %arg15[%c0_57, %c0_58] : memref<32x32xf32, #tpu.memory_space<vmem>>, vector<32x32xf32>
    %cst_59 = arith.constant dense<0.000000e+00> : vector<16x32xf32>
    %111 = tpu.matmul %109, %110, %cst_59 {dimension_numbers = #tpu.dot_dimension_numbers<[1], [0], [0], [1], [0, 0, 1, 1], [], []>} : vector<16x32xf32>, vector<32x32xf32>, vector<16x32xf32> -> vector<16x32xf32>
    %cst_60 = arith.constant 0.353553385 : f32
    %112 = vector.broadcast %cst_60 : f32 to vector<16x32xf32>
    %113 = arith.mulf %111, %112 : vector<16x32xf32>
    %114 = vector.extract_strided_slice %113 {offsets = [0, 0], sizes = [16, 8], strides = [1, 1]} : vector<16x32xf32> to vector<16x8xf32>
    %c0_61 = arith.constant 0 : index
    %c0_62 = arith.constant 0 : index
    %c0_63 = arith.constant 0 : index
    %115 = vector.load %arg31[%c0_61, %c0_62, %c0_63] : memref<4x16x8xf32, #tpu.memory_space<vmem>>, vector<1x16x8xf32>
    %116 = vector.shape_cast %115 : vector<1x16x8xf32> to vector<16x8xf32>
    %117 = vector.shape_cast %114 : vector<16x8xf32> to vector<1x16x8xf32>
    tpu.vector_store %arg31[%c0_61, %c0_62, %c0_63], %117 {strides = array<i32>} : memref<4x16x8xf32, #tpu.memory_space<vmem>>, vector<1x16x8xf32>,
    %118 = vector.extract_strided_slice %113 {offsets = [0, 8], sizes = [16, 8], strides = [1, 1]} : vector<16x32xf32> to vector<16x8xf32>
    %c1_64 = arith.constant 1 : index
    %c0_65 = arith.constant 0 : index
    %c0_66 = arith.constant 0 : index
    %119 = vector.load %arg31[%c1_64, %c0_65, %c0_66] : memref<4x16x8xf32, #tpu.memory_space<vmem>>, vector<1x16x8xf32>
    %120 = vector.shape_cast %119 : vector<1x16x8xf32> to vector<16x8xf32>
    %121 = vector.shape_cast %118 : vector<16x8xf32> to vector<1x16x8xf32>
    tpu.vector_store %arg31[%c1_64, %c0_65, %c0_66], %121 {strides = array<i32>} : memref<4x16x8xf32, #tpu.memory_space<vmem>>, vector<1x16x8xf32>,
    %122 = vector.extract_strided_slice %113 {offsets = [0, 16], sizes = [16, 8], strides = [1, 1]} : vector<16x32xf32> to vector<16x8xf32>
    %c2_67 = arith.constant 2 : index
    %c0_68 = arith.constant 0 : index
    %c0_69 = arith.constant 0 : index
    %123 = vector.load %arg31[%c2_67, %c0_68, %c0_69] : memref<4x16x8xf32, #tpu.memory_space<vmem>>, vector<1x16x8xf32>
    %124 = vector.shape_cast %123 : vector<1x16x8xf32> to vector<16x8xf32>
    %125 = vector.shape_cast %122 : vector<16x8xf32> to vector<1x16x8xf32>
    tpu.vector_store %arg31[%c2_67, %c0_68, %c0_69], %125 {strides = array<i32>} : memref<4x16x8xf32, #tpu.memory_space<vmem>>, vector<1x16x8xf32>,
    %126 = vector.extract_strided_slice %113 {offsets = [0, 24], sizes = [16, 8], strides = [1, 1]} : vector<16x32xf32> to vector<16x8xf32>
    %c3_70 = arith.constant 3 : index
    %c0_71 = arith.constant 0 : index
    %c0_72 = arith.constant 0 : index
    %127 = vector.load %arg31[%c3_70, %c0_71, %c0_72] : memref<4x16x8xf32, #tpu.memory_space<vmem>>, vector<1x16x8xf32>
    %128 = vector.shape_cast %127 : vector<1x16x8xf32> to vector<16x8xf32>
    %129 = vector.shape_cast %126 : vector<16x8xf32> to vector<1x16x8xf32>
    tpu.vector_store %arg31[%c3_70, %c0_71, %c0_72], %129 {strides = array<i32>} : memref<4x16x8xf32, #tpu.memory_space<vmem>>, vector<1x16x8xf32>,
    %c0_73 = arith.constant 0 : index
    %c0_74 = arith.constant 0 : index
    %c0_75 = arith.constant 0 : index
    %130 = vector.load %arg31[%c0_73, %c0_74, %c0_75] : memref<4x16x8xf32, #tpu.memory_space<vmem>>, vector<4x16x8xf32>
    %c0_76 = arith.constant 0 : index
    %c0_77 = arith.constant 0 : index
    %c0_78 = arith.constant 0 : index
    %131 = vector.load %arg29[%c0_76, %c0_77, %c0_78] : memref<4x8x8xf32, #tpu.memory_space<vmem>>, vector<4x8x8xf32>
    "tpu.trace_start"() <{level = 10 : i32, message = "hqd,hkd->hqk"}> : () -> ()
    %cst_79 = arith.constant dense<0.000000e+00> : vector<4x16x8xf32>
    %132 = tpu.matmul %130, %131, %cst_79 {dimension_numbers = #tpu.dot_dimension_numbers<[2], [2], [1], [1], [0, 0, 0, 1, 1, 1], [0], [0]>} : vector<4x16x8xf32>, vector<4x8x8xf32>, vector<4x16x8xf32> -> vector<4x16x8xf32>
    "tpu.trace_stop"() : () -> ()
    %cst_80 = arith.constant dense<0xFF800000> : vector<4x16xf32>
    %133 = vector.multi_reduction <maximumf>, %132, %cst_80 [2] : vector<4x16x8xf32> to vector<4x16xf32>
    %134 = vector.shape_cast %133 : vector<4x16xf32> to vector<4x16x1xf32>
    %135 = vector.broadcast %134 : vector<4x16x1xf32> to vector<4x16x8xf32>
    %136 = arith.subf %132, %135 : vector<4x16x8xf32>
    %137 = math.exp %136 : vector<4x16x8xf32>
    %cst_81 = arith.constant dense<0.000000e+00> : vector<4x16xf32>
    %138 = vector.multi_reduction <add>, %137, %cst_81 [2] : vector<4x16x8xf32> to vector<4x16xf32>
    %139 = vector.shape_cast %138 : vector<4x16xf32> to vector<4x16x1xf32>
    %140 = tpu.reciprocal %139 {approx = true} : vector<4x16x1xf32> -> vector<4x16x1xf32>
    %141 = vector.broadcast %140 : vector<4x16x1xf32> to vector<4x16x8xf32>
    %142 = arith.mulf %137, %141 : vector<4x16x8xf32>
    %c0_82 = arith.constant 0 : index
    %c0_83 = arith.constant 0 : index
    %c0_84 = arith.constant 0 : index
    %143 = vector.load %arg30[%c0_82, %c0_83, %c0_84] : memref<4x8x8xf32, #tpu.memory_space<vmem>>, vector<4x8x8xf32>
    "tpu.trace_start"() <{level = 10 : i32, message = "hqk,hkd->hqd"}> : () -> ()
    %cst_85 = arith.constant dense<0.000000e+00> : vector<4x16x8xf32>
    %144 = tpu.matmul %142, %143, %cst_85 {dimension_numbers = #tpu.dot_dimension_numbers<[2], [1], [1], [2], [0, 0, 0, 1, 1, 2], [0], [0]>} : vector<4x16x8xf32>, vector<4x8x8xf32>, vector<4x16x8xf32> -> vector<4x16x8xf32>
    "tpu.trace_stop"() : () -> ()
    %145 = vector.extract_strided_slice %144 {offsets = [0, 0, 0], sizes = [1, 16, 8], strides = [1, 1, 1]} : vector<4x16x8xf32> to vector<1x16x8xf32>
    %146 = vector.shape_cast %145 : vector<1x16x8xf32> to vector<16x8xf32>
    %c0_86 = arith.constant 0 : index
    %c0_87 = arith.constant 0 : index
    %147 = vector.load %arg32[%c0_86, %c0_87] : memref<16x32xf32, #tpu.memory_space<vmem>>, vector<16x8xf32>
    tpu.vector_store %arg32[%c0_86, %c0_87], %146 {strides = array<i32>} : memref<16x32xf32, #tpu.memory_space<vmem>>, vector<16x8xf32>,
    %148 = vector.extract_strided_slice %144 {offsets = [1, 0, 0], sizes = [1, 16, 8], strides = [1, 1, 1]} : vector<4x16x8xf32> to vector<1x16x8xf32>
    %149 = vector.shape_cast %148 : vector<1x16x8xf32> to vector<16x8xf32>
    %c0_88 = arith.constant 0 : index
    %c8_89 = arith.constant 8 : index
    %150 = vector.load %arg32[%c0_88, %c8_89] : memref<16x32xf32, #tpu.memory_space<vmem>>, vector<16x8xf32>
    tpu.vector_store %arg32[%c0_88, %c8_89], %149 {strides = array<i32>} : memref<16x32xf32, #tpu.memory_space<vmem>>, vector<16x8xf32>,
    %151 = vector.extract_strided_slice %144 {offsets = [2, 0, 0], sizes = [1, 16, 8], strides = [1, 1, 1]} : vector<4x16x8xf32> to vector<1x16x8xf32>
    %152 = vector.shape_cast %151 : vector<1x16x8xf32> to vector<16x8xf32>
    %c0_90 = arith.constant 0 : index
    %c16_91 = arith.constant 16 : index
    %153 = vector.load %arg32[%c0_90, %c16_91] : memref<16x32xf32, #tpu.memory_space<vmem>>, vector<16x8xf32>
    tpu.vector_store %arg32[%c0_90, %c16_91], %152 {strides = array<i32>} : memref<16x32xf32, #tpu.memory_space<vmem>>, vector<16x8xf32>,
    %154 = vector.extract_strided_slice %144 {offsets = [3, 0, 0], sizes = [1, 16, 8], strides = [1, 1, 1]} : vector<4x16x8xf32> to vector<1x16x8xf32>
    %155 = vector.shape_cast %154 : vector<1x16x8xf32> to vector<16x8xf32>
    %c0_92 = arith.constant 0 : index
    %c24_93 = arith.constant 24 : index
    %156 = vector.load %arg32[%c0_92, %c24_93] : memref<16x32xf32, #tpu.memory_space<vmem>>, vector<16x8xf32>
    tpu.vector_store %arg32[%c0_92, %c24_93], %155 {strides = array<i32>} : memref<16x32xf32, #tpu.memory_space<vmem>>, vector<16x8xf32>,
    %c0_94 = arith.constant 0 : index
    %c0_95 = arith.constant 0 : index
    %157 = vector.load %arg32[%c0_94, %c0_95] : memref<16x32xf32, #tpu.memory_space<vmem>>, vector<16x32xf32>
    %c0_96 = arith.constant 0 : index
    %c0_97 = arith.constant 0 : index
    %158 = vector.load %arg18[%c0_96, %c0_97] : memref<32x32xf32, #tpu.memory_space<vmem>>, vector<32x32xf32>
    %cst_98 = arith.constant dense<0.000000e+00> : vector<16x32xf32>
    %159 = tpu.matmul %157, %158, %cst_98 {dimension_numbers = #tpu.dot_dimension_numbers<[1], [0], [0], [1], [0, 0, 1, 1], [], []>} : vector<16x32xf32>, vector<32x32xf32>, vector<16x32xf32> -> vector<16x32xf32>
    %c0_99 = arith.constant 0 : index
    %c0_100 = arith.constant 0 : index
    %160 = vector.load %arg19[%c0_99, %c0_100] : memref<1x32xf32, #tpu.memory_space<vmem>>, vector<1x32xf32>
    %161 = vector.broadcast %160 : vector<1x32xf32> to vector<16x32xf32>
    %162 = arith.addf %159, %161 : vector<16x32xf32>
    %163 = arith.addf %85, %162 : vector<16x32xf32>
    %cst_101 = arith.constant dense<0.000000e+00> : vector<16xf32>
    %164 = vector.multi_reduction <add>, %163, %cst_101 [1] : vector<16x32xf32> to vector<16xf32>
    %165 = vector.shape_cast %164 : vector<16xf32> to vector<16x1xf32>
    %166 = arith.mulf %163, %163 : vector<16x32xf32>
    %cst_102 = arith.constant dense<0.000000e+00> : vector<16xf32>
    %167 = vector.multi_reduction <add>, %166, %cst_102 [1] : vector<16x32xf32> to vector<16xf32>
    %168 = vector.shape_cast %167 : vector<16xf32> to vector<16x1xf32>
    %cst_103 = arith.constant 3.125000e-02 : f32
    %169 = vector.broadcast %cst_103 : f32 to vector<16x1xf32>
    %170 = arith.mulf %165, %169 : vector<16x1xf32>
    %cst_104 = arith.constant 3.125000e-02 : f32
    %171 = vector.broadcast %cst_104 : f32 to vector<16x1xf32>
    %172 = arith.mulf %168, %171 : vector<16x1xf32>
    %173 = arith.mulf %170, %170 : vector<16x1xf32>
    %174 = arith.subf %172, %173 : vector<16x1xf32>
    %175 = vector.broadcast %170 : vector<16x1xf32> to vector<16x32xf32>
    %176 = arith.subf %163, %175 : vector<16x32xf32>
    %cst_105 = arith.constant 9.99999974E-6 : f32
    %177 = vector.broadcast %cst_105 : f32 to vector<16x1xf32>
    %178 = arith.addf %174, %177 : vector<16x1xf32>
    %179 = math.rsqrt %178 : vector<16x1xf32>
    %180 = vector.broadcast %179 : vector<16x1xf32> to vector<16x32xf32>
    %181 = arith.mulf %176, %180 : vector<16x32xf32>
    %c0_106 = arith.constant 0 : index
    %c0_107 = arith.constant 0 : index
    %182 = vector.load %arg8[%c0_106, %c0_107] : memref<1x32xf32, #tpu.memory_space<vmem>>, vector<1x32xf32>
    %183 = vector.broadcast %182 : vector<1x32xf32> to vector<16x32xf32>
    %184 = arith.mulf %181, %183 : vector<16x32xf32>
    %c0_108 = arith.constant 0 : index
    %c0_109 = arith.constant 0 : index
    %185 = vector.load %arg9[%c0_108, %c0_109] : memref<1x32xf32, #tpu.memory_space<vmem>>, vector<1x32xf32>
    %186 = vector.broadcast %185 : vector<1x32xf32> to vector<16x32xf32>
    %187 = arith.addf %184, %186 : vector<16x32xf32>
    %c0_110 = arith.constant 0 : index
    %c0_111 = arith.constant 0 : index
    %188 = vector.load %arg20[%c0_110, %c0_111] : memref<32x128xf32, #tpu.memory_space<vmem>>, vector<32x128xf32>
    %cst_112 = arith.constant dense<0.000000e+00> : vector<16x128xf32>
    %189 = tpu.matmul %187, %188, %cst_112 {dimension_numbers = #tpu.dot_dimension_numbers<[1], [0], [0], [1], [0, 0, 1, 1], [], []>} : vector<16x32xf32>, vector<32x128xf32>, vector<16x128xf32> -> vector<16x128xf32>
    %c0_113 = arith.constant 0 : index
    %c0_114 = arith.constant 0 : index
    %190 = vector.load %arg21[%c0_113, %c0_114] : memref<1x128xf32, #tpu.memory_space<vmem>>, vector<1x128xf32>
    %191 = vector.broadcast %190 : vector<1x128xf32> to vector<16x128xf32>
    %192 = arith.addf %189, %191 : vector<16x128xf32>
    %c0_115 = arith.constant 0 : index
    %c0_116 = arith.constant 0 : index
    %193 = vector.load %arg22[%c0_115, %c0_116] : memref<32x128xf32, #tpu.memory_space<vmem>>, vector<32x128xf32>
    %cst_117 = arith.constant dense<0.000000e+00> : vector<16x128xf32>
    %194 = tpu.matmul %187, %193, %cst_117 {dimension_numbers = #tpu.dot_dimension_numbers<[1], [0], [0], [1], [0, 0, 1, 1], [], []>} : vector<16x32xf32>, vector<32x128xf32>, vector<16x128xf32> -> vector<16x128xf32>
    %c0_118 = arith.constant 0 : index
    %c0_119 = arith.constant 0 : index
    %195 = vector.load %arg23[%c0_118, %c0_119] : memref<1x128xf32, #tpu.memory_space<vmem>>, vector<1x128xf32>
    %196 = vector.broadcast %195 : vector<1x128xf32> to vector<16x128xf32>
    %197 = arith.addf %194, %196 : vector<16x128xf32>
    %cst_120 = arith.constant 5.000000e-01 : f32
    %198 = vector.broadcast %cst_120 : f32 to vector<16x128xf32>
    %199 = arith.mulf %198, %197 : vector<16x128xf32>
    %cst_121 = arith.constant 0.707106769 : f32
    %200 = vector.broadcast %cst_121 : f32 to vector<16x128xf32>
    %201 = arith.mulf %197, %200 : vector<16x128xf32>
    %202 = math.erf %201 : vector<16x128xf32>
    %cst_122 = arith.constant 1.000000e+00 : f32
    %203 = vector.broadcast %cst_122 : f32 to vector<16x128xf32>
    %204 = arith.addf %203, %202 : vector<16x128xf32>
    %205 = arith.mulf %199, %204 : vector<16x128xf32>
    %206 = arith.mulf %192, %205 : vector<16x128xf32>
    %c0_123 = arith.constant 0 : index
    %c0_124 = arith.constant 0 : index
    %207 = vector.load %arg24[%c0_123, %c0_124] : memref<128x32xf32, #tpu.memory_space<vmem>>, vector<128x32xf32>
    %cst_125 = arith.constant dense<0.000000e+00> : vector<16x32xf32>
    %208 = tpu.matmul %206, %207, %cst_125 {dimension_numbers = #tpu.dot_dimension_numbers<[1], [0], [0], [1], [0, 0, 1, 1], [], []>} : vector<16x128xf32>, vector<128x32xf32>, vector<16x32xf32> -> vector<16x32xf32>
    %c0_126 = arith.constant 0 : index
    %c0_127 = arith.constant 0 : index
    %209 = vector.load %arg25[%c0_126, %c0_127] : memref<1x32xf32, #tpu.memory_space<vmem>>, vector<1x32xf32>
    %210 = vector.broadcast %209 : vector<1x32xf32> to vector<16x32xf32>
    %211 = arith.addf %208, %210 : vector<16x32xf32>
    %212 = arith.addf %163, %211 : vector<16x32xf32>
    %c0_128 = arith.constant 0 : index
    %c0_129 = arith.constant 0 : index
    %c0_130 = arith.constant 0 : index
    %213 = vector.load %arg26[%c0_128, %c0_129, %c0_130] : memref<1x16x32xf32, #tpu.memory_space<vmem>>, vector<1x16x32xf32>
    %214 = vector.shape_cast %213 : vector<1x16x32xf32> to vector<16x32xf32>
    %215 = vector.shape_cast %212 : vector<16x32xf32> to vector<1x16x32xf32>
    tpu.vector_store %arg26[%c0_128, %c0_129, %c0_130], %215 {strides = array<i32>} : memref<1x16x32xf32, #tpu.memory_space<vmem>>, vector<1x16x32xf32>,
    return
  }
  func.func @transform_0(%arg0: i32, %arg1: i32) -> (i32, i32, i32) {
    %c0_i32 = arith.constant 0 : i32
    %c0_i32_0 = arith.constant 0 : i32
    %c0_i32_1 = arith.constant 0 : i32
    return %arg0, %c0_i32, %c0_i32_0 : i32, i32, i32
  }
  func.func @transform_1(%arg0: i32, %arg1: i32) -> (i32, i32, i32) {
    %c0_i32 = arith.constant 0 : i32
    %c0_i32_0 = arith.constant 0 : i32
    %c0_i32_1 = arith.constant 0 : i32
    return %arg0, %c0_i32, %c0_i32_0 : i32, i32, i32
  }
  func.func @transform_2(%arg0: i32, %arg1: i32) -> (i32, i32) {
    %c0_i32 = arith.constant 0 : i32
    %c0_i32_0 = arith.constant 0 : i32
    %c0_i32_1 = arith.constant 0 : i32
    return %c0_i32, %c0_i32_0 : i32, i32
  }
  func.func @transform_3(%arg0: i32, %arg1: i32) -> (i32, i32) {
    %c0_i32 = arith.constant 0 : i32
    %c0_i32_0 = arith.constant 0 : i32
    %c0_i32_1 = arith.constant 0 : i32
    return %c0_i32, %c0_i32_0 : i32, i32
  }
  func.func @transform_4(%arg0: i32, %arg1: i32) -> (i32, i32) {
    %c0_i32 = arith.constant 0 : i32
    %c0_i32_0 = arith.constant 0 : i32
    %c0_i32_1 = arith.constant 0 : i32
    return %c0_i32, %c0_i32_0 : i32, i32
  }
  func.func @transform_5(%arg0: i32, %arg1: i32) -> (i32, i32) {
    %c0_i32 = arith.constant 0 : i32
    %c0_i32_0 = arith.constant 0 : i32
    %c0_i32_1 = arith.constant 0 : i32
    return %c0_i32, %c0_i32_0 : i32, i32
  }
  func.func @transform_6(%arg0: i32, %arg1: i32) -> (i32, i32) {
    %c0_i32 = arith.constant 0 : i32
    %c0_i32_0 = arith.constant 0 : i32
    %c0_i32_1 = arith.constant 0 : i32
    return %c0_i32, %c0_i32_0 : i32, i32
  }
  func.func @transform_7(%arg0: i32, %arg1: i32) -> (i32, i32) {
    %c0_i32 = arith.constant 0 : i32
    %c0_i32_0 = arith.constant 0 : i32
    %c0_i32_1 = arith.constant 0 : i32
    return %c0_i32, %c0_i32_0 : i32, i32
  }
  func.func @transform_8(%arg0: i32, %arg1: i32) -> (i32, i32) {
    %c0_i32 = arith.constant 0 : i32
    %c0_i32_0 = arith.constant 0 : i32
    %c0_i32_1 = arith.constant 0 : i32
    return %c0_i32, %c0_i32_0 : i32, i32
  }
  func.func @transform_9(%arg0: i32, %arg1: i32) -> (i32, i32) {
    %c0_i32 = arith.constant 0 : i32
    %c0_i32_0 = arith.constant 0 : i32
    %c0_i32_1 = arith.constant 0 : i32
    return %c0_i32, %c0_i32_0 : i32, i32
  }
  func.func @transform_10(%arg0: i32, %arg1: i32) -> (i32, i32) {
    %c0_i32 = arith.constant 0 : i32
    %c0_i32_0 = arith.constant 0 : i32
    %c0_i32_1 = arith.constant 0 : i32
    return %c0_i32, %c0_i32_0 : i32, i32
  }
  func.func @transform_11(%arg0: i32, %arg1: i32) -> (i32, i32) {
    %c0_i32 = arith.constant 0 : i32
    %c0_i32_0 = arith.constant 0 : i32
    %c0_i32_1 = arith.constant 0 : i32
    return %c0_i32, %c0_i32_0 : i32, i32
  }
  func.func @transform_12(%arg0: i32, %arg1: i32) -> (i32, i32) {
    %c0_i32 = arith.constant 0 : i32
    %c0_i32_0 = arith.constant 0 : i32
    %c0_i32_1 = arith.constant 0 : i32
    return %c0_i32, %c0_i32_0 : i32, i32
  }
  func.func @transform_13(%arg0: i32, %arg1: i32) -> (i32, i32) {
    %c0_i32 = arith.constant 0 : i32
    %c0_i32_0 = arith.constant 0 : i32
    %c0_i32_1 = arith.constant 0 : i32
    return %c0_i32, %c0_i32_0 : i32, i32
  }
  func.func @transform_14(%arg0: i32, %arg1: i32) -> (i32, i32) {
    %c0_i32 = arith.constant 0 : i32
    %c0_i32_0 = arith.constant 0 : i32
    %c0_i32_1 = arith.constant 0 : i32
    return %c0_i32, %c0_i32_0 : i32, i32
  }
  func.func @transform_15(%arg0: i32, %arg1: i32) -> (i32, i32) {
    %c0_i32 = arith.constant 0 : i32
    %c0_i32_0 = arith.constant 0 : i32
    %c0_i32_1 = arith.constant 0 : i32
    return %c0_i32, %c0_i32_0 : i32, i32
  }
  func.func @transform_16(%arg0: i32, %arg1: i32) -> (i32, i32) {
    %c0_i32 = arith.constant 0 : i32
    %c0_i32_0 = arith.constant 0 : i32
    %c0_i32_1 = arith.constant 0 : i32
    return %c0_i32, %c0_i32_0 : i32, i32
  }
  func.func @transform_17(%arg0: i32, %arg1: i32) -> (i32, i32) {
    %c0_i32 = arith.constant 0 : i32
    %c0_i32_0 = arith.constant 0 : i32
    %c0_i32_1 = arith.constant 0 : i32
    return %c0_i32, %c0_i32_0 : i32, i32
  }
  func.func @transform_18(%arg0: i32, %arg1: i32) -> (i32, i32) {
    %c0_i32 = arith.constant 0 : i32
    %c0_i32_0 = arith.constant 0 : i32
    %c0_i32_1 = arith.constant 0 : i32
    return %c0_i32, %c0_i32_0 : i32, i32
  }
  func.func @transform_19(%arg0: i32, %arg1: i32) -> (i32, i32) {
    %c0_i32 = arith.constant 0 : i32
    %c0_i32_0 = arith.constant 0 : i32
    %c0_i32_1 = arith.constant 0 : i32
    return %c0_i32, %c0_i32_0 : i32, i32
  }
  func.func @transform_20(%arg0: i32, %arg1: i32) -> (i32, i32) {
    %c0_i32 = arith.constant 0 : i32
    %c0_i32_0 = arith.constant 0 : i32
    %c0_i32_1 = arith.constant 0 : i32
    return %c0_i32, %c0_i32_0 : i32, i32
  }
  func.func @transform_21(%arg0: i32, %arg1: i32) -> (i32, i32) {
    %c0_i32 = arith.constant 0 : i32
    %c0_i32_0 = arith.constant 0 : i32
    %c0_i32_1 = arith.constant 0 : i32
    return %c0_i32, %c0_i32_0 : i32, i32
  }
  func.func @transform_22(%arg0: i32, %arg1: i32) -> (i32, i32) {
    %c0_i32 = arith.constant 0 : i32
    %c0_i32_0 = arith.constant 0 : i32
    %c0_i32_1 = arith.constant 0 : i32
    return %c0_i32, %c0_i32_0 : i32, i32
  }
  func.func @transform_23(%arg0: i32, %arg1: i32) -> (i32, i32) {
    %c0_i32 = arith.constant 0 : i32
    %c0_i32_0 = arith.constant 0 : i32
    %c0_i32_1 = arith.constant 0 : i32
    return %c0_i32, %c0_i32_0 : i32, i32
  }
  func.func @transform_24(%arg0: i32, %arg1: i32) -> (i32, i32, i32) {
    %c0_i32 = arith.constant 0 : i32
    %c0_i32_0 = arith.constant 0 : i32
    return %arg0, %arg1, %c0_i32 : i32, i32, i32
  }
}

module attributes {stable_mosaic.version = 11 : i64} {
  func.func @_block_kernel(%arg0: i32, %arg1: i32, %arg2: memref<1x16x32xf32, #tpu.memory_space<vmem>>, %arg3: memref<1x8x16xf32, #tpu.memory_space<vmem>>, %arg4: memref<1x32xf32, #tpu.memory_space<vmem>>, %arg5: memref<1x32xf32, #tpu.memory_space<vmem>>, %arg6: memref<1x32xf32, #tpu.memory_space<vmem>>, %arg7: memref<1x32xf32, #tpu.memory_space<vmem>>, %arg8: memref<1x32xf32, #tpu.memory_space<vmem>>, %arg9: memref<1x32xf32, #tpu.memory_space<vmem>>, %arg10: memref<32x32xf32, #tpu.memory_space<vmem>>, %arg11: memref<32x32xf32, #tpu.memory_space<vmem>>, %arg12: memref<32x32xf32, #tpu.memory_space<vmem>>, %arg13: memref<32x32xf32, #tpu.memory_space<vmem>>, %arg14: memref<1x32xf32, #tpu.memory_space<vmem>>, %arg15: memref<32x32xf32, #tpu.memory_space<vmem>>, %arg16: memref<16x32xf32, #tpu.memory_space<vmem>>, %arg17: memref<16x32xf32, #tpu.memory_space<vmem>>, %arg18: memref<32x32xf32, #tpu.memory_space<vmem>>, %arg19: memref<1x32xf32, #tpu.memory_space<vmem>>, %arg20: memref<32x128xf32, #tpu.memory_space<vmem>>, %arg21: memref<1x128xf32, #tpu.memory_space<vmem>>, %arg22: memref<32x128xf32, #tpu.memory_space<vmem>>, %arg23: memref<1x128xf32, #tpu.memory_space<vmem>>, %arg24: memref<128x32xf32, #tpu.memory_space<vmem>>, %arg25: memref<1x32xf32, #tpu.memory_space<vmem>>, %arg26: memref<1x16x32xf32, #tpu.memory_space<vmem>>, %arg27: memref<4x16x8xf32, #tpu.memory_space<vmem>>, %arg28: memref<4x16x8xf32, #tpu.memory_space<vmem>>, %arg29: memref<4x8x8xf32, #tpu.memory_space<vmem>>, %arg30: memref<4x8x8xf32, #tpu.memory_space<vmem>>, %arg31: memref<4x16x8xf32, #tpu.memory_space<vmem>>, %arg32: memref<16x32xf32, #tpu.memory_space<vmem>>) attributes {dimension_semantics = [#tpu.dimension_semantics<parallel>, #tpu.dimension_semantics<arbitrary>], iteration_bounds = array<i64: 2, 1>, scalar_prefetch = 0 : i64, scratch_operands = 6 : i64, tpu.core_type = #tpu.core_type<tc>, window_params = [{transform_indices = @transform_0, window_bounds = array<i64: 1, 16, 32>}, {transform_indices = @transform_1, window_bounds = array<i64: 1, 8, 16>}, {pipeline_mode = #tpu.pipeline_mode<synchronous>, transform_indices = @transform_2, window_bounds = array<i64: 1, 32>}, {pipeline_mode = #tpu.pipeline_mode<synchronous>, transform_indices = @transform_3, window_bounds = array<i64: 1, 32>}, {pipeline_mode = #tpu.pipeline_mode<synchronous>, transform_indices = @transform_4, window_bounds = array<i64: 1, 32>}, {pipeline_mode = #tpu.pipeline_mode<synchronous>, transform_indices = @transform_5, window_bounds = array<i64: 1, 32>}, {pipeline_mode = #tpu.pipeline_mode<synchronous>, transform_indices = @transform_6, window_bounds = array<i64: 1, 32>}, {pipeline_mode = #tpu.pipeline_mode<synchronous>, transform_indices = @transform_7, window_bounds = array<i64: 1, 32>}, {pipeline_mode = #tpu.pipeline_mode<synchronous>, transform_indices = @transform_8, window_bounds = array<i64: 32, 32>}, {pipeline_mode = #tpu.pipeline_mode<synchronous>, transform_indices = @transform_9, window_bounds = array<i64: 32, 32>}, {pipeline_mode = #tpu.pipeline_mode<synchronous>, transform_indices = @transform_10, window_bounds = array<i64: 32, 32>}, {pipeline_mode = #tpu.pipeline_mode<synchronous>, transform_indices = @transform_11, window_bounds = array<i64: 32, 32>}, {pipeline_mode = #tpu.pipeline_mode<synchronous>, transform_indices = @transform_12, window_bounds = array<i64: 1, 32>}, {pipeline_mode = #tpu.pipeline_mode<synchronous>, transform_indices = @transform_13, window_bounds = array<i64: 32, 32>}, {pipeline_mode = #tpu.pipeline_mode<synchronous>, transform_indices = @transform_14, window_bounds = array<i64: 16, 32>}, {pipeline_mode = #tpu.pipeline_mode<synchronous>, transform_indices = @transform_15, window_bounds = array<i64: 16, 32>}, {pipeline_mode = #tpu.pipeline_mode<synchronous>, transform_indices = @transform_16, window_bounds = array<i64: 32, 32>}, {pipeline_mode = #tpu.pipeline_mode<synchronous>, transform_indices = @transform_17, window_bounds = array<i64: 1, 32>}, {pipeline_mode = #tpu.pipeline_mode<synchronous>, transform_indices = @transform_18, window_bounds = array<i64: 32, 128>}, {pipeline_mode = #tpu.pipeline_mode<synchronous>, transform_indices = @transform_19, window_bounds = array<i64: 1, 128>}, {pipeline_mode = #tpu.pipeline_mode<synchronous>, transform_indices = @transform_20, window_bounds = array<i64: 32, 128>}, {pipeline_mode = #tpu.pipeline_mode<synchronous>, transform_indices = @transform_21, window_bounds = array<i64: 1, 128>}, {pipeline_mode = #tpu.pipeline_mode<synchronous>, transform_indices = @transform_22, window_bounds = array<i64: 128, 32>}, {pipeline_mode = #tpu.pipeline_mode<synchronous>, transform_indices = @transform_23, window_bounds = array<i64: 1, 32>}, {transform_indices = @transform_24, window_bounds = array<i64: 1, 16, 32>}]} {
    %c0_i32 = arith.constant 0 : i32
    %0 = arith.cmpi eq, %arg1, %c0_i32 : i32
    %1 = arith.extui %0 : i1 to i32
    %c0_i32_0 = arith.constant 0 : i32
    %2 = arith.cmpi ne, %1, %c0_i32_0 : i32
    scf.if %2 {
      %c0_131 = arith.constant 0 : index
      %c0_132 = arith.constant 0 : index
      %c0_133 = arith.constant 0 : index
      %216 = vector.load %arg2[%c0_131, %c0_132, %c0_133] : memref<1x16x32xf32, #tpu.memory_space<vmem>>, vector<1x16x32xf32>
      %217 = vector.shape_cast %216 : vector<1x16x32xf32> to vector<16x32xf32>
      %cst_134 = arith.constant dense<0.000000e+00> : vector<16xf32>
      %218 = vector.multi_reduction <add>, %217, %cst_134 [1] : vector<16x32xf32> to vector<16xf32>
      %219 = vector.shape_cast %218 : vector<16xf32> to vector<16x1xf32>
      %220 = arith.mulf %217, %217 : vector<16x32xf32>
      %cst_135 = arith.constant dense<0.000000e+00> : vector<16xf32>
      %221 = vector.multi_reduction <add>, %220, %cst_135 [1] : vector<16x32xf32> to vector<16xf32>
      %222 = vector.shape_cast %221 : vector<16xf32> to vector<16x1xf32>
      %cst_136 = arith.constant 3.125000e-02 : f32
      %223 = vector.broadcast %cst_136 : f32 to vector<16x1xf32>
      %224 = arith.mulf %219, %223 : vector<16x1xf32>
      %cst_137 = arith.constant 3.125000e-02 : f32
      %225 = vector.broadcast %cst_137 : f32 to vector<16x1xf32>
      %226 = arith.mulf %222, %225 : vector<16x1xf32>
      %227 = arith.mulf %224, %224 : vector<16x1xf32>
      %228 = arith.subf %226, %227 : vector<16x1xf32>
      %229 = vector.broadcast %224 : vector<16x1xf32> to vector<16x32xf32>
      %230 = arith.subf %217, %229 : vector<16x32xf32>
      %cst_138 = arith.constant 9.99999974E-6 : f32
      %231 = vector.broadcast %cst_138 : f32 to vector<16x1xf32>
      %232 = arith.addf %228, %231 : vector<16x1xf32>
      %233 = math.rsqrt %232 : vector<16x1xf32>
      %234 = vector.broadcast %233 : vector<16x1xf32> to vector<16x32xf32>
      %235 = arith.mulf %230, %234 : vector<16x32xf32>
      %c0_139 = arith.constant 0 : index
      %c0_140 = arith.constant 0 : index
      %236 = vector.load %arg4[%c0_139, %c0_140] : memref<1x32xf32, #tpu.memory_space<vmem>>, vector<1x32xf32>
      %237 = vector.broadcast %236 : vector<1x32xf32> to vector<16x32xf32>
      %238 = arith.mulf %235, %237 : vector<16x32xf32>
      %c0_141 = arith.constant 0 : index
      %c0_142 = arith.constant 0 : index
      %239 = vector.load %arg5[%c0_141, %c0_142] : memref<1x32xf32, #tpu.memory_space<vmem>>, vector<1x32xf32>
      %240 = vector.broadcast %239 : vector<1x32xf32> to vector<16x32xf32>
      %241 = arith.addf %238, %240 : vector<16x32xf32>
      %c0_143 = arith.constant 0 : index
      %c0_144 = arith.constant 0 : index
      %242 = vector.load %arg11[%c0_143, %c0_144] : memref<32x32xf32, #tpu.memory_space<vmem>>, vector<32x32xf32>
      %cst_145 = arith.constant dense<0.000000e+00> : vector<16x32xf32>
      %243 = tpu.matmul %241, %242, %cst_145 {dimension_numbers = #tpu.dot_dimension_numbers<[1], [0], [0], [1], [0, 0, 1, 1], [], []>} : vector<16x32xf32>, vector<32x32xf32>, vector<16x32xf32> -> vector<16x32xf32>
      %244 = vector.extract_strided_slice %243 {offsets = [0, 0], sizes = [16, 8], strides = [1, 1]} : vector<16x32xf32> to vector<16x8xf32>
      %c0_146 = arith.constant 0 : index
      %c0_147 = arith.constant 0 : index
      %c0_148 = arith.constant 0 : index
      %245 = vector.load %arg27[%c0_146, %c0_147, %c0_148] : memref<4x16x8xf32, #tpu.memory_space<vmem>>, vector<1x16x8xf32>
      %246 = vector.shape_cast %245 : vector<1x16x8xf32> to vector<16x8xf32>
      %247 = vector.shape_cast %244 : vector<16x8xf32> to vector<1x16x8xf32>
      tpu.vector_store %arg27[%c0_146, %c0_147, %c0_148], %247 {strides = array<i32>} : memref<4x16x8xf32, #tpu.memory_space<vmem>>, vector<1x16x8xf32>,
      %248 = vector.extract_strided_slice %243 {offsets = [0, 8], sizes = [16, 8], strides = [1, 1]} : vector<16x32xf32> to vector<16x8xf32>
      %c1_149 = arith.constant 1 : index
      %c0_150 = arith.constant 0 : index
      %c0_151 = arith.constant 0 : index
      %249 = vector.load %arg27[%c1_149, %c0_150, %c0_151] : memref<4x16x8xf32, #tpu.memory_space<vmem>>, vector<1x16x8xf32>
      %250 = vector.shape_cast %249 : vector<1x16x8xf32> to vector<16x8xf32>
      %251 = vector.shape_cast %248 : vector<16x8xf32> to vector<1x16x8xf32>
      tpu.vector_store %arg27[%c1_149, %c0_150, %c0_151], %251 {strides = array<i32>} : memref<4x16x8xf32, #tpu.memory_space<vmem>>, vector<1x16x8xf32>,
      %252 = vector.extract_strided_slice %243 {offsets = [0, 16], sizes = [16, 8], strides = [1, 1]} : vector<16x32xf32> to vector<16x8xf32>
      %c2_152 = arith.constant 2 : index
      %c0_153 = arith.constant 0 : index
      %c0_154 = arith.constant 0 : index
      %253 = vector.load %arg27[%c2_152, %c0_153, %c0_154] : memref<4x16x8xf32, #tpu.memory_space<vmem>>, vector<1x16x8xf32>
      %254 = vector.shape_cast %253 : vector<1x16x8xf32> to vector<16x8xf32>
      %255 = vector.shape_cast %252 : vector<16x8xf32> to vector<1x16x8xf32>
      tpu.vector_store %arg27[%c2_152, %c0_153, %c0_154], %255 {strides = array<i32>} : memref<4x16x8xf32, #tpu.memory_space<vmem>>, vector<1x16x8xf32>,
      %256 = vector.extract_strided_slice %243 {offsets = [0, 24], sizes = [16, 8], strides = [1, 1]} : vector<16x32xf32> to vector<16x8xf32>
      %c3_155 = arith.constant 3 : index
      %c0_156 = arith.constant 0 : index
      %c0_157 = arith.constant 0 : index
      %257 = vector.load %arg27[%c3_155, %c0_156, %c0_157] : memref<4x16x8xf32, #tpu.memory_space<vmem>>, vector<1x16x8xf32>
      %258 = vector.shape_cast %257 : vector<1x16x8xf32> to vector<16x8xf32>
      %259 = vector.shape_cast %256 : vector<16x8xf32> to vector<1x16x8xf32>
      tpu.vector_store %arg27[%c3_155, %c0_156, %c0_157], %259 {strides = array<i32>} : memref<4x16x8xf32, #tpu.memory_space<vmem>>, vector<1x16x8xf32>,
      %c0_158 = arith.constant 0 : index
      %c0_159 = arith.constant 0 : index
      %260 = vector.load %arg12[%c0_158, %c0_159] : memref<32x32xf32, #tpu.memory_space<vmem>>, vector<32x32xf32>
      %cst_160 = arith.constant dense<0.000000e+00> : vector<16x32xf32>
      %261 = tpu.matmul %241, %260, %cst_160 {dimension_numbers = #tpu.dot_dimension_numbers<[1], [0], [0], [1], [0, 0, 1, 1], [], []>} : vector<16x32xf32>, vector<32x32xf32>, vector<16x32xf32> -> vector<16x32xf32>
      %262 = vector.extract_strided_slice %261 {offsets = [0, 0], sizes = [16, 8], strides = [1, 1]} : vector<16x32xf32> to vector<16x8xf32>
      %c0_161 = arith.constant 0 : index
      %c0_162 = arith.constant 0 : index
      %c0_163 = arith.constant 0 : index
      %263 = vector.load %arg28[%c0_161, %c0_162, %c0_163] : memref<4x16x8xf32, #tpu.memory_space<vmem>>, vector<1x16x8xf32>
      %264 = vector.shape_cast %263 : vector<1x16x8xf32> to vector<16x8xf32>
      %265 = vector.shape_cast %262 : vector<16x8xf32> to vector<1x16x8xf32>
      tpu.vector_store %arg28[%c0_161, %c0_162, %c0_163], %265 {strides = array<i32>} : memref<4x16x8xf32, #tpu.memory_space<vmem>>, vector<1x16x8xf32>,
      %266 = vector.extract_strided_slice %261 {offsets = [0, 8], sizes = [16, 8], strides = [1, 1]} : vector<16x32xf32> to vector<16x8xf32>
      %c1_164 = arith.constant 1 : index
      %c0_165 = arith.constant 0 : index
      %c0_166 = arith.constant 0 : index
      %267 = vector.load %arg28[%c1_164, %c0_165, %c0_166] : memref<4x16x8xf32, #tpu.memory_space<vmem>>, vector<1x16x8xf32>
      %268 = vector.shape_cast %267 : vector<1x16x8xf32> to vector<16x8xf32>
      %269 = vector.shape_cast %266 : vector<16x8xf32> to vector<1x16x8xf32>
      tpu.vector_store %arg28[%c1_164, %c0_165, %c0_166], %269 {strides = array<i32>} : memref<4x16x8xf32, #tpu.memory_space<vmem>>, vector<1x16x8xf32>,
      %270 = vector.extract_strided_slice %261 {offsets = [0, 16], sizes = [16, 8], strides = [1, 1]} : vector<16x32xf32> to vector<16x8xf32>
      %c2_167 = arith.constant 2 : index
      %c0_168 = arith.constant 0 : index
      %c0_169 = arith.constant 0 : index
      %271 = vector.load %arg28[%c2_167, %c0_168, %c0_169] : memref<4x16x8xf32, #tpu.memory_space<vmem>>, vector<1x16x8xf32>
      %272 = vector.shape_cast %271 : vector<1x16x8xf32> to vector<16x8xf32>
      %273 = vector.shape_cast %270 : vector<16x8xf32> to vector<1x16x8xf32>
      tpu.vector_store %arg28[%c2_167, %c0_168, %c0_169], %273 {strides = array<i32>} : memref<4x16x8xf32, #tpu.memory_space<vmem>>, vector<1x16x8xf32>,
      %274 = vector.extract_strided_slice %261 {offsets = [0, 24], sizes = [16, 8], strides = [1, 1]} : vector<16x32xf32> to vector<16x8xf32>
      %c3_170 = arith.constant 3 : index
      %c0_171 = arith.constant 0 : index
      %c0_172 = arith.constant 0 : index
      %275 = vector.load %arg28[%c3_170, %c0_171, %c0_172] : memref<4x16x8xf32, #tpu.memory_space<vmem>>, vector<1x16x8xf32>
      %276 = vector.shape_cast %275 : vector<1x16x8xf32> to vector<16x8xf32>
      %277 = vector.shape_cast %274 : vector<16x8xf32> to vector<1x16x8xf32>
      tpu.vector_store %arg28[%c3_170, %c0_171, %c0_172], %277 {strides = array<i32>} : memref<4x16x8xf32, #tpu.memory_space<vmem>>, vector<1x16x8xf32>,
      %c0_173 = arith.constant 0 : index
      %c0_174 = arith.constant 0 : index
      %c0_175 = arith.constant 0 : index
      %278 = vector.load %arg3[%c0_173, %c0_174, %c0_175] : memref<1x8x16xf32, #tpu.memory_space<vmem>>, vector<1x8x16xf32>
      %279 = vector.shape_cast %278 : vector<1x8x16xf32> to vector<8x16xf32>
      %c0_176 = arith.constant 0 : index
      %c0_177 = arith.constant 0 : index
      %280 = vector.load %arg16[%c0_176, %c0_177] : memref<16x32xf32, #tpu.memory_space<vmem>>, vector<16x32xf32>
      %cst_178 = arith.constant dense<0.000000e+00> : vector<8x32xf32>
      %281 = tpu.matmul %279, %280, %cst_178 {dimension_numbers = #tpu.dot_dimension_numbers<[1], [0], [0], [1], [0, 0, 1, 1], [], []>} : vector<8x16xf32>, vector<16x32xf32>, vector<8x32xf32> -> vector<8x32xf32>
      %282 = vector.extract_strided_slice %281 {offsets = [0, 0], sizes = [8, 8], strides = [1, 1]} : vector<8x32xf32> to vector<8x8xf32>
      %c0_179 = arith.constant 0 : index
      %c0_180 = arith.constant 0 : index
      %c0_181 = arith.constant 0 : index
      %283 = vector.load %arg29[%c0_179, %c0_180, %c0_181] : memref<4x8x8xf32, #tpu.memory_space<vmem>>, vector<1x8x8xf32>
      %284 = vector.shape_cast %283 : vector<1x8x8xf32> to vector<8x8xf32>
      %285 = vector.shape_cast %282 : vector<8x8xf32> to vector<1x8x8xf32>
      tpu.vector_store %arg29[%c0_179, %c0_180, %c0_181], %285 {strides = array<i32>} : memref<4x8x8xf32, #tpu.memory_space<vmem>>, vector<1x8x8xf32>,
      %286 = vector.extract_strided_slice %281 {offsets = [0, 8], sizes = [8, 8], strides = [1, 1]} : vector<8x32xf32> to vector<8x8xf32>
      %c1_182 = arith.constant 1 : index
      %c0_183 = arith.constant 0 : index
      %c0_184 = arith.constant 0 : index
      %287 = vector.load %arg29[%c1_182, %c0_183, %c0_184] : memref<4x8x8xf32, #tpu.memory_space<vmem>>, vector<1x8x8xf32>
      %288 = vector.shape_cast %287 : vector<1x8x8xf32> to vector<8x8xf32>
      %289 = vector.shape_cast %286 : vector<8x8xf32> to vector<1x8x8xf32>
      tpu.vector_store %arg29[%c1_182, %c0_183, %c0_184], %289 {strides = array<i32>} : memref<4x8x8xf32, #tpu.memory_space<vmem>>, vector<1x8x8xf32>,
      %290 = vector.extract_strided_slice %281 {offsets = [0, 16], sizes = [8, 8], strides = [1, 1]} : vector<8x32xf32> to vector<8x8xf32>
      %c2_185 = arith.constant 2 : index
      %c0_186 = arith.constant 0 : index
      %c0_187 = arith.constant 0 : index
      %291 = vector.load %arg29[%c2_185, %c0_186, %c0_187] : memref<4x8x8xf32, #tpu.memory_space<vmem>>, vector<1x8x8xf32>
      %292 = vector.shape_cast %291 : vector<1x8x8xf32> to vector<8x8xf32>
      %293 = vector.shape_cast %290 : vector<8x8xf32> to vector<1x8x8xf32>
      tpu.vector_store %arg29[%c2_185, %c0_186, %c0_187], %293 {strides = array<i32>} : memref<4x8x8xf32, #tpu.memory_space<vmem>>, vector<1x8x8xf32>,
      %294 = vector.extract_strided_slice %281 {offsets = [0, 24], sizes = [8, 8], strides = [1, 1]} : vector<8x32xf32> to vector<8x8xf32>
      %c3_188 = arith.constant 3 : index
      %c0_189 = arith.constant 0 : index
      %c0_190 = arith.constant 0 : index
      %295 = vector.load %arg29[%c3_188, %c0_189, %c0_190] : memref<4x8x8xf32, #tpu.memory_space<vmem>>, vector<1x8x8xf32>
      %296 = vector.shape_cast %295 : vector<1x8x8xf32> to vector<8x8xf32>
      %297 = vector.shape_cast %294 : vector<8x8xf32> to vector<1x8x8xf32>
      tpu.vector_store %arg29[%c3_188, %c0_189, %c0_190], %297 {strides = array<i32>} : memref<4x8x8xf32, #tpu.memory_space<vmem>>, vector<1x8x8xf32>,
      %c0_191 = arith.constant 0 : index
      %c0_192 = arith.constant 0 : index
      %298 = vector.load %arg17[%c0_191, %c0_192] : memref<16x32xf32, #tpu.memory_space<vmem>>, vector<16x32xf32>
      %cst_193 = arith.constant dense<0.000000e+00> : vector<8x32xf32>
      %299 = tpu.matmul %279, %298, %cst_193 {dimension_numbers = #tpu.dot_dimension_numbers<[1], [0], [0], [1], [0, 0, 1, 1], [], []>} : vector<8x16xf32>, vector<16x32xf32>, vector<8x32xf32> -> vector<8x32xf32>
      %300 = vector.extract_strided_slice %299 {offsets = [0, 0], sizes = [8, 8], strides = [1, 1]} : vector<8x32xf32> to vector<8x8xf32>
      %c0_194 = arith.constant 0 : index
      %c0_195 = arith.constant 0 : index
      %c0_196 = arith.constant 0 : index
      %301 = vector.load %arg30[%c0_194, %c0_195, %c0_196] : memref<4x8x8xf32, #tpu.memory_space<vmem>>, vector<1x8x8xf32>
      %302 = vector.shape_cast %301 : vector<1x8x8xf32> to vector<8x8xf32>
      %303 = vector.shape_cast %300 : vector<8x8xf32> to vector<1x8x8xf32>
      tpu.vector_store %arg30[%c0_194, %c0_195, %c0_196], %303 {strides = array<i32>} : memref<4x8x8xf32, #tpu.memory_space<vmem>>, vector<1x8x8xf32>,
      %304 = vector.extract_strided_slice %299 {offsets = [0, 8], sizes = [8, 8], strides = [1, 1]} : vector<8x32xf32> to vector<8x8xf32>
      %c1_197 = arith.constant 1 : index
      %c0_198 = arith.constant 0 : index
      %c0_199 = arith.constant 0 : index
      %305 = vector.load %arg30[%c1_197, %c0_198, %c0_199] : memref<4x8x8xf32, #tpu.memory_space<vmem>>, vector<1x8x8xf32>
      %306 = vector.shape_cast %305 : vector<1x8x8xf32> to vector<8x8xf32>
      %307 = vector.shape_cast %304 : vector<8x8xf32> to vector<1x8x8xf32>
      tpu.vector_store %arg30[%c1_197, %c0_198, %c0_199], %307 {strides = array<i32>} : memref<4x8x8xf32, #tpu.memory_space<vmem>>, vector<1x8x8xf32>,
      %308 = vector.extract_strided_slice %299 {offsets = [0, 16], sizes = [8, 8], strides = [1, 1]} : vector<8x32xf32> to vector<8x8xf32>
      %c2_200 = arith.constant 2 : index
      %c0_201 = arith.constant 0 : index
      %c0_202 = arith.constant 0 : index
      %309 = vector.load %arg30[%c2_200, %c0_201, %c0_202] : memref<4x8x8xf32, #tpu.memory_space<vmem>>, vector<1x8x8xf32>
      %310 = vector.shape_cast %309 : vector<1x8x8xf32> to vector<8x8xf32>
      %311 = vector.shape_cast %308 : vector<8x8xf32> to vector<1x8x8xf32>
      tpu.vector_store %arg30[%c2_200, %c0_201, %c0_202], %311 {strides = array<i32>} : memref<4x8x8xf32, #tpu.memory_space<vmem>>, vector<1x8x8xf32>,
      %312 = vector.extract_strided_slice %299 {offsets = [0, 24], sizes = [8, 8], strides = [1, 1]} : vector<8x32xf32> to vector<8x8xf32>
      %c3_203 = arith.constant 3 : index
      %c0_204 = arith.constant 0 : index
      %c0_205 = arith.constant 0 : index
      %313 = vector.load %arg30[%c3_203, %c0_204, %c0_205] : memref<4x8x8xf32, #tpu.memory_space<vmem>>, vector<1x8x8xf32>
      %314 = vector.shape_cast %313 : vector<1x8x8xf32> to vector<8x8xf32>
      %315 = vector.shape_cast %312 : vector<8x8xf32> to vector<1x8x8xf32>
      tpu.vector_store %arg30[%c3_203, %c0_204, %c0_205], %315 {strides = array<i32>} : memref<4x8x8xf32, #tpu.memory_space<vmem>>, vector<1x8x8xf32>,
    } else {
    }
    %c16_i32 = arith.constant 16 : i32
    %3 = arith.muli %arg1, %c16_i32 : i32
    %4 = tpu.assume_multiple %3, 16 : i32
    %c0 = arith.constant 0 : index
    %5 = arith.index_cast %4 : i32 to index
    %c0_1 = arith.constant 0 : index
    %6 = vector.load %arg2[%c0, %5, %c0_1] : memref<1x16x32xf32, #tpu.memory_space<vmem>>, vector<1x16x32xf32>
    %7 = vector.shape_cast %6 : vector<1x16x32xf32> to vector<16x32xf32>
    %cst = arith.constant dense<0.000000e+00> : vector<16xf32>
    %8 = vector.multi_reduction <add>, %7, %cst [1] : vector<16x32xf32> to vector<16xf32>
    %9 = vector.shape_cast %8 : vector<16xf32> to vector<16x1xf32>
    %10 = arith.mulf %7, %7 : vector<16x32xf32>
    %cst_2 = arith.constant dense<0.000000e+00> : vector<16xf32>
    %11 = vector.multi_reduction <add>, %10, %cst_2 [1] : vector<16x32xf32> to vector<16xf32>
    %12 = vector.shape_cast %11 : vector<16xf32> to vector<16x1xf32>
    %cst_3 = arith.constant 3.125000e-02 : f32
    %13 = vector.broadcast %cst_3 : f32 to vector<16x1xf32>
    %14 = arith.mulf %9, %13 : vector<16x1xf32>
    %cst_4 = arith.constant 3.125000e-02 : f32
    %15 = vector.broadcast %cst_4 : f32 to vector<16x1xf32>
    %16 = arith.mulf %12, %15 : vector<16x1xf32>
    %17 = arith.mulf %14, %14 : vector<16x1xf32>
    %18 = arith.subf %16, %17 : vector<16x1xf32>
    %19 = vector.broadcast %14 : vector<16x1xf32> to vector<16x32xf32>
    %20 = arith.subf %7, %19 : vector<16x32xf32>
    %cst_5 = arith.constant 9.99999974E-6 : f32
    %21 = vector.broadcast %cst_5 : f32 to vector<16x1xf32>
    %22 = arith.addf %18, %21 : vector<16x1xf32>
    %23 = math.rsqrt %22 : vector<16x1xf32>
    %24 = vector.broadcast %23 : vector<16x1xf32> to vector<16x32xf32>
    %25 = arith.mulf %20, %24 : vector<16x32xf32>
    %c0_6 = arith.constant 0 : index
    %c0_7 = arith.constant 0 : index
    %26 = vector.load %arg4[%c0_6, %c0_7] : memref<1x32xf32, #tpu.memory_space<vmem>>, vector<1x32xf32>
    %27 = vector.broadcast %26 : vector<1x32xf32> to vector<16x32xf32>
    %28 = arith.mulf %25, %27 : vector<16x32xf32>
    %c0_8 = arith.constant 0 : index
    %c0_9 = arith.constant 0 : index
    %29 = vector.load %arg5[%c0_8, %c0_9] : memref<1x32xf32, #tpu.memory_space<vmem>>, vector<1x32xf32>
    %30 = vector.broadcast %29 : vector<1x32xf32> to vector<16x32xf32>
    %31 = arith.addf %28, %30 : vector<16x32xf32>
    %c0_10 = arith.constant 0 : index
    %c0_11 = arith.constant 0 : index
    %32 = vector.load %arg10[%c0_10, %c0_11] : memref<32x32xf32, #tpu.memory_space<vmem>>, vector<32x32xf32>
    %cst_12 = arith.constant dense<0.000000e+00> : vector<16x32xf32>
    %33 = tpu.matmul %31, %32, %cst_12 {dimension_numbers = #tpu.dot_dimension_numbers<[1], [0], [0], [1], [0, 0, 1, 1], [], []>} : vector<16x32xf32>, vector<32x32xf32>, vector<16x32xf32> -> vector<16x32xf32>
    %cst_13 = arith.constant 0.353553385 : f32
    %34 = vector.broadcast %cst_13 : f32 to vector<16x32xf32>
    %35 = arith.mulf %33, %34 : vector<16x32xf32>
    %36 = vector.extract_strided_slice %35 {offsets = [0, 0], sizes = [16, 8], strides = [1, 1]} : vector<16x32xf32> to vector<16x8xf32>
    %c0_14 = arith.constant 0 : index
    %c0_15 = arith.constant 0 : index
    %c0_16 = arith.constant 0 : index
    %37 = vector.load %arg31[%c0_14, %c0_15, %c0_16] : memref<4x16x8xf32, #tpu.memory_space<vmem>>, vector<1x16x8xf32>
    %38 = vector.shape_cast %37 : vector<1x16x8xf32> to vector<16x8xf32>
    %39 = vector.shape_cast %36 : vector<16x8xf32> to vector<1x16x8xf32>
    tpu.vector_store %arg31[%c0_14, %c0_15, %c0_16], %39 {strides = array<i32>} : memref<4x16x8xf32, #tpu.memory_space<vmem>>, vector<1x16x8xf32>,
    %40 = vector.extract_strided_slice %35 {offsets = [0, 8], sizes = [16, 8], strides = [1, 1]} : vector<16x32xf32> to vector<16x8xf32>
    %c1 = arith.constant 1 : index
    %c0_17 = arith.constant 0 : index
    %c0_18 = arith.constant 0 : index
    %41 = vector.load %arg31[%c1, %c0_17, %c0_18] : memref<4x16x8xf32, #tpu.memory_space<vmem>>, vector<1x16x8xf32>
    %42 = vector.shape_cast %41 : vector<1x16x8xf32> to vector<16x8xf32>
    %43 = vector.shape_cast %40 : vector<16x8xf32> to vector<1x16x8xf32>
    tpu.vector_store %arg31[%c1, %c0_17, %c0_18], %43 {strides = array<i32>} : memref<4x16x8xf32, #tpu.memory_space<vmem>>, vector<1x16x8xf32>,
    %44 = vector.extract_strided_slice %35 {offsets = [0, 16], sizes = [16, 8], strides = [1, 1]} : vector<16x32xf32> to vector<16x8xf32>
    %c2 = arith.constant 2 : index
    %c0_19 = arith.constant 0 : index
    %c0_20 = arith.constant 0 : index
    %45 = vector.load %arg31[%c2, %c0_19, %c0_20] : memref<4x16x8xf32, #tpu.memory_space<vmem>>, vector<1x16x8xf32>
    %46 = vector.shape_cast %45 : vector<1x16x8xf32> to vector<16x8xf32>
    %47 = vector.shape_cast %44 : vector<16x8xf32> to vector<1x16x8xf32>
    tpu.vector_store %arg31[%c2, %c0_19, %c0_20], %47 {strides = array<i32>} : memref<4x16x8xf32, #tpu.memory_space<vmem>>, vector<1x16x8xf32>,
    %48 = vector.extract_strided_slice %35 {offsets = [0, 24], sizes = [16, 8], strides = [1, 1]} : vector<16x32xf32> to vector<16x8xf32>
    %c3 = arith.constant 3 : index
    %c0_21 = arith.constant 0 : index
    %c0_22 = arith.constant 0 : index
    %49 = vector.load %arg31[%c3, %c0_21, %c0_22] : memref<4x16x8xf32, #tpu.memory_space<vmem>>, vector<1x16x8xf32>
    %50 = vector.shape_cast %49 : vector<1x16x8xf32> to vector<16x8xf32>
    %51 = vector.shape_cast %48 : vector<16x8xf32> to vector<1x16x8xf32>
    tpu.vector_store %arg31[%c3, %c0_21, %c0_22], %51 {strides = array<i32>} : memref<4x16x8xf32, #tpu.memory_space<vmem>>, vector<1x16x8xf32>,
    %c0_23 = arith.constant 0 : index
    %c0_24 = arith.constant 0 : index
    %c0_25 = arith.constant 0 : index
    %52 = vector.load %arg31[%c0_23, %c0_24, %c0_25] : memref<4x16x8xf32, #tpu.memory_space<vmem>>, vector<4x16x8xf32>
    %c0_26 = arith.constant 0 : index
    %c0_27 = arith.constant 0 : index
    %c0_28 = arith.constant 0 : index
    %53 = vector.load %arg27[%c0_26, %c0_27, %c0_28] : memref<4x16x8xf32, #tpu.memory_space<vmem>>, vector<4x16x8xf32>
    "tpu.trace_start"() <{level = 10 : i32, message = "hqd,hkd->hqk"}> : () -> ()
    %cst_29 = arith.constant dense<0.000000e+00> : vector<4x16x16xf32>
    %54 = tpu.matmul %52, %53, %cst_29 {dimension_numbers = #tpu.dot_dimension_numbers<[2], [2], [1], [1], [0, 0, 0, 1, 1, 1], [0], [0]>} : vector<4x16x8xf32>, vector<4x16x8xf32>, vector<4x16x16xf32> -> vector<4x16x16xf32>
    "tpu.trace_stop"() : () -> ()
    %cst_30 = arith.constant dense<0xFF800000> : vector<4x16xf32>
    %55 = vector.multi_reduction <maximumf>, %54, %cst_30 [2] : vector<4x16x16xf32> to vector<4x16xf32>
    %56 = vector.shape_cast %55 : vector<4x16xf32> to vector<4x16x1xf32>
    %57 = vector.broadcast %56 : vector<4x16x1xf32> to vector<4x16x16xf32>
    %58 = arith.subf %54, %57 : vector<4x16x16xf32>
    %59 = math.exp %58 : vector<4x16x16xf32>
    %cst_31 = arith.constant dense<0.000000e+00> : vector<4x16xf32>
    %60 = vector.multi_reduction <add>, %59, %cst_31 [2] : vector<4x16x16xf32> to vector<4x16xf32>
    %61 = vector.shape_cast %60 : vector<4x16xf32> to vector<4x16x1xf32>
    %62 = tpu.reciprocal %61 {approx = true} : vector<4x16x1xf32> -> vector<4x16x1xf32>
    %63 = vector.broadcast %62 : vector<4x16x1xf32> to vector<4x16x16xf32>
    %64 = arith.mulf %59, %63 : vector<4x16x16xf32>
    %c0_32 = arith.constant 0 : index
    %c0_33 = arith.constant 0 : index
    %c0_34 = arith.constant 0 : index
    %65 = vector.load %arg28[%c0_32, %c0_33, %c0_34] : memref<4x16x8xf32, #tpu.memory_space<vmem>>, vector<4x16x8xf32>
    "tpu.trace_start"() <{level = 10 : i32, message = "hqk,hkd->hqd"}> : () -> ()
    %cst_35 = arith.constant dense<0.000000e+00> : vector<4x16x8xf32>
    %66 = tpu.matmul %64, %65, %cst_35 {dimension_numbers = #tpu.dot_dimension_numbers<[2], [1], [1], [2], [0, 0, 0, 1, 1, 2], [0], [0]>} : vector<4x16x16xf32>, vector<4x16x8xf32>, vector<4x16x8xf32> -> vector<4x16x8xf32>
    "tpu.trace_stop"() : () -> ()
    %67 = vector.extract_strided_slice %66 {offsets = [0, 0, 0], sizes = [1, 16, 8], strides = [1, 1, 1]} : vector<4x16x8xf32> to vector<1x16x8xf32>
    %68 = vector.shape_cast %67 : vector<1x16x8xf32> to vector<16x8xf32>
    %c0_36 = arith.constant 0 : index
    %c0_37 = arith.constant 0 : index
    %69 = vector.load %arg32[%c0_36, %c0_37] : memref<16x32xf32, #tpu.memory_space<vmem>>, vector<16x8xf32>
    tpu.vector_store %arg32[%c0_36, %c0_37], %68 {strides = array<i32>} : memref<16x32xf32, #tpu.memory_space<vmem>>, vector<16x8xf32>,
    %70 = vector.extract_strided_slice %66 {offsets = [1, 0, 0], sizes = [1, 16, 8], strides = [1, 1, 1]} : vector<4x16x8xf32> to vector<1x16x8xf32>
    %71 = vector.shape_cast %70 : vector<1x16x8xf32> to vector<16x8xf32>
    %c0_38 = arith.constant 0 : index
    %c8 = arith.constant 8 : index
    %72 = vector.load %arg32[%c0_38, %c8] : memref<16x32xf32, #tpu.memory_space<vmem>>, vector<16x8xf32>
    tpu.vector_store %arg32[%c0_38, %c8], %71 {strides = array<i32>} : memref<16x32xf32, #tpu.memory_space<vmem>>, vector<16x8xf32>,
    %73 = vector.extract_strided_slice %66 {offsets = [2, 0, 0], sizes = [1, 16, 8], strides = [1, 1, 1]} : vector<4x16x8xf32> to vector<1x16x8xf32>
    %74 = vector.shape_cast %73 : vector<1x16x8xf32> to vector<16x8xf32>
    %c0_39 = arith.constant 0 : index
    %c16 = arith.constant 16 : index
    %75 = vector.load %arg32[%c0_39, %c16] : memref<16x32xf32, #tpu.memory_space<vmem>>, vector<16x8xf32>
    tpu.vector_store %arg32[%c0_39, %c16], %74 {strides = array<i32>} : memref<16x32xf32, #tpu.memory_space<vmem>>, vector<16x8xf32>,
    %76 = vector.extract_strided_slice %66 {offsets = [3, 0, 0], sizes = [1, 16, 8], strides = [1, 1, 1]} : vector<4x16x8xf32> to vector<1x16x8xf32>
    %77 = vector.shape_cast %76 : vector<1x16x8xf32> to vector<16x8xf32>
    %c0_40 = arith.constant 0 : index
    %c24 = arith.constant 24 : index
    %78 = vector.load %arg32[%c0_40, %c24] : memref<16x32xf32, #tpu.memory_space<vmem>>, vector<16x8xf32>
    tpu.vector_store %arg32[%c0_40, %c24], %77 {strides = array<i32>} : memref<16x32xf32, #tpu.memory_space<vmem>>, vector<16x8xf32>,
    %c0_41 = arith.constant 0 : index
    %c0_42 = arith.constant 0 : index
    %79 = vector.load %arg32[%c0_41, %c0_42] : memref<16x32xf32, #tpu.memory_space<vmem>>, vector<16x32xf32>
    %c0_43 = arith.constant 0 : index
    %c0_44 = arith.constant 0 : index
    %80 = vector.load %arg13[%c0_43, %c0_44] : memref<32x32xf32, #tpu.memory_space<vmem>>, vector<32x32xf32>
    %cst_45 = arith.constant dense<0.000000e+00> : vector<16x32xf32>
    %81 = tpu.matmul %79, %80, %cst_45 {dimension_numbers = #tpu.dot_dimension_numbers<[1], [0], [0], [1], [0, 0, 1, 1], [], []>} : vector<16x32xf32>, vector<32x32xf32>, vector<16x32xf32> -> vector<16x32xf32>
    %c0_46 = arith.constant 0 : index
    %c0_47 = arith.constant 0 : index
    %82 = vector.load %arg14[%c0_46, %c0_47] : memref<1x32xf32, #tpu.memory_space<vmem>>, vector<1x32xf32>
    %83 = vector.broadcast %82 : vector<1x32xf32> to vector<16x32xf32>
    %84 = arith.addf %81, %83 : vector<16x32xf32>
    %85 = arith.addf %7, %84 : vector<16x32xf32>
    %cst_48 = arith.constant dense<0.000000e+00> : vector<16xf32>
    %86 = vector.multi_reduction <add>, %85, %cst_48 [1] : vector<16x32xf32> to vector<16xf32>
    %87 = vector.shape_cast %86 : vector<16xf32> to vector<16x1xf32>
    %88 = arith.mulf %85, %85 : vector<16x32xf32>
    %cst_49 = arith.constant dense<0.000000e+00> : vector<16xf32>
    %89 = vector.multi_reduction <add>, %88, %cst_49 [1] : vector<16x32xf32> to vector<16xf32>
    %90 = vector.shape_cast %89 : vector<16xf32> to vector<16x1xf32>
    %cst_50 = arith.constant 3.125000e-02 : f32
    %91 = vector.broadcast %cst_50 : f32 to vector<16x1xf32>
    %92 = arith.mulf %87, %91 : vector<16x1xf32>
    %cst_51 = arith.constant 3.125000e-02 : f32
    %93 = vector.broadcast %cst_51 : f32 to vector<16x1xf32>
    %94 = arith.mulf %90, %93 : vector<16x1xf32>
    %95 = arith.mulf %92, %92 : vector<16x1xf32>
    %96 = arith.subf %94, %95 : vector<16x1xf32>
    %97 = vector.broadcast %92 : vector<16x1xf32> to vector<16x32xf32>
    %98 = arith.subf %85, %97 : vector<16x32xf32>
    %cst_52 = arith.constant 9.99999974E-6 : f32
    %99 = vector.broadcast %cst_52 : f32 to vector<16x1xf32>
    %100 = arith.addf %96, %99 : vector<16x1xf32>
    %101 = math.rsqrt %100 : vector<16x1xf32>
    %102 = vector.broadcast %101 : vector<16x1xf32> to vector<16x32xf32>
    %103 = arith.mulf %98, %102 : vector<16x32xf32>
    %c0_53 = arith.constant 0 : index
    %c0_54 = arith.constant 0 : index
    %104 = vector.load %arg6[%c0_53, %c0_54] : memref<1x32xf32, #tpu.memory_space<vmem>>, vector<1x32xf32>
    %105 = vector.broadcast %104 : vector<1x32xf32> to vector<16x32xf32>
    %106 = arith.mulf %103, %105 : vector<16x32xf32>
    %c0_55 = arith.constant 0 : index
    %c0_56 = arith.constant 0 : index
    %107 = vector.load %arg7[%c0_55, %c0_56] : memref<1x32xf32, #tpu.memory_space<vmem>>, vector<1x32xf32>
    %108 = vector.broadcast %107 : vector<1x32xf32> to vector<16x32xf32>
    %109 = arith.addf %106, %108 : vector<16x32xf32>
    %c0_57 = arith.constant 0 : index
    %c0_58 = arith.constant 0 : index
    %110 = vector.load %arg15[%c0_57, %c0_58] : memref<32x32xf32, #tpu.memory_space<vmem>>, vector<32x32xf32>
    %cst_59 = arith.constant dense<0.000000e+00> : vector<16x32xf32>
    %111 = tpu.matmul %109, %110, %cst_59 {dimension_numbers = #tpu.dot_dimension_numbers<[1], [0], [0], [1], [0, 0, 1, 1], [], []>} : vector<16x32xf32>, vector<32x32xf32>, vector<16x32xf32> -> vector<16x32xf32>
    %cst_60 = arith.constant 0.353553385 : f32
    %112 = vector.broadcast %cst_60 : f32 to vector<16x32xf32>
    %113 = arith.mulf %111, %112 : vector<16x32xf32>
    %114 = vector.extract_strided_slice %113 {offsets = [0, 0], sizes = [16, 8], strides = [1, 1]} : vector<16x32xf32> to vector<16x8xf32>
    %c0_61 = arith.constant 0 : index
    %c0_62 = arith.constant 0 : index
    %c0_63 = arith.constant 0 : index
    %115 = vector.load %arg31[%c0_61, %c0_62, %c0_63] : memref<4x16x8xf32, #tpu.memory_space<vmem>>, vector<1x16x8xf32>
    %116 = vector.shape_cast %115 : vector<1x16x8xf32> to vector<16x8xf32>
    %117 = vector.shape_cast %114 : vector<16x8xf32> to vector<1x16x8xf32>
    tpu.vector_store %arg31[%c0_61, %c0_62, %c0_63], %117 {strides = array<i32>} : memref<4x16x8xf32, #tpu.memory_space<vmem>>, vector<1x16x8xf32>,
    %118 = vector.extract_strided_slice %113 {offsets = [0, 8], sizes = [16, 8], strides = [1, 1]} : vector<16x32xf32> to vector<16x8xf32>
    %c1_64 = arith.constant 1 : index
    %c0_65 = arith.constant 0 : index
    %c0_66 = arith.constant 0 : index
    %119 = vector.load %arg31[%c1_64, %c0_65, %c0_66] : memref<4x16x8xf32, #tpu.memory_space<vmem>>, vector<1x16x8xf32>
    %120 = vector.shape_cast %119 : vector<1x16x8xf32> to vector<16x8xf32>
    %121 = vector.shape_cast %118 : vector<16x8xf32> to vector<1x16x8xf32>
    tpu.vector_store %arg31[%c1_64, %c0_65, %c0_66], %121 {strides = array<i32>} : memref<4x16x8xf32, #tpu.memory_space<vmem>>, vector<1x16x8xf32>,
    %122 = vector.extract_strided_slice %113 {offsets = [0, 16], sizes = [16, 8], strides = [1, 1]} : vector<16x32xf32> to vector<16x8xf32>
    %c2_67 = arith.constant 2 : index
    %c0_68 = arith.constant 0 : index
    %c0_69 = arith.constant 0 : index
    %123 = vector.load %arg31[%c2_67, %c0_68, %c0_69] : memref<4x16x8xf32, #tpu.memory_space<vmem>>, vector<1x16x8xf32>
    %124 = vector.shape_cast %123 : vector<1x16x8xf32> to vector<16x8xf32>
    %125 = vector.shape_cast %122 : vector<16x8xf32> to vector<1x16x8xf32>
    tpu.vector_store %arg31[%c2_67, %c0_68, %c0_69], %125 {strides = array<i32>} : memref<4x16x8xf32, #tpu.memory_space<vmem>>, vector<1x16x8xf32>,
    %126 = vector.extract_strided_slice %113 {offsets = [0, 24], sizes = [16, 8], strides = [1, 1]} : vector<16x32xf32> to vector<16x8xf32>
    %c3_70 = arith.constant 3 : index
    %c0_71 = arith.constant 0 : index
    %c0_72 = arith.constant 0 : index
    %127 = vector.load %arg31[%c3_70, %c0_71, %c0_72] : memref<4x16x8xf32, #tpu.memory_space<vmem>>, vector<1x16x8xf32>
    %128 = vector.shape_cast %127 : vector<1x16x8xf32> to vector<16x8xf32>
    %129 = vector.shape_cast %126 : vector<16x8xf32> to vector<1x16x8xf32>
    tpu.vector_store %arg31[%c3_70, %c0_71, %c0_72], %129 {strides = array<i32>} : memref<4x16x8xf32, #tpu.memory_space<vmem>>, vector<1x16x8xf32>,
    %c0_73 = arith.constant 0 : index
    %c0_74 = arith.constant 0 : index
    %c0_75 = arith.constant 0 : index
    %130 = vector.load %arg31[%c0_73, %c0_74, %c0_75] : memref<4x16x8xf32, #tpu.memory_space<vmem>>, vector<4x16x8xf32>
    %c0_76 = arith.constant 0 : index
    %c0_77 = arith.constant 0 : index
    %c0_78 = arith.constant 0 : index
    %131 = vector.load %arg29[%c0_76, %c0_77, %c0_78] : memref<4x8x8xf32, #tpu.memory_space<vmem>>, vector<4x8x8xf32>
    "tpu.trace_start"() <{level = 10 : i32, message = "hqd,hkd->hqk"}> : () -> ()
    %cst_79 = arith.constant dense<0.000000e+00> : vector<4x16x8xf32>
    %132 = tpu.matmul %130, %131, %cst_79 {dimension_numbers = #tpu.dot_dimension_numbers<[2], [2], [1], [1], [0, 0, 0, 1, 1, 1], [0], [0]>} : vector<4x16x8xf32>, vector<4x8x8xf32>, vector<4x16x8xf32> -> vector<4x16x8xf32>
    "tpu.trace_stop"() : () -> ()
    %cst_80 = arith.constant dense<0xFF800000> : vector<4x16xf32>
    %133 = vector.multi_reduction <maximumf>, %132, %cst_80 [2] : vector<4x16x8xf32> to vector<4x16xf32>
    %134 = vector.shape_cast %133 : vector<4x16xf32> to vector<4x16x1xf32>
    %135 = vector.broadcast %134 : vector<4x16x1xf32> to vector<4x16x8xf32>
    %136 = arith.subf %132, %135 : vector<4x16x8xf32>
    %137 = math.exp %136 : vector<4x16x8xf32>
    %cst_81 = arith.constant dense<0.000000e+00> : vector<4x16xf32>
    %138 = vector.multi_reduction <add>, %137, %cst_81 [2] : vector<4x16x8xf32> to vector<4x16xf32>
    %139 = vector.shape_cast %138 : vector<4x16xf32> to vector<4x16x1xf32>
    %140 = tpu.reciprocal %139 {approx = true} : vector<4x16x1xf32> -> vector<4x16x1xf32>
    %141 = vector.broadcast %140 : vector<4x16x1xf32> to vector<4x16x8xf32>
    %142 = arith.mulf %137, %141 : vector<4x16x8xf32>
    %c0_82 = arith.constant 0 : index
    %c0_83 = arith.constant 0 : index
    %c0_84 = arith.constant 0 : index
    %143 = vector.load %arg30[%c0_82, %c0_83, %c0_84] : memref<4x8x8xf32, #tpu.memory_space<vmem>>, vector<4x8x8xf32>
    "tpu.trace_start"() <{level = 10 : i32, message = "hqk,hkd->hqd"}> : () -> ()
    %cst_85 = arith.constant dense<0.000000e+00> : vector<4x16x8xf32>
    %144 = tpu.matmul %142, %143, %cst_85 {dimension_numbers = #tpu.dot_dimension_numbers<[2], [1], [1], [2], [0, 0, 0, 1, 1, 2], [0], [0]>} : vector<4x16x8xf32>, vector<4x8x8xf32>, vector<4x16x8xf32> -> vector<4x16x8xf32>
    "tpu.trace_stop"() : () -> ()
    %145 = vector.extract_strided_slice %144 {offsets = [0, 0, 0], sizes = [1, 16, 8], strides = [1, 1, 1]} : vector<4x16x8xf32> to vector<1x16x8xf32>
    %146 = vector.shape_cast %145 : vector<1x16x8xf32> to vector<16x8xf32>
    %c0_86 = arith.constant 0 : index
    %c0_87 = arith.constant 0 : index
    %147 = vector.load %arg32[%c0_86, %c0_87] : memref<16x32xf32, #tpu.memory_space<vmem>>, vector<16x8xf32>
    tpu.vector_store %arg32[%c0_86, %c0_87], %146 {strides = array<i32>} : memref<16x32xf32, #tpu.memory_space<vmem>>, vector<16x8xf32>,
    %148 = vector.extract_strided_slice %144 {offsets = [1, 0, 0], sizes = [1, 16, 8], strides = [1, 1, 1]} : vector<4x16x8xf32> to vector<1x16x8xf32>
    %149 = vector.shape_cast %148 : vector<1x16x8xf32> to vector<16x8xf32>
    %c0_88 = arith.constant 0 : index
    %c8_89 = arith.constant 8 : index
    %150 = vector.load %arg32[%c0_88, %c8_89] : memref<16x32xf32, #tpu.memory_space<vmem>>, vector<16x8xf32>
    tpu.vector_store %arg32[%c0_88, %c8_89], %149 {strides = array<i32>} : memref<16x32xf32, #tpu.memory_space<vmem>>, vector<16x8xf32>,
    %151 = vector.extract_strided_slice %144 {offsets = [2, 0, 0], sizes = [1, 16, 8], strides = [1, 1, 1]} : vector<4x16x8xf32> to vector<1x16x8xf32>
    %152 = vector.shape_cast %151 : vector<1x16x8xf32> to vector<16x8xf32>
    %c0_90 = arith.constant 0 : index
    %c16_91 = arith.constant 16 : index
    %153 = vector.load %arg32[%c0_90, %c16_91] : memref<16x32xf32, #tpu.memory_space<vmem>>, vector<16x8xf32>
    tpu.vector_store %arg32[%c0_90, %c16_91], %152 {strides = array<i32>} : memref<16x32xf32, #tpu.memory_space<vmem>>, vector<16x8xf32>,
    %154 = vector.extract_strided_slice %144 {offsets = [3, 0, 0], sizes = [1, 16, 8], strides = [1, 1, 1]} : vector<4x16x8xf32> to vector<1x16x8xf32>
    %155 = vector.shape_cast %154 : vector<1x16x8xf32> to vector<16x8xf32>
    %c0_92 = arith.constant 0 : index
    %c24_93 = arith.constant 24 : index
    %156 = vector.load %arg32[%c0_92, %c24_93] : memref<16x32xf32, #tpu.memory_space<vmem>>, vector<16x8xf32>
    tpu.vector_store %arg32[%c0_92, %c24_93], %155 {strides = array<i32>} : memref<16x32xf32, #tpu.memory_space<vmem>>, vector<16x8xf32>,
    %c0_94 = arith.constant 0 : index
    %c0_95 = arith.constant 0 : index
    %157 = vector.load %arg32[%c0_94, %c0_95] : memref<16x32xf32, #tpu.memory_space<vmem>>, vector<16x32xf32>
    %c0_96 = arith.constant 0 : index
    %c0_97 = arith.constant 0 : index
    %158 = vector.load %arg18[%c0_96, %c0_97] : memref<32x32xf32, #tpu.memory_space<vmem>>, vector<32x32xf32>
    %cst_98 = arith.constant dense<0.000000e+00> : vector<16x32xf32>
    %159 = tpu.matmul %157, %158, %cst_98 {dimension_numbers = #tpu.dot_dimension_numbers<[1], [0], [0], [1], [0, 0, 1, 1], [], []>} : vector<16x32xf32>, vector<32x32xf32>, vector<16x32xf32> -> vector<16x32xf32>
    %c0_99 = arith.constant 0 : index
    %c0_100 = arith.constant 0 : index
    %160 = vector.load %arg19[%c0_99, %c0_100] : memref<1x32xf32, #tpu.memory_space<vmem>>, vector<1x32xf32>
    %161 = vector.broadcast %160 : vector<1x32xf32> to vector<16x32xf32>
    %162 = arith.addf %159, %161 : vector<16x32xf32>
    %163 = arith.addf %85, %162 : vector<16x32xf32>
    %cst_101 = arith.constant dense<0.000000e+00> : vector<16xf32>
    %164 = vector.multi_reduction <add>, %163, %cst_101 [1] : vector<16x32xf32> to vector<16xf32>
    %165 = vector.shape_cast %164 : vector<16xf32> to vector<16x1xf32>
    %166 = arith.mulf %163, %163 : vector<16x32xf32>
    %cst_102 = arith.constant dense<0.000000e+00> : vector<16xf32>
    %167 = vector.multi_reduction <add>, %166, %cst_102 [1] : vector<16x32xf32> to vector<16xf32>
    %168 = vector.shape_cast %167 : vector<16xf32> to vector<16x1xf32>
    %cst_103 = arith.constant 3.125000e-02 : f32
    %169 = vector.broadcast %cst_103 : f32 to vector<16x1xf32>
    %170 = arith.mulf %165, %169 : vector<16x1xf32>
    %cst_104 = arith.constant 3.125000e-02 : f32
    %171 = vector.broadcast %cst_104 : f32 to vector<16x1xf32>
    %172 = arith.mulf %168, %171 : vector<16x1xf32>
    %173 = arith.mulf %170, %170 : vector<16x1xf32>
    %174 = arith.subf %172, %173 : vector<16x1xf32>
    %175 = vector.broadcast %170 : vector<16x1xf32> to vector<16x32xf32>
    %176 = arith.subf %163, %175 : vector<16x32xf32>
    %cst_105 = arith.constant 9.99999974E-6 : f32
    %177 = vector.broadcast %cst_105 : f32 to vector<16x1xf32>
    %178 = arith.addf %174, %177 : vector<16x1xf32>
    %179 = math.rsqrt %178 : vector<16x1xf32>
    %180 = vector.broadcast %179 : vector<16x1xf32> to vector<16x32xf32>
    %181 = arith.mulf %176, %180 : vector<16x32xf32>
    %c0_106 = arith.constant 0 : index
    %c0_107 = arith.constant 0 : index
    %182 = vector.load %arg8[%c0_106, %c0_107] : memref<1x32xf32, #tpu.memory_space<vmem>>, vector<1x32xf32>
    %183 = vector.broadcast %182 : vector<1x32xf32> to vector<16x32xf32>
    %184 = arith.mulf %181, %183 : vector<16x32xf32>
    %c0_108 = arith.constant 0 : index
    %c0_109 = arith.constant 0 : index
    %185 = vector.load %arg9[%c0_108, %c0_109] : memref<1x32xf32, #tpu.memory_space<vmem>>, vector<1x32xf32>
    %186 = vector.broadcast %185 : vector<1x32xf32> to vector<16x32xf32>
    %187 = arith.addf %184, %186 : vector<16x32xf32>
    %c0_110 = arith.constant 0 : index
    %c0_111 = arith.constant 0 : index
    %188 = vector.load %arg20[%c0_110, %c0_111] : memref<32x128xf32, #tpu.memory_space<vmem>>, vector<32x128xf32>
    %cst_112 = arith.constant dense<0.000000e+00> : vector<16x128xf32>
    %189 = tpu.matmul %187, %188, %cst_112 {dimension_numbers = #tpu.dot_dimension_numbers<[1], [0], [0], [1], [0, 0, 1, 1], [], []>} : vector<16x32xf32>, vector<32x128xf32>, vector<16x128xf32> -> vector<16x128xf32>
    %c0_113 = arith.constant 0 : index
    %c0_114 = arith.constant 0 : index
    %190 = vector.load %arg21[%c0_113, %c0_114] : memref<1x128xf32, #tpu.memory_space<vmem>>, vector<1x128xf32>
    %191 = vector.broadcast %190 : vector<1x128xf32> to vector<16x128xf32>
    %192 = arith.addf %189, %191 : vector<16x128xf32>
    %c0_115 = arith.constant 0 : index
    %c0_116 = arith.constant 0 : index
    %193 = vector.load %arg22[%c0_115, %c0_116] : memref<32x128xf32, #tpu.memory_space<vmem>>, vector<32x128xf32>
    %cst_117 = arith.constant dense<0.000000e+00> : vector<16x128xf32>
    %194 = tpu.matmul %187, %193, %cst_117 {dimension_numbers = #tpu.dot_dimension_numbers<[1], [0], [0], [1], [0, 0, 1, 1], [], []>} : vector<16x32xf32>, vector<32x128xf32>, vector<16x128xf32> -> vector<16x128xf32>
    %c0_118 = arith.constant 0 : index
    %c0_119 = arith.constant 0 : index
    %195 = vector.load %arg23[%c0_118, %c0_119] : memref<1x128xf32, #tpu.memory_space<vmem>>, vector<1x128xf32>
    %196 = vector.broadcast %195 : vector<1x128xf32> to vector<16x128xf32>
    %197 = arith.addf %194, %196 : vector<16x128xf32>
    %cst_120 = arith.constant 5.000000e-01 : f32
    %198 = vector.broadcast %cst_120 : f32 to vector<16x128xf32>
    %199 = arith.mulf %198, %197 : vector<16x128xf32>
    %cst_121 = arith.constant 0.707106769 : f32
    %200 = vector.broadcast %cst_121 : f32 to vector<16x128xf32>
    %201 = arith.mulf %197, %200 : vector<16x128xf32>
    %202 = math.erf %201 : vector<16x128xf32>
    %cst_122 = arith.constant 1.000000e+00 : f32
    %203 = vector.broadcast %cst_122 : f32 to vector<16x128xf32>
    %204 = arith.addf %203, %202 : vector<16x128xf32>
    %205 = arith.mulf %199, %204 : vector<16x128xf32>
    %206 = arith.mulf %192, %205 : vector<16x128xf32>
    %c0_123 = arith.constant 0 : index
    %c0_124 = arith.constant 0 : index
    %207 = vector.load %arg24[%c0_123, %c0_124] : memref<128x32xf32, #tpu.memory_space<vmem>>, vector<128x32xf32>
    %cst_125 = arith.constant dense<0.000000e+00> : vector<16x32xf32>
    %208 = tpu.matmul %206, %207, %cst_125 {dimension_numbers = #tpu.dot_dimension_numbers<[1], [0], [0], [1], [0, 0, 1, 1], [], []>} : vector<16x128xf32>, vector<128x32xf32>, vector<16x32xf32> -> vector<16x32xf32>
    %c0_126 = arith.constant 0 : index
    %c0_127 = arith.constant 0 : index
    %209 = vector.load %arg25[%c0_126, %c0_127] : memref<1x32xf32, #tpu.memory_space<vmem>>, vector<1x32xf32>
    %210 = vector.broadcast %209 : vector<1x32xf32> to vector<16x32xf32>
    %211 = arith.addf %208, %210 : vector<16x32xf32>
    %212 = arith.addf %163, %211 : vector<16x32xf32>
    %c0_128 = arith.constant 0 : index
    %c0_129 = arith.constant 0 : index
    %c0_130 = arith.constant 0 : index
    %213 = vector.load %arg26[%c0_128, %c0_129, %c0_130] : memref<1x16x32xf32, #tpu.memory_space<vmem>>, vector<1x16x32xf32>
    %214 = vector.shape_cast %213 : vector<1x16x32xf32> to vector<16x32xf32>
    %215 = vector.shape_cast %212 : vector<16x32xf32> to vector<1x16x32xf32>
    tpu.vector_store %arg26[%c0_128, %c0_129, %c0_130], %215 {strides = array<i32>} : memref<1x16x32xf32, #tpu.memory_space<vmem>>, vector<1x16x32xf32>,
    return
  }
  func.func @transform_0(%arg0: i32, %arg1: i32) -> (i32, i32, i32) {
    %c0_i32 = arith.constant 0 : i32
    %c0_i32_0 = arith.constant 0 : i32
    %c0_i32_1 = arith.constant 0 : i32
    return %arg0, %c0_i32, %c0_i32_0 : i32, i32, i32
  }
  func.func @transform_1(%arg0: i32, %arg1: i32) -> (i32, i32, i32) {
    %c0_i32 = arith.constant 0 : i32
    %c0_i32_0 = arith.constant 0 : i32
    %c0_i32_1 = arith.constant 0 : i32
    return %arg0, %c0_i32, %c0_i32_0 : i32, i32, i32
  }
  func.func @transform_2(%arg0: i32, %arg1: i32) -> (i32, i32) {
    %c0_i32 = arith.constant 0 : i32
    %c0_i32_0 = arith.constant 0 : i32
    %c0_i32_1 = arith.constant 0 : i32
    return %c0_i32, %c0_i32_0 : i32, i32
  }
  func.func @transform_3(%arg0: i32, %arg1: i32) -> (i32, i32) {
    %c0_i32 = arith.constant 0 : i32
    %c0_i32_0 = arith.constant 0 : i32
    %c0_i32_1 = arith.constant 0 : i32
    return %c0_i32, %c0_i32_0 : i32, i32
  }
  func.func @transform_4(%arg0: i32, %arg1: i32) -> (i32, i32) {
    %c0_i32 = arith.constant 0 : i32
    %c0_i32_0 = arith.constant 0 : i32
    %c0_i32_1 = arith.constant 0 : i32
    return %c0_i32, %c0_i32_0 : i32, i32
  }
  func.func @transform_5(%arg0: i32, %arg1: i32) -> (i32, i32) {
    %c0_i32 = arith.constant 0 : i32
    %c0_i32_0 = arith.constant 0 : i32
    %c0_i32_1 = arith.constant 0 : i32
    return %c0_i32, %c0_i32_0 : i32, i32
  }
  func.func @transform_6(%arg0: i32, %arg1: i32) -> (i32, i32) {
    %c0_i32 = arith.constant 0 : i32
    %c0_i32_0 = arith.constant 0 : i32
    %c0_i32_1 = arith.constant 0 : i32
    return %c0_i32, %c0_i32_0 : i32, i32
  }
  func.func @transform_7(%arg0: i32, %arg1: i32) -> (i32, i32) {
    %c0_i32 = arith.constant 0 : i32
    %c0_i32_0 = arith.constant 0 : i32
    %c0_i32_1 = arith.constant 0 : i32
    return %c0_i32, %c0_i32_0 : i32, i32
  }
  func.func @transform_8(%arg0: i32, %arg1: i32) -> (i32, i32) {
    %c0_i32 = arith.constant 0 : i32
    %c0_i32_0 = arith.constant 0 : i32
    %c0_i32_1 = arith.constant 0 : i32
    return %c0_i32, %c0_i32_0 : i32, i32
  }
  func.func @transform_9(%arg0: i32, %arg1: i32) -> (i32, i32) {
    %c0_i32 = arith.constant 0 : i32
    %c0_i32_0 = arith.constant 0 : i32
    %c0_i32_1 = arith.constant 0 : i32
    return %c0_i32, %c0_i32_0 : i32, i32
  }
  func.func @transform_10(%arg0: i32, %arg1: i32) -> (i32, i32) {
    %c0_i32 = arith.constant 0 : i32
    %c0_i32_0 = arith.constant 0 : i32
    %c0_i32_1 = arith.constant 0 : i32
    return %c0_i32, %c0_i32_0 : i32, i32
  }
  func.func @transform_11(%arg0: i32, %arg1: i32) -> (i32, i32) {
    %c0_i32 = arith.constant 0 : i32
    %c0_i32_0 = arith.constant 0 : i32
    %c0_i32_1 = arith.constant 0 : i32
    return %c0_i32, %c0_i32_0 : i32, i32
  }
  func.func @transform_12(%arg0: i32, %arg1: i32) -> (i32, i32) {
    %c0_i32 = arith.constant 0 : i32
    %c0_i32_0 = arith.constant 0 : i32
    %c0_i32_1 = arith.constant 0 : i32
    return %c0_i32, %c0_i32_0 : i32, i32
  }
  func.func @transform_13(%arg0: i32, %arg1: i32) -> (i32, i32) {
    %c0_i32 = arith.constant 0 : i32
    %c0_i32_0 = arith.constant 0 : i32
    %c0_i32_1 = arith.constant 0 : i32
    return %c0_i32, %c0_i32_0 : i32, i32
  }
  func.func @transform_14(%arg0: i32, %arg1: i32) -> (i32, i32) {
    %c0_i32 = arith.constant 0 : i32
    %c0_i32_0 = arith.constant 0 : i32
    %c0_i32_1 = arith.constant 0 : i32
    return %c0_i32, %c0_i32_0 : i32, i32
  }
  func.func @transform_15(%arg0: i32, %arg1: i32) -> (i32, i32) {
    %c0_i32 = arith.constant 0 : i32
    %c0_i32_0 = arith.constant 0 : i32
    %c0_i32_1 = arith.constant 0 : i32
    return %c0_i32, %c0_i32_0 : i32, i32
  }
  func.func @transform_16(%arg0: i32, %arg1: i32) -> (i32, i32) {
    %c0_i32 = arith.constant 0 : i32
    %c0_i32_0 = arith.constant 0 : i32
    %c0_i32_1 = arith.constant 0 : i32
    return %c0_i32, %c0_i32_0 : i32, i32
  }
  func.func @transform_17(%arg0: i32, %arg1: i32) -> (i32, i32) {
    %c0_i32 = arith.constant 0 : i32
    %c0_i32_0 = arith.constant 0 : i32
    %c0_i32_1 = arith.constant 0 : i32
    return %c0_i32, %c0_i32_0 : i32, i32
  }
  func.func @transform_18(%arg0: i32, %arg1: i32) -> (i32, i32) {
    %c0_i32 = arith.constant 0 : i32
    %c0_i32_0 = arith.constant 0 : i32
    %c0_i32_1 = arith.constant 0 : i32
    return %c0_i32, %c0_i32_0 : i32, i32
  }
  func.func @transform_19(%arg0: i32, %arg1: i32) -> (i32, i32) {
    %c0_i32 = arith.constant 0 : i32
    %c0_i32_0 = arith.constant 0 : i32
    %c0_i32_1 = arith.constant 0 : i32
    return %c0_i32, %c0_i32_0 : i32, i32
  }
  func.func @transform_20(%arg0: i32, %arg1: i32) -> (i32, i32) {
    %c0_i32 = arith.constant 0 : i32
    %c0_i32_0 = arith.constant 0 : i32
    %c0_i32_1 = arith.constant 0 : i32
    return %c0_i32, %c0_i32_0 : i32, i32
  }
  func.func @transform_21(%arg0: i32, %arg1: i32) -> (i32, i32) {
    %c0_i32 = arith.constant 0 : i32
    %c0_i32_0 = arith.constant 0 : i32
    %c0_i32_1 = arith.constant 0 : i32
    return %c0_i32, %c0_i32_0 : i32, i32
  }
  func.func @transform_22(%arg0: i32, %arg1: i32) -> (i32, i32) {
    %c0_i32 = arith.constant 0 : i32
    %c0_i32_0 = arith.constant 0 : i32
    %c0_i32_1 = arith.constant 0 : i32
    return %c0_i32, %c0_i32_0 : i32, i32
  }
  func.func @transform_23(%arg0: i32, %arg1: i32) -> (i32, i32) {
    %c0_i32 = arith.constant 0 : i32
    %c0_i32_0 = arith.constant 0 : i32
    %c0_i32_1 = arith.constant 0 : i32
    return %c0_i32, %c0_i32_0 : i32, i32
  }
  func.func @transform_24(%arg0: i32, %arg1: i32) -> (i32, i32, i32) {
    %c0_i32 = arith.constant 0 : i32
    %c0_i32_0 = arith.constant 0 : i32
    return %arg0, %arg1, %c0_i32 : i32, i32, i32
  }
}

</mosaic_0001>

<bundles_post_ra>
// kernel: tpu_custom_call.1
= control target key start
LH: loop header
LB: loop body
LE: loop exit
PB: predicated region body
PF: predicated region fallthrough
CT: control target
= control target key end

     0   :  { %s6687_s0 = inlined_call_operand.vmem [shape: f32[2,16,32], index: 0, kind: input, shape index: {}]   ;;  %s6688_s1 = inlined_call_operand.hbm [shape: f32[2,8,16], index: 1, kind: input, shape index: {}]   ;;  %s6689_s2 = inlined_call_operand.hbm [shape: f32[1,32], index: 2, kind: input, shape index: {}]   ;;  %s6690_s3 = inlined_call_operand.hbm [shape: f32[1,32], index: 3, kind: input, shape index: {}]   ;;  %s6691_s4 = inlined_call_operand.hbm [shape: f32[1,32], index: 4, kind: input, shape index: {}]   ;;  %s6692_s5 = inlined_call_operand.hbm [shape: f32[1,32], index: 5, kind: input, shape index: {}]   ;;  %s6693_s6 = inlined_call_operand.hbm [shape: f32[1,32], index: 6, kind: input, shape index: {}]   ;;  %s6694_s7 = inlined_call_operand.hbm [shape: f32[1,32], index: 7, kind: input, shape index: {}]   ;;  %s6695_s8 = inlined_call_operand.vmem [shape: f32[32,32], index: 8, kind: input, shape index: {}]   ;;  %s6696_s9 = inlined_call_operand.vmem [shape: f32[32,32], index: 9, kind: input, shape index: {}]   ;;  %s6697_s10 = inlined_call_operand.vmem [shape: f32[32,32], index: 10, kind: input, shape index: {}]   ;;  %s6698_s11 = inlined_call_operand.vmem [shape: f32[32,32], index: 11, kind: input, shape index: {}]   ;;  %s6699_s12 = inlined_call_operand.hbm [shape: f32[1,32], index: 12, kind: input, shape index: {}]   ;;  %s6700_s13 = inlined_call_operand.vmem [shape: f32[32,32], index: 13, kind: input, shape index: {}]   ;;  %s6701_s14 = inlined_call_operand.hbm [shape: f32[16,32], index: 14, kind: input, shape index: {}]   ;;  %s6702_s15 = inlined_call_operand.hbm [shape: f32[16,32], index: 15, kind: input, shape index: {}]   ;;  %s6703_s16 = inlined_call_operand.hbm [shape: f32[32,32], index: 16, kind: input, shape index: {}]   ;;  %s6704_s17 = inlined_call_operand.hbm [shape: f32[1,32], index: 17, kind: input, shape index: {}]   ;;  %s6705_s18 = inlined_call_operand.hbm [shape: f32[32,128], index: 18, kind: input, shape index: {}]   ;;  %s6706_s19 = inlined_call_operand.vmem [shape: f32[1,128], index: 19, kind: input, shape index: {}]   ;;  %s6707_s20 = inlined_call_operand.hbm [shape: f32[32,128], index: 20, kind: input, shape index: {}]   ;;  %s6708_s21 = inlined_call_operand.vmem [shape: f32[1,128], index: 21, kind: input, shape index: {}]   ;;  %s6709_s22 = inlined_call_operand.vmem [shape: f32[128,32], index: 22, kind: input, shape index: {}]   ;;  %s6710_s23 = inlined_call_operand.vmem [shape: f32[1,32], index: 23, kind: input, shape index: {}]   ;;  %s6711_s24 = inlined_call_operand.hbm [shape: f32[2,16,32], index: 24, kind: output, shape index: {}]  }
   0x1   :  { %6752 = sst [smem:[#allocation41_spill]] %s6687_s0 }
   0x2   :  { %6753 = sst [smem:[#allocation42_spill]] %s6688_s1 }
   0x3   :  { %6754 = sst [smem:[#allocation43_spill]] %s6689_s2 }
   0x4   :  { %6755 = sst [smem:[#allocation44_spill]] %s6690_s3 }
   0x5   :  { %6756 = sst [smem:[#allocation45_spill]] %s6691_s4 }
   0x6   :  { %6757 = sst [smem:[#allocation46_spill]] %s6692_s5 }
   0x7   :  { %6758 = sst [smem:[#allocation47_spill]] %s6693_s6 }
   0x8   :  { %6759 = sst [smem:[#allocation48_spill]] %s6694_s7 }
   0x9   :  { %6760 = sst [smem:[#allocation49_spill]] %s6695_s8 }
   0xa   :  { %6761 = sst [smem:[#allocation50_spill]] %s6696_s9 }
   0xb   :  { %6762 = sst [smem:[#allocation51_spill]] %s6697_s10 }
   0xc   :  { %6763 = sst [smem:[#allocation52_spill]] %s6698_s11 }
   0xd   :  { %6764 = sst [smem:[#allocation53_spill]] %s6699_s12 }
   0xe   :  { %6765 = sst [smem:[#allocation54_spill]] %s6700_s13 }
   0xf   :  { %6766 = sst [smem:[#allocation55_spill]] %s6701_s14 }
  0x10   :  { %6767 = sst [smem:[#allocation56_spill]] %s6702_s15 }
  0x11   :  { %6768 = sst [smem:[#allocation57_spill]] %s6703_s16 }
  0x12   :  { %6769 = sst [smem:[#allocation58_spill]] %s6704_s17 }
  0x13   :  { %6770 = sst [smem:[#allocation59_spill]] %s6706_s19 }
  0x14   :  { %6771 = sst [smem:[#allocation60_spill]] %s6708_s21 }
  0x15   :  { %6772 = sst [smem:[#allocation61_spill]] %s6709_s22 }
  0x16   :  { %6773 = sst [smem:[#allocation62_spill]] %s6710_s23 }
  0x17   :  { %6774 = sst [smem:[#allocation63_spill]] %s6711_s24 }
  0x18   :  { %29 = vsyncpa [#allocation9], 0 }
  0x19   :  { %31 = vsyncpa [#allocation9 + $0x1], 0 }
  0x1a   :  { %32 = vsyncpa [#allocation12], 0 }
  0x1b   :  { %33 = vsyncpa [#allocation15], 0 }
  0x1c   :  { %34 = vsyncpa [#allocation18], 0 }
  0x1d   :  { %35 = vsyncpa [#allocation21], 0 }
  0x1e   :  { %36 = vsyncpa [#allocation24], 0 }
  0x1f   :  { %37 = vsyncpa [#allocation27], 0 }
  0x20   :  { %38 = vsyncpa [#allocation30], 0 }
  0x21   :  { %39 = vsyncpa [#allocation10], 0 }
  0x22   :  { %41 = vsyncpa [#allocation10 + $0x1], 0  ;;  %s5716_s5 = smov 0   ;;  %s5718_s26 = smov 0  }
  0x23   :  { %s5720_s27 = smov 0   ;;  %s5722_s28 = smov 0  }
  0x24   :  { %s5724_s6 = smov 0   ;;  %s5726_s2 = smov 0  }
  0x25 LB: > { %s6720_s29 = sadd.s32 4294967295, %s5562_s2   ;;  %p4149_p0 = scmp.ge.s32.totalorder %s5562_s2, 1  ;;  %s5562_s2 = sphi %s5726_s2, %s47_s2   ;;  %s5558_s6 = sphi %s5724_s6, %s6827_s6   ;;  %s5554_s28 = sphi %s5722_s28, %s6826_s28   ;;  %s5550_s27 = sphi %s5720_s27, %s6825_s27   ;;  %s5546_s26 = sphi %s5718_s26, %s6824_s26   ;;  %s5542_s5 = sphi %s5716_s5, %s6823_s5  }
  0x26   : > { %p5750_p1 = scmp.eq.s32.totalorder %s6720_s29, 0  ;;  %p606_p2 = scmp.lt.s32.totalorder %s5562_s2, 3 }
  0x27   : > { %s5564_s30 = smov [#allocation11]   ;;  %s5565_s25 = smov [#allocation14]  }
  0x28   : > { %s6775_s0 = scalar_select %p5750_p1, 1, 0 }
  0x29   : > { %p5755_p3 = pnand %p4149_p0, %p606_p2  ;;  %s619_s3 = sshll.u32 %s5564_s30, 4  ;;  %s620_s3 = int_to_ptr.vmem [resolvable:$true] %s619_s3 }
  0x2a   : > { %s641_s8 = sshll.u32 %s5565_s25, 4  ;;  %s5566_s1 = smov [#allocation17]   ;;  %s5768_s8 = int_to_ptr.vmem [resolvable:$true] %s641_s8 }
  0x2b   : > { %s6776_s7 = scalar_select %p5755_p3, 1, 0 }
  0x2c   : > { %p4825_p5 = pneg %p5755_p3  ;;  %s663_s29 = sshll.u32 %s5566_s1, 4  ;;  %s5770_s29 = int_to_ptr.vmem [resolvable:$true] %s663_s29 }
  0x2d   : > { %s6778_s23 = sld [smem:[#allocation43_spill]] }
  0x2e   : > { %p5764_p6 = pnand %p4825_p5, %p5750_p1 }
  0x30   : > { %p5780_p8 = pneg %p5764_p6 }
  0x33   : > { %s5058_s19 = scalar_lea.hbm %s6778_s23, 16 }
  0x34   : > { %p5059_p7 = scmp.ne.s32.totalorder %s6778_s23, %s5058_s19  ;;  %p5065_p11 = scmp.lt.u32.totalorder %s5058_s19, %s6778_s23 }
  0x36   : > { %p5061_p9 = pnand %p5780_p8, %p5059_p7 }
  0x38   : > { %p5062_p10 = pneg %p5061_p9 }
  0x3a   : > { %p5067_p12 = pnand %p5065_p11, %p5062_p10 }
  0x3c   : > { %5070 = shalt.err (!%p5067_p12)
}
  0x3d   : > { %s5071_s24 = scalar_lea.vmem %s620_s3, 16  ;;  %s5078_s21 = scalar_lea.vmem %s620_s3, 32 }
  0x3e   : > { %p5072_p13 = scmp.ne.s32.totalorder %s620_s3, %s5071_s24  ;;  %p5079_p5 = scmp.lt.s32.totalorder %s620_s3, %s620_s3 }
  0x3f   : > { %p5080_p4 = scmp.lt.s32.totalorder %s5078_s21, %s5071_s24 }
  0x40   : > { %p5074_p0 = pnand %p5072_p13, %p5780_p8 }
  0x41   : > { %p5081_p3 = por %p5080_p4, %p5079_p5 }
  0x42   : > { %p5075_p2 = pneg %p5074_p0 }
  0x44   : > { %p5082_p1 = pnand %p5081_p3, %p5075_p2 }
  0x46   : > { %5085 = shalt.err (!%p5082_p1)
}
  0x47   : > { %4828 = dma.hbm_to_vmem [thread:$0]  (!%p5764_p6), %s6778_s23, 16, %s620_s3, [#allocation12]  }
  0x48   : > { %s6780_s1 = sld [smem:[#allocation45_spill]] }
  0x4e   : > { %s5086_s11 = scalar_lea.hbm %s6780_s1, 16 }
  0x4f   : > { %p5087_p7 = scmp.ne.s32.totalorder %s6780_s1, %s5086_s11  ;;  %p5093_p1 = scmp.lt.u32.totalorder %s5086_s11, %s6780_s1 }
  0x51   : > { %p5089_p9 = pnand %p5087_p7, %p5780_p8 }
  0x53   : > { %p5090_p4 = pneg %p5089_p9 }
  0x55   : > { %p5095_p3 = pnand %p5093_p1, %p5090_p4 }
  0x57   : > { %5098 = shalt.err (!%p5095_p3)
}
  0x58   : > { %s5099_s3 = scalar_lea.vmem %s5768_s8, 16  ;;  %s5106_s9 = scalar_lea.vmem %s5768_s8, 32 }
  0x59   : > { %p5100_p10 = scmp.ne.s32.totalorder %s5768_s8, %s5099_s3  ;;  %p5107_p13 = scmp.lt.s32.totalorder %s5768_s8, %s5768_s8 }
  0x5a   : > { %p5108_p0 = scmp.lt.s32.totalorder %s5106_s9, %s5099_s3 }
  0x5b   : > { %p5102_p11 = pnand %p5100_p10, %p5780_p8 }
  0x5c   : > { %p5109_p2 = por %p5108_p0, %p5107_p13 }
  0x5d   : > { %p5103_p12 = pneg %p5102_p11 }
  0x5f   : > { %p5110_p5 = pnand %p5109_p2, %p5103_p12 }
  0x61   : > { %5113 = shalt.err (!%p5110_p5)
}
  0x62   : > { %4834 = dma.hbm_to_vmem [thread:$0]  (!%p5764_p6), %s6780_s1, 16, %s5768_s8, [#allocation15]  }
  0x63   : > { %s6781_s13 = sld [smem:[#allocation47_spill]] }
  0x69   : > { %s5114_s19 = scalar_lea.hbm %s6781_s13, 16 }
  0x6a   : > { %p5115_p7 = scmp.ne.s32.totalorder %s6781_s13, %s5114_s19  ;;  %p5121_p1 = scmp.lt.u32.totalorder %s5114_s19, %s6781_s13 }
  0x6c   : > { %p5117_p9 = pnand %p5115_p7, %p5780_p8 }
  0x6e   : > { %p5118_p4 = pneg %p5117_p9 }
  0x70   : > { %p5123_p3 = pnand %p5121_p1, %p5118_p4 }
  0x72   : > { %5126 = shalt.err (!%p5123_p3)
}
  0x73   : > { %s5127_s8 = scalar_lea.vmem %s5770_s29, 16  ;;  %s5134_s10 = scalar_lea.vmem %s5770_s29, 32 }
  0x74   : > { %p5128_p10 = scmp.ne.s32.totalorder %s5770_s29, %s5127_s8  ;;  %p5135_p13 = scmp.lt.s32.totalorder %s5770_s29, %s5770_s29 }
  0x75   : > { %p5136_p0 = scmp.lt.s32.totalorder %s5134_s10, %s5127_s8 }
  0x76   : > { %p5130_p11 = pnand %p5128_p10, %p5780_p8 }
  0x77   : > { %p5137_p2 = por %p5136_p0, %p5135_p13 }
  0x78   : > { %p5131_p12 = pneg %p5130_p11 }
  0x7a   : > { %p5138_p5 = pnand %p5137_p2, %p5131_p12 }
  0x7c   : > { %5141 = shalt.err (!%p5138_p5)
}
  0x7d   : > { %4840 = dma.hbm_to_vmem [thread:$0]  (!%p5764_p6), %s6781_s13, 16, %s5770_s29, [#allocation18]  }
  0x7e   : > { %s5567_s30 = smov [#allocation20]   ;;  %s6782_s12 = sld [smem:[#allocation53_spill]] }
  0x7f   : > { %s697_s19 = sshll.u32 %s5567_s30, 4  ;;  %s698_s19 = int_to_ptr.vmem [resolvable:$true] %s697_s19 }
  0x84   : > { %s5142_s3 = scalar_lea.hbm %s6782_s12, 16 }
  0x85   : > { %p5143_p7 = scmp.ne.s32.totalorder %s6782_s12, %s5142_s3  ;;  %p5149_p1 = scmp.lt.u32.totalorder %s5142_s3, %s6782_s12 }
  0x87   : > { %p5145_p9 = pnand %p5143_p7, %p5780_p8 }
  0x89   : > { %p5146_p4 = pneg %p5145_p9 }
  0x8b   : > { %p5151_p3 = pnand %p5149_p1, %p5146_p4 }
  0x8d   : > { %5154 = shalt.err (!%p5151_p3)
}
  0x8e   : > { %s5155_s29 = scalar_lea.vmem %s698_s19, 16  ;;  %s5162_s11 = scalar_lea.vmem %s698_s19, 32 }
  0x8f   : > { %p5156_p10 = scmp.ne.s32.totalorder %s698_s19, %s5155_s29  ;;  %p5163_p13 = scmp.lt.s32.totalorder %s698_s19, %s698_s19 }
  0x90   : > { %p5164_p0 = scmp.lt.s32.totalorder %s5162_s11, %s5155_s29 }
  0x91   : > { %p5158_p11 = pnand %p5156_p10, %p5780_p8 }
  0x92   : > { %p5165_p2 = por %p5164_p0, %p5163_p13 }
  0x93   : > { %p5159_p12 = pneg %p5158_p11 }
  0x95   : > { %p5166_p5 = pnand %p5165_p2, %p5159_p12 }
  0x97   : > { %5169 = shalt.err (!%p5166_p5)
}
  0x98   : > { %4846 = dma.hbm_to_vmem [thread:$0]  (!%p5764_p6), %s6782_s12, 16, %s698_s19, [#allocation21]  }
  0x99   : > { %s5568_s1 = smov [#allocation23]   ;;  %s5569_s21 = smov [#allocation26]  }
  0x9a   : > { %s723_s24 = sshll.u32 %s5568_s1, 4  ;;  %s750_s3 = sshll.u32 %s5569_s21, 4  ;;  %s724_s24 = int_to_ptr.vmem [resolvable:$true] %s723_s24  ;;  %s5862_s3 = int_to_ptr.vmem [resolvable:$true] %s750_s3 }
  0x9b   : > { %s6783_s15 = sld [smem:[#allocation56_spill]] }
  0xa1   : > { %s5170_s10 = scalar_lea.hbm %s6783_s15, 256 }
  0xa2   : > { %p5171_p7 = scmp.ne.s32.totalorder %s6783_s15, %s5170_s10  ;;  %p5177_p1 = scmp.lt.u32.totalorder %s5170_s10, %s6783_s15 }
  0xa4   : > { %p5173_p9 = pnand %p5171_p7, %p5780_p8 }
  0xa6   : > { %p5174_p4 = pneg %p5173_p9 }
  0xa8   : > { %p5179_p3 = pnand %p5177_p1, %p5174_p4 }
  0xaa   : > { %5182 = shalt.err (!%p5179_p3)
}
  0xab   : > { %s5183_s30 = scalar_lea.vmem %s724_s24, 256  ;;  %p5191_p13 = scmp.lt.s32.totalorder %s724_s24, %s724_s24 }
  0xac   : > { %p5184_p10 = scmp.ne.s32.totalorder %s724_s24, %s5183_s30  ;;  %p5192_p0 = scmp.lt.s32.totalorder %s5183_s30, %s5183_s30 }
  0xae   : > { %p5186_p11 = pnand %p5184_p10, %p5780_p8  ;;  %p5193_p2 = por %p5192_p0, %p5191_p13 }
  0xb0   : > { %p5187_p12 = pneg %p5186_p11 }
  0xb2   : > { %p5194_p5 = pnand %p5193_p2, %p5187_p12 }
  0xb4   : > { %5197 = shalt.err (!%p5194_p5)
}
  0xb5   : > { %s6731_s1 = smov 128   ;;  %s6733_s21 = smov 8  }
  0xb6   : > { %4852 = dma.hbm_to_vmem [thread:$0]  (!%p5764_p6), %s6783_s15, 256, %s724_s24, [#allocation24], %s6731_s1, %s6731_s1, %s6733_s21  }
  0xb7   : > { %s6784_s17 = sld [smem:[#allocation58_spill]] }
  0xbd   : > { %s5198_s11 = scalar_lea.hbm %s6784_s17, 16 }
  0xbe   : > { %p5199_p7 = scmp.ne.s32.totalorder %s6784_s17, %s5198_s11  ;;  %p5205_p1 = scmp.lt.u32.totalorder %s5198_s11, %s6784_s17 }
  0xc0   : > { %p5201_p9 = pnand %p5199_p7, %p5780_p8 }
  0xc2   : > { %p5202_p4 = pneg %p5201_p9 }
  0xc4   : > { %p5207_p3 = pnand %p5205_p1, %p5202_p4 }
  0xc6   : > { %5210 = shalt.err (!%p5207_p3)
}
  0xc7   : > { %s5211_s24 = scalar_lea.vmem %s5862_s3, 16  ;;  %s5218_s9 = scalar_lea.vmem %s5862_s3, 32 }
  0xc8   : > { %p5212_p10 = scmp.ne.s32.totalorder %s5862_s3, %s5211_s24  ;;  %p5219_p13 = scmp.lt.s32.totalorder %s5862_s3, %s5862_s3 }
  0xc9   : > { %p5220_p0 = scmp.lt.s32.totalorder %s5218_s9, %s5211_s24 }
  0xca   : > { %p5214_p11 = pnand %p5212_p10, %p5780_p8 }
  0xcb   : > { %p5221_p2 = por %p5220_p0, %p5219_p13 }
  0xcc   : > { %p5215_p12 = pneg %p5214_p11 }
  0xce   : > { %p5222_p5 = pnand %p5221_p2, %p5215_p12 }
  0xd0   : > { %5225 = shalt.err (!%p5222_p5)
}
  0xd1   : > { %4858 = dma.hbm_to_vmem [thread:$0]  (!%p5764_p6), %s6784_s17, 16, %s5862_s3, [#allocation27]  }
  0xd2   : > { %s5572_s10 = smov [#allocation13]   ;;  %s5573_s11 = smov [#allocation16]  }
  0xd3   : > { %s630_s29 = sshll.u32 %s5572_s10, 4  ;;  %s652_s22 = sshll.u32 %s5573_s11, 4  ;;  %s631_s29 = int_to_ptr.vmem [resolvable:$true] %s630_s29  ;;  %s5909_s22 = int_to_ptr.vmem [resolvable:$true] %s652_s22 }
  0xd4   : > { %s6785_s24 = sld [smem:[#allocation44_spill]] }
  0xda   : > { %s5226_s9 = scalar_lea.hbm %s6785_s24, 16 }
  0xdb   : > { %p5227_p7 = scmp.ne.s32.totalorder %s6785_s24, %s5226_s9  ;;  %p5233_p1 = scmp.lt.u32.totalorder %s5226_s9, %s6785_s24 }
  0xdd   : > { %p5229_p9 = pnand %p5227_p7, %p5780_p8 }
  0xdf   : > { %p5230_p4 = pneg %p5229_p9 }
  0xe1   : > { %p5235_p3 = pnand %p5233_p1, %p5230_p4 }
  0xe3   : > { %5238 = shalt.err (!%p5235_p3)
}
  0xe4   : > { %s5239_s8 = scalar_lea.vmem %s631_s29, 16  ;;  %s5246_s10 = scalar_lea.vmem %s631_s29, 32 }
  0xe5   : > { %p5240_p10 = scmp.ne.s32.totalorder %s631_s29, %s5239_s8  ;;  %p5247_p13 = scmp.lt.s32.totalorder %s631_s29, %s631_s29 }
  0xe6   : > { %p5248_p0 = scmp.lt.s32.totalorder %s5246_s10, %s5239_s8 }
  0xe7   : > { %p5242_p11 = pnand %p5240_p10, %p5780_p8 }
  0xe8   : > { %p5249_p2 = por %p5248_p0, %p5247_p13 }
  0xe9   : > { %p5243_p12 = pneg %p5242_p11 }
  0xeb   : > { %p5250_p5 = pnand %p5249_p2, %p5243_p12 }
  0xed   : > { %5253 = shalt.err (!%p5250_p5)
}
  0xee   : > { %4831 = dma.hbm_to_vmem [thread:$0]  (!%p5764_p6), %s6785_s24, 16, %s631_s29, [#allocation12]  }
  0xef   : > { %s6786_s30 = sld [smem:[#allocation46_spill]] }
  0xf5   : > { %s5254_s9 = scalar_lea.hbm %s6786_s30, 16 }
  0xf6   : > { %p5255_p7 = scmp.ne.s32.totalorder %s6786_s30, %s5254_s9  ;;  %p5261_p1 = scmp.lt.u32.totalorder %s5254_s9, %s6786_s30 }
  0xf8   : > { %p5257_p9 = pnand %p5255_p7, %p5780_p8 }
  0xfa   : > { %p5258_p4 = pneg %p5257_p9 }
  0xfc   : > { %p5263_p3 = pnand %p5261_p1, %p5258_p4 }
  0xfe   : > { %5266 = shalt.err (!%p5263_p3)
}
  0xff   : > { %s5267_s29 = scalar_lea.vmem %s5909_s22, 16  ;;  %s5274_s1 = scalar_lea.vmem %s5909_s22, 32 }
 0x100   : > { %p5268_p10 = scmp.ne.s32.totalorder %s5909_s22, %s5267_s29  ;;  %p5275_p13 = scmp.lt.s32.totalorder %s5909_s22, %s5909_s22 }
 0x101   : > { %p5276_p0 = scmp.lt.s32.totalorder %s5274_s1, %s5267_s29 }
 0x102   : > { %p5270_p11 = pnand %p5268_p10, %p5780_p8 }
 0x103   : > { %p5277_p2 = por %p5276_p0, %p5275_p13 }
 0x104   : > { %p5271_p12 = pneg %p5270_p11 }
 0x106   : > { %p5278_p5 = pnand %p5277_p2, %p5271_p12 }
 0x108   : > { %5281 = shalt.err (!%p5278_p5)
}
 0x109   : > { %4837 = dma.hbm_to_vmem [thread:$0]  (!%p5764_p6), %s6786_s30, 16, %s5909_s22, [#allocation15]  }
 0x10a   : > { %s5574_s19 = smov [#allocation19]   ;;  %s5575_s12 = smov [#allocation22]  }
 0x10b   : > { %s674_s9 = sshll.u32 %s5574_s19, 4  ;;  %s710_s3 = sshll.u32 %s5575_s12, 4  ;;  %s675_s9 = int_to_ptr.vmem [resolvable:$true] %s674_s9  ;;  %s5953_s3 = int_to_ptr.vmem [resolvable:$true] %s710_s3 }
 0x10c   : > { %s6787_s29 = sld [smem:[#allocation48_spill]] }
 0x112   : > { %s5282_s1 = scalar_lea.hbm %s6787_s29, 16 }
 0x113   : > { %p5283_p7 = scmp.ne.s32.totalorder %s6787_s29, %s5282_s1  ;;  %p5289_p1 = scmp.lt.u32.totalorder %s5282_s1, %s6787_s29 }
 0x115   : > { %p5285_p9 = pnand %p5283_p7, %p5780_p8 }
 0x117   : > { %p5286_p4 = pneg %p5285_p9 }
 0x119   : > { %p5291_p3 = pnand %p5289_p1, %p5286_p4 }
 0x11b   : > { %5294 = shalt.err (!%p5291_p3)
}
 0x11c   : > { %s5295_s11 = scalar_lea.vmem %s675_s9, 16  ;;  %s5302_s19 = scalar_lea.vmem %s675_s9, 32 }
 0x11d   : > { %p5296_p10 = scmp.ne.s32.totalorder %s675_s9, %s5295_s11  ;;  %p5303_p13 = scmp.lt.s32.totalorder %s675_s9, %s675_s9 }
 0x11e   : > { %p5304_p0 = scmp.lt.s32.totalorder %s5302_s19, %s5295_s11 }
 0x11f   : > { %p5298_p11 = pnand %p5296_p10, %p5780_p8 }
 0x120   : > { %p5305_p2 = por %p5304_p0, %p5303_p13 }
 0x121   : > { %p5299_p12 = pneg %p5298_p11 }
 0x123   : > { %p5306_p5 = pnand %p5305_p2, %p5299_p12 }
 0x125   : > { %5309 = shalt.err (!%p5306_p5)
}
 0x126   : > { %4843 = dma.hbm_to_vmem [thread:$0]  (!%p5764_p6), %s6787_s29, 16, %s675_s9, [#allocation18]  }
 0x127   : > { %s6788_s14 = sld [smem:[#allocation55_spill]] }
 0x12d   : > { %s5310_s10 = scalar_lea.hbm %s6788_s14, 256 }
 0x12e   : > { %p5311_p7 = scmp.ne.s32.totalorder %s6788_s14, %s5310_s10  ;;  %p5317_p1 = scmp.lt.u32.totalorder %s5310_s10, %s6788_s14 }
 0x130   : > { %p5313_p9 = pnand %p5311_p7, %p5780_p8 }
 0x132   : > { %p5314_p4 = pneg %p5313_p9 }
 0x134   : > { %p5319_p3 = pnand %p5317_p1, %p5314_p4 }
 0x136   : > { %5322 = shalt.err (!%p5319_p3)
}
 0x137   : > { %s5323_s9 = scalar_lea.vmem %s5953_s3, 256  ;;  %p5331_p13 = scmp.lt.s32.totalorder %s5953_s3, %s5953_s3 }
 0x138   : > { %p5324_p10 = scmp.ne.s32.totalorder %s5953_s3, %s5323_s9  ;;  %p5332_p0 = scmp.lt.s32.totalorder %s5323_s9, %s5323_s9 }
 0x13a   : > { %p5326_p11 = pnand %p5324_p10, %p5780_p8  ;;  %p5333_p2 = por %p5332_p0, %p5331_p13 }
 0x13c   : > { %p5327_p12 = pneg %p5326_p11 }
 0x13e   : > { %p5334_p5 = pnand %p5333_p2, %p5327_p12 }
 0x140   : > { %5337 = shalt.err (!%p5334_p5)
}
 0x141   : > { %s6789_s19 = smov 8   ;;  %s6790_s15 = smov 128  }
 0x142   : > { %4849 = dma.hbm_to_vmem [thread:$0]  (!%p5764_p6), %s6788_s14, 256, %s5953_s3, [#allocation21], %s6790_s15, %s6790_s15, %s6789_s19  }
 0x143   : > { %s5576_s8 = smov [#allocation25]   ;;  %s5577_s1 = smov [#allocation28]  }
 0x144   : > { %s736_s10 = sshll.u32 %s5576_s8, 4  ;;  %s760_s21 = sshll.u32 %s5577_s1, 4  ;;  %s737_s10 = int_to_ptr.vmem [resolvable:$true] %s736_s10  ;;  %s5999_s21 = int_to_ptr.vmem [resolvable:$true] %s760_s21 }
 0x145   : > { %s6791_s16 = sld [smem:[#allocation57_spill]] }
 0x14b   : > { %s5338_s9 = scalar_lea.hbm %s6791_s16, 512 }
 0x14c   : > { %p5339_p7 = scmp.ne.s32.totalorder %s6791_s16, %s5338_s9  ;;  %p5345_p1 = scmp.lt.u32.totalorder %s5338_s9, %s6791_s16 }
 0x14e   : > { %p5341_p9 = pnand %p5339_p7, %p5780_p8 }
 0x150   : > { %p5342_p4 = pneg %p5341_p9 }
 0x152   : > { %p5347_p3 = pnand %p5345_p1, %p5342_p4 }
 0x154   : > { %5350 = shalt.err (!%p5347_p3)
}
 0x155   : > { %s5351_s12 = scalar_lea.vmem %s737_s10, 512  ;;  %p5359_p13 = scmp.lt.s32.totalorder %s737_s10, %s737_s10 }
 0x156   : > { %p5352_p10 = scmp.ne.s32.totalorder %s737_s10, %s5351_s12  ;;  %p5360_p0 = scmp.lt.s32.totalorder %s5351_s12, %s5351_s12 }
 0x158   : > { %p5354_p11 = pnand %p5352_p10, %p5780_p8  ;;  %p5361_p2 = por %p5360_p0, %p5359_p13 }
 0x15a   : > { %p5355_p12 = pneg %p5354_p11 }
 0x15c   : > { %p5362_p5 = pnand %p5361_p2, %p5355_p12 }
 0x15e   : > { %5365 = shalt.err (!%p5362_p5)
}
 0x15f   : > { %4855 = dma.hbm_to_vmem [thread:$0]  (!%p5764_p6), %s6791_s16, 512, %s737_s10, [#allocation24], %s6790_s15, %s6790_s15, %s6789_s19  }
 0x160   : > { %s5366_s22 = scalar_lea.hbm %s6705_s18, 512 }
 0x161   : > { %p5367_p7 = scmp.ne.s32.totalorder %s6705_s18, %s5366_s22  ;;  %p5373_p1 = scmp.lt.u32.totalorder %s5366_s22, %s6705_s18 }
 0x163   : > { %p5369_p9 = pnand %p5367_p7, %p5780_p8 }
 0x165   : > { %p5370_p4 = pneg %p5369_p9 }
 0x167   : > { %p5375_p3 = pnand %p5373_p1, %p5370_p4 }
 0x169   : > { %5378 = shalt.err (!%p5375_p3)
}
 0x16a   : > { %s5379_s10 = scalar_lea.vmem %s5999_s21, 512  ;;  %p5387_p13 = scmp.lt.s32.totalorder %s5999_s21, %s5999_s21 }
 0x16b   : > { %p5380_p10 = scmp.ne.s32.totalorder %s5999_s21, %s5379_s10  ;;  %p5388_p0 = scmp.lt.s32.totalorder %s5379_s10, %s5379_s10 }
 0x16d   : > { %p5382_p11 = pnand %p5380_p10, %p5780_p8  ;;  %p5389_p2 = por %p5388_p0, %p5387_p13 }
 0x16f   : > { %p5383_p12 = pneg %p5382_p11 }
 0x171   : > { %p5390_p5 = pnand %p5389_p2, %p5383_p12 }
 0x173   : > { %5393 = shalt.err (!%p5390_p5)
}
 0x174   : > { %4861 = dma.hbm_to_vmem [thread:$0]  (!%p5764_p6), %s6705_s18, 512, %s5999_s21, [#allocation27], %s6790_s15, %s6790_s15, %s6789_s19  }
 0x175   : > { %s5578_s23 = smov [#allocation29]   ;;  %s5394_s11 = scalar_lea.hbm %s6707_s20, 512 }
 0x176   : > { %s776_s8 = sshll.u32 %s5578_s23, 4  ;;  %p5395_p7 = scmp.ne.s32.totalorder %s6707_s20, %s5394_s11  ;;  %s777_s8 = int_to_ptr.vmem [resolvable:$true] %s776_s8 }
 0x177   : > { %p5401_p1 = scmp.lt.u32.totalorder %s5394_s11, %s6707_s20 }
 0x178   : > { %p5397_p9 = pnand %p5395_p7, %p5780_p8 }
 0x17a   : > { %p5398_p4 = pneg %p5397_p9 }
 0x17c   : > { %p5403_p3 = pnand %p5401_p1, %p5398_p4 }
 0x17e   : > { %5406 = shalt.err (!%p5403_p3)
}
 0x17f   : > { %s5407_s21 = scalar_lea.vmem %s777_s8, 512  ;;  %p5415_p13 = scmp.lt.s32.totalorder %s777_s8, %s777_s8 }
 0x180   : > { %p5408_p10 = scmp.ne.s32.totalorder %s777_s8, %s5407_s21  ;;  %p5416_p0 = scmp.lt.s32.totalorder %s5407_s21, %s5407_s21 }
 0x182   : > { %p5410_p11 = pnand %p5408_p10, %p5780_p8  ;;  %p5417_p2 = por %p5416_p0, %p5415_p13 }
 0x184   : > { %p5411_p12 = pneg %p5410_p11 }
 0x186   : > { %p5418_p5 = pnand %p5417_p2, %p5411_p12 }
 0x188   : > { %5421 = shalt.err (!%p5418_p5)
}
 0x189   : > { %4864 = dma.hbm_to_vmem [thread:$0]  (!%p5764_p6), %s6707_s20, 512, %s777_s8, [#allocation30], %s6790_s15, %s6790_s15, %s6789_s19  }
 0x18a   : > { %s4148_s4 = sadd.s32 4294967294, %s5562_s2   ;;  %s59_s25 = sadd.s32 1, %s5558_s6 }
 0x18b   : > { %s92_s23 = sadd.s32 1, %s5550_s27  ;;  %p61_p8 = scmp.ge.s32.totalorder %s59_s25, 2 }
 0x18c   : > { %p99_p7 = scmp.ne.s32.totalorder %s5550_s27, %s5546_s26  ;;  %p100_p9 = scmp.eq.s32.totalorder %s5562_s2, 0 }
 0x18d   : > { %p105_p4 = scmp.ne.s32.totalorder %s5546_s26, %s5542_s5  ;;  %s6829_s25 = smov (%p61_p8, %s59_s25), 0 }
 0x18e   : > { %p6079_p1 = por %p100_p9, %p99_p7  ;;  %p6793_p3 = scmp.ne.s32.totalorder %s6775_s0, 0 }
 0x18f   : > { %s89_s15 = ssub.s32 %s5558_s6, %s6829_s25  ;;  %s6795_s8 = sadd.s32 4294967295, %s5562_s2  }
 0x190   : > { %p6085_p6 = por %p6793_p3, %p105_p4  ;;  %p593_p10 = scmp.eq.s32.totalorder %s6795_s8, 1 }
 0x191   : > { %p90_p11 = scmp.eq.s32.totalorder %s89_s15, 0  ;;  %p599_p12 = scmp.eq.s32.totalorder %s4148_s4, 1 }
 0x192   : > { %p6093_p13 = por %p593_p10, %p99_p7  ;;  %p4886_p0 = scmp.lt.s32.totalorder %s5562_s2, 2 }
 0x193   : > { %s6099_s11 = scalar_select %p90_p11, %s5550_s27, %s92_s23  }
 0x194   : > { %s6796_s22 = scalar_select %p6093_p13, 1, 0 }
 0x195   : > { %p6101_p2 = por %p599_p12, %p105_p4  ;;  %s807_s13 = sand.u32 1, %s5550_s27  }
 0x196   : > { %s4164_s3 = sshll.u32 %s807_s13, 3  ;;  %s4165_s10 = sshll.u32 %s5558_s6, 7 }
 0x197   : > { %s6797_s9 = scalar_select %p6101_p2, 1, 0 }
 0x198   : > { %s6798_s17 = sld [smem:[#allocation42_spill]]  ;;  %s811_s4 = scalar_lea.vmem [#allocation8], %s4164_s3 }
 0x199   : > { %s818_s15 = sshll.u32 %s811_s4, 4  ;;  %p6116_p5 = pnand %p4886_p0, %p6079_p1  ;;  %s6112_s15 = int_to_ptr.vmem [resolvable:$true] %s818_s15 }
 0x19a   : > { %s808_s14 = scalar_lea.sflag [#allocation9], %s807_s13 }
 0x19b   : > { %p5424_p7 = pneg %p6116_p5 }
 0x19e   : > { %s6110_s8 = scalar_lea.hbm %s6798_s17, %s4165_s10  ;;  %s5427_s21 = scalar_lea.hbm %s6798_s17, 256 }
 0x19f   : > { %s5422_s16 = scalar_lea.hbm %s6110_s8, 128  ;;  %p5428_p1 = scmp.lt.u32.totalorder %s6110_s8, %s6798_s17 }
 0x1a0   : > { %p5423_p8 = scmp.ne.s32.totalorder %s6110_s8, %s5422_s16  ;;  %p5429_p3 = scmp.lt.u32.totalorder %s5427_s21, %s5422_s16 }
 0x1a1   : > { %p5431_p11 = scmp.lt.u32.totalorder %s5422_s16, %s6110_s8 }
 0x1a2   : > { %p5425_p9 = pnand %p5424_p7, %p5423_p8  ;;  %p5430_p10 = por %p5429_p3, %p5428_p1 }
 0x1a4   : > { %p5426_p4 = pneg %p5425_p9  ;;  %p5432_p12 = por %p5431_p11, %p5430_p10 }
 0x1a6   : > { %p5433_p0 = pnand %p5432_p12, %p5426_p4 }
 0x1a8   : > { %5436 = shalt.err (!%p5433_p0)
}
 0x1a9   : > { %s5437_s13 = scalar_lea.vmem %s6112_s15, 128  ;;  %s5579_s4 = smov [#allocation8]  }
 0x1aa   : > { %p5438_p8 = scmp.ne.s32.totalorder %s6112_s15, %s5437_s13  ;;  %s5442_s3 = sshll.u32 %s5579_s4, 4  ;;  %s5443_s3 = int_to_ptr.vmem [resolvable:$false] %s5442_s3 }
 0x1ab   : > { %s5444_s10 = scalar_lea.vmem %s5443_s3, 256  ;;  %p5445_p13 = scmp.lt.s32.totalorder %s6112_s15, %s5443_s3 }
 0x1ac   : > { %p5440_p9 = pnand %p5438_p8, %p5424_p7  ;;  %p5446_p1 = scmp.lt.s32.totalorder %s5444_s10, %s5437_s13 }
 0x1ae   : > { %p5441_p2 = pneg %p5440_p9  ;;  %p5447_p3 = por %p5446_p1, %p5445_p13 }
 0x1b0   : > { %p5448_p10 = pnand %p5447_p3, %p5441_p2 }
 0x1b2   : > { %5451 = shalt.err (!%p5448_p10)
}
 0x1b3   : > { %4868 = dma.hbm_to_vmem [thread:$0]  (!%p6116_p5), %s6110_s8, 128, %s6112_s15, %s808_s14  }
 0x1b4   : > { %p6800_p4 = scmp.ne.s32.totalorder %s6776_s7, 0 }
 0x1b5   : > { %s6148_s16 = sand.u32 (!%p6800_p4), 1, %s5546_s26  }
 0x1b6   : > { %827 = sbr.rel (%p6800_p4) target bundleno = 4355 (0x1103), region = 116  ;;  %s4167_s21 = sshll.u32 (!%p6800_p4), %s6148_s16, 3 }
 0x1b7   : > { %s830_s1 = scalar_lea.sflag (!%p6800_p4), [#allocation9], %s6148_s16  ;;  %s6152_s12 = scalar_lea.vmem (!%p6800_p4), [#allocation8], %s4167_s21 }
 0x1bd   : > { %5505 = dma.done.wait (%p6085_p6), %s830_s1, 128  }
 0x1be   : > { %5507 = vsyncadd (%p6085_p6), %s830_s1, 4294967168  ;;  %p6801_p13 = scmp.ne.s32.totalorder %s6775_s0, 0 }
 0x1c0   : > { %5509 = dma.done.wait (%p6801_p13), [#allocation12], 32  }
 0x1c1   : > { %5511 = vsyncadd (%p6801_p13), [#allocation12], 4294967264 }
 0x1c2   : > { %5513 = dma.done.wait (%p6801_p13), [#allocation15], 32  }
 0x1c3   : > { %5515 = vsyncadd (%p6801_p13), [#allocation15], 4294967264 }
 0x1c4   : > { %5517 = dma.done.wait (%p6801_p13), [#allocation18], 32  }
 0x1c5   : > { %5519 = vsyncadd (%p6801_p13), [#allocation18], 4294967264 }
 0x1c6   : > { %5521 = dma.done.wait (%p6801_p13), [#allocation21], 272  }
 0x1c7   : > { %5523 = vsyncadd (%p6801_p13), [#allocation21], 4294967024 }
 0x1c8   : > { %5525 = dma.done.wait (%p6801_p13), [#allocation24], 768  }
 0x1c9   : > { %5527 = vsyncadd (%p6801_p13), [#allocation24], 4294966528 }
 0x1ca   : > { %5529 = dma.done.wait (%p6801_p13), [#allocation27], 528  }
 0x1cb   : > { %5531 = vsyncadd (%p6801_p13), [#allocation27], 4294966768 }
 0x1cc   : > { %5533 = dma.done.wait (%p6801_p13), [#allocation30], 512  }
 0x1cd   : > { %5535 = vsyncadd (%p6801_p13), [#allocation30], 4294966784  ;;  %p955_p6 = scmp.lt.s32.totalorder %s5554_s28, 1  ;;  %s6802_s15 = sld [smem:[#allocation41_spill]]  ;;  %vm967_vm0 = vcmask 261120   ;;  %v1244_v60 = vld [vmem:[#allocation22] sm:$0xff] }
 0x1ce   : > { %s6803_s4 = sld [smem:[#allocation50_spill]]  ;;  %v4184_v44 = vld [vmem:[#allocation11] ss:$0 sm:$0xff]  ;;  %v4185_v47 = vld [vmem:[#allocation13] ss:$0 sm:$0xff]  ;;  %v1245_v61 = vld [vmem:[#allocation22 + $0x8] sm:$0xff] }
 0x1cf   : > { %s956_s14 = scalar_select %p955_p6, %s5554_s28, 1  ;;  %vm5581_vm1 = vmmov 0   ;;  %vm1246_vm2 = vcmask 130048   ;;  %vm1101_vm3 = vcmask 64512   ;;  %vm2393_vm5 = vcmask 130112  }
 0x1d0   : > { %s5584_s10 = smov 112   ;;  %s6747_s21 = smov 104   ;;  %vm6274_vm4 = vmpackc.low %vm1101_vm3, %vm1101_vm3  ;;  %vm2404_vm6 = vcmask 195712   ;;  %vm2415_vm7 = vcmask 261312  }
 0x1d1   : > { %s4264_s7 = sshll.u32 %s956_s14, 4  ;;  %s6808_s19 = sld [smem:[#allocation52_spill]] }
 0x1d2   : > { %s6742_s14 = smov 8   ;;  %s6740_s8 = smov 16  }
 0x1d3   : > { %s959_s23 = scalar_lea.vmem %s6802_s15, %s4264_s7  ;;  %s6804_s15 = sld [smem:[#allocation51_spill]] }
 0x1d4   : > { %v6191_v0 = vld [vmem:[%s959_s23] sm:$0xff]  ;;  %v6193_v1 = vld [vmem:[%s959_s23 + $0x8] sm:$0xff]  ;;  %v1018_v11 = vld [vmem:[%s6803_s4 + $0x10] sm:$0xff]  ;;  %s6805_s7 = sld [smem:[#allocation49_spill]]  ;;  %s6738_s23 = smov 24  }
 0x1d5   : > { %v968_v2 = vsel %vm967_vm0, %v6191_v0, 0.0  ;;  %v974_v3 = vmul.f32 %v6191_v0, %v6191_v0  ;;  %v975_v4 = vmul.f32 %v6193_v1, %v6193_v1  ;;  %v971_v6 = vsel %vm967_vm0, %v6193_v1, 0.0  ;;  %v1016_v8 = vld [vmem:[%s6803_s4] sm:$0xff]  ;;  %v1017_v9 = vld [vmem:[%s6803_s4 + $0x8] sm:$0xff]  ;;  %v1019_v12 = vld [vmem:[%s6803_s4 + $0x18] sm:$0xff]  ;;  %s6809_s3 = sld [smem:[#allocation54_spill]] }
 0x1d6   : > { %969 = vadd.xlane.f32.xlu0 %v968_v2  ;;  %v4627_v10 = vpack.c.bf16 %v1017_v9, %v1016_v8  ;;  %v4631_v13 = vpack.c.bf16 %v1019_v12, %v1018_v11  ;;  %v5582_v9 = vmov 0.0   ;;  %s6811_s4 = smov 104   ;;  %s6817_s1 = sld [smem:[#allocation59_spill]] }
 0x1d7   : > { %v976_v5 = vsel %vm967_vm0, %v974_v3, 0.0  ;;  %v979_v7 = vsel %vm967_vm0, %v975_v4, 0.0  ;;  %v5580_v3 = vmov 0.0|0.0   ;;  %v1337_v4 = vld [vmem:[#allocation23] sm:$0xff]  ;;  %p6820_p5 = scmp.ne.s32.totalorder %s6796_s22, 0 }
 0x1d8   : > { %977 = vadd.xlane.f32.xlu1 %v976_v5  ;;  %4628 = vmatprep.subr.bf16.mxu0 %v4627_v10 }
 0x1d9   : > { %4630 = vmatpush3.bf16.msra.mxu0 %v4627_v10  ;;  %v1133_v14 = vld [vmem:[%s6804_s15] sm:$0xff]  ;;  %v1134_v15 = vld [vmem:[%s6804_s15 + $0x8] sm:$0xff]  ;;  %v1135_v54 = vld [vmem:[%s6804_s15 + $0x10] sm:$0xff] }
 0x1da   : > { %972 = vadd.xlane.f32.xlu0 %v971_v6  ;;  %4632 = vmatprep.subr.bf16.mxu0 %v4631_v13  ;;  %v4635_v16 = vpack.c.bf16 %v1134_v15, %v1133_v14  ;;  %v1136_v55 = vld [vmem:[%s6804_s15 + $0x18] sm:$0xff]  ;;  %v1481_v15 = vld [vmem:[%s6805_s7 + $0x10] sm:$0xff] }
 0x1db   : > { %v4639_v59 = vpack.c.bf16 %v1136_v55, %v1135_v54  ;;  %v1243_v10 = vld [vmem:[%s6152_s12] sm:$0xff]  ;;  %s6744_s12 = smov 120  }
 0x1dc   : > { %980 = vadd.xlane.f32.xlu1 %v979_v7 }
 0x1dd   : > { %4634 = vmatpush3.bf16.msra.mxu0 %v4631_v13 }
 0x1de   : > { %1432 = vadd.xlane.f32.xlu0 %v968_v2  ;;  %4636 = vmatprep.subr.bf16.mxu0 %v4635_v16  ;;  %v4644_v2 = vpack.c.bf16 %v1245_v61, %v1244_v60 }
 0x1e0   : > { %1435 = vadd.xlane.f32.xlu1 %v971_v6  ;;  %v1479_v6 = vld [vmem:[%s6805_s7] sm:$0xff] }
 0x1e2   : > { %1440 = vadd.xlane.f32.xlu0 %v976_v5  ;;  %v1338_v5 = vld [vmem:[#allocation23 + $0x8] sm:$0xff] }
 0x1e3   : > { %v4647_v11 = vpack.c.bf16 %v1338_v5, %v1337_v4 }
 0x1e4   : > { %1443 = vadd.xlane.f32.xlu1 %v979_v7  ;;  %v1480_v7 = vld [vmem:[%s6805_s7 + $0x8] sm:$0xff] }
 0x1e5   : > { %v4649_v12 = vpack.c.bf16 %v1480_v7, %v1479_v6 }
 0x263   : > { %v970_v17 = vpop.xlane.xlu0 %969 }
 0x264   : > { %v982_v18 = vmul.f32 0.03125, %v970_v17 }
 0x265   : > { %v978_v19 = vpop.xlane.xlu1 %977 }
 0x266   : > { %v986_v20 = vmul.f32 %v982_v18, %v982_v18  ;;  %v984_v21 = vmul.f32 0.03125, %v978_v19  ;;  %v990_v40 = vsub.f32 %v6191_v0, %v982_v18 }
 0x267   : > { %v973_v22 = vpop.xlane.xlu0 %972 }
 0x268   : > { %v988_v23 = vsub.f32 %v984_v21, %v986_v20  ;;  %v983_v24 = vmul.f32 0.03125, %v973_v22 }
 0x269   : > { %v981_v25 = vpop.xlane.xlu1 %980 }
 0x26a   : > { %v992_v26 = vadd.f32 1e-05, %v988_v23  ;;  %v987_v27 = vmul.f32 %v983_v24, %v983_v24  ;;  %v985_v28 = vmul.f32 0.03125, %v981_v25  ;;  %v991_v48 = vsub.f32 %v6193_v1, %v983_v24 }
 0x26b   : > { %v1433_v29 = vpop.xlane.xlu0 %1432 }
 0x26c   : > { %4974 = vrsqrt.f32 %v992_v26  ;;  %v989_v30 = vsub.f32 %v985_v28, %v987_v27  ;;  %v1445_v31 = vmul.f32 0.03125, %v1433_v29 }
 0x26d   : > { %v1436_v32 = vpop.xlane.xlu1 %1435 }
 0x26e   : > { %v993_v33 = vadd.f32 1e-05, %v989_v30  ;;  %v1449_v34 = vmul.f32 %v1445_v31, %v1445_v31  ;;  %v6223_v37 = vmul.f32 0.03125, %v1436_v32  ;;  %v1453_v62 = vsub.f32 %v6191_v0, %v1445_v31 }
 0x26f   : > { %v1441_v35 = vpop.xlane.xlu0 %1440 }
 0x270   : > { %4976 = vrsqrt.f32 %v993_v33  ;;  %v1447_v36 = vmul.f32 0.03125, %v1441_v35  ;;  %v1450_v42 = vmul.f32 %v6223_v37, %v6223_v37  ;;  %v1454_v17 = vsub.f32 %v6193_v1, %v6223_v37 }
 0x271   : > { %v1444_v39 = vpop.xlane.xlu1 %1443 }
 0x272   : > { %v1451_v38 = vsub.f32 %v1447_v36, %v1449_v34  ;;  %v1448_v43 = vmul.f32 0.03125, %v1444_v39 }
 0x274   : > { %v1455_v45 = vadd.f32 1e-05, %v1451_v38  ;;  %v1452_v51 = vsub.f32 %v1448_v43, %v1450_v42 }
 0x276   : > { %v4975_v41 = vpop.eup %4974  ;;  %4978 = vrsqrt.f32 %v1455_v45  ;;  %v1456_v57 = vadd.f32 1e-05, %v1452_v51 }
 0x277   : > { %v996_v46 = vmul.f32 %v4975_v41, %v990_v40 }
 0x278   : > { %4980 = vrsqrt.f32 %v1456_v57 }
 0x279   : > { %v1005_v49 = vmul.f32 %v4184_v44, %v996_v46 }
 0x27a   : > { %v4977_v50 = vpop.eup %4976 }
 0x27b   : > { %v997_v52 = vmul.f32 %v4977_v50, %v991_v48  ;;  %v1014_v53 = vadd.f32 %v4185_v47, %v1005_v49 }
 0x27d   : > { %v1006_v56 = vmul.f32 %v4184_v44, %v997_v52  ;;  %4402 = vmatprep.mubr.msk.f32.mxu0 %vm967_vm0, %v1014_v53 }
 0x27f   : > { %v1015_v58 = vadd.f32 %v4185_v47, %v1006_v56 }
 0x280   : > { %v4979_v63 = vpop.eup %4978 }
 0x281   : > { %4403 = vmatmul.mubr.msk.f32.vlgmr.msra.gmra.mrb[0].mxu0 %vm967_vm0, %v1015_v58  ;;  %v1459_v8 = vmul.f32 %v4979_v63, %v1453_v62 }
 0x282   : > { %4638 = vmatpush3.bf16.msra.mxu0 %v4635_v16  ;;  %4413 = vmatprep.mubr.msk.f32.mxu0 %vm967_vm0, %v1014_v53  ;;  %v4981_v13 = vpop.eup %4980  ;;  %v1482_v16 = vld [vmem:[%s6805_s7 + $0x18] sm:$0xff]  ;;  %s6819_s7 = sld [smem:[#allocation63_spill]] }
 0x283   : > { %4640 = vmatprep.subr.bf16.mxu0 %v4639_v59  ;;  %v1468_v14 = vmul.f32 %v4184_v44, %v1459_v8  ;;  %v1460_v18 = vmul.f32 %v4981_v13, %v1454_v17  ;;  %v4653_v19 = vpack.c.bf16 %v1482_v16, %v1481_v15 }
 0x285   : > { %v1477_v20 = vadd.f32 %v4185_v47, %v1468_v14  ;;  %v1469_v21 = vmul.f32 %v4184_v44, %v1460_v18 }
 0x286   : > { %4642 = vmatpush3.bf16.msra.mxu0 %v4639_v59 }
 0x287   : > { %4643 = vmatprep.subr.bf16.mxu0 %v5580_v3  ;;  %v1478_v22 = vadd.f32 %v4185_v47, %v1469_v21 }
 0x289   : > { %4414 = vmatmul.mubr.msk.f32.vlgmr.msra.gmra.mrb[2].mxu0 %vm967_vm0, %v1015_v58 }
 0x28a   : > { %4645 = vmatpush3.bf16.msra.mxu0 %v4644_v2  ;;  %4420 = vmatprep.mubr.msk.f32.mxu0 %vm5581_vm1, %v5582_v9 }
 0x28b   : > { %4646 = vmatprep.subr.bf16.mxu0 %v5580_v3 }
 0x28d   : > { %4421 = vmatmul.mubr.msk.f32.vlgmr.msra.gmra.mrb[4].mxu0 %vm1246_vm2, %v1243_v10 }
 0x28e   : > { %4648 = vmatpush3.bf16.msra.mxu0 %v4647_v11  ;;  %4427 = vmatprep.mubr.msk.f32.mxu0 %vm5581_vm1, %v5582_v9 }
 0x28f   : > { %4650 = vmatprep.subr.bf16.mxu0 %v4649_v12 }
 0x291   : > { %4428 = vmatmul.mubr.msk.f32.vlgmr.msra.gmra.mrb[6].mxu0 %vm1246_vm2, %v1243_v10 }
 0x292   : > { %4652 = vmatpush3.bf16.msra.mxu0 %v4649_v12  ;;  %4438 = vmatprep.mubr.msk.f32.mxu0 %vm967_vm0, %v1477_v20 }
 0x293   : > { %4654 = vmatprep.subr.bf16.mxu0 %v4653_v19 }
 0x296   : > { %4656 = vmatpush3.bf16.msra.mxu0 %v4653_v19 }
 0x299   : > { %4439 = vmatmul.mubr.msk.f32.vlgmr.msra.gmra.mrb[8].mxu0 %vm967_vm0, %v1478_v22 }
 0x354   : > { %v4404_v23 = vpop.f32.mrb[0].mxu0 }
 0x355   : > { %1103 = vst.msk [vmem:[#allocation2 + $0x8] sm:$0xff] %vm1101_vm3, %v4404_v23  ;;  %1108 = vrot.lane.b32.xlu1 %v4404_v23, %s6744_s12  ;;  %v1092_v24 = vpop.f32.mrb[1].mxu0 }
 0x356   : > { %1102 = vst.msk [vmem:[#allocation2] sm:$0xff] %vm1101_vm3, %v1092_v24  ;;  %1106 = vrot.lane.b32.xlu0 %v1092_v24, %s6744_s12 }
 0x359   : > { %1117 = vrot.lane.b32.xlu1 %v4404_v23, %s5584_s10 }
 0x35a   : > { %1124 = vrot.lane.b32.xlu0 %v1092_v24, %s6747_s21 }
 0x35c   : > { %v6265_v25 = vpop.f32.mrb[2].mxu0  ;;  %v1607_v26 = vld [vmem:[#allocation2 + $0x8] sm:$0xff] }
 0x35d   : > { %1213 = vst.msk [vmem:[#allocation3 + $0x8] sm:$0xff] %vm1101_vm3, %v6265_v25  ;;  %v6269_v27 = vpop.f32.mrb[3].mxu0  ;;  %1126 = vrot.lane.b32.xlu1 %v4404_v23, %s6747_s21  ;;  %v1606_v28 = vld [vmem:[#allocation2] sm:$0xff] }
 0x35e   : > { %1212 = vst.msk [vmem:[#allocation3] sm:$0xff] %vm1101_vm3, %v6269_v27  ;;  %v4657_v30 = vpack.c.bf16 %v1607_v26, %v1606_v28 }
 0x360   : > { %v6280_v31 = vpop.f32.mrb[4].mxu0  ;;  %4659 = vmatprep.subr.msk.bf16.mxu1 %vm6274_vm4, %v4657_v30 }
 0x361   : > { %1320 = vst.msk [vmem:[#allocation4] sm:$0xff] %vm1101_vm3, %v6280_v31  ;;  %v4422_v32 = vpop.f32.mrb[5].mxu0  ;;  %1115 = vrot.lane.b32.xlu1 %v1092_v24, %s5584_s10  ;;  %4662 = vmatpush3.bf16.xpose.msk.msra.mxu1 %vm6274_vm4, %v4657_v30 }
 0x364   : > { %v6289_v33 = vpop.f32.mrb[6].mxu0  ;;  %v2052_v53 = vld [vmem:[#allocation3 + $0x8] sm:$0xff] }
 0x365   : > { %1409 = vst.msk [vmem:[#allocation5] sm:$0xff] %vm1101_vm3, %v6289_v33  ;;  %v4429_v34 = vpop.f32.mrb[7].mxu0  ;;  %v2051_v56 = vld [vmem:[#allocation3] sm:$0xff] }
 0x366   : > { %v4681_v58 = vpack.c.bf16 %v2052_v53, %v2051_v56 }
 0x36c   : > { %v4440_v35 = vpop.f32.mrb[8].mxu0 }
 0x36d   : > { %v1565_v36 = vmul.f32 0.35355338, %v4440_v35  ;;  %v1555_v37 = vpop.f32.mrb[9].mxu0 }
 0x36e   : > { %v1564_v38 = vmul.f32 0.35355338, %v1555_v37 }
 0x36f   : > { %1568 = vst.msk [vmem:[#allocation6 + $0x8] sm:$0xff] %vm1101_vm3, %v1565_v36  ;;  %1573 = vrot.lane.b32.xlu1 %v1565_v36, %s6744_s12 }
 0x370   : > { %1567 = vst.msk [vmem:[#allocation6] sm:$0xff] %vm1101_vm3, %v1564_v38  ;;  %1571 = vrot.lane.b32.xlu0 %v1564_v38, %s6744_s12 }
 0x373   : > { %1582 = vrot.lane.b32.xlu1 %v1565_v36, %s5584_s10 }
 0x374   : > { %1580 = vrot.lane.b32.xlu0 %v1564_v38, %s5584_s10 }
 0x376   : > { %v1599_v40 = vld [vmem:[#allocation6 + $0x8] sm:$0xff] }
 0x377   : > { %1591 = vrot.lane.b32.xlu1 %v1565_v36, %s6747_s21  ;;  %v1598_v39 = vld [vmem:[#allocation6] sm:$0xff] }
 0x378   : > { %1589 = vrot.lane.b32.xlu0 %v1564_v38, %s6747_s21  ;;  %4445 = vmatprep.mubr.msk.f32.mxu1 %vm1101_vm3, %v1598_v39 }
 0x379   : > { %4446 = vmatmul.mubr.msk.f32.vlgmr.msra.gmra.mrb[0].mxu1 %vm1101_vm3, %v1599_v40 }
 0x3c7   : > { %v1109_v41 = vpop.permute.xlu1 %1108 }
 0x3c8   : > { %1114 = vst.msk [vmem:[#allocation2 + $0x18] sm:$0xff] %vm1101_vm3, %v1109_v41  ;;  %v1107_v42 = vpop.permute.xlu0 %1106 }
 0x3c9   : > { %1113 = vst.msk [vmem:[#allocation2 + $0x10] sm:$0xff] %vm1101_vm3, %v1107_v42 }
 0x3cb   : > { %v1118_v43 = vpop.permute.xlu1 %1117 }
 0x3cc   : > { %1123 = vst.msk [vmem:[#allocation2 + $0x28] sm:$0xff] %vm1101_vm3, %v1118_v43  ;;  %v1125_v44 = vpop.permute.xlu0 %1124 }
 0x3cd   : > { %1131 = vst.msk [vmem:[#allocation2 + $0x30] sm:$0xff] %vm1101_vm3, %v1125_v44 }
 0x3cf   : > { %v1127_v45 = vpop.permute.xlu1 %1126  ;;  %v1609_v46 = vld [vmem:[#allocation2 + $0x18] sm:$0xff] }
 0x3d0   : > { %1132 = vst.msk [vmem:[#allocation2 + $0x38] sm:$0xff] %vm1101_vm3, %v1127_v45  ;;  %v1608_v47 = vld [vmem:[#allocation2 + $0x10] sm:$0xff] }
 0x3d1   : > { %v4663_v48 = vpack.c.bf16 %v1609_v46, %v1608_v47 }
 0x3d3   : > { %v1116_v49 = vpop.permute.xlu1 %1115  ;;  %4665 = vmatprep.subr.msk.bf16.mxu0 %vm6274_vm4, %v4663_v48  ;;  %v1611_v55 = vld [vmem:[#allocation2 + $0x28] sm:$0xff] }
 0x3d4   : > { %1122 = vst.msk [vmem:[#allocation2 + $0x20] sm:$0xff] %vm1101_vm3, %v1116_v49  ;;  %4668 = vmatpush3.bf16.xpose.msk.msra.mxu0 %vm6274_vm4, %v4663_v48  ;;  %v1612_v50 = vld [vmem:[#allocation2 + $0x30] sm:$0xff] }
 0x3d7   : > { %v1613_v51 = vld [vmem:[#allocation2 + $0x38] sm:$0xff] }
 0x3d8   : > { %v4675_v52 = vpack.c.bf16 %v1613_v51, %v1612_v50 }
 0x3da   : > { %4677 = vmatprep.subr.msk.bf16.mxu0 %vm6274_vm4, %v4675_v52 }
 0x3db   : > { %v1610_v54 = vld [vmem:[#allocation2 + $0x20] sm:$0xff] }
 0x3dc   : > { %v4669_v57 = vpack.c.bf16 %v1611_v55, %v1610_v54 }
 0x3de   : > { %4671 = vmatprep.subr.msk.bf16.mxu1 %vm6274_vm4, %v4669_v57 }
 0x3df   : > { %4674 = vmatpush3.bf16.xpose.msk.msra.mxu1 %vm6274_vm4, %v4669_v57 }
 0x3e0   : > { %4682 = vmatprep.subr.bf16.mxu1 %v4681_v58 }
 0x3e1   : > { %v1574_v59 = vpop.permute.xlu1 %1573 }
 0x3e2   : > { %1579 = vst.msk [vmem:[#allocation6 + $0x18] sm:$0xff] %vm1101_vm3, %v1574_v59  ;;  %v1572_v60 = vpop.permute.xlu0 %1571 }
 0x3e3   : > { %1578 = vst.msk [vmem:[#allocation6 + $0x10] sm:$0xff] %vm1101_vm3, %v1572_v60 }
 0x3e5   : > { %v1583_v61 = vpop.permute.xlu1 %1582 }
 0x3e6   : > { %1588 = vst.msk [vmem:[#allocation6 + $0x28] sm:$0xff] %vm1101_vm3, %v1583_v61  ;;  %v1581_v62 = vpop.permute.xlu0 %1580 }
 0x3e7   : > { %1587 = vst.msk [vmem:[#allocation6 + $0x20] sm:$0xff] %vm1101_vm3, %v1581_v62 }
 0x3e9   : > { %v1592_v63 = vpop.permute.xlu1 %1591  ;;  %v1601_v4 = vld [vmem:[#allocation6 + $0x18] sm:$0xff] }
 0x3ea   : > { %1597 = vst.msk [vmem:[#allocation6 + $0x38] sm:$0xff] %vm1101_vm3, %v1592_v63  ;;  %v1590_v2 = vpop.permute.xlu0 %1589  ;;  %v1600_v3 = vld [vmem:[#allocation6 + $0x10] sm:$0xff] }
 0x3eb   : > { %1596 = vst.msk [vmem:[#allocation6 + $0x30] sm:$0xff] %vm1101_vm3, %v1590_v2  ;;  %4452 = vmatprep.mubr.msk.f32.mxu0 %vm1101_vm3, %v1600_v3 }
 0x3ec   : > { %4453 = vmatmul.mubr.msk.f32.vlgmr.msra.gmra.mrb[10].mxu0 %vm1101_vm3, %v1601_v4 }
 0x3ed   : > { %4680 = vmatpush3.bf16.xpose.msk.msra.mxu0 %vm6274_vm4, %v4675_v52  ;;  %v1603_v6 = vld [vmem:[#allocation6 + $0x28] sm:$0xff] }
 0x3ee   : > { %v1602_v5 = vld [vmem:[#allocation6 + $0x20] sm:$0xff] }
 0x3ef   : > { %4459 = vmatprep.mubr.msk.f32.mxu1 %vm1101_vm3, %v1602_v5 }
 0x3f0   : > { %4460 = vmatmul.mubr.msk.f32.vlgmr.msra.gmra.mrb[2].mxu1 %vm1101_vm3, %v1603_v6 }
 0x3f1   : > { %4684 = vmatpush3.bf16.msra.mxu1 %v4681_v58  ;;  %v1605_v8 = vld [vmem:[#allocation6 + $0x38] sm:$0xff] }
 0x3f2   : > { %v1604_v7 = vld [vmem:[#allocation6 + $0x30] sm:$0xff] }
 0x3f3   : > { %4466 = vmatprep.mubr.msk.f32.mxu0 %vm1101_vm3, %v1604_v7 }
 0x3f4   : > { %4467 = vmatmul.mubr.msk.f32.vlgmr.msra.gmra.mrb[12].mxu0 %vm1101_vm3, %v1605_v8 }
 0x44c   : > { %v4447_v9 = vpop.f32.mrb[0].mxu1 }
 0x44d   : > { %v1692_v10 = vpop.f32.mrb[1].mxu1  ;;  %v1966_v11 = vsel %vm1246_vm2, %v4447_v9, -inf }
 0x44e   : > { %1967 = vmax.xlane.f32.xlu1 %v1966_v11  ;;  %v1963_v12 = vsel %vm1246_vm2, %v1692_v10, -inf }
 0x44f   : > { %1964 = vmax.xlane.f32.xlu0 %v1963_v12 }
 0x4bf   : > { %v4454_v13 = vpop.f32.mrb[10].mxu0 }
 0x4c0   : > { %v1779_v14 = vpop.f32.mrb[11].mxu0  ;;  %v1972_v15 = vsel %vm1246_vm2, %v4454_v13, -inf }
 0x4c1   : > { %1973 = vmax.xlane.f32.xlu0 %v1972_v15  ;;  %v1969_v18 = vsel %vm1246_vm2, %v1779_v14, -inf }
 0x4c3   : > { %v4461_v16 = vpop.f32.mrb[2].mxu1 }
 0x4c4   : > { %v1866_v17 = vpop.f32.mrb[3].mxu1  ;;  %v1978_v19 = vsel %vm1246_vm2, %v4461_v16, -inf }
 0x4c5   : > { %1970 = vmax.xlane.f32.xlu0 %v1969_v18  ;;  %1979 = vmax.xlane.f32.xlu1 %v1978_v19  ;;  %v1975_v22 = vsel %vm1246_vm2, %v1866_v17, -inf  ;;  %v2421_v18 = vld [vmem:[%s6808_s19 + $0x8] sm:$0xff] }
 0x4c7   : > { %v4468_v20 = vpop.f32.mrb[12].mxu0 }
 0x4c8   : > { %v1953_v21 = vpop.f32.mrb[13].mxu0  ;;  %v1984_v23 = vsel %vm1246_vm2, %v4468_v20, -inf }
 0x4c9   : > { %1976 = vmax.xlane.f32.xlu0 %v1975_v22  ;;  %1985 = vmax.xlane.f32.xlu1 %v1984_v23  ;;  %v1981_v24 = vsel %vm1246_vm2, %v1953_v21, -inf }
 0x4cd   : > { %1982 = vmax.xlane.f32.xlu0 %v1981_v24 }
 0x4da   : > { %1218 = vrot.lane.b32.xlu1 %v6265_v25, %s6744_s12 }
 0x4db   : > { %v1968_v29 = vpop.xlane.xlu1 %1967 }
 0x4dc   : > { %v1965_v26 = vpop.xlane.xlu0 %1964  ;;  %v1988_v30 = vsub.f32 %v4447_v9, %v1968_v29 }
 0x4dd   : > { %v1987_v28 = vsub.f32 %v1692_v10, %v1965_v26 }
 0x4de   : > { %1225 = vrot.lane.b32.xlu1 %v6269_v27, %s5584_s10  ;;  %v1997_v34 = vmul.f32 1.442695, %v1988_v30 }
 0x4df   : > { %v1995_v32 = vmul.f32 1.442695, %v1987_v28 }
 0x4e1   : > { %4982 = vpow2.f32 %v1995_v32 }
 0x4e2   : > { %1227 = vrot.lane.b32.xlu1 %v6265_v25, %s5584_s10  ;;  %4984 = vpow2.f32 %v1997_v34 }
 0x4e3   : > { %1216 = vrot.lane.b32.xlu0 %v6269_v27, %s6744_s12  ;;  %s6812_s12 = smov 8  }
 0x4eb   : > { %v6349_v35 = vpop.eup %4982 }
 0x4ec   : > { %v2011_v36 = vsel %vm1246_vm2, %v6349_v35, 0.0  ;;  %v6353_v37 = vpop.eup %4984 }
 0x4ed   : > { %v2014_v38 = vsel %vm1246_vm2, %v6353_v37, 0.0 }
 0x502   : > { %2012 = vadd.xlane.f32.xlu0 %v2011_v36 }
 0x506   : > { %2015 = vadd.xlane.f32.xlu1 %v2014_v38 }
 0x54e   : > { %v1974_v39 = vpop.xlane.xlu0 %1973 }
 0x54f   : > { %v1990_v40 = vsub.f32 %v4454_v13, %v1974_v39 }
 0x551   : > { %v2001_v41 = vmul.f32 1.442695, %v1990_v40 }
 0x552   : > { %v1980_v42 = vpop.xlane.xlu1 %1979  ;;  %v1971_v43 = vpop.xlane.xlu0 %1970 }
 0x553   : > { %4986 = vpow2.f32 %v2001_v41  ;;  %v1992_v44 = vsub.f32 %v4461_v16, %v1980_v42  ;;  %v1989_v45 = vsub.f32 %v1779_v14, %v1971_v43  ;;  %v2422_v41 = vld [vmem:[%s6808_s19 + $0x10] sm:$0xff]  ;;  %v2423_v42 = vld [vmem:[%s6808_s19 + $0x18] sm:$0xff] }
 0x555   : > { %v2005_v46 = vmul.f32 1.442695, %v1992_v44  ;;  %v1999_v47 = vmul.f32 1.442695, %v1989_v45 }
 0x556   : > { %v1986_v48 = vpop.xlane.xlu1 %1985  ;;  %v1977_v49 = vpop.xlane.xlu0 %1976 }
 0x557   : > { %4988 = vpow2.f32 %v2005_v46  ;;  %v1994_v50 = vsub.f32 %v4468_v20, %v1986_v48  ;;  %v1991_v51 = vsub.f32 %v1866_v17, %v1977_v49  ;;  %v2420_v17 = vld [vmem:[%s6808_s19] sm:$0xff]  ;;  %v4701_v46 = vpack.c.bf16 %v2423_v42, %v2422_v41 }
 0x558   : > { %4990 = vpow2.f32 %v1999_v47  ;;  %v4697_v19 = vpack.c.bf16 %v2421_v18, %v2420_v17 }
 0x559   : > { %v2009_v52 = vmul.f32 1.442695, %v1994_v50  ;;  %v2003_v53 = vmul.f32 1.442695, %v1991_v51 }
 0x55a   : > { %v1219_v54 = vpop.permute.xlu1 %1218  ;;  %v1983_v55 = vpop.xlane.xlu0 %1982 }
 0x55b   : > { %4992 = vpow2.f32 %v2009_v52  ;;  %1224 = vst.msk [vmem:[#allocation3 + $0x18] sm:$0xff] %vm1101_vm3, %v1219_v54  ;;  %v1993_v56 = vsub.f32 %v1953_v21, %v1983_v55 }
 0x55c   : > { %4994 = vpow2.f32 %v2003_v53  ;;  %v2685_v53 = vld [vmem:[#allocation4] sm:$0xff] }
 0x55d   : > { %v6358_v57 = vpop.eup %4986  ;;  %v2007_v58 = vmul.f32 1.442695, %v1993_v56 }
 0x55e   : > { %v1226_v59 = vpop.permute.xlu1 %1225  ;;  %v1217_v60 = vpop.permute.xlu0 %1216  ;;  %v2020_v61 = vsel %vm1246_vm2, %v6358_v57, 0.0 }
 0x55f   : > { %4996 = vpow2.f32 %v2007_v58  ;;  %1232 = vst.msk [vmem:[#allocation3 + $0x20] sm:$0xff] %vm1101_vm3, %v1226_v59  ;;  %1223 = vst.msk [vmem:[#allocation3 + $0x10] sm:$0xff] %vm1101_vm3, %v1217_v60  ;;  %2021 = vadd.xlane.f32.xlu1 %v2020_v61 }
 0x561   : > { %v6364_v62 = vpop.eup %4988 }
 0x562   : > { %v4991_v63 = vpop.eup %4990  ;;  %v1228_v2 = vpop.permute.xlu1 %1227  ;;  %v2026_v3 = vsel %vm1246_vm2, %v6364_v62, 0.0  ;;  %v2054_v9 = vld [vmem:[#allocation3 + $0x18] sm:$0xff] }
 0x563   : > { %1233 = vst.msk [vmem:[#allocation3 + $0x28] sm:$0xff] %vm1101_vm3, %v1228_v2  ;;  %2027 = vadd.xlane.f32.xlu1 %v2026_v3  ;;  %v2017_v4 = vsel %vm1246_vm2, %v4991_v63, 0.0 }
 0x564   : > { %2018 = vadd.xlane.f32.xlu0 %v2017_v4 }
 0x565   : > { %v6370_v5 = vpop.eup %4992 }
 0x566   : > { %v4995_v6 = vpop.eup %4994  ;;  %v2032_v7 = vsel %vm1246_vm2, %v6370_v5, 0.0  ;;  %v2053_v8 = vld [vmem:[#allocation3 + $0x10] sm:$0xff]  ;;  %v2055_v14 = vld [vmem:[#allocation3 + $0x20] sm:$0xff] }
 0x567   : > { %2033 = vadd.xlane.f32.xlu1 %v2032_v7  ;;  %v2023_v10 = vsel %vm1246_vm2, %v4995_v6, 0.0  ;;  %v4685_v11 = vpack.c.bf16 %v2054_v9, %v2053_v8  ;;  %v4220_v9 = vld [vmem:[#allocation20] ss:$0 sm:$0xff] }
 0x568   : > { %2024 = vadd.xlane.f32.xlu0 %v2023_v10 }
 0x569   : > { %v4997_v12 = vpop.eup %4996  ;;  %4686 = vmatprep.subr.bf16.mxu1 %v4685_v11 }
 0x56a   : > { %v2029_v13 = vsel %vm1246_vm2, %v4997_v12, 0.0  ;;  %v2056_v15 = vld [vmem:[#allocation3 + $0x28] sm:$0xff] }
 0x56b   : > { %v4689_v16 = vpack.c.bf16 %v2056_v15, %v2055_v14 }
 0x56c   : > { %2030 = vadd.xlane.f32.xlu0 %v2029_v13 }
 0x56d   : > { %4690 = vmatprep.subr.bf16.mxu0 %v4689_v16 }
 0x56e   : > { %4692 = vmatpush3.bf16.msra.mxu0 %v4689_v16 }
 0x56f   : > { %4698 = vmatprep.subr.bf16.mxu0 %v4697_v19 }
 0x578   : > { %1236 = vrot.lane.b32.xlu1 %v6265_v25, %s6747_s21 }
 0x582   : > { %1234 = vrot.lane.b32.xlu0 %v6269_v27, %s6747_s21 }
 0x58f   : > { %v2013_v20 = vpop.xlane.xlu0 %2012 }
 0x590   : > { %4998 = vrcp.f32 %v2013_v20  ;;  %v2562_v20 = vld [vmem:[%s6809_s3] sm:$0xff] }
 0x593   : > { %v2016_v21 = vpop.xlane.xlu1 %2015 }
 0x594   : > { %5000 = vrcp.f32 %v2016_v21  ;;  %v2563_v21 = vld [vmem:[%s6809_s3 + $0x8] sm:$0xff] }
 0x59a   : > { %v4999_v22 = vpop.eup %4998 }
 0x59b   : > { %v2043_v25 = vmul.f32 %v4999_v22, %v6349_v35  ;;  %v4705_v22 = vpack.c.bf16 %v2563_v21, %v2562_v20 }
 0x59d   : > { %4473 = vmatprep.mubr.msk.f32.mxu1 %vm1246_vm2, %v2043_v25  ;;  %v2564_v25 = vld [vmem:[%s6809_s3 + $0x10] sm:$0xff] }
 0x59e   : > { %v5001_v23 = vpop.eup %5000 }
 0x59f   : > { %v2044_v24 = vmul.f32 %v5001_v23, %v6353_v37  ;;  %v2565_v23 = vld [vmem:[%s6809_s3 + $0x18] sm:$0xff]  ;;  %s6816_s3 = sld [smem:[#allocation60_spill]] }
 0x5a1   : > { %4474 = vmatmul.mubr.msk.f32.vlgmr.msra.gmra.mrb[4].mxu1 %vm1246_vm2, %v2044_v24  ;;  %v4709_v24 = vpack.c.bf16 %v2565_v23, %v2564_v25 }
 0x5a2   : > { %4688 = vmatpush3.bf16.msra.mxu1 %v4685_v11 }
 0x5ec   : > { %v2022_v26 = vpop.xlane.xlu1 %2021 }
 0x5ed   : > { %5002 = vrcp.f32 %v2022_v26 }
 0x5f0   : > { %v2028_v28 = vpop.xlane.xlu1 %2027 }
 0x5f1   : > { %v2019_v27 = vpop.xlane.xlu0 %2018 }
 0x5f2   : > { %5004 = vrcp.f32 %v2019_v27 }
 0x5f3   : > { %5006 = vrcp.f32 %v2028_v28 }
 0x5f4   : > { %v2034_v29 = vpop.xlane.xlu1 %2033 }
 0x5f5   : > { %v2025_v30 = vpop.xlane.xlu0 %2024 }
 0x5f6   : > { %5008 = vrcp.f32 %v2025_v30 }
 0x5f7   : > { %v5003_v35 = vpop.eup %5002 }
 0x5f8   : > { %v1237_v32 = vpop.permute.xlu1 %1236  ;;  %v2046_v39 = vmul.f32 %v5003_v35, %v6358_v57 }
 0x5f9   : > { %1242 = vst.msk [vmem:[#allocation3 + $0x38] sm:$0xff] %vm1101_vm3, %v1237_v32  ;;  %v2031_v34 = vpop.xlane.xlu0 %2030 }
 0x5fa   : > { %5010 = vrcp.f32 %v2031_v34 }
 0x5fb   : > { %5012 = vrcp.f32 %v2034_v29 }
 0x5fc   : > { %v5005_v36 = vpop.eup %5004 }
 0x5fd   : > { %v1235_v37 = vpop.permute.xlu0 %1234  ;;  %v2045_v38 = vmul.f32 %v5005_v36, %v4991_v63  ;;  %v5007_v40 = vpop.eup %5006 }
 0x5fe   : > { %1241 = vst.msk [vmem:[#allocation3 + $0x30] sm:$0xff] %vm1101_vm3, %v1235_v37  ;;  %v2048_v45 = vmul.f32 %v5007_v40, %v6364_v62 }
 0x5ff   : > { %4480 = vmatprep.mubr.msk.f32.mxu1 %vm1246_vm2, %v2045_v38 }
 0x600   : > { %v5009_v43 = vpop.eup %5008  ;;  %4481 = vmatmul.mubr.msk.f32.vlgmr.msra.gmra.mrb[6].mxu1 %vm1246_vm2, %v2046_v39  ;;  %v2058_v50 = vld [vmem:[#allocation3 + $0x38] sm:$0xff] }
 0x601   : > { %v2047_v44 = vmul.f32 %v5009_v43, %v4995_v6 }
 0x603   : > { %4487 = vmatprep.mubr.msk.f32.mxu0 %vm1246_vm2, %v2047_v44 }
 0x604   : > { %v5011_v47 = vpop.eup %5010  ;;  %4488 = vmatmul.mubr.msk.f32.vlgmr.msra.gmra.mrb[14].mxu0 %vm1246_vm2, %v2048_v45 }
 0x605   : > { %4700 = vmatpush3.bf16.msra.mxu0 %v4697_v19  ;;  %v2049_v48 = vmul.f32 %v5011_v47, %v4997_v12  ;;  %v2057_v49 = vld [vmem:[#allocation3 + $0x30] sm:$0xff]  ;;  %v5013_v52 = vpop.eup %5012 }
 0x606   : > { %4702 = vmatprep.subr.bf16.mxu0 %v4701_v46  ;;  %v4693_v51 = vpack.c.bf16 %v2058_v50, %v2057_v49  ;;  %v2050_v54 = vmul.f32 %v5013_v52, %v6370_v5  ;;  %v4224_v50 = vld [vmem:[#allocation16] ss:$0 sm:$0xff] }
 0x607   : > { %4494 = vmatprep.mubr.msk.f32.mxu1 %vm1246_vm2, %v2049_v48  ;;  %v4223_v48 = vld [vmem:[#allocation14] ss:$0 sm:$0xff] }
 0x608   : > { %4694 = vmatprep.subr.bf16.mxu1 %v4693_v51 }
 0x609   : > { %4704 = vmatpush3.bf16.msra.mxu0 %v4701_v46  ;;  %4696 = vmatpush3.bf16.msra.mxu1 %v4693_v51 }
 0x60a   : > { %4519 = vmatprep.subr.msk.mxu0 %vm1101_vm3, %v2685_v53  ;;  %4706 = vmatprep.subr.bf16.mxu1 %v4705_v22 }
 0x60c   : > { %4495 = vmatmul.mubr.msk.f32.vlgmr.msra.gmra.mrb[8].mxu1 %vm1246_vm2, %v2050_v54 }
 0x60d   : > { %4708 = vmatpush3.bf16.msra.mxu1 %v4705_v22 }
 0x60e   : > { %4710 = vmatprep.subr.bf16.mxu1 %v4709_v24 }
 0x611   : > { %4712 = vmatpush3.bf16.msra.mxu1 %v4709_v24 }
 0x674   : > { %v4475_v55 = vpop.f32.mrb[4].mxu1 }
 0x675   : > { %2384 = vst.msk [vmem:[#allocation7 + $0x8] sm:$0xff] %vm1101_vm3, %v4475_v55  ;;  %v2131_v56 = vpop.f32.mrb[5].mxu1 }
 0x676   : > { %2383 = vst.msk [vmem:[#allocation7] sm:$0xff] %vm1101_vm3, %v2131_v56 }
 0x6d3   : > { %v4482_v57 = vpop.f32.mrb[6].mxu1 }
 0x6d4   : > { %2389 = vrot.lane.b32.xlu1 %v4482_v57, %s6742_s14  ;;  %v2212_v58 = vpop.f32.mrb[7].mxu1 }
 0x6d5   : > { %2387 = vrot.lane.b32.xlu0 %v2212_v58, %s6742_s14  ;;  %s4265_s14 = sshll.u32 %s5554_s28, 8  ;;  %s3910_s28 = scalar_lea.sflag [#allocation10], %s6148_s16 }
 0x6d6   : > { %s6632_s15 = scalar_lea.hbm %s6819_s7, %s4265_s14 }
 0x6d7   : > { %v4489_v59 = vpop.f32.mrb[14].mxu0 }
 0x6d8   : > { %2400 = vrot.lane.b32.xlu1 %v4489_v59, %s6740_s8  ;;  %v2293_v60 = vpop.f32.mrb[15].mxu0 }
 0x6d9   : > { %2398 = vrot.lane.b32.xlu0 %v2293_v60, %s6740_s8 }
 0x6df   : > { %v4496_v61 = vpop.f32.mrb[8].mxu1 }
 0x6e0   : > { %2411 = vrot.lane.b32.xlu1 %v4496_v61, %s6738_s23  ;;  %v2374_v62 = vpop.f32.mrb[9].mxu1 }
 0x6e1   : > { %2409 = vrot.lane.b32.xlu0 %v2374_v62, %s6738_s23  ;;  %s6815_s23 = sld [smem:[#allocation61_spill]] }
 0x746   : > { %v2390_v63 = vpop.permute.xlu1 %2389 }
 0x747   : > { %2395 = vst.msk [vmem:[#allocation7 + $0x8] sm:$0xff] %vm2393_vm5, %v2390_v63  ;;  %v2388_v2 = vpop.permute.xlu0 %2387 }
 0x748   : > { %2394 = vst.msk [vmem:[#allocation7] sm:$0xff] %vm2393_vm5, %v2388_v2 }
 0x74a   : > { %v2401_v3 = vpop.permute.xlu1 %2400 }
 0x74b   : > { %2406 = vst.msk [vmem:[#allocation7 + $0x8] sm:$0xff] %vm2404_vm6, %v2401_v3  ;;  %v2399_v4 = vpop.permute.xlu0 %2398  ;;  %v3113_v3 = vld [vmem:[#allocation5] sm:$0xff] }
 0x74c   : > { %2405 = vst.msk [vmem:[#allocation7] sm:$0xff] %vm2404_vm6, %v2399_v4 }
 0x752   : > { %v2412_v5 = vpop.permute.xlu1 %2411 }
 0x753   : > { %2417 = vst.msk [vmem:[#allocation7 + $0x8] sm:$0xff] %vm2415_vm7, %v2412_v5  ;;  %v2410_v6 = vpop.permute.xlu0 %2409 }
 0x754   : > { %2416 = vst.msk [vmem:[#allocation7] sm:$0xff] %vm2415_vm7, %v2410_v6 }
 0x75a   : > { %v2419_v8 = vld [vmem:[#allocation7 + $0x8] sm:$0xff] }
 0x75b   : > { %v2418_v7 = vld [vmem:[#allocation7] sm:$0xff] }
 0x75c   : > { %4505 = vmatprep.mubr.msk.f32.mxu0 %vm967_vm0, %v2418_v7 }
 0x75d   : > { %4506 = vmatmul.mubr.msk.f32.vlgmr.msra.gmra.mrb[16].mxu0 %vm967_vm0, %v2419_v8 }
 0x75e   : > { %4520 = vmatpush3.xpose.msk.msra.mxu0 %vm1101_vm3, %v2685_v53 }
 0x830   : > { %v4507_v10 = vpop.f32.mrb[16].mxu0 }
 0x831   : > { %v2509_v11 = vadd.f32 %v4507_v10, %v4220_v9  ;;  %v2503_v12 = vpop.f32.mrb[17].mxu0 }
 0x832   : > { %v2504_v13 = vadd.f32 %v4220_v9, %v2503_v12 }
 0x833   : > { %v6426_v14 = vadd.f32 %v2509_v11, %v6193_v1 }
 0x834   : > { %v6429_v15 = vadd.f32 %v2504_v13, %v6191_v0 }
 0x835   : > { %v2517_v16 = vsel %vm967_vm0, %v6426_v14, 0.0  ;;  %v2521_v1 = vmul.f32 %v6426_v14, %v6426_v14 }
 0x836   : > { %2518 = vadd.xlane.f32.xlu1 %v2517_v16  ;;  %v2514_v17 = vsel %vm967_vm0, %v6429_v15, 0.0  ;;  %v2520_v18 = vmul.f32 %v6429_v15, %v6429_v15 }
 0x837   : > { %2515 = vadd.xlane.f32.xlu0 %v2514_v17  ;;  %v2525_v0 = vsel %vm967_vm0, %v2521_v1, 0.0 }
 0x838   : > { %v2522_v19 = vsel %vm967_vm0, %v2520_v18, 0.0 }
 0x83b   : > { %2523 = vadd.xlane.f32.xlu0 %v2522_v19 }
 0x83f   : > { %2526 = vadd.xlane.f32.xlu0 %v2525_v0 }
 0x847   : > { %1327 = vrot.lane.b32.xlu1 %v6280_v31, %s5584_s10 }
 0x84b   : > { %1332 = vrot.lane.b32.xlu1 %v6280_v31, %s6747_s21  ;;  %s6810_s21 = smov 120  }
 0x855   : > { %1322 = vrot.lane.b32.xlu0 %v6280_v31, %s6810_s21 }
 0x8c3   : > { %v2519_v26 = vpop.xlane.xlu1 %2518 }
 0x8c4   : > { %v2516_v28 = vpop.xlane.xlu0 %2515  ;;  %v2529_v32 = vmul.f32 0.03125, %v2519_v26 }
 0x8c5   : > { %v2528_v27 = vmul.f32 0.03125, %v2516_v28 }
 0x8c6   : > { %v2533_v39 = vmul.f32 %v2529_v32, %v2529_v32  ;;  %v2537_v51 = vsub.f32 %v6426_v14, %v2529_v32 }
 0x8c7   : > { %v1328_v29 = vpop.permute.xlu1 %1327  ;;  %v2532_v34 = vmul.f32 %v2528_v27, %v2528_v27  ;;  %v2536_v45 = vsub.f32 %v6429_v15, %v2528_v27 }
 0x8c8   : > { %1331 = vst.msk [vmem:[#allocation4 + $0x10] sm:$0xff] %vm1101_vm3, %v1328_v29  ;;  %v2524_v30 = vpop.xlane.xlu0 %2523 }
 0x8c9   : > { %v2530_v35 = vmul.f32 0.03125, %v2524_v30 }
 0x8cb   : > { %v2534_v36 = vsub.f32 %v2530_v35, %v2532_v34  ;;  %v1333_v37 = vpop.permute.xlu1 %1332 }
 0x8cc   : > { %1336 = vst.msk [vmem:[#allocation4 + $0x18] sm:$0xff] %vm1101_vm3, %v1333_v37  ;;  %v2527_v38 = vpop.xlane.xlu0 %2526 }
 0x8cd   : > { %v2538_v31 = vadd.f32 1e-05, %v2534_v36  ;;  %v2531_v40 = vmul.f32 0.03125, %v2527_v38 }
 0x8cf   : > { %5014 = vrsqrt.f32 %v2538_v31  ;;  %v2535_v41 = vsub.f32 %v2531_v40, %v2533_v39  ;;  %v2687_v42 = vld [vmem:[#allocation4 + $0x10] sm:$0xff] }
 0x8d0   : > { %4529 = vmatprep.subr.msk.mxu0 %vm1101_vm3, %v2687_v42  ;;  %v1323_v43 = vpop.permute.xlu0 %1322 }
 0x8d1   : > { %v2539_v44 = vadd.f32 1e-05, %v2535_v41  ;;  %1326 = vst.msk [vmem:[#allocation4 + $0x8] sm:$0xff] %vm1101_vm3, %v1323_v43 }
 0x8d3   : > { %5016 = vrsqrt.f32 %v2539_v44  ;;  %v2688_v58 = vld [vmem:[#allocation4 + $0x18] sm:$0xff] }
 0x8d8   : > { %v2686_v46 = vld [vmem:[#allocation4 + $0x8] sm:$0xff] }
 0x8d9   : > { %v5015_v47 = vpop.eup %5014  ;;  %4524 = vmatprep.subr.msk.mxu1 %vm1101_vm3, %v2686_v46 }
 0x8da   : > { %v2542_v49 = vmul.f32 %v5015_v47, %v2536_v45 }
 0x8dc   : > { %v2551_v52 = vmul.f32 %v4223_v48, %v2542_v49 }
 0x8dd   : > { %v5017_v53 = vpop.eup %5016 }
 0x8de   : > { %v2543_v54 = vmul.f32 %v5017_v53, %v2537_v51  ;;  %v2560_v55 = vadd.f32 %v4224_v50, %v2551_v52 }
 0x8e0   : > { %v2552_v56 = vmul.f32 %v4223_v48, %v2543_v54  ;;  %4516 = vmatprep.mubr.msk.f32.mxu1 %vm967_vm0, %v2560_v55 }
 0x8e2   : > { %v2561_v57 = vadd.f32 %v4224_v50, %v2552_v56 }
 0x8e4   : > { %4517 = vmatmul.mubr.msk.f32.vlgmr.msra.gmra.mrb[10].mxu1 %vm967_vm0, %v2561_v57 }
 0x8e5   : > { %4525 = vmatpush3.xpose.msk.msra.mxu1 %vm1101_vm3, %v2686_v46 }
 0x8e6   : > { %4534 = vmatprep.subr.msk.mxu1 %vm1101_vm3, %v2688_v58 }
 0x9b7   : > { %v4518_v59 = vpop.f32.mrb[10].mxu1 }
 0x9b8   : > { %v2648_v60 = vmul.f32 0.35355338, %v4518_v59  ;;  %v2638_v61 = vpop.f32.mrb[11].mxu1 }
 0x9b9   : > { %v2647_v62 = vmul.f32 0.35355338, %v2638_v61 }
 0x9ba   : > { %2650 = vst.msk [vmem:[#allocation6 + $0x8] sm:$0xff] %vm1101_vm3, %v2648_v60  ;;  %2655 = vrot.lane.b32.xlu0 %v2648_v60, %s6810_s21 }
 0x9bb   : > { %2649 = vst.msk [vmem:[#allocation6] sm:$0xff] %vm1101_vm3, %v2647_v62  ;;  %2653 = vrot.lane.b32.xlu1 %v2647_v62, %s6810_s21 }
 0x9be   : > { %2663 = vrot.lane.b32.xlu0 %v2648_v60, %s5584_s10 }
 0x9bf   : > { %2661 = vrot.lane.b32.xlu1 %v2647_v62, %s5584_s10 }
 0x9c1   : > { %v2678_v2 = vld [vmem:[#allocation6 + $0x8] sm:$0xff] }
 0x9c2   : > { %2671 = vrot.lane.b32.xlu0 %v2648_v60, %s6811_s4  ;;  %v2677_v63 = vld [vmem:[#allocation6] sm:$0xff] }
 0x9c3   : > { %2669 = vrot.lane.b32.xlu1 %v2647_v62, %s6811_s4  ;;  %4521 = vmatprep.mubr.msk.f32.mxu0 %vm1101_vm3, %v2677_v63 }
 0x9c4   : > { %4522 = vmatmul.mubr.msk.f32.vlgmr.msra.gmra.mrb[18].mxu0 %vm1101_vm3, %v2678_v2 }
 0x9c5   : > { %4530 = vmatpush3.xpose.msk.msra.mxu0 %vm1101_vm3, %v2687_v42 }
 0x9c6   : > { %4539 = vmatprep.subr.mxu0 %v3113_v3 }
 0xa2c   : > { %v2656_v4 = vpop.permute.xlu0 %2655 }
 0xa2d   : > { %2660 = vst.msk [vmem:[#allocation6 + $0x18] sm:$0xff] %vm1101_vm3, %v2656_v4  ;;  %v2654_v5 = vpop.permute.xlu1 %2653 }
 0xa2e   : > { %2659 = vst.msk [vmem:[#allocation6 + $0x10] sm:$0xff] %vm1101_vm3, %v2654_v5 }
 0xa30   : > { %v2664_v6 = vpop.permute.xlu0 %2663 }
 0xa31   : > { %2668 = vst.msk [vmem:[#allocation6 + $0x28] sm:$0xff] %vm1101_vm3, %v2664_v6  ;;  %v2662_v7 = vpop.permute.xlu1 %2661 }
 0xa32   : > { %2667 = vst.msk [vmem:[#allocation6 + $0x20] sm:$0xff] %vm1101_vm3, %v2662_v7 }
 0xa34   : > { %v2672_v8 = vpop.permute.xlu0 %2671  ;;  %v2680_v11 = vld [vmem:[#allocation6 + $0x18] sm:$0xff] }
 0xa35   : > { %2676 = vst.msk [vmem:[#allocation6 + $0x38] sm:$0xff] %vm1101_vm3, %v2672_v8  ;;  %v2670_v9 = vpop.permute.xlu1 %2669  ;;  %v2679_v10 = vld [vmem:[#allocation6 + $0x10] sm:$0xff] }
 0xa36   : > { %2675 = vst.msk [vmem:[#allocation6 + $0x30] sm:$0xff] %vm1101_vm3, %v2670_v9  ;;  %4526 = vmatprep.mubr.msk.f32.mxu1 %vm1101_vm3, %v2679_v10 }
 0xa37   : > { %4527 = vmatmul.mubr.msk.f32.vlgmr.msra.gmra.mrb[12].mxu1 %vm1101_vm3, %v2680_v11 }
 0xa38   : > { %4535 = vmatpush3.xpose.msk.msra.mxu1 %vm1101_vm3, %v2688_v58  ;;  %v2682_v13 = vld [vmem:[#allocation6 + $0x28] sm:$0xff] }
 0xa39   : > { %v2681_v12 = vld [vmem:[#allocation6 + $0x20] sm:$0xff] }
 0xa3a   : > { %4531 = vmatprep.mubr.msk.f32.mxu0 %vm1101_vm3, %v2681_v12 }
 0xa3b   : > { %4532 = vmatmul.mubr.msk.f32.vlgmr.msra.gmra.mrb[20].mxu0 %vm1101_vm3, %v2682_v13 }
 0xa3c   : > { %4540 = vmatpush3.msra.mxu0 %v3113_v3  ;;  %v2684_v17 = vld [vmem:[#allocation6 + $0x38] sm:$0xff] }
 0xa3d   : > { %v2683_v16 = vld [vmem:[#allocation6 + $0x30] sm:$0xff] }
 0xa3e   : > { %4536 = vmatprep.mubr.msk.f32.mxu1 %vm1101_vm3, %v2683_v16 }
 0xa3f   : > { %4537 = vmatmul.mubr.msk.f32.vlgmr.msra.gmra.mrb[14].mxu1 %vm1101_vm3, %v2684_v17 }
 0xa97   : > { %v4523_v18 = vpop.f32.mrb[18].mxu0 }
 0xa98   : > { %v2764_v19 = vpop.f32.mrb[19].mxu0  ;;  %v3028_v1 = vsel %vm1101_vm3, %v4523_v18, -inf }
 0xa99   : > { %3029 = vmax.xlane.f32.xlu0 %v3028_v1  ;;  %v3025_v0 = vsel %vm1101_vm3, %v2764_v19, -inf }
 0xa9a   : > { %3026 = vmax.xlane.f32.xlu1 %v3025_v0 }
 0xb0a   : > { %v4528_v20 = vpop.f32.mrb[12].mxu1 }
 0xb0b   : > { %v2848_v21 = vpop.f32.mrb[13].mxu1  ;;  %v3034_v22 = vsel %vm1101_vm3, %v4528_v20, -inf }
 0xb0c   : > { %3035 = vmax.xlane.f32.xlu0 %v3034_v22  ;;  %v3031_v24 = vsel %vm1101_vm3, %v2848_v21, -inf }
 0xb0e   : > { %v4533_v25 = vpop.f32.mrb[20].mxu0 }
 0xb0f   : > { %v2932_v23 = vpop.f32.mrb[21].mxu0  ;;  %v3040_v29 = vsel %vm1101_vm3, %v4533_v25, -inf }
 0xb10   : > { %3032 = vmax.xlane.f32.xlu0 %v3031_v24  ;;  %v3037_v26 = vsel %vm1101_vm3, %v2932_v23, -inf }
 0xb11   : > { %3038 = vmax.xlane.f32.xlu1 %v3037_v26 }
 0xb12   : > { %v4538_v28 = vpop.f32.mrb[14].mxu1 }
 0xb13   : > { %v3016_v27 = vpop.f32.mrb[15].mxu1  ;;  %v3046_v32 = vsel %vm1101_vm3, %v4538_v28, -inf }
 0xb14   : > { %3041 = vmax.xlane.f32.xlu0 %v3040_v29  ;;  %v3043_v30 = vsel %vm1101_vm3, %v3016_v27, -inf }
 0xb15   : > { %3044 = vmax.xlane.f32.xlu1 %v3043_v30 }
 0xb18   : > { %3047 = vmax.xlane.f32.xlu0 %v3046_v32 }
 0xb26   : > { %1411 = vrot.lane.b32.xlu1 %v6289_v33, %s6810_s21  ;;  %v3030_v34 = vpop.xlane.xlu0 %3029  ;;  %s6814_s21 = smov 24  }
 0xb27   : > { %v3050_v35 = vsub.f32 %v4523_v18, %v3030_v34  ;;  %v3027_v37 = vpop.xlane.xlu1 %3026 }
 0xb28   : > { %v3049_v38 = vsub.f32 %v2764_v19, %v3027_v37 }
 0xb29   : > { %v3059_v36 = vmul.f32 1.442695, %v3050_v35 }
 0xb2a   : > { %v3057_v40 = vmul.f32 1.442695, %v3049_v38 }
 0xb2b   : > { %5018 = vpow2.f32 %v3059_v36 }
 0xb2c   : > { %5020 = vpow2.f32 %v3057_v40 }
 0xb35   : > { %v6504_v39 = vpop.eup %5018 }
 0xb36   : > { %v3076_v31 = vsel %vm1101_vm3, %v6504_v39, 0.0  ;;  %v5021_v41 = vpop.eup %5020 }
 0xb37   : > { %3077 = vadd.xlane.f32.xlu0 %v3076_v31  ;;  %v3073_v42 = vsel %vm1101_vm3, %v5021_v41, 0.0 }
 0xb4a   : > { %3074 = vadd.xlane.f32.xlu1 %v3073_v42 }
 0xb99   : > { %v3036_v43 = vpop.xlane.xlu0 %3035 }
 0xb9a   : > { %v3052_v44 = vsub.f32 %v4528_v20, %v3036_v43 }
 0xb9c   : > { %v3063_v45 = vmul.f32 1.442695, %v3052_v44 }
 0xb9d   : > { %v3033_v46 = vpop.xlane.xlu0 %3032 }
 0xb9e   : > { %5022 = vpow2.f32 %v3063_v45  ;;  %v3051_v47 = vsub.f32 %v2848_v21, %v3033_v46  ;;  %v3039_v48 = vpop.xlane.xlu1 %3038  ;;  %v3475_v45 = vld [vmem:[#allocation25] sm:$0xff]  ;;  %v3476_v46 = vld [vmem:[#allocation25 + $0x8] sm:$0xff] }
 0xb9f   : > { %v3053_v49 = vsub.f32 %v2932_v23, %v3039_v48  ;;  %v3477_v48 = vld [vmem:[#allocation25 + $0x10] sm:$0xff] }
 0xba0   : > { %v3061_v50 = vmul.f32 1.442695, %v3051_v47  ;;  %v4713_v47 = vpack.c.bf16 %v3476_v46, %v3475_v45  ;;  %v4251_v45 = vld [vmem:[#allocation19] ss:$0 sm:$0xff] }
 0xba1   : > { %v3065_v51 = vmul.f32 1.442695, %v3053_v49  ;;  %v3042_v52 = vpop.xlane.xlu0 %3041  ;;  %v3478_v49 = vld [vmem:[#allocation25 + $0x18] sm:$0xff] }
 0xba2   : > { %5024 = vpow2.f32 %v3061_v50  ;;  %v3054_v53 = vsub.f32 %v4533_v25, %v3042_v52  ;;  %v3045_v54 = vpop.xlane.xlu1 %3044  ;;  %v4717_v50 = vpack.c.bf16 %v3478_v49, %v3477_v48 }
 0xba3   : > { %v3055_v55 = vsub.f32 %v3016_v27, %v3045_v54  ;;  %5026 = vpow2.f32 %v3065_v51 }
 0xba4   : > { %v3067_v56 = vmul.f32 1.442695, %v3054_v53 }
 0xba5   : > { %v3069_v57 = vmul.f32 1.442695, %v3055_v55  ;;  %v3048_v58 = vpop.xlane.xlu0 %3047 }
 0xba6   : > { %5028 = vpow2.f32 %v3067_v56  ;;  %v3056_v59 = vsub.f32 %v4538_v28, %v3048_v58  ;;  %v1412_v60 = vpop.permute.xlu1 %1411 }
 0xba7   : > { %1415 = vst.msk [vmem:[#allocation5 + $0x8] sm:$0xff] %vm1101_vm3, %v1412_v60  ;;  %5030 = vpow2.f32 %v3069_v57 }
 0xba8   : > { %v5023_v61 = vpop.eup %5022  ;;  %v3071_v62 = vmul.f32 1.442695, %v3056_v59 }
 0xba9   : > { %v3082_v63 = vsel %vm1101_vm3, %v5023_v61, 0.0 }
 0xbaa   : > { %5032 = vpow2.f32 %v3071_v62  ;;  %3083 = vadd.xlane.f32.xlu0 %v3082_v63  ;;  %v4247_v63 = vld [vmem:[#allocation26] ss:$0 sm:$0xff] }
 0xbac   : > { %v5025_v2 = vpop.eup %5024 }
 0xbad   : > { %v3079_v3 = vsel %vm1101_vm3, %v5025_v2, 0.0  ;;  %v5027_v4 = vpop.eup %5026 }
 0xbae   : > { %3080 = vadd.xlane.f32.xlu1 %v3079_v3  ;;  %v3114_v5 = vld [vmem:[#allocation5 + $0x8] sm:$0xff]  ;;  %v3085_v7 = vsel %vm1101_vm3, %v5027_v4, 0.0 }
 0xbaf   : > { %4544 = vmatprep.subr.mxu1 %v3114_v5 }
 0xbb0   : > { %v5029_v6 = vpop.eup %5028  ;;  %4545 = vmatpush3.msra.mxu1 %v3114_v5 }
 0xbb1   : > { %v3088_v8 = vsel %vm1101_vm3, %v5029_v6, 0.0  ;;  %v5031_v9 = vpop.eup %5030 }
 0xbb2   : > { %3086 = vadd.xlane.f32.xlu1 %v3085_v7  ;;  %3089 = vadd.xlane.f32.xlu0 %v3088_v8  ;;  %v3091_v11 = vsel %vm1101_vm3, %v5031_v9, 0.0 }
 0xbb4   : > { %v5033_v10 = vpop.eup %5032 }
 0xbb5   : > { %v3094_v12 = vsel %vm1101_vm3, %v5033_v10, 0.0 }
 0xbb6   : > { %3092 = vadd.xlane.f32.xlu1 %v3091_v11  ;;  %3095 = vadd.xlane.f32.xlu0 %v3094_v12  ;;  %v3617_v12 = vld [vmem:[#allocation28] sm:$0xff] }
 0xbc4   : > { %v3078_v13 = vpop.xlane.xlu0 %3077 }
 0xbc5   : > { %5034 = vrcp.f32 %v3078_v13  ;;  %v3618_v13 = vld [vmem:[#allocation28 + $0x8] sm:$0xff] }
 0xbc7   : > { %1421 = vrot.lane.b32.xlu1 %v6289_v33, %s6811_s4  ;;  %s5589_s4 = smov [#allocation31]  }
 0xbcc   : > { %1416 = vrot.lane.b32.xlu0 %v6289_v33, %s5584_s10  ;;  %s6813_s10 = smov 16  }
 0xbcf   : > { %v5035_v17 = vpop.eup %5034 }
 0xbd0   : > { %v3106_v1 = vmul.f32 %v5035_v17, %v6504_v39  ;;  %v4721_v17 = vpack.c.bf16 %v3618_v13, %v3617_v12  ;;  %v4255_v12 = vld [vmem:[%s6816_s3] ss:$0 sm:$0xff]  ;;  %s4181_s3 = sshll.u32 %s6148_s16, 4 }
 0xbd1   : > { %s954_s8 = scalar_lea.vmem [#allocation31], %s4181_s3 }
 0xbd2   : > { %s3925_s0 = sshll.u32 %s954_s8, 4  ;;  %s6635_s0 = int_to_ptr.vmem [resolvable:$true] %s3925_s0 }
 0xbd3   : > { %s5452_s3 = scalar_lea.vmem %s6635_s0, 256 }
 0xbd4   : > { %p5453_p2 = scmp.ne.s32.totalorder %s6635_s0, %s5452_s3 }
 0xbd6   : > { %p5454_p7 = pnand %p5453_p2, %p6820_p5 }
 0xbd7   : > { %v3075_v16 = vpop.xlane.xlu1 %3074 }
 0xbd8   : > { %5036 = vrcp.f32 %v3075_v16  ;;  %v3709_v16 = vld [vmem:[#allocation29] sm:$0xff]  ;;  %p5455_p11 = pneg %p5454_p7 }
 0xbe2   : > { %v5037_v18 = vpop.eup %5036 }
 0xbe3   : > { %v3105_v19 = vmul.f32 %v5037_v18, %v5021_v41  ;;  %v3710_v18 = vld [vmem:[#allocation29 + $0x8] sm:$0xff] }
 0xbe5   : > { %4541 = vmatprep.mubr.msk.f32.mxu0 %vm1101_vm3, %v3105_v19  ;;  %v3619_v19 = vld [vmem:[#allocation28 + $0x10] sm:$0xff] }
 0xbe6   : > { %4542 = vmatmul.mubr.msk.f32.vlgmr.msra.gmra.mrb[22].mxu0 %vm1101_vm3, %v3106_v1  ;;  %v3620_v1 = vld [vmem:[#allocation28 + $0x18] sm:$0xff] }
 0xc37   : > { %v3084_v0 = vpop.xlane.xlu0 %3083 }
 0xc38   : > { %5038 = vrcp.f32 %v3084_v0  ;;  %v4729_v0 = vpack.c.bf16 %v3710_v18, %v3709_v16 }
 0xc3b   : > { %v3081_v20 = vpop.xlane.xlu1 %3080 }
 0xc3c   : > { %5040 = vrcp.f32 %v3081_v20  ;;  %v4725_v20 = vpack.c.bf16 %v3620_v1, %v3619_v19 }
 0xc3f   : > { %v3087_v21 = vpop.xlane.xlu1 %3086  ;;  %v3090_v22 = vpop.xlane.xlu0 %3089 }
 0xc40   : > { %5042 = vrcp.f32 %v3087_v21  ;;  %v3711_v21 = vld [vmem:[#allocation29 + $0x10] sm:$0xff] }
 0xc41   : > { %5044 = vrcp.f32 %v3090_v22  ;;  %v3712_v22 = vld [vmem:[#allocation29 + $0x18] sm:$0xff] }
 0xc42   : > { %v5039_v23 = vpop.eup %5038 }
 0xc43   : > { %v3093_v33 = vpop.xlane.xlu1 %3092  ;;  %v3096_v25 = vpop.xlane.xlu0 %3095  ;;  %v3108_v29 = vmul.f32 %v5039_v23, %v5023_v61  ;;  %v3808_v23 = vld [vmem:[%s6815_s23 + $0x8] sm:$0xff] }
 0xc44   : > { %5046 = vrcp.f32 %v3093_v33  ;;  %v4733_v33 = vpack.c.bf16 %v3712_v22, %v3711_v21  ;;  %v4252_v22 = vld [vmem:[%s6817_s1] ss:$0 sm:$0xff] }
 0xc45   : > { %5048 = vrcp.f32 %v3096_v25  ;;  %v3807_v25 = vld [vmem:[%s6815_s23] sm:$0xff] }
 0xc46   : > { %v5041_v24 = vpop.eup %5040 }
 0xc47   : > { %v1422_v26 = vpop.permute.xlu1 %1421  ;;  %v1417_v28 = vpop.permute.xlu0 %1416  ;;  %v3107_v27 = vmul.f32 %v5041_v24, %v5025_v2  ;;  %v4737_v24 = vpack.c.bf16 %v3808_v23, %v3807_v25 }
 0xc48   : > { %1425 = vst.msk [vmem:[#allocation5 + $0x18] sm:$0xff] %vm1101_vm3, %v1422_v26  ;;  %1420 = vst.msk [vmem:[#allocation5 + $0x10] sm:$0xff] %vm1101_vm3, %v1417_v28 }
 0xc49   : > { %4546 = vmatprep.mubr.msk.f32.mxu1 %vm1101_vm3, %v3107_v27 }
 0xc4a   : > { %v5043_v30 = vpop.eup %5042  ;;  %4547 = vmatmul.mubr.msk.f32.vlgmr.msra.gmra.mrb[16].mxu1 %vm1101_vm3, %v3108_v29 }
 0xc4b   : > { %v3109_v32 = vmul.f32 %v5043_v30, %v5027_v4  ;;  %v5045_v34 = vpop.eup %5044 }
 0xc4c   : > { %v3110_v31 = vmul.f32 %v5045_v34, %v5029_v6 }
 0xc4d   : > { %4551 = vmatprep.mubr.msk.f32.mxu0 %vm1101_vm3, %v3109_v32 }
 0xc4e   : > { %v5047_v35 = vpop.eup %5046 }
 0xc4f   : > { %v5049_v36 = vpop.eup %5048  ;;  %v3115_v37 = vld [vmem:[#allocation5 + $0x10] sm:$0xff]  ;;  %v3116_v38 = vld [vmem:[#allocation5 + $0x18] sm:$0xff]  ;;  %v3111_v39 = vmul.f32 %v5047_v35, %v5031_v9 }
 0xc50   : > { %v3112_v40 = vmul.f32 %v5049_v36, %v5033_v10  ;;  %4549 = vmatprep.subr.mxu0 %v3115_v37  ;;  %4554 = vmatprep.subr.mxu1 %v3116_v38 }
 0xc51   : > { %4550 = vmatpush3.msra.mxu0 %v3115_v37  ;;  %4555 = vmatpush3.msra.mxu1 %v3116_v38 }
 0xc52   : > { %4556 = vmatprep.mubr.msk.f32.mxu1 %vm1101_vm3, %v3111_v39  ;;  %4552 = vmatmul.mubr.msk.f32.vlgmr.msra.gmra.mrb[24].mxu0 %vm1101_vm3, %v3110_v31 }
 0xc53   : > { %4557 = vmatmul.mubr.msk.f32.vlgmr.msra.gmra.mrb[18].mxu1 %vm1101_vm3, %v3112_v40  ;;  %4714 = vmatprep.subr.bf16.mxu0 %v4713_v47 }
 0xc54   : > { %4716 = vmatpush3.bf16.msra.mxu0 %v4713_v47  ;;  %4722 = vmatprep.subr.bf16.mxu1 %v4721_v17 }
 0xc55   : > { %4718 = vmatprep.subr.bf16.mxu0 %v4717_v50  ;;  %4724 = vmatpush3.bf16.msra.mxu1 %v4721_v17 }
 0xc56   : > { %4726 = vmatprep.subr.bf16.mxu1 %v4725_v20 }
 0xc58   : > { %4720 = vmatpush3.bf16.msra.mxu0 %v4717_v50 }
 0xc59   : > { %4730 = vmatprep.subr.bf16.mxu0 %v4729_v0  ;;  %4728 = vmatpush3.bf16.msra.mxu1 %v4725_v20 }
 0xc5a   : > { %4738 = vmatprep.subr.bf16.mxu1 %v4737_v24 }
 0xcb9   : > { %v4543_v41 = vpop.f32.mrb[22].mxu0 }
 0xcba   : > { %3442 = vst.msk [vmem:[#allocation7 + $0x8] sm:$0xff] %vm1101_vm3, %v4543_v41  ;;  %v3189_v42 = vpop.f32.mrb[23].mxu0 }
 0xcbb   : > { %3441 = vst.msk [vmem:[#allocation7] sm:$0xff] %vm1101_vm3, %v3189_v42 }
 0xd1d   : > { %v4548_v43 = vpop.f32.mrb[16].mxu1 }
 0xd1e   : > { %3447 = vrot.lane.b32.xlu1 %v4548_v43, %s6812_s12  ;;  %v3270_v44 = vpop.f32.mrb[17].mxu1  ;;  %v4250_v43 = vld [vmem:[#allocation17] ss:$0 sm:$0xff] }
 0xd25   : > { %v4553_v51 = vpop.f32.mrb[24].mxu0 }
 0xd26   : > { %v4558_v52 = vpop.f32.mrb[18].mxu1  ;;  %3457 = vrot.lane.b32.xlu1 %v4553_v51, %s6813_s10  ;;  %v3351_v53 = vpop.f32.mrb[25].mxu0  ;;  %v3809_v51 = vld [vmem:[%s6815_s23 + $0x10] sm:$0xff] }
 0xd27   : > { %v3432_v54 = vpop.f32.mrb[19].mxu1  ;;  %3455 = vrot.lane.b32.xlu0 %v3351_v53, %s6813_s10  ;;  %s5456_s10 = sshll.u32 %s5589_s4, 4  ;;  %s5457_s10 = int_to_ptr.vmem [resolvable:$false] %s5456_s10 }
 0xd28   : > { %p5459_p12 = scmp.lt.s32.totalorder %s6635_s0, %s5457_s10 }
 0xd2a   : > { %3445 = vrot.lane.b32.xlu1 %v3270_v44, %s6812_s12 }
 0xd2b   : > { %3465 = vrot.lane.b32.xlu0 %v3432_v54, %s6814_s21 }
 0xd2e   : > { %3467 = vrot.lane.b32.xlu1 %v4558_v52, %s6814_s21  ;;  %v3810_v52 = vld [vmem:[%s6815_s23 + $0x18] sm:$0xff]  ;;  %s6818_s21 = sld [smem:[#allocation62_spill]] }
 0xd90   : > { %v3448_v55 = vpop.permute.xlu1 %3447 }
 0xd91   : > { %3452 = vst.msk [vmem:[#allocation7 + $0x8] sm:$0xff] %vm2393_vm5, %v3448_v55  ;;  %v4741_v55 = vpack.c.bf16 %v3810_v52, %v3809_v51 }
 0xd98   : > { %v3458_v56 = vpop.permute.xlu1 %3457 }
 0xd99   : > { %3462 = vst.msk [vmem:[#allocation7 + $0x8] sm:$0xff] %vm2404_vm6, %v3458_v56  ;;  %v3456_v57 = vpop.permute.xlu0 %3455  ;;  %v3811_v56 = vld [vmem:[%s6815_s23 + $0x20] sm:$0xff] }
 0xd9c   : > { %v3446_v58 = vpop.permute.xlu1 %3445 }
 0xd9d   : > { %3451 = vst.msk [vmem:[#allocation7] sm:$0xff] %vm2393_vm5, %v3446_v58  ;;  %v3466_v59 = vpop.permute.xlu0 %3465 }
 0xd9e   : > { %3461 = vst.msk [vmem:[#allocation7] sm:$0xff] %vm2404_vm6, %v3456_v57  ;;  %v3812_v57 = vld [vmem:[%s6815_s23 + $0x28] sm:$0xff] }
 0xd9f   : > { %3471 = vst.msk [vmem:[#allocation7] sm:$0xff] %vm2415_vm7, %v3466_v59  ;;  %v4745_v58 = vpack.c.bf16 %v3812_v57, %v3811_v56  ;;  %v3813_v59 = vld [vmem:[%s6815_s23 + $0x30] sm:$0xff] }
 0xda0   : > { %v3468_v60 = vpop.permute.xlu1 %3467 }
 0xda1   : > { %3472 = vst.msk [vmem:[#allocation7 + $0x8] sm:$0xff] %vm2415_vm7, %v3468_v60  ;;  %v3814_v60 = vld [vmem:[%s6815_s23 + $0x38] sm:$0xff] }
 0xda6   : > { %v3473_v61 = vld [vmem:[#allocation7] sm:$0xff] }
 0xda7   : > { %4567 = vmatprep.mubr.msk.f32.mxu0 %vm967_vm0, %v3473_v61  ;;  %v4749_v61 = vpack.c.bf16 %v3814_v60, %v3813_v59 }
 0xda8   : > { %v3474_v62 = vld [vmem:[#allocation7 + $0x8] sm:$0xff] }
 0xda9   : > { %4568 = vmatmul.mubr.msk.f32.vlgmr.msra.gmra.mrb[26].mxu0 %vm967_vm0, %v3474_v62  ;;  %v3815_v62 = vld [vmem:[%s6815_s23 + $0x40] sm:$0xff] }
 0xdaa   : > { %4732 = vmatpush3.bf16.msra.mxu0 %v4729_v0 }
 0xdab   : > { %4734 = vmatprep.subr.bf16.mxu0 %v4733_v33 }
 0xdae   : > { %4736 = vmatpush3.bf16.msra.mxu0 %v4733_v33 }
 0xe7c   : > { %v4569_v2 = vpop.f32.mrb[26].mxu0 }
 0xe7d   : > { %v3564_v3 = vadd.f32 %v4569_v2, %v4247_v63  ;;  %v3558_v4 = vpop.f32.mrb[27].mxu0 }
 0xe7e   : > { %v3559_v5 = vadd.f32 %v4247_v63, %v3558_v4  ;;  %v3816_v63 = vld [vmem:[%s6815_s23 + $0x48] sm:$0xff]  ;;  %v3818_v4 = vld [vmem:[%s6815_s23 + $0x58] sm:$0xff] }
 0xe7f   : > { %v6548_v6 = vadd.f32 %v3564_v3, %v6426_v14  ;;  %v4753_v2 = vpack.c.bf16 %v3816_v63, %v3815_v62  ;;  %v3817_v3 = vld [vmem:[%s6815_s23 + $0x50] sm:$0xff] }
 0xe80   : > { %v6551_v7 = vadd.f32 %v3559_v5, %v6429_v15  ;;  %v4757_v5 = vpack.c.bf16 %v3818_v4, %v3817_v3 }
 0xe81   : > { %v3572_v8 = vsel %vm967_vm0, %v6548_v6, 0.0  ;;  %v3576_v14 = vmul.f32 %v6548_v6, %v6548_v6 }
 0xe82   : > { %3573 = vadd.xlane.f32.xlu1 %v3572_v8  ;;  %v3569_v9 = vsel %vm967_vm0, %v6551_v7, 0.0  ;;  %v3575_v10 = vmul.f32 %v6551_v7, %v6551_v7  ;;  %v3819_v8 = vld [vmem:[%s6815_s23 + $0x60] sm:$0xff] }
 0xe83   : > { %3570 = vadd.xlane.f32.xlu0 %v3569_v9  ;;  %v3580_v15 = vsel %vm967_vm0, %v3576_v14, 0.0  ;;  %v3820_v9 = vld [vmem:[%s6815_s23 + $0x68] sm:$0xff]  ;;  %v3822_v14 = vld [vmem:[%s6815_s23 + $0x78] sm:$0xff] }
 0xe84   : > { %v3577_v11 = vsel %vm967_vm0, %v3575_v10, 0.0  ;;  %v4761_v10 = vpack.c.bf16 %v3820_v9, %v3819_v8 }
 0xe87   : > { %3578 = vadd.xlane.f32.xlu0 %v3577_v11  ;;  %v3821_v11 = vld [vmem:[%s6815_s23 + $0x70] sm:$0xff] }
 0xe8b   : > { %3581 = vadd.xlane.f32.xlu0 %v3580_v15  ;;  %v4765_v15 = vpack.c.bf16 %v3822_v14, %v3821_v11 }
 0xf0f   : > { %v3574_v27 = vpop.xlane.xlu1 %3573 }
 0xf10   : > { %v3571_v26 = vpop.xlane.xlu0 %3570  ;;  %v3584_v30 = vmul.f32 0.03125, %v3574_v27 }
 0xf11   : > { %v3583_v28 = vmul.f32 0.03125, %v3571_v26 }
 0xf12   : > { %v3588_v37 = vmul.f32 %v3584_v30, %v3584_v30  ;;  %v3592_v46 = vsub.f32 %v6548_v6, %v3584_v30 }
 0xf13   : > { %v3587_v32 = vmul.f32 %v3583_v28, %v3583_v28  ;;  %v3591_v41 = vsub.f32 %v6551_v7, %v3583_v28 }
 0xf14   : > { %v3579_v29 = vpop.xlane.xlu0 %3578 }
 0xf15   : > { %v3585_v34 = vmul.f32 0.03125, %v3579_v29 }
 0xf17   : > { %v3589_v35 = vsub.f32 %v3585_v34, %v3587_v32 }
 0xf18   : > { %v3582_v36 = vpop.xlane.xlu0 %3581 }
 0xf19   : > { %v3593_v38 = vadd.f32 1e-05, %v3589_v35  ;;  %v3586_v39 = vmul.f32 0.03125, %v3582_v36  ;;  %v4258_v35 = vld [vmem:[%s6818_s21] ss:$0 sm:$0xff]  ;;  %s5458_s21 = scalar_lea.vmem %s5457_s10, 512 }
 0xf1a   : > { %p5460_p0 = scmp.lt.s32.totalorder %s5458_s21, %s5452_s3 }
 0xf1b   : > { %5050 = vrsqrt.f32 %v3593_v38  ;;  %v3590_v31 = vsub.f32 %v3586_v39, %v3588_v37 }
 0xf1c   : > { %p5461_p8 = por %p5460_p0, %p5459_p12 }
 0xf1d   : > { %v3594_v40 = vadd.f32 1e-05, %v3590_v31 }
 0xf1e   : > { %p5462_p9 = pnand %p5461_p8, %p5455_p11 }
 0xf1f   : > { %5052 = vrsqrt.f32 %v3594_v40 }
 0xf25   : > { %v5051_v42 = vpop.eup %5050 }
 0xf26   : > { %v3597_v44 = vmul.f32 %v5051_v42, %v3591_v41 }
 0xf28   : > { %v3606_v47 = vmul.f32 %v4250_v43, %v3597_v44 }
 0xf29   : > { %v5053_v48 = vpop.eup %5052 }
 0xf2a   : > { %v3598_v49 = vmul.f32 %v5053_v48, %v3592_v46  ;;  %v3615_v50 = vadd.f32 %v4251_v45, %v3606_v47 }
 0xf2c   : > { %v3607_v53 = vmul.f32 %v4250_v43, %v3598_v49  ;;  %4578 = vmatprep.mubr.msk.f32.mxu1 %vm967_vm0, %v3615_v50  ;;  %4589 = vmatprep.mubr.msk.f32.mxu0 %vm967_vm0, %v3615_v50 }
 0xf2e   : > { %v3616_v54 = vadd.f32 %v4251_v45, %v3607_v53 }
 0xf30   : > { %4579 = vmatmul.mubr.msk.f32.vlgmr.msra.gmra.mrb[20].mxu1 %vm967_vm0, %v3616_v54  ;;  %4590 = vmatmul.mubr.msk.f32.vlgmr.msra.gmra.mrb[28].mxu0 %vm967_vm0, %v3616_v54 }
 0xf31   : > { %4740 = vmatpush3.bf16.msra.mxu1 %v4737_v24 }
 0xf32   : > { %4742 = vmatprep.subr.bf16.mxu1 %v4741_v55 }
 0xf35   : > { %4744 = vmatpush3.bf16.msra.mxu1 %v4741_v55 }
 0xf36   : > { %4746 = vmatprep.subr.bf16.mxu1 %v4745_v58 }
 0xf39   : > { %4748 = vmatpush3.bf16.msra.mxu1 %v4745_v58 }
 0xf3a   : > { %4750 = vmatprep.subr.bf16.mxu1 %v4749_v61 }
 0xf3d   : > { %4752 = vmatpush3.bf16.msra.mxu1 %v4749_v61 }
 0xf3e   : > { %4754 = vmatprep.subr.bf16.mxu1 %v4753_v2 }
 0xf41   : > { %4756 = vmatpush3.bf16.msra.mxu1 %v4753_v2 }
 0xf42   : > { %4758 = vmatprep.subr.bf16.mxu1 %v4757_v5 }
 0xf45   : > { %4760 = vmatpush3.bf16.msra.mxu1 %v4757_v5 }
 0xf46   : > { %4762 = vmatprep.subr.bf16.mxu1 %v4761_v10 }
 0xf49   : > { %4764 = vmatpush3.bf16.msra.mxu1 %v4761_v10 }
 0xf4a   : > { %4766 = vmatprep.subr.bf16.mxu1 %v4765_v15 }
 0xf4d   : > { %4768 = vmatpush3.bf16.msra.mxu1 %v4765_v15 }
0x1003   : > { %v4580_v13 = vpop.f32.mrb[20].mxu1  ;;  %v4591_v16 = vpop.f32.mrb[28].mxu0 }
0x1004   : > { %v3792_v17 = vadd.f32 %v4591_v16, %v4255_v12  ;;  %v3700_v18 = vpop.f32.mrb[21].mxu1  ;;  %v3786_v19 = vpop.f32.mrb[29].mxu0  ;;  %v3706_v28 = vadd.f32 %v4580_v13, %v4252_v22 }
0x1005   : > { %v3787_v1 = vadd.f32 %v4255_v12, %v3786_v19  ;;  %v3701_v29 = vadd.f32 %v4252_v22, %v3700_v18 }
0x1006   : > { %v3798_v0 = vmul.f32 0.70710677, %v3792_v17  ;;  %v3796_v25 = vmul.f32 0.5, %v3792_v17 }
0x1007   : > { %v3797_v20 = vmul.f32 0.70710677, %v3787_v1  ;;  %v3795_v24 = vmul.f32 0.5, %v3787_v1 }
0x1008   : > { %5054 = verf.f32 %v3798_v0 }
0x1009   : > { %5056 = verf.f32 %v3797_v20 }
0x1012   : > { %v5055_v21 = vpop.eup %5054 }
0x1013   : > { %v5057_v33 = vpop.eup %5056  ;;  %v3802_v23 = vadd.f32 1.0, %v5055_v21 }
0x1014   : > { %v3801_v26 = vadd.f32 1.0, %v5057_v33 }
0x1015   : > { %v3804_v27 = vmul.f32 %v3802_v23, %v3796_v25 }
0x1016   : > { %v3803_v30 = vmul.f32 %v3801_v26, %v3795_v24 }
0x1017   : > { %v3806_v32 = vmul.f32 %v3804_v27, %v3706_v28 }
0x1018   : > { %v3805_v34 = vmul.f32 %v3803_v30, %v3701_v29 }
0x101a   : > { %4624 = vmatprep.mubr.f32.mxu1 %v3805_v34 }
0x101b   : > { %4625 = vmatmul.mubr.f32.vlgmr.msra.gmra.mrb[22].mxu1 %v3806_v32 }
0x10ee   : > { %v4626_v36 = vpop.f32.mrb[22].mxu1 }
0x10ef   : > { %v3902_v37 = vadd.f32 %v4626_v36, %v4258_v35  ;;  %v3896_v38 = vpop.f32.mrb[23].mxu1 }
0x10f0   : > { %v3897_v39 = vadd.f32 %v4258_v35, %v3896_v38 }
0x10f1   : > { %v3906_v31 = vadd.f32 %v3902_v37, %v6548_v6 }
0x10f2   : > { %v3905_v40 = vadd.f32 %v3897_v39, %v6551_v7 }
0x10f3   : > { %3908 = vst.msk [vmem:[%s954_s8 + $0x8] sm:$0xff] %vm967_vm0, %v3906_v31 }
0x10f4   : > { %3907 = vst.msk [vmem:[%s954_s8] sm:$0xff] %vm967_vm0, %v3905_v40 }
0x10f5   : > { %5465 = shalt.err (!%p5462_p9)
}
0x10f6   : > { %s5466_s14 = scalar_lea.hbm %s6632_s15, 256  ;;  %s5470_s1 = scalar_lea.hbm %s6819_s7, 512 }
0x10f7   : > { %p5467_p1 = scmp.ne.s32.totalorder %s6632_s15, %s5466_s14  ;;  %p5471_p4 = scmp.lt.u32.totalorder %s6632_s15, %s6819_s7 }
0x10f8   : > { %p5472_p13 = scmp.lt.u32.totalorder %s5470_s1, %s5466_s14  ;;  %p5474_p2 = scmp.lt.u32.totalorder %s5466_s14, %s6632_s15 }
0x10f9   : > { %p5468_p3 = pnand %p5467_p1, %p6820_p5 }
0x10fa   : > { %p5473_p6 = por %p5472_p13, %p5471_p4 }
0x10fb   : > { %p5469_p10 = pneg %p5468_p3 }
0x10fc   : > { %p5475_p7 = por %p5474_p2, %p5473_p6 }
0x10fe   : > { %p5476_p11 = pnand %p5475_p7, %p5469_p10 }
0x1100   : > { %5479 = shalt.err (!%p5476_p11)
}
0x1101   : > { %s5590_s3 = smov 128  }
0x1102   : > { %4823 = dma.vmem_to_hbm [thread:$0]  (%p6820_p5), %s6635_s0, 256, %s6632_s15, %s3910_s28, %s5590_s3, %s5590_s3, %s6812_s12  }
0x1103 PF: > { %s3940_s21 = sand.u32 1, %s5542_s5   ;;  %p6821_p12 = scmp.ne.s32.totalorder %s6797_s9, 0 }
0x1104   : > { %p6822_p0 = scmp.ge.s32.totalorder %s5562_s2, 2  ;;  %s3941_s14 = scalar_lea.sflag [#allocation10], %s3940_s21 }
0x1106   : > { %p4870_p8 = pnand %p6822_p0, %p6821_p12 }
0x1108   : > { %5537 = dma.done.wait (!%p4870_p8), %s3941_s14, 256  }
0x1109   : > { %5539 = vsyncadd (!%p4870_p8), %s3941_s14, 4294967040  ;;  %s47_s2 = sadd.s32 1, %s5562_s2   ;;  %s6823_s5 = smov %s5546_s26 }
0x110a   : > { %p44_p9 = scmp.ge.s32.totalorder %s47_s2, 4   ;;  %s6824_s26 = smov %s5550_s27 }
0x110b   : > { %s6825_s27 = smov %s6099_s11  ;;  %s6826_s28 = smov %s5558_s6 }
0x110c   : > { %s6827_s6 = smov %s6829_s25  ;;  %46 = sbr.rel (!%p44_p9) target bundleno = 37 (0x25), region = 236 }
0x1113   :  { %3946 = vsyncpa [#allocation9], 1 }
0x1114   :  { %3948 = vsyncpa [#allocation9 + $0x1], 1 }
0x1115   :  { %3949 = vsyncpa [#allocation12], 1 }
0x1116   :  { %3950 = vsyncpa [#allocation15], 1 }
0x1117   :  { %3951 = vsyncpa [#allocation18], 1 }
0x1118   :  { %3952 = vsyncpa [#allocation21], 1 }
0x1119   :  { %3953 = vsyncpa [#allocation24], 1 }
0x111a   :  { %3954 = vsyncpa [#allocation27], 1 }
0x111b   :  { %3955 = vsyncpa [#allocation30], 1 }
0x111c   :  { %3956 = vsyncpa [#allocation10], 1 }
0x111d   :  { %3958 = vsyncpa [#allocation10 + $0x1], 1 }

// kernel: tpu_custom_call.1
= control target key start
LH: loop header
LB: loop body
LE: loop exit
PB: predicated region body
PF: predicated region fallthrough
CT: control target
= control target key end

     0   :  { %s6687_s0 = inlined_call_operand.vmem [shape: f32[2,16,32], index: 0, kind: input, shape index: {}]   ;;  %s6688_s1 = inlined_call_operand.hbm [shape: f32[2,8,16], index: 1, kind: input, shape index: {}]   ;;  %s6689_s2 = inlined_call_operand.hbm [shape: f32[1,32], index: 2, kind: input, shape index: {}]   ;;  %s6690_s3 = inlined_call_operand.hbm [shape: f32[1,32], index: 3, kind: input, shape index: {}]   ;;  %s6691_s4 = inlined_call_operand.hbm [shape: f32[1,32], index: 4, kind: input, shape index: {}]   ;;  %s6692_s5 = inlined_call_operand.hbm [shape: f32[1,32], index: 5, kind: input, shape index: {}]   ;;  %s6693_s6 = inlined_call_operand.hbm [shape: f32[1,32], index: 6, kind: input, shape index: {}]   ;;  %s6694_s7 = inlined_call_operand.hbm [shape: f32[1,32], index: 7, kind: input, shape index: {}]   ;;  %s6695_s8 = inlined_call_operand.vmem [shape: f32[32,32], index: 8, kind: input, shape index: {}]   ;;  %s6696_s9 = inlined_call_operand.vmem [shape: f32[32,32], index: 9, kind: input, shape index: {}]   ;;  %s6697_s10 = inlined_call_operand.vmem [shape: f32[32,32], index: 10, kind: input, shape index: {}]   ;;  %s6698_s11 = inlined_call_operand.vmem [shape: f32[32,32], index: 11, kind: input, shape index: {}]   ;;  %s6699_s12 = inlined_call_operand.hbm [shape: f32[1,32], index: 12, kind: input, shape index: {}]   ;;  %s6700_s13 = inlined_call_operand.vmem [shape: f32[32,32], index: 13, kind: input, shape index: {}]   ;;  %s6701_s14 = inlined_call_operand.hbm [shape: f32[16,32], index: 14, kind: input, shape index: {}]   ;;  %s6702_s15 = inlined_call_operand.hbm [shape: f32[16,32], index: 15, kind: input, shape index: {}]   ;;  %s6703_s16 = inlined_call_operand.hbm [shape: f32[32,32], index: 16, kind: input, shape index: {}]   ;;  %s6704_s17 = inlined_call_operand.hbm [shape: f32[1,32], index: 17, kind: input, shape index: {}]   ;;  %s6705_s18 = inlined_call_operand.hbm [shape: f32[32,128], index: 18, kind: input, shape index: {}]   ;;  %s6706_s19 = inlined_call_operand.vmem [shape: f32[1,128], index: 19, kind: input, shape index: {}]   ;;  %s6707_s20 = inlined_call_operand.hbm [shape: f32[32,128], index: 20, kind: input, shape index: {}]   ;;  %s6708_s21 = inlined_call_operand.vmem [shape: f32[1,128], index: 21, kind: input, shape index: {}]   ;;  %s6709_s22 = inlined_call_operand.vmem [shape: f32[128,32], index: 22, kind: input, shape index: {}]   ;;  %s6710_s23 = inlined_call_operand.vmem [shape: f32[1,32], index: 23, kind: input, shape index: {}]   ;;  %s6711_s24 = inlined_call_operand.hbm [shape: f32[2,16,32], index: 24, kind: output, shape index: {}]  }
   0x1   :  { %6752 = sst [smem:[#allocation41_spill]] %s6687_s0 }
   0x2   :  { %6753 = sst [smem:[#allocation42_spill]] %s6688_s1 }
   0x3   :  { %6754 = sst [smem:[#allocation43_spill]] %s6689_s2 }
   0x4   :  { %6755 = sst [smem:[#allocation44_spill]] %s6690_s3 }
   0x5   :  { %6756 = sst [smem:[#allocation45_spill]] %s6691_s4 }
   0x6   :  { %6757 = sst [smem:[#allocation46_spill]] %s6692_s5 }
   0x7   :  { %6758 = sst [smem:[#allocation47_spill]] %s6693_s6 }
   0x8   :  { %6759 = sst [smem:[#allocation48_spill]] %s6694_s7 }
   0x9   :  { %6760 = sst [smem:[#allocation49_spill]] %s6695_s8 }
   0xa   :  { %6761 = sst [smem:[#allocation50_spill]] %s6696_s9 }
   0xb   :  { %6762 = sst [smem:[#allocation51_spill]] %s6697_s10 }
   0xc   :  { %6763 = sst [smem:[#allocation52_spill]] %s6698_s11 }
   0xd   :  { %6764 = sst [smem:[#allocation53_spill]] %s6699_s12 }
   0xe   :  { %6765 = sst [smem:[#allocation54_spill]] %s6700_s13 }
   0xf   :  { %6766 = sst [smem:[#allocation55_spill]] %s6701_s14 }
  0x10   :  { %6767 = sst [smem:[#allocation56_spill]] %s6702_s15 }
  0x11   :  { %6768 = sst [smem:[#allocation57_spill]] %s6703_s16 }
  0x12   :  { %6769 = sst [smem:[#allocation58_spill]] %s6704_s17 }
  0x13   :  { %6770 = sst [smem:[#allocation59_spill]] %s6706_s19 }
  0x14   :  { %6771 = sst [smem:[#allocation60_spill]] %s6708_s21 }
  0x15   :  { %6772 = sst [smem:[#allocation61_spill]] %s6709_s22 }
  0x16   :  { %6773 = sst [smem:[#allocation62_spill]] %s6710_s23 }
  0x17   :  { %6774 = sst [smem:[#allocation63_spill]] %s6711_s24 }
  0x18   :  { %29 = vsyncpa [#allocation9], 0 }
  0x19   :  { %31 = vsyncpa [#allocation9 + $0x1], 0 }
  0x1a   :  { %32 = vsyncpa [#allocation12], 0 }
  0x1b   :  { %33 = vsyncpa [#allocation15], 0 }
  0x1c   :  { %34 = vsyncpa [#allocation18], 0 }
  0x1d   :  { %35 = vsyncpa [#allocation21], 0 }
  0x1e   :  { %36 = vsyncpa [#allocation24], 0 }
  0x1f   :  { %37 = vsyncpa [#allocation27], 0 }
  0x20   :  { %38 = vsyncpa [#allocation30], 0 }
  0x21   :  { %39 = vsyncpa [#allocation10], 0 }
  0x22   :  { %41 = vsyncpa [#allocation10 + $0x1], 0  ;;  %s5716_s5 = smov 0   ;;  %s5718_s26 = smov 0  }
  0x23   :  { %s5720_s27 = smov 0   ;;  %s5722_s28 = smov 0  }
  0x24   :  { %s5724_s6 = smov 0   ;;  %s5726_s2 = smov 0  }
  0x25 LB: > { %s6720_s29 = sadd.s32 4294967295, %s5562_s2   ;;  %p4149_p0 = scmp.ge.s32.totalorder %s5562_s2, 1  ;;  %s5562_s2 = sphi %s5726_s2, %s47_s2   ;;  %s5558_s6 = sphi %s5724_s6, %s6827_s6   ;;  %s5554_s28 = sphi %s5722_s28, %s6826_s28   ;;  %s5550_s27 = sphi %s5720_s27, %s6825_s27   ;;  %s5546_s26 = sphi %s5718_s26, %s6824_s26   ;;  %s5542_s5 = sphi %s5716_s5, %s6823_s5  }
  0x26   : > { %p5750_p1 = scmp.eq.s32.totalorder %s6720_s29, 0  ;;  %p606_p2 = scmp.lt.s32.totalorder %s5562_s2, 3 }
  0x27   : > { %s5564_s30 = smov [#allocation11]   ;;  %s5565_s25 = smov [#allocation14]  }
  0x28   : > { %s6775_s0 = scalar_select %p5750_p1, 1, 0 }
  0x29   : > { %p5755_p3 = pnand %p4149_p0, %p606_p2  ;;  %s619_s3 = sshll.u32 %s5564_s30, 4  ;;  %s620_s3 = int_to_ptr.vmem [resolvable:$true] %s619_s3 }
  0x2a   : > { %s641_s8 = sshll.u32 %s5565_s25, 4  ;;  %s5566_s1 = smov [#allocation17]   ;;  %s5768_s8 = int_to_ptr.vmem [resolvable:$true] %s641_s8 }
  0x2b   : > { %s6776_s7 = scalar_select %p5755_p3, 1, 0 }
  0x2c   : > { %p4825_p5 = pneg %p5755_p3  ;;  %s663_s29 = sshll.u32 %s5566_s1, 4  ;;  %s5770_s29 = int_to_ptr.vmem [resolvable:$true] %s663_s29 }
  0x2d   : > { %s6778_s23 = sld [smem:[#allocation43_spill]] }
  0x2e   : > { %p5764_p6 = pnand %p4825_p5, %p5750_p1 }
  0x30   : > { %p5780_p8 = pneg %p5764_p6 }
  0x33   : > { %s5058_s19 = scalar_lea.hbm %s6778_s23, 16 }
  0x34   : > { %p5059_p7 = scmp.ne.s32.totalorder %s6778_s23, %s5058_s19  ;;  %p5065_p11 = scmp.lt.u32.totalorder %s5058_s19, %s6778_s23 }
  0x36   : > { %p5061_p9 = pnand %p5780_p8, %p5059_p7 }
  0x38   : > { %p5062_p10 = pneg %p5061_p9 }
  0x3a   : > { %p5067_p12 = pnand %p5065_p11, %p5062_p10 }
  0x3c   : > { %5070 = shalt.err (!%p5067_p12)
}
  0x3d   : > { %s5071_s24 = scalar_lea.vmem %s620_s3, 16  ;;  %s5078_s21 = scalar_lea.vmem %s620_s3, 32 }
  0x3e   : > { %p5072_p13 = scmp.ne.s32.totalorder %s620_s3, %s5071_s24  ;;  %p5079_p5 = scmp.lt.s32.totalorder %s620_s3, %s620_s3 }
  0x3f   : > { %p5080_p4 = scmp.lt.s32.totalorder %s5078_s21, %s5071_s24 }
  0x40   : > { %p5074_p0 = pnand %p5072_p13, %p5780_p8 }
  0x41   : > { %p5081_p3 = por %p5080_p4, %p5079_p5 }
  0x42   : > { %p5075_p2 = pneg %p5074_p0 }
  0x44   : > { %p5082_p1 = pnand %p5081_p3, %p5075_p2 }
  0x46   : > { %5085 = shalt.err (!%p5082_p1)
}
  0x47   : > { %4828 = dma.hbm_to_vmem [thread:$0]  (!%p5764_p6), %s6778_s23, 16, %s620_s3, [#allocation12]  }
  0x48   : > { %s6780_s1 = sld [smem:[#allocation45_spill]] }
  0x4e   : > { %s5086_s11 = scalar_lea.hbm %s6780_s1, 16 }
  0x4f   : > { %p5087_p7 = scmp.ne.s32.totalorder %s6780_s1, %s5086_s11  ;;  %p5093_p1 = scmp.lt.u32.totalorder %s5086_s11, %s6780_s1 }
  0x51   : > { %p5089_p9 = pnand %p5087_p7, %p5780_p8 }
  0x53   : > { %p5090_p4 = pneg %p5089_p9 }
  0x55   : > { %p5095_p3 = pnand %p5093_p1, %p5090_p4 }
  0x57   : > { %5098 = shalt.err (!%p5095_p3)
}
  0x58   : > { %s5099_s3 = scalar_lea.vmem %s5768_s8, 16  ;;  %s5106_s9 = scalar_lea.vmem %s5768_s8, 32 }
  0x59   : > { %p5100_p10 = scmp.ne.s32.totalorder %s5768_s8, %s5099_s3  ;;  %p5107_p13 = scmp.lt.s32.totalorder %s5768_s8, %s5768_s8 }
  0x5a   : > { %p5108_p0 = scmp.lt.s32.totalorder %s5106_s9, %s5099_s3 }
  0x5b   : > { %p5102_p11 = pnand %p5100_p10, %p5780_p8 }
  0x5c   : > { %p5109_p2 = por %p5108_p0, %p5107_p13 }
  0x5d   : > { %p5103_p12 = pneg %p5102_p11 }
  0x5f   : > { %p5110_p5 = pnand %p5109_p2, %p5103_p12 }
  0x61   : > { %5113 = shalt.err (!%p5110_p5)
}
  0x62   : > { %4834 = dma.hbm_to_vmem [thread:$0]  (!%p5764_p6), %s6780_s1, 16, %s5768_s8, [#allocation15]  }
  0x63   : > { %s6781_s13 = sld [smem:[#allocation47_spill]] }
  0x69   : > { %s5114_s19 = scalar_lea.hbm %s6781_s13, 16 }
  0x6a   : > { %p5115_p7 = scmp.ne.s32.totalorder %s6781_s13, %s5114_s19  ;;  %p5121_p1 = scmp.lt.u32.totalorder %s5114_s19, %s6781_s13 }
  0x6c   : > { %p5117_p9 = pnand %p5115_p7, %p5780_p8 }
  0x6e   : > { %p5118_p4 = pneg %p5117_p9 }
  0x70   : > { %p5123_p3 = pnand %p5121_p1, %p5118_p4 }
  0x72   : > { %5126 = shalt.err (!%p5123_p3)
}
  0x73   : > { %s5127_s8 = scalar_lea.vmem %s5770_s29, 16  ;;  %s5134_s10 = scalar_lea.vmem %s5770_s29, 32 }
  0x74   : > { %p5128_p10 = scmp.ne.s32.totalorder %s5770_s29, %s5127_s8  ;;  %p5135_p13 = scmp.lt.s32.totalorder %s5770_s29, %s5770_s29 }
  0x75   : > { %p5136_p0 = scmp.lt.s32.totalorder %s5134_s10, %s5127_s8 }
  0x76   : > { %p5130_p11 = pnand %p5128_p10, %p5780_p8 }
  0x77   : > { %p5137_p2 = por %p5136_p0, %p5135_p13 }
  0x78   : > { %p5131_p12 = pneg %p5130_p11 }
  0x7a   : > { %p5138_p5 = pnand %p5137_p2, %p5131_p12 }
  0x7c   : > { %5141 = shalt.err (!%p5138_p5)
}
  0x7d   : > { %4840 = dma.hbm_to_vmem [thread:$0]  (!%p5764_p6), %s6781_s13, 16, %s5770_s29, [#allocation18]  }
  0x7e   : > { %s5567_s30 = smov [#allocation20]   ;;  %s6782_s12 = sld [smem:[#allocation53_spill]] }
  0x7f   : > { %s697_s19 = sshll.u32 %s5567_s30, 4  ;;  %s698_s19 = int_to_ptr.vmem [resolvable:$true] %s697_s19 }
  0x84   : > { %s5142_s3 = scalar_lea.hbm %s6782_s12, 16 }
  0x85   : > { %p5143_p7 = scmp.ne.s32.totalorder %s6782_s12, %s5142_s3  ;;  %p5149_p1 = scmp.lt.u32.totalorder %s5142_s3, %s6782_s12 }
  0x87   : > { %p5145_p9 = pnand %p5143_p7, %p5780_p8 }
  0x89   : > { %p5146_p4 = pneg %p5145_p9 }
  0x8b   : > { %p5151_p3 = pnand %p5149_p1, %p5146_p4 }
  0x8d   : > { %5154 = shalt.err (!%p5151_p3)
}
  0x8e   : > { %s5155_s29 = scalar_lea.vmem %s698_s19, 16  ;;  %s5162_s11 = scalar_lea.vmem %s698_s19, 32 }
  0x8f   : > { %p5156_p10 = scmp.ne.s32.totalorder %s698_s19, %s5155_s29  ;;  %p5163_p13 = scmp.lt.s32.totalorder %s698_s19, %s698_s19 }
  0x90   : > { %p5164_p0 = scmp.lt.s32.totalorder %s5162_s11, %s5155_s29 }
  0x91   : > { %p5158_p11 = pnand %p5156_p10, %p5780_p8 }
  0x92   : > { %p5165_p2 = por %p5164_p0, %p5163_p13 }
  0x93   : > { %p5159_p12 = pneg %p5158_p11 }
  0x95   : > { %p5166_p5 = pnand %p5165_p2, %p5159_p12 }
  0x97   : > { %5169 = shalt.err (!%p5166_p5)
}
  0x98   : > { %4846 = dma.hbm_to_vmem [thread:$0]  (!%p5764_p6), %s6782_s12, 16, %s698_s19, [#allocation21]  }
  0x99   : > { %s5568_s1 = smov [#allocation23]   ;;  %s5569_s21 = smov [#allocation26]  }
  0x9a   : > { %s723_s24 = sshll.u32 %s5568_s1, 4  ;;  %s750_s3 = sshll.u32 %s5569_s21, 4  ;;  %s724_s24 = int_to_ptr.vmem [resolvable:$true] %s723_s24  ;;  %s5862_s3 = int_to_ptr.vmem [resolvable:$true] %s750_s3 }
  0x9b   : > { %s6783_s15 = sld [smem:[#allocation56_spill]] }
  0xa1   : > { %s5170_s10 = scalar_lea.hbm %s6783_s15, 256 }
  0xa2   : > { %p5171_p7 = scmp.ne.s32.totalorder %s6783_s15, %s5170_s10  ;;  %p5177_p1 = scmp.lt.u32.totalorder %s5170_s10, %s6783_s15 }
  0xa4   : > { %p5173_p9 = pnand %p5171_p7, %p5780_p8 }
  0xa6   : > { %p5174_p4 = pneg %p5173_p9 }
  0xa8   : > { %p5179_p3 = pnand %p5177_p1, %p5174_p4 }
  0xaa   : > { %5182 = shalt.err (!%p5179_p3)
}
  0xab   : > { %s5183_s30 = scalar_lea.vmem %s724_s24, 256  ;;  %p5191_p13 = scmp.lt.s32.totalorder %s724_s24, %s724_s24 }
  0xac   : > { %p5184_p10 = scmp.ne.s32.totalorder %s724_s24, %s5183_s30  ;;  %p5192_p0 = scmp.lt.s32.totalorder %s5183_s30, %s5183_s30 }
  0xae   : > { %p5186_p11 = pnand %p5184_p10, %p5780_p8  ;;  %p5193_p2 = por %p5192_p0, %p5191_p13 }
  0xb0   : > { %p5187_p12 = pneg %p5186_p11 }
  0xb2   : > { %p5194_p5 = pnand %p5193_p2, %p5187_p12 }
  0xb4   : > { %5197 = shalt.err (!%p5194_p5)
}
  0xb5   : > { %s6731_s1 = smov 128   ;;  %s6733_s21 = smov 8  }
  0xb6   : > { %4852 = dma.hbm_to_vmem [thread:$0]  (!%p5764_p6), %s6783_s15, 256, %s724_s24, [#allocation24], %s6731_s1, %s6731_s1, %s6733_s21  }
  0xb7   : > { %s6784_s17 = sld [smem:[#allocation58_spill]] }
  0xbd   : > { %s5198_s11 = scalar_lea.hbm %s6784_s17, 16 }
  0xbe   : > { %p5199_p7 = scmp.ne.s32.totalorder %s6784_s17, %s5198_s11  ;;  %p5205_p1 = scmp.lt.u32.totalorder %s5198_s11, %s6784_s17 }
  0xc0   : > { %p5201_p9 = pnand %p5199_p7, %p5780_p8 }
  0xc2   : > { %p5202_p4 = pneg %p5201_p9 }
  0xc4   : > { %p5207_p3 = pnand %p5205_p1, %p5202_p4 }
  0xc6   : > { %5210 = shalt.err (!%p5207_p3)
}
  0xc7   : > { %s5211_s24 = scalar_lea.vmem %s5862_s3, 16  ;;  %s5218_s9 = scalar_lea.vmem %s5862_s3, 32 }
  0xc8   : > { %p5212_p10 = scmp.ne.s32.totalorder %s5862_s3, %s5211_s24  ;;  %p5219_p13 = scmp.lt.s32.totalorder %s5862_s3, %s5862_s3 }
  0xc9   : > { %p5220_p0 = scmp.lt.s32.totalorder %s5218_s9, %s5211_s24 }
  0xca   : > { %p5214_p11 = pnand %p5212_p10, %p5780_p8 }
  0xcb   : > { %p5221_p2 = por %p5220_p0, %p5219_p13 }
  0xcc   : > { %p5215_p12 = pneg %p5214_p11 }
  0xce   : > { %p5222_p5 = pnand %p5221_p2, %p5215_p12 }
  0xd0   : > { %5225 = shalt.err (!%p5222_p5)
}
  0xd1   : > { %4858 = dma.hbm_to_vmem [thread:$0]  (!%p5764_p6), %s6784_s17, 16, %s5862_s3, [#allocation27]  }
  0xd2   : > { %s5572_s10 = smov [#allocation13]   ;;  %s5573_s11 = smov [#allocation16]  }
  0xd3   : > { %s630_s29 = sshll.u32 %s5572_s10, 4  ;;  %s652_s22 = sshll.u32 %s5573_s11, 4  ;;  %s631_s29 = int_to_ptr.vmem [resolvable:$true] %s630_s29  ;;  %s5909_s22 = int_to_ptr.vmem [resolvable:$true] %s652_s22 }
  0xd4   : > { %s6785_s24 = sld [smem:[#allocation44_spill]] }
  0xda   : > { %s5226_s9 = scalar_lea.hbm %s6785_s24, 16 }
  0xdb   : > { %p5227_p7 = scmp.ne.s32.totalorder %s6785_s24, %s5226_s9  ;;  %p5233_p1 = scmp.lt.u32.totalorder %s5226_s9, %s6785_s24 }
  0xdd   : > { %p5229_p9 = pnand %p5227_p7, %p5780_p8 }
  0xdf   : > { %p5230_p4 = pneg %p5229_p9 }
  0xe1   : > { %p5235_p3 = pnand %p5233_p1, %p5230_p4 }
  0xe3   : > { %5238 = shalt.err (!%p5235_p3)
}
  0xe4   : > { %s5239_s8 = scalar_lea.vmem %s631_s29, 16  ;;  %s5246_s10 = scalar_lea.vmem %s631_s29, 32 }
  0xe5   : > { %p5240_p10 = scmp.ne.s32.totalorder %s631_s29, %s5239_s8  ;;  %p5247_p13 = scmp.lt.s32.totalorder %s631_s29, %s631_s29 }
  0xe6   : > { %p5248_p0 = scmp.lt.s32.totalorder %s5246_s10, %s5239_s8 }
  0xe7   : > { %p5242_p11 = pnand %p5240_p10, %p5780_p8 }
  0xe8   : > { %p5249_p2 = por %p5248_p0, %p5247_p13 }
  0xe9   : > { %p5243_p12 = pneg %p5242_p11 }
  0xeb   : > { %p5250_p5 = pnand %p5249_p2, %p5243_p12 }
  0xed   : > { %5253 = shalt.err (!%p5250_p5)
}
  0xee   : > { %4831 = dma.hbm_to_vmem [thread:$0]  (!%p5764_p6), %s6785_s24, 16, %s631_s29, [#allocation12]  }
  0xef   : > { %s6786_s30 = sld [smem:[#allocation46_spill]] }
  0xf5   : > { %s5254_s9 = scalar_lea.hbm %s6786_s30, 16 }
  0xf6   : > { %p5255_p7 = scmp.ne.s32.totalorder %s6786_s30, %s5254_s9  ;;  %p5261_p1 = scmp.lt.u32.totalorder %s5254_s9, %s6786_s30 }
  0xf8   : > { %p5257_p9 = pnand %p5255_p7, %p5780_p8 }
  0xfa   : > { %p5258_p4 = pneg %p5257_p9 }
  0xfc   : > { %p5263_p3 = pnand %p5261_p1, %p5258_p4 }
  0xfe   : > { %5266 = shalt.err (!%p5263_p3)
}
  0xff   : > { %s5267_s29 = scalar_lea.vmem %s5909_s22, 16  ;;  %s5274_s1 = scalar_lea.vmem %s5909_s22, 32 }
 0x100   : > { %p5268_p10 = scmp.ne.s32.totalorder %s5909_s22, %s5267_s29  ;;  %p5275_p13 = scmp.lt.s32.totalorder %s5909_s22, %s5909_s22 }
 0x101   : > { %p5276_p0 = scmp.lt.s32.totalorder %s5274_s1, %s5267_s29 }
 0x102   : > { %p5270_p11 = pnand %p5268_p10, %p5780_p8 }
 0x103   : > { %p5277_p2 = por %p5276_p0, %p5275_p13 }
 0x104   : > { %p5271_p12 = pneg %p5270_p11 }
 0x106   : > { %p5278_p5 = pnand %p5277_p2, %p5271_p12 }
 0x108   : > { %5281 = shalt.err (!%p5278_p5)
}
 0x109   : > { %4837 = dma.hbm_to_vmem [thread:$0]  (!%p5764_p6), %s6786_s30, 16, %s5909_s22, [#allocation15]  }
 0x10a   : > { %s5574_s19 = smov [#allocation19]   ;;  %s5575_s12 = smov [#allocation22]  }
 0x10b   : > { %s674_s9 = sshll.u32 %s5574_s19, 4  ;;  %s710_s3 = sshll.u32 %s5575_s12, 4  ;;  %s675_s9 = int_to_ptr.vmem [resolvable:$true] %s674_s9  ;;  %s5953_s3 = int_to_ptr.vmem [resolvable:$true] %s710_s3 }
 0x10c   : > { %s6787_s29 = sld [smem:[#allocation48_spill]] }
 0x112   : > { %s5282_s1 = scalar_lea.hbm %s6787_s29, 16 }
 0x113   : > { %p5283_p7 = scmp.ne.s32.totalorder %s6787_s29, %s5282_s1  ;;  %p5289_p1 = scmp.lt.u32.totalorder %s5282_s1, %s6787_s29 }
 0x115   : > { %p5285_p9 = pnand %p5283_p7, %p5780_p8 }
 0x117   : > { %p5286_p4 = pneg %p5285_p9 }
 0x119   : > { %p5291_p3 = pnand %p5289_p1, %p5286_p4 }
 0x11b   : > { %5294 = shalt.err (!%p5291_p3)
}
 0x11c   : > { %s5295_s11 = scalar_lea.vmem %s675_s9, 16  ;;  %s5302_s19 = scalar_lea.vmem %s675_s9, 32 }
 0x11d   : > { %p5296_p10 = scmp.ne.s32.totalorder %s675_s9, %s5295_s11  ;;  %p5303_p13 = scmp.lt.s32.totalorder %s675_s9, %s675_s9 }
 0x11e   : > { %p5304_p0 = scmp.lt.s32.totalorder %s5302_s19, %s5295_s11 }
 0x11f   : > { %p5298_p11 = pnand %p5296_p10, %p5780_p8 }
 0x120   : > { %p5305_p2 = por %p5304_p0, %p5303_p13 }
 0x121   : > { %p5299_p12 = pneg %p5298_p11 }
 0x123   : > { %p5306_p5 = pnand %p5305_p2, %p5299_p12 }
 0x125   : > { %5309 = shalt.err (!%p5306_p5)
}
 0x126   : > { %4843 = dma.hbm_to_vmem [thread:$0]  (!%p5764_p6), %s6787_s29, 16, %s675_s9, [#allocation18]  }
 0x127   : > { %s6788_s14 = sld [smem:[#allocation55_spill]] }
 0x12d   : > { %s5310_s10 = scalar_lea.hbm %s6788_s14, 256 }
 0x12e   : > { %p5311_p7 = scmp.ne.s32.totalorder %s6788_s14, %s5310_s10  ;;  %p5317_p1 = scmp.lt.u32.totalorder %s5310_s10, %s6788_s14 }
 0x130   : > { %p5313_p9 = pnand %p5311_p7, %p5780_p8 }
 0x132   : > { %p5314_p4 = pneg %p5313_p9 }
 0x134   : > { %p5319_p3 = pnand %p5317_p1, %p5314_p4 }
 0x136   : > { %5322 = shalt.err (!%p5319_p3)
}
 0x137   : > { %s5323_s9 = scalar_lea.vmem %s5953_s3, 256  ;;  %p5331_p13 = scmp.lt.s32.totalorder %s5953_s3, %s5953_s3 }
 0x138   : > { %p5324_p10 = scmp.ne.s32.totalorder %s5953_s3, %s5323_s9  ;;  %p5332_p0 = scmp.lt.s32.totalorder %s5323_s9, %s5323_s9 }
 0x13a   : > { %p5326_p11 = pnand %p5324_p10, %p5780_p8  ;;  %p5333_p2 = por %p5332_p0, %p5331_p13 }
 0x13c   : > { %p5327_p12 = pneg %p5326_p11 }
 0x13e   : > { %p5334_p5 = pnand %p5333_p2, %p5327_p12 }
 0x140   : > { %5337 = shalt.err (!%p5334_p5)
}
 0x141   : > { %s6789_s19 = smov 8   ;;  %s6790_s15 = smov 128  }
 0x142   : > { %4849 = dma.hbm_to_vmem [thread:$0]  (!%p5764_p6), %s6788_s14, 256, %s5953_s3, [#allocation21], %s6790_s15, %s6790_s15, %s6789_s19  }
 0x143   : > { %s5576_s8 = smov [#allocation25]   ;;  %s5577_s1 = smov [#allocation28]  }
 0x144   : > { %s736_s10 = sshll.u32 %s5576_s8, 4  ;;  %s760_s21 = sshll.u32 %s5577_s1, 4  ;;  %s737_s10 = int_to_ptr.vmem [resolvable:$true] %s736_s10  ;;  %s5999_s21 = int_to_ptr.vmem [resolvable:$true] %s760_s21 }
 0x145   : > { %s6791_s16 = sld [smem:[#allocation57_spill]] }
 0x14b   : > { %s5338_s9 = scalar_lea.hbm %s6791_s16, 512 }
 0x14c   : > { %p5339_p7 = scmp.ne.s32.totalorder %s6791_s16, %s5338_s9  ;;  %p5345_p1 = scmp.lt.u32.totalorder %s5338_s9, %s6791_s16 }
 0x14e   : > { %p5341_p9 = pnand %p5339_p7, %p5780_p8 }
 0x150   : > { %p5342_p4 = pneg %p5341_p9 }
 0x152   : > { %p5347_p3 = pnand %p5345_p1, %p5342_p4 }
 0x154   : > { %5350 = shalt.err (!%p5347_p3)
}
 0x155   : > { %s5351_s12 = scalar_lea.vmem %s737_s10, 512  ;;  %p5359_p13 = scmp.lt.s32.totalorder %s737_s10, %s737_s10 }
 0x156   : > { %p5352_p10 = scmp.ne.s32.totalorder %s737_s10, %s5351_s12  ;;  %p5360_p0 = scmp.lt.s32.totalorder %s5351_s12, %s5351_s12 }
 0x158   : > { %p5354_p11 = pnand %p5352_p10, %p5780_p8  ;;  %p5361_p2 = por %p5360_p0, %p5359_p13 }
 0x15a   : > { %p5355_p12 = pneg %p5354_p11 }
 0x15c   : > { %p5362_p5 = pnand %p5361_p2, %p5355_p12 }
 0x15e   : > { %5365 = shalt.err (!%p5362_p5)
}
 0x15f   : > { %4855 = dma.hbm_to_vmem [thread:$0]  (!%p5764_p6), %s6791_s16, 512, %s737_s10, [#allocation24], %s6790_s15, %s6790_s15, %s6789_s19  }
 0x160   : > { %s5366_s22 = scalar_lea.hbm %s6705_s18, 512 }
 0x161   : > { %p5367_p7 = scmp.ne.s32.totalorder %s6705_s18, %s5366_s22  ;;  %p5373_p1 = scmp.lt.u32.totalorder %s5366_s22, %s6705_s18 }
 0x163   : > { %p5369_p9 = pnand %p5367_p7, %p5780_p8 }
 0x165   : > { %p5370_p4 = pneg %p5369_p9 }
 0x167   : > { %p5375_p3 = pnand %p5373_p1, %p5370_p4 }
 0x169   : > { %5378 = shalt.err (!%p5375_p3)
}
 0x16a   : > { %s5379_s10 = scalar_lea.vmem %s5999_s21, 512  ;;  %p5387_p13 = scmp.lt.s32.totalorder %s5999_s21, %s5999_s21 }
 0x16b   : > { %p5380_p10 = scmp.ne.s32.totalorder %s5999_s21, %s5379_s10  ;;  %p5388_p0 = scmp.lt.s32.totalorder %s5379_s10, %s5379_s10 }
 0x16d   : > { %p5382_p11 = pnand %p5380_p10, %p5780_p8  ;;  %p5389_p2 = por %p5388_p0, %p5387_p13 }
 0x16f   : > { %p5383_p12 = pneg %p5382_p11 }
 0x171   : > { %p5390_p5 = pnand %p5389_p2, %p5383_p12 }
 0x173   : > { %5393 = shalt.err (!%p5390_p5)
}
 0x174   : > { %4861 = dma.hbm_to_vmem [thread:$0]  (!%p5764_p6), %s6705_s18, 512, %s5999_s21, [#allocation27], %s6790_s15, %s6790_s15, %s6789_s19  }
 0x175   : > { %s5578_s23 = smov [#allocation29]   ;;  %s5394_s11 = scalar_lea.hbm %s6707_s20, 512 }
 0x176   : > { %s776_s8 = sshll.u32 %s5578_s23, 4  ;;  %p5395_p7 = scmp.ne.s32.totalorder %s6707_s20, %s5394_s11  ;;  %s777_s8 = int_to_ptr.vmem [resolvable:$true] %s776_s8 }
 0x177   : > { %p5401_p1 = scmp.lt.u32.totalorder %s5394_s11, %s6707_s20 }
 0x178   : > { %p5397_p9 = pnand %p5395_p7, %p5780_p8 }
 0x17a   : > { %p5398_p4 = pneg %p5397_p9 }
 0x17c   : > { %p5403_p3 = pnand %p5401_p1, %p5398_p4 }
 0x17e   : > { %5406 = shalt.err (!%p5403_p3)
}
 0x17f   : > { %s5407_s21 = scalar_lea.vmem %s777_s8, 512  ;;  %p5415_p13 = scmp.lt.s32.totalorder %s777_s8, %s777_s8 }
 0x180   : > { %p5408_p10 = scmp.ne.s32.totalorder %s777_s8, %s5407_s21  ;;  %p5416_p0 = scmp.lt.s32.totalorder %s5407_s21, %s5407_s21 }
 0x182   : > { %p5410_p11 = pnand %p5408_p10, %p5780_p8  ;;  %p5417_p2 = por %p5416_p0, %p5415_p13 }
 0x184   : > { %p5411_p12 = pneg %p5410_p11 }
 0x186   : > { %p5418_p5 = pnand %p5417_p2, %p5411_p12 }
 0x188   : > { %5421 = shalt.err (!%p5418_p5)
}
 0x189   : > { %4864 = dma.hbm_to_vmem [thread:$0]  (!%p5764_p6), %s6707_s20, 512, %s777_s8, [#allocation30], %s6790_s15, %s6790_s15, %s6789_s19  }
 0x18a   : > { %s4148_s4 = sadd.s32 4294967294, %s5562_s2   ;;  %s59_s25 = sadd.s32 1, %s5558_s6 }
 0x18b   : > { %s92_s23 = sadd.s32 1, %s5550_s27  ;;  %p61_p8 = scmp.ge.s32.totalorder %s59_s25, 2 }
 0x18c   : > { %p99_p7 = scmp.ne.s32.totalorder %s5550_s27, %s5546_s26  ;;  %p100_p9 = scmp.eq.s32.totalorder %s5562_s2, 0 }
 0x18d   : > { %p105_p4 = scmp.ne.s32.totalorder %s5546_s26, %s5542_s5  ;;  %s6829_s25 = smov (%p61_p8, %s59_s25), 0 }
 0x18e   : > { %p6079_p1 = por %p100_p9, %p99_p7  ;;  %p6793_p3 = scmp.ne.s32.totalorder %s6775_s0, 0 }
 0x18f   : > { %s89_s15 = ssub.s32 %s5558_s6, %s6829_s25  ;;  %s6795_s8 = sadd.s32 4294967295, %s5562_s2  }
 0x190   : > { %p6085_p6 = por %p6793_p3, %p105_p4  ;;  %p593_p10 = scmp.eq.s32.totalorder %s6795_s8, 1 }
 0x191   : > { %p90_p11 = scmp.eq.s32.totalorder %s89_s15, 0  ;;  %p599_p12 = scmp.eq.s32.totalorder %s4148_s4, 1 }
 0x192   : > { %p6093_p13 = por %p593_p10, %p99_p7  ;;  %p4886_p0 = scmp.lt.s32.totalorder %s5562_s2, 2 }
 0x193   : > { %s6099_s11 = scalar_select %p90_p11, %s5550_s27, %s92_s23  }
 0x194   : > { %s6796_s22 = scalar_select %p6093_p13, 1, 0 }
 0x195   : > { %p6101_p2 = por %p599_p12, %p105_p4  ;;  %s807_s13 = sand.u32 1, %s5550_s27  }
 0x196   : > { %s4164_s3 = sshll.u32 %s807_s13, 3  ;;  %s4165_s10 = sshll.u32 %s5558_s6, 7 }
 0x197   : > { %s6797_s9 = scalar_select %p6101_p2, 1, 0 }
 0x198   : > { %s6798_s17 = sld [smem:[#allocation42_spill]]  ;;  %s811_s4 = scalar_lea.vmem [#allocation8], %s4164_s3 }
 0x199   : > { %s818_s15 = sshll.u32 %s811_s4, 4  ;;  %p6116_p5 = pnand %p4886_p0, %p6079_p1  ;;  %s6112_s15 = int_to_ptr.vmem [resolvable:$true] %s818_s15 }
 0x19a   : > { %s808_s14 = scalar_lea.sflag [#allocation9], %s807_s13 }
 0x19b   : > { %p5424_p7 = pneg %p6116_p5 }
 0x19e   : > { %s6110_s8 = scalar_lea.hbm %s6798_s17, %s4165_s10  ;;  %s5427_s21 = scalar_lea.hbm %s6798_s17, 256 }
 0x19f   : > { %s5422_s16 = scalar_lea.hbm %s6110_s8, 128  ;;  %p5428_p1 = scmp.lt.u32.totalorder %s6110_s8, %s6798_s17 }
 0x1a0   : > { %p5423_p8 = scmp.ne.s32.totalorder %s6110_s8, %s5422_s16  ;;  %p5429_p3 = scmp.lt.u32.totalorder %s5427_s21, %s5422_s16 }
 0x1a1   : > { %p5431_p11 = scmp.lt.u32.totalorder %s5422_s16, %s6110_s8 }
 0x1a2   : > { %p5425_p9 = pnand %p5424_p7, %p5423_p8  ;;  %p5430_p10 = por %p5429_p3, %p5428_p1 }
 0x1a4   : > { %p5426_p4 = pneg %p5425_p9  ;;  %p5432_p12 = por %p5431_p11, %p5430_p10 }
 0x1a6   : > { %p5433_p0 = pnand %p5432_p12, %p5426_p4 }
 0x1a8   : > { %5436 = shalt.err (!%p5433_p0)
}
 0x1a9   : > { %s5437_s13 = scalar_lea.vmem %s6112_s15, 128  ;;  %s5579_s4 = smov [#allocation8]  }
 0x1aa   : > { %p5438_p8 = scmp.ne.s32.totalorder %s6112_s15, %s5437_s13  ;;  %s5442_s3 = sshll.u32 %s5579_s4, 4  ;;  %s5443_s3 = int_to_ptr.vmem [resolvable:$false] %s5442_s3 }
 0x1ab   : > { %s5444_s10 = scalar_lea.vmem %s5443_s3, 256  ;;  %p5445_p13 = scmp.lt.s32.totalorder %s6112_s15, %s5443_s3 }
 0x1ac   : > { %p5440_p9 = pnand %p5438_p8, %p5424_p7  ;;  %p5446_p1 = scmp.lt.s32.totalorder %s5444_s10, %s5437_s13 }
 0x1ae   : > { %p5441_p2 = pneg %p5440_p9  ;;  %p5447_p3 = por %p5446_p1, %p5445_p13 }
 0x1b0   : > { %p5448_p10 = pnand %p5447_p3, %p5441_p2 }
 0x1b2   : > { %5451 = shalt.err (!%p5448_p10)
}
 0x1b3   : > { %4868 = dma.hbm_to_vmem [thread:$0]  (!%p6116_p5), %s6110_s8, 128, %s6112_s15, %s808_s14  }
 0x1b4   : > { %p6800_p4 = scmp.ne.s32.totalorder %s6776_s7, 0 }
 0x1b5   : > { %s6148_s16 = sand.u32 (!%p6800_p4), 1, %s5546_s26  }
 0x1b6   : > { %827 = sbr.rel (%p6800_p4) target bundleno = 4355 (0x1103), region = 116  ;;  %s4167_s21 = sshll.u32 (!%p6800_p4), %s6148_s16, 3 }
 0x1b7   : > { %s830_s1 = scalar_lea.sflag (!%p6800_p4), [#allocation9], %s6148_s16  ;;  %s6152_s12 = scalar_lea.vmem (!%p6800_p4), [#allocation8], %s4167_s21 }
 0x1bd   : > { %5505 = dma.done.wait (%p6085_p6), %s830_s1, 128  }
 0x1be   : > { %5507 = vsyncadd (%p6085_p6), %s830_s1, 4294967168  ;;  %p6801_p13 = scmp.ne.s32.totalorder %s6775_s0, 0 }
 0x1c0   : > { %5509 = dma.done.wait (%p6801_p13), [#allocation12], 32  }
 0x1c1   : > { %5511 = vsyncadd (%p6801_p13), [#allocation12], 4294967264 }
 0x1c2   : > { %5513 = dma.done.wait (%p6801_p13), [#allocation15], 32  }
 0x1c3   : > { %5515 = vsyncadd (%p6801_p13), [#allocation15], 4294967264 }
 0x1c4   : > { %5517 = dma.done.wait (%p6801_p13), [#allocation18], 32  }
 0x1c5   : > { %5519 = vsyncadd (%p6801_p13), [#allocation18], 4294967264 }
 0x1c6   : > { %5521 = dma.done.wait (%p6801_p13), [#allocation21], 272  }
 0x1c7   : > { %5523 = vsyncadd (%p6801_p13), [#allocation21], 4294967024 }
 0x1c8   : > { %5525 = dma.done.wait (%p6801_p13), [#allocation24], 768  }
 0x1c9   : > { %5527 = vsyncadd (%p6801_p13), [#allocation24], 4294966528 }
 0x1ca   : > { %5529 = dma.done.wait (%p6801_p13), [#allocation27], 528  }
 0x1cb   : > { %5531 = vsyncadd (%p6801_p13), [#allocation27], 4294966768 }
 0x1cc   : > { %5533 = dma.done.wait (%p6801_p13), [#allocation30], 512  }
 0x1cd   : > { %5535 = vsyncadd (%p6801_p13), [#allocation30], 4294966784  ;;  %p955_p6 = scmp.lt.s32.totalorder %s5554_s28, 1  ;;  %s6802_s15 = sld [smem:[#allocation41_spill]]  ;;  %vm967_vm0 = vcmask 261120   ;;  %v1244_v60 = vld [vmem:[#allocation22] sm:$0xff] }
 0x1ce   : > { %s6803_s4 = sld [smem:[#allocation50_spill]]  ;;  %v4184_v44 = vld [vmem:[#allocation11] ss:$0 sm:$0xff]  ;;  %v4185_v47 = vld [vmem:[#allocation13] ss:$0 sm:$0xff]  ;;  %v1245_v61 = vld [vmem:[#allocation22 + $0x8] sm:$0xff] }
 0x1cf   : > { %s956_s14 = scalar_select %p955_p6, %s5554_s28, 1  ;;  %vm5581_vm1 = vmmov 0   ;;  %vm1246_vm2 = vcmask 130048   ;;  %vm1101_vm3 = vcmask 64512   ;;  %vm2393_vm5 = vcmask 130112  }
 0x1d0   : > { %s5584_s10 = smov 112   ;;  %s6747_s21 = smov 104   ;;  %vm6274_vm4 = vmpackc.low %vm1101_vm3, %vm1101_vm3  ;;  %vm2404_vm6 = vcmask 195712   ;;  %vm2415_vm7 = vcmask 261312  }
 0x1d1   : > { %s4264_s7 = sshll.u32 %s956_s14, 4  ;;  %s6808_s19 = sld [smem:[#allocation52_spill]] }
 0x1d2   : > { %s6742_s14 = smov 8   ;;  %s6740_s8 = smov 16  }
 0x1d3   : > { %s959_s23 = scalar_lea.vmem %s6802_s15, %s4264_s7  ;;  %s6804_s15 = sld [smem:[#allocation51_spill]] }
 0x1d4   : > { %v6191_v0 = vld [vmem:[%s959_s23] sm:$0xff]  ;;  %v6193_v1 = vld [vmem:[%s959_s23 + $0x8] sm:$0xff]  ;;  %v1018_v11 = vld [vmem:[%s6803_s4 + $0x10] sm:$0xff]  ;;  %s6805_s7 = sld [smem:[#allocation49_spill]]  ;;  %s6738_s23 = smov 24  }
 0x1d5   : > { %v968_v2 = vsel %vm967_vm0, %v6191_v0, 0.0  ;;  %v974_v3 = vmul.f32 %v6191_v0, %v6191_v0  ;;  %v975_v4 = vmul.f32 %v6193_v1, %v6193_v1  ;;  %v971_v6 = vsel %vm967_vm0, %v6193_v1, 0.0  ;;  %v1016_v8 = vld [vmem:[%s6803_s4] sm:$0xff]  ;;  %v1017_v9 = vld [vmem:[%s6803_s4 + $0x8] sm:$0xff]  ;;  %v1019_v12 = vld [vmem:[%s6803_s4 + $0x18] sm:$0xff]  ;;  %s6809_s3 = sld [smem:[#allocation54_spill]] }
 0x1d6   : > { %969 = vadd.xlane.f32.xlu0 %v968_v2  ;;  %v4627_v10 = vpack.c.bf16 %v1017_v9, %v1016_v8  ;;  %v4631_v13 = vpack.c.bf16 %v1019_v12, %v1018_v11  ;;  %v5582_v9 = vmov 0.0   ;;  %s6811_s4 = smov 104   ;;  %s6817_s1 = sld [smem:[#allocation59_spill]] }
 0x1d7   : > { %v976_v5 = vsel %vm967_vm0, %v974_v3, 0.0  ;;  %v979_v7 = vsel %vm967_vm0, %v975_v4, 0.0  ;;  %v5580_v3 = vmov 0.0|0.0   ;;  %v1337_v4 = vld [vmem:[#allocation23] sm:$0xff]  ;;  %p6820_p5 = scmp.ne.s32.totalorder %s6796_s22, 0 }
 0x1d8   : > { %977 = vadd.xlane.f32.xlu1 %v976_v5  ;;  %4628 = vmatprep.subr.bf16.mxu0 %v4627_v10 }
 0x1d9   : > { %4630 = vmatpush3.bf16.msra.mxu0 %v4627_v10  ;;  %v1133_v14 = vld [vmem:[%s6804_s15] sm:$0xff]  ;;  %v1134_v15 = vld [vmem:[%s6804_s15 + $0x8] sm:$0xff]  ;;  %v1135_v54 = vld [vmem:[%s6804_s15 + $0x10] sm:$0xff] }
 0x1da   : > { %972 = vadd.xlane.f32.xlu0 %v971_v6  ;;  %4632 = vmatprep.subr.bf16.mxu0 %v4631_v13  ;;  %v4635_v16 = vpack.c.bf16 %v1134_v15, %v1133_v14  ;;  %v1136_v55 = vld [vmem:[%s6804_s15 + $0x18] sm:$0xff]  ;;  %v1481_v15 = vld [vmem:[%s6805_s7 + $0x10] sm:$0xff] }
 0x1db   : > { %v4639_v59 = vpack.c.bf16 %v1136_v55, %v1135_v54  ;;  %v1243_v10 = vld [vmem:[%s6152_s12] sm:$0xff]  ;;  %s6744_s12 = smov 120  }
 0x1dc   : > { %980 = vadd.xlane.f32.xlu1 %v979_v7 }
 0x1dd   : > { %4634 = vmatpush3.bf16.msra.mxu0 %v4631_v13 }
 0x1de   : > { %1432 = vadd.xlane.f32.xlu0 %v968_v2  ;;  %4636 = vmatprep.subr.bf16.mxu0 %v4635_v16  ;;  %v4644_v2 = vpack.c.bf16 %v1245_v61, %v1244_v60 }
 0x1e0   : > { %1435 = vadd.xlane.f32.xlu1 %v971_v6  ;;  %v1479_v6 = vld [vmem:[%s6805_s7] sm:$0xff] }
 0x1e2   : > { %1440 = vadd.xlane.f32.xlu0 %v976_v5  ;;  %v1338_v5 = vld [vmem:[#allocation23 + $0x8] sm:$0xff] }
 0x1e3   : > { %v4647_v11 = vpack.c.bf16 %v1338_v5, %v1337_v4 }
 0x1e4   : > { %1443 = vadd.xlane.f32.xlu1 %v979_v7  ;;  %v1480_v7 = vld [vmem:[%s6805_s7 + $0x8] sm:$0xff] }
 0x1e5   : > { %v4649_v12 = vpack.c.bf16 %v1480_v7, %v1479_v6 }
 0x263   : > { %v970_v17 = vpop.xlane.xlu0 %969 }
 0x264   : > { %v982_v18 = vmul.f32 0.03125, %v970_v17 }
 0x265   : > { %v978_v19 = vpop.xlane.xlu1 %977 }
 0x266   : > { %v986_v20 = vmul.f32 %v982_v18, %v982_v18  ;;  %v984_v21 = vmul.f32 0.03125, %v978_v19  ;;  %v990_v40 = vsub.f32 %v6191_v0, %v982_v18 }
 0x267   : > { %v973_v22 = vpop.xlane.xlu0 %972 }
 0x268   : > { %v988_v23 = vsub.f32 %v984_v21, %v986_v20  ;;  %v983_v24 = vmul.f32 0.03125, %v973_v22 }
 0x269   : > { %v981_v25 = vpop.xlane.xlu1 %980 }
 0x26a   : > { %v992_v26 = vadd.f32 1e-05, %v988_v23  ;;  %v987_v27 = vmul.f32 %v983_v24, %v983_v24  ;;  %v985_v28 = vmul.f32 0.03125, %v981_v25  ;;  %v991_v48 = vsub.f32 %v6193_v1, %v983_v24 }
 0x26b   : > { %v1433_v29 = vpop.xlane.xlu0 %1432 }
 0x26c   : > { %4974 = vrsqrt.f32 %v992_v26  ;;  %v989_v30 = vsub.f32 %v985_v28, %v987_v27  ;;  %v1445_v31 = vmul.f32 0.03125, %v1433_v29 }
 0x26d   : > { %v1436_v32 = vpop.xlane.xlu1 %1435 }
 0x26e   : > { %v993_v33 = vadd.f32 1e-05, %v989_v30  ;;  %v1449_v34 = vmul.f32 %v1445_v31, %v1445_v31  ;;  %v6223_v37 = vmul.f32 0.03125, %v1436_v32  ;;  %v1453_v62 = vsub.f32 %v6191_v0, %v1445_v31 }
 0x26f   : > { %v1441_v35 = vpop.xlane.xlu0 %1440 }
 0x270   : > { %4976 = vrsqrt.f32 %v993_v33  ;;  %v1447_v36 = vmul.f32 0.03125, %v1441_v35  ;;  %v1450_v42 = vmul.f32 %v6223_v37, %v6223_v37  ;;  %v1454_v17 = vsub.f32 %v6193_v1, %v6223_v37 }
 0x271   : > { %v1444_v39 = vpop.xlane.xlu1 %1443 }
 0x272   : > { %v1451_v38 = vsub.f32 %v1447_v36, %v1449_v34  ;;  %v1448_v43 = vmul.f32 0.03125, %v1444_v39 }
 0x274   : > { %v1455_v45 = vadd.f32 1e-05, %v1451_v38  ;;  %v1452_v51 = vsub.f32 %v1448_v43, %v1450_v42 }
 0x276   : > { %v4975_v41 = vpop.eup %4974  ;;  %4978 = vrsqrt.f32 %v1455_v45  ;;  %v1456_v57 = vadd.f32 1e-05, %v1452_v51 }
 0x277   : > { %v996_v46 = vmul.f32 %v4975_v41, %v990_v40 }
 0x278   : > { %4980 = vrsqrt.f32 %v1456_v57 }
 0x279   : > { %v1005_v49 = vmul.f32 %v4184_v44, %v996_v46 }
 0x27a   : > { %v4977_v50 = vpop.eup %4976 }
 0x27b   : > { %v997_v52 = vmul.f32 %v4977_v50, %v991_v48  ;;  %v1014_v53 = vadd.f32 %v4185_v47, %v1005_v49 }
 0x27d   : > { %v1006_v56 = vmul.f32 %v4184_v44, %v997_v52  ;;  %4402 = vmatprep.mubr.msk.f32.mxu0 %vm967_vm0, %v1014_v53 }
 0x27f   : > { %v1015_v58 = vadd.f32 %v4185_v47, %v1006_v56 }
 0x280   : > { %v4979_v63 = vpop.eup %4978 }
 0x281   : > { %4403 = vmatmul.mubr.msk.f32.vlgmr.msra.gmra.mrb[0].mxu0 %vm967_vm0, %v1015_v58  ;;  %v1459_v8 = vmul.f32 %v4979_v63, %v1453_v62 }
 0x282   : > { %4638 = vmatpush3.bf16.msra.mxu0 %v4635_v16  ;;  %4413 = vmatprep.mubr.msk.f32.mxu0 %vm967_vm0, %v1014_v53  ;;  %v4981_v13 = vpop.eup %4980  ;;  %v1482_v16 = vld [vmem:[%s6805_s7 + $0x18] sm:$0xff]  ;;  %s6819_s7 = sld [smem:[#allocation63_spill]] }
 0x283   : > { %4640 = vmatprep.subr.bf16.mxu0 %v4639_v59  ;;  %v1468_v14 = vmul.f32 %v4184_v44, %v1459_v8  ;;  %v1460_v18 = vmul.f32 %v4981_v13, %v1454_v17  ;;  %v4653_v19 = vpack.c.bf16 %v1482_v16, %v1481_v15 }
 0x285   : > { %v1477_v20 = vadd.f32 %v4185_v47, %v1468_v14  ;;  %v1469_v21 = vmul.f32 %v4184_v44, %v1460_v18 }
 0x286   : > { %4642 = vmatpush3.bf16.msra.mxu0 %v4639_v59 }
 0x287   : > { %4643 = vmatprep.subr.bf16.mxu0 %v5580_v3  ;;  %v1478_v22 = vadd.f32 %v4185_v47, %v1469_v21 }
 0x289   : > { %4414 = vmatmul.mubr.msk.f32.vlgmr.msra.gmra.mrb[2].mxu0 %vm967_vm0, %v1015_v58 }
 0x28a   : > { %4645 = vmatpush3.bf16.msra.mxu0 %v4644_v2  ;;  %4420 = vmatprep.mubr.msk.f32.mxu0 %vm5581_vm1, %v5582_v9 }
 0x28b   : > { %4646 = vmatprep.subr.bf16.mxu0 %v5580_v3 }
 0x28d   : > { %4421 = vmatmul.mubr.msk.f32.vlgmr.msra.gmra.mrb[4].mxu0 %vm1246_vm2, %v1243_v10 }
 0x28e   : > { %4648 = vmatpush3.bf16.msra.mxu0 %v4647_v11  ;;  %4427 = vmatprep.mubr.msk.f32.mxu0 %vm5581_vm1, %v5582_v9 }
 0x28f   : > { %4650 = vmatprep.subr.bf16.mxu0 %v4649_v12 }
 0x291   : > { %4428 = vmatmul.mubr.msk.f32.vlgmr.msra.gmra.mrb[6].mxu0 %vm1246_vm2, %v1243_v10 }
 0x292   : > { %4652 = vmatpush3.bf16.msra.mxu0 %v4649_v12  ;;  %4438 = vmatprep.mubr.msk.f32.mxu0 %vm967_vm0, %v1477_v20 }
 0x293   : > { %4654 = vmatprep.subr.bf16.mxu0 %v4653_v19 }
 0x296   : > { %4656 = vmatpush3.bf16.msra.mxu0 %v4653_v19 }
 0x299   : > { %4439 = vmatmul.mubr.msk.f32.vlgmr.msra.gmra.mrb[8].mxu0 %vm967_vm0, %v1478_v22 }
 0x354   : > { %v4404_v23 = vpop.f32.mrb[0].mxu0 }
 0x355   : > { %1103 = vst.msk [vmem:[#allocation2 + $0x8] sm:$0xff] %vm1101_vm3, %v4404_v23  ;;  %1108 = vrot.lane.b32.xlu1 %v4404_v23, %s6744_s12  ;;  %v1092_v24 = vpop.f32.mrb[1].mxu0 }
 0x356   : > { %1102 = vst.msk [vmem:[#allocation2] sm:$0xff] %vm1101_vm3, %v1092_v24  ;;  %1106 = vrot.lane.b32.xlu0 %v1092_v24, %s6744_s12 }
 0x359   : > { %1117 = vrot.lane.b32.xlu1 %v4404_v23, %s5584_s10 }
 0x35a   : > { %1124 = vrot.lane.b32.xlu0 %v1092_v24, %s6747_s21 }
 0x35c   : > { %v6265_v25 = vpop.f32.mrb[2].mxu0  ;;  %v1607_v26 = vld [vmem:[#allocation2 + $0x8] sm:$0xff] }
 0x35d   : > { %1213 = vst.msk [vmem:[#allocation3 + $0x8] sm:$0xff] %vm1101_vm3, %v6265_v25  ;;  %v6269_v27 = vpop.f32.mrb[3].mxu0  ;;  %1126 = vrot.lane.b32.xlu1 %v4404_v23, %s6747_s21  ;;  %v1606_v28 = vld [vmem:[#allocation2] sm:$0xff] }
 0x35e   : > { %1212 = vst.msk [vmem:[#allocation3] sm:$0xff] %vm1101_vm3, %v6269_v27  ;;  %v4657_v30 = vpack.c.bf16 %v1607_v26, %v1606_v28 }
 0x360   : > { %v6280_v31 = vpop.f32.mrb[4].mxu0  ;;  %4659 = vmatprep.subr.msk.bf16.mxu1 %vm6274_vm4, %v4657_v30 }
 0x361   : > { %1320 = vst.msk [vmem:[#allocation4] sm:$0xff] %vm1101_vm3, %v6280_v31  ;;  %v4422_v32 = vpop.f32.mrb[5].mxu0  ;;  %1115 = vrot.lane.b32.xlu1 %v1092_v24, %s5584_s10  ;;  %4662 = vmatpush3.bf16.xpose.msk.msra.mxu1 %vm6274_vm4, %v4657_v30 }
 0x364   : > { %v6289_v33 = vpop.f32.mrb[6].mxu0  ;;  %v2052_v53 = vld [vmem:[#allocation3 + $0x8] sm:$0xff] }
 0x365   : > { %1409 = vst.msk [vmem:[#allocation5] sm:$0xff] %vm1101_vm3, %v6289_v33  ;;  %v4429_v34 = vpop.f32.mrb[7].mxu0  ;;  %v2051_v56 = vld [vmem:[#allocation3] sm:$0xff] }
 0x366   : > { %v4681_v58 = vpack.c.bf16 %v2052_v53, %v2051_v56 }
 0x36c   : > { %v4440_v35 = vpop.f32.mrb[8].mxu0 }
 0x36d   : > { %v1565_v36 = vmul.f32 0.35355338, %v4440_v35  ;;  %v1555_v37 = vpop.f32.mrb[9].mxu0 }
 0x36e   : > { %v1564_v38 = vmul.f32 0.35355338, %v1555_v37 }
 0x36f   : > { %1568 = vst.msk [vmem:[#allocation6 + $0x8] sm:$0xff] %vm1101_vm3, %v1565_v36  ;;  %1573 = vrot.lane.b32.xlu1 %v1565_v36, %s6744_s12 }
 0x370   : > { %1567 = vst.msk [vmem:[#allocation6] sm:$0xff] %vm1101_vm3, %v1564_v38  ;;  %1571 = vrot.lane.b32.xlu0 %v1564_v38, %s6744_s12 }
 0x373   : > { %1582 = vrot.lane.b32.xlu1 %v1565_v36, %s5584_s10 }
 0x374   : > { %1580 = vrot.lane.b32.xlu0 %v1564_v38, %s5584_s10 }
 0x376   : > { %v1599_v40 = vld [vmem:[#allocation6 + $0x8] sm:$0xff] }
 0x377   : > { %1591 = vrot.lane.b32.xlu1 %v1565_v36, %s6747_s21  ;;  %v1598_v39 = vld [vmem:[#allocation6] sm:$0xff] }
 0x378   : > { %1589 = vrot.lane.b32.xlu0 %v1564_v38, %s6747_s21  ;;  %4445 = vmatprep.mubr.msk.f32.mxu1 %vm1101_vm3, %v1598_v39 }
 0x379   : > { %4446 = vmatmul.mubr.msk.f32.vlgmr.msra.gmra.mrb[0].mxu1 %vm1101_vm3, %v1599_v40 }
 0x3c7   : > { %v1109_v41 = vpop.permute.xlu1 %1108 }
 0x3c8   : > { %1114 = vst.msk [vmem:[#allocation2 + $0x18] sm:$0xff] %vm1101_vm3, %v1109_v41  ;;  %v1107_v42 = vpop.permute.xlu0 %1106 }
 0x3c9   : > { %1113 = vst.msk [vmem:[#allocation2 + $0x10] sm:$0xff] %vm1101_vm3, %v1107_v42 }
 0x3cb   : > { %v1118_v43 = vpop.permute.xlu1 %1117 }
 0x3cc   : > { %1123 = vst.msk [vmem:[#allocation2 + $0x28] sm:$0xff] %vm1101_vm3, %v1118_v43  ;;  %v1125_v44 = vpop.permute.xlu0 %1124 }
 0x3cd   : > { %1131 = vst.msk [vmem:[#allocation2 + $0x30] sm:$0xff] %vm1101_vm3, %v1125_v44 }
 0x3cf   : > { %v1127_v45 = vpop.permute.xlu1 %1126  ;;  %v1609_v46 = vld [vmem:[#allocation2 + $0x18] sm:$0xff] }
 0x3d0   : > { %1132 = vst.msk [vmem:[#allocation2 + $0x38] sm:$0xff] %vm1101_vm3, %v1127_v45  ;;  %v1608_v47 = vld [vmem:[#allocation2 + $0x10] sm:$0xff] }
 0x3d1   : > { %v4663_v48 = vpack.c.bf16 %v1609_v46, %v1608_v47 }
 0x3d3   : > { %v1116_v49 = vpop.permute.xlu1 %1115  ;;  %4665 = vmatprep.subr.msk.bf16.mxu0 %vm6274_vm4, %v4663_v48  ;;  %v1611_v55 = vld [vmem:[#allocation2 + $0x28] sm:$0xff] }
 0x3d4   : > { %1122 = vst.msk [vmem:[#allocation2 + $0x20] sm:$0xff] %vm1101_vm3, %v1116_v49  ;;  %4668 = vmatpush3.bf16.xpose.msk.msra.mxu0 %vm6274_vm4, %v4663_v48  ;;  %v1612_v50 = vld [vmem:[#allocation2 + $0x30] sm:$0xff] }
 0x3d7   : > { %v1613_v51 = vld [vmem:[#allocation2 + $0x38] sm:$0xff] }
 0x3d8   : > { %v4675_v52 = vpack.c.bf16 %v1613_v51, %v1612_v50 }
 0x3da   : > { %4677 = vmatprep.subr.msk.bf16.mxu0 %vm6274_vm4, %v4675_v52 }
 0x3db   : > { %v1610_v54 = vld [vmem:[#allocation2 + $0x20] sm:$0xff] }
 0x3dc   : > { %v4669_v57 = vpack.c.bf16 %v1611_v55, %v1610_v54 }
 0x3de   : > { %4671 = vmatprep.subr.msk.bf16.mxu1 %vm6274_vm4, %v4669_v57 }
 0x3df   : > { %4674 = vmatpush3.bf16.xpose.msk.msra.mxu1 %vm6274_vm4, %v4669_v57 }
 0x3e0   : > { %4682 = vmatprep.subr.bf16.mxu1 %v4681_v58 }
 0x3e1   : > { %v1574_v59 = vpop.permute.xlu1 %1573 }
 0x3e2   : > { %1579 = vst.msk [vmem:[#allocation6 + $0x18] sm:$0xff] %vm1101_vm3, %v1574_v59  ;;  %v1572_v60 = vpop.permute.xlu0 %1571 }
 0x3e3   : > { %1578 = vst.msk [vmem:[#allocation6 + $0x10] sm:$0xff] %vm1101_vm3, %v1572_v60 }
 0x3e5   : > { %v1583_v61 = vpop.permute.xlu1 %1582 }
 0x3e6   : > { %1588 = vst.msk [vmem:[#allocation6 + $0x28] sm:$0xff] %vm1101_vm3, %v1583_v61  ;;  %v1581_v62 = vpop.permute.xlu0 %1580 }
 0x3e7   : > { %1587 = vst.msk [vmem:[#allocation6 + $0x20] sm:$0xff] %vm1101_vm3, %v1581_v62 }
 0x3e9   : > { %v1592_v63 = vpop.permute.xlu1 %1591  ;;  %v1601_v4 = vld [vmem:[#allocation6 + $0x18] sm:$0xff] }
 0x3ea   : > { %1597 = vst.msk [vmem:[#allocation6 + $0x38] sm:$0xff] %vm1101_vm3, %v1592_v63  ;;  %v1590_v2 = vpop.permute.xlu0 %1589  ;;  %v1600_v3 = vld [vmem:[#allocation6 + $0x10] sm:$0xff] }
 0x3eb   : > { %1596 = vst.msk [vmem:[#allocation6 + $0x30] sm:$0xff] %vm1101_vm3, %v1590_v2  ;;  %4452 = vmatprep.mubr.msk.f32.mxu0 %vm1101_vm3, %v1600_v3 }
 0x3ec   : > { %4453 = vmatmul.mubr.msk.f32.vlgmr.msra.gmra.mrb[10].mxu0 %vm1101_vm3, %v1601_v4 }
 0x3ed   : > { %4680 = vmatpush3.bf16.xpose.msk.msra.mxu0 %vm6274_vm4, %v4675_v52  ;;  %v1603_v6 = vld [vmem:[#allocation6 + $0x28] sm:$0xff] }
 0x3ee   : > { %v1602_v5 = vld [vmem:[#allocation6 + $0x20] sm:$0xff] }
 0x3ef   : > { %4459 = vmatprep.mubr.msk.f32.mxu1 %vm1101_vm3, %v1602_v5 }
 0x3f0   : > { %4460 = vmatmul.mubr.msk.f32.vlgmr.msra.gmra.mrb[2].mxu1 %vm1101_vm3, %v1603_v6 }
 0x3f1   : > { %4684 = vmatpush3.bf16.msra.mxu1 %v4681_v58  ;;  %v1605_v8 = vld [vmem:[#allocation6 + $0x38] sm:$0xff] }
 0x3f2   : > { %v1604_v7 = vld [vmem:[#allocation6 + $0x30] sm:$0xff] }
 0x3f3   : > { %4466 = vmatprep.mubr.msk.f32.mxu0 %vm1101_vm3, %v1604_v7 }
 0x3f4   : > { %4467 = vmatmul.mubr.msk.f32.vlgmr.msra.gmra.mrb[12].mxu0 %vm1101_vm3, %v1605_v8 }
 0x44c   : > { %v4447_v9 = vpop.f32.mrb[0].mxu1 }
 0x44d   : > { %v1692_v10 = vpop.f32.mrb[1].mxu1  ;;  %v1966_v11 = vsel %vm1246_vm2, %v4447_v9, -inf }
 0x44e   : > { %1967 = vmax.xlane.f32.xlu1 %v1966_v11  ;;  %v1963_v12 = vsel %vm1246_vm2, %v1692_v10, -inf }
 0x44f   : > { %1964 = vmax.xlane.f32.xlu0 %v1963_v12 }
 0x4bf   : > { %v4454_v13 = vpop.f32.mrb[10].mxu0 }
 0x4c0   : > { %v1779_v14 = vpop.f32.mrb[11].mxu0  ;;  %v1972_v15 = vsel %vm1246_vm2, %v4454_v13, -inf }
 0x4c1   : > { %1973 = vmax.xlane.f32.xlu0 %v1972_v15  ;;  %v1969_v18 = vsel %vm1246_vm2, %v1779_v14, -inf }
 0x4c3   : > { %v4461_v16 = vpop.f32.mrb[2].mxu1 }
 0x4c4   : > { %v1866_v17 = vpop.f32.mrb[3].mxu1  ;;  %v1978_v19 = vsel %vm1246_vm2, %v4461_v16, -inf }
 0x4c5   : > { %1970 = vmax.xlane.f32.xlu0 %v1969_v18  ;;  %1979 = vmax.xlane.f32.xlu1 %v1978_v19  ;;  %v1975_v22 = vsel %vm1246_vm2, %v1866_v17, -inf  ;;  %v2421_v18 = vld [vmem:[%s6808_s19 + $0x8] sm:$0xff] }
 0x4c7   : > { %v4468_v20 = vpop.f32.mrb[12].mxu0 }
 0x4c8   : > { %v1953_v21 = vpop.f32.mrb[13].mxu0  ;;  %v1984_v23 = vsel %vm1246_vm2, %v4468_v20, -inf }
 0x4c9   : > { %1976 = vmax.xlane.f32.xlu0 %v1975_v22  ;;  %1985 = vmax.xlane.f32.xlu1 %v1984_v23  ;;  %v1981_v24 = vsel %vm1246_vm2, %v1953_v21, -inf }
 0x4cd   : > { %1982 = vmax.xlane.f32.xlu0 %v1981_v24 }
 0x4da   : > { %1218 = vrot.lane.b32.xlu1 %v6265_v25, %s6744_s12 }
 0x4db   : > { %v1968_v29 = vpop.xlane.xlu1 %1967 }
 0x4dc   : > { %v1965_v26 = vpop.xlane.xlu0 %1964  ;;  %v1988_v30 = vsub.f32 %v4447_v9, %v1968_v29 }
 0x4dd   : > { %v1987_v28 = vsub.f32 %v1692_v10, %v1965_v26 }
 0x4de   : > { %1225 = vrot.lane.b32.xlu1 %v6269_v27, %s5584_s10  ;;  %v1997_v34 = vmul.f32 1.442695, %v1988_v30 }
 0x4df   : > { %v1995_v32 = vmul.f32 1.442695, %v1987_v28 }
 0x4e1   : > { %4982 = vpow2.f32 %v1995_v32 }
 0x4e2   : > { %1227 = vrot.lane.b32.xlu1 %v6265_v25, %s5584_s10  ;;  %4984 = vpow2.f32 %v1997_v34 }
 0x4e3   : > { %1216 = vrot.lane.b32.xlu0 %v6269_v27, %s6744_s12  ;;  %s6812_s12 = smov 8  }
 0x4eb   : > { %v6349_v35 = vpop.eup %4982 }
 0x4ec   : > { %v2011_v36 = vsel %vm1246_vm2, %v6349_v35, 0.0  ;;  %v6353_v37 = vpop.eup %4984 }
 0x4ed   : > { %v2014_v38 = vsel %vm1246_vm2, %v6353_v37, 0.0 }
 0x502   : > { %2012 = vadd.xlane.f32.xlu0 %v2011_v36 }
 0x506   : > { %2015 = vadd.xlane.f32.xlu1 %v2014_v38 }
 0x54e   : > { %v1974_v39 = vpop.xlane.xlu0 %1973 }
 0x54f   : > { %v1990_v40 = vsub.f32 %v4454_v13, %v1974_v39 }
 0x551   : > { %v2001_v41 = vmul.f32 1.442695, %v1990_v40 }
 0x552   : > { %v1980_v42 = vpop.xlane.xlu1 %1979  ;;  %v1971_v43 = vpop.xlane.xlu0 %1970 }
 0x553   : > { %4986 = vpow2.f32 %v2001_v41  ;;  %v1992_v44 = vsub.f32 %v4461_v16, %v1980_v42  ;;  %v1989_v45 = vsub.f32 %v1779_v14, %v1971_v43  ;;  %v2422_v41 = vld [vmem:[%s6808_s19 + $0x10] sm:$0xff]  ;;  %v2423_v42 = vld [vmem:[%s6808_s19 + $0x18] sm:$0xff] }
 0x555   : > { %v2005_v46 = vmul.f32 1.442695, %v1992_v44  ;;  %v1999_v47 = vmul.f32 1.442695, %v1989_v45 }
 0x556   : > { %v1986_v48 = vpop.xlane.xlu1 %1985  ;;  %v1977_v49 = vpop.xlane.xlu0 %1976 }
 0x557   : > { %4988 = vpow2.f32 %v2005_v46  ;;  %v1994_v50 = vsub.f32 %v4468_v20, %v1986_v48  ;;  %v1991_v51 = vsub.f32 %v1866_v17, %v1977_v49  ;;  %v2420_v17 = vld [vmem:[%s6808_s19] sm:$0xff]  ;;  %v4701_v46 = vpack.c.bf16 %v2423_v42, %v2422_v41 }
 0x558   : > { %4990 = vpow2.f32 %v1999_v47  ;;  %v4697_v19 = vpack.c.bf16 %v2421_v18, %v2420_v17 }
 0x559   : > { %v2009_v52 = vmul.f32 1.442695, %v1994_v50  ;;  %v2003_v53 = vmul.f32 1.442695, %v1991_v51 }
 0x55a   : > { %v1219_v54 = vpop.permute.xlu1 %1218  ;;  %v1983_v55 = vpop.xlane.xlu0 %1982 }
 0x55b   : > { %4992 = vpow2.f32 %v2009_v52  ;;  %1224 = vst.msk [vmem:[#allocation3 + $0x18] sm:$0xff] %vm1101_vm3, %v1219_v54  ;;  %v1993_v56 = vsub.f32 %v1953_v21, %v1983_v55 }
 0x55c   : > { %4994 = vpow2.f32 %v2003_v53  ;;  %v2685_v53 = vld [vmem:[#allocation4] sm:$0xff] }
 0x55d   : > { %v6358_v57 = vpop.eup %4986  ;;  %v2007_v58 = vmul.f32 1.442695, %v1993_v56 }
 0x55e   : > { %v1226_v59 = vpop.permute.xlu1 %1225  ;;  %v1217_v60 = vpop.permute.xlu0 %1216  ;;  %v2020_v61 = vsel %vm1246_vm2, %v6358_v57, 0.0 }
 0x55f   : > { %4996 = vpow2.f32 %v2007_v58  ;;  %1232 = vst.msk [vmem:[#allocation3 + $0x20] sm:$0xff] %vm1101_vm3, %v1226_v59  ;;  %1223 = vst.msk [vmem:[#allocation3 + $0x10] sm:$0xff] %vm1101_vm3, %v1217_v60  ;;  %2021 = vadd.xlane.f32.xlu1 %v2020_v61 }
 0x561   : > { %v6364_v62 = vpop.eup %4988 }
 0x562   : > { %v4991_v63 = vpop.eup %4990  ;;  %v1228_v2 = vpop.permute.xlu1 %1227  ;;  %v2026_v3 = vsel %vm1246_vm2, %v6364_v62, 0.0  ;;  %v2054_v9 = vld [vmem:[#allocation3 + $0x18] sm:$0xff] }
 0x563   : > { %1233 = vst.msk [vmem:[#allocation3 + $0x28] sm:$0xff] %vm1101_vm3, %v1228_v2  ;;  %2027 = vadd.xlane.f32.xlu1 %v2026_v3  ;;  %v2017_v4 = vsel %vm1246_vm2, %v4991_v63, 0.0 }
 0x564   : > { %2018 = vadd.xlane.f32.xlu0 %v2017_v4 }
 0x565   : > { %v6370_v5 = vpop.eup %4992 }
 0x566   : > { %v4995_v6 = vpop.eup %4994  ;;  %v2032_v7 = vsel %vm1246_vm2, %v6370_v5, 0.0  ;;  %v2053_v8 = vld [vmem:[#allocation3 + $0x10] sm:$0xff]  ;;  %v2055_v14 = vld [vmem:[#allocation3 + $0x20] sm:$0xff] }
 0x567   : > { %2033 = vadd.xlane.f32.xlu1 %v2032_v7  ;;  %v2023_v10 = vsel %vm1246_vm2, %v4995_v6, 0.0  ;;  %v4685_v11 = vpack.c.bf16 %v2054_v9, %v2053_v8  ;;  %v4220_v9 = vld [vmem:[#allocation20] ss:$0 sm:$0xff] }
 0x568   : > { %2024 = vadd.xlane.f32.xlu0 %v2023_v10 }
 0x569   : > { %v4997_v12 = vpop.eup %4996  ;;  %4686 = vmatprep.subr.bf16.mxu1 %v4685_v11 }
 0x56a   : > { %v2029_v13 = vsel %vm1246_vm2, %v4997_v12, 0.0  ;;  %v2056_v15 = vld [vmem:[#allocation3 + $0x28] sm:$0xff] }
 0x56b   : > { %v4689_v16 = vpack.c.bf16 %v2056_v15, %v2055_v14 }
 0x56c   : > { %2030 = vadd.xlane.f32.xlu0 %v2029_v13 }
 0x56d   : > { %4690 = vmatprep.subr.bf16.mxu0 %v4689_v16 }
 0x56e   : > { %4692 = vmatpush3.bf16.msra.mxu0 %v4689_v16 }
 0x56f   : > { %4698 = vmatprep.subr.bf16.mxu0 %v4697_v19 }
 0x578   : > { %1236 = vrot.lane.b32.xlu1 %v6265_v25, %s6747_s21 }
 0x582   : > { %1234 = vrot.lane.b32.xlu0 %v6269_v27, %s6747_s21 }
 0x58f   : > { %v2013_v20 = vpop.xlane.xlu0 %2012 }
 0x590   : > { %4998 = vrcp.f32 %v2013_v20  ;;  %v2562_v20 = vld [vmem:[%s6809_s3] sm:$0xff] }
 0x593   : > { %v2016_v21 = vpop.xlane.xlu1 %2015 }
 0x594   : > { %5000 = vrcp.f32 %v2016_v21  ;;  %v2563_v21 = vld [vmem:[%s6809_s3 + $0x8] sm:$0xff] }
 0x59a   : > { %v4999_v22 = vpop.eup %4998 }
 0x59b   : > { %v2043_v25 = vmul.f32 %v4999_v22, %v6349_v35  ;;  %v4705_v22 = vpack.c.bf16 %v2563_v21, %v2562_v20 }
 0x59d   : > { %4473 = vmatprep.mubr.msk.f32.mxu1 %vm1246_vm2, %v2043_v25  ;;  %v2564_v25 = vld [vmem:[%s6809_s3 + $0x10] sm:$0xff] }
 0x59e   : > { %v5001_v23 = vpop.eup %5000 }
 0x59f   : > { %v2044_v24 = vmul.f32 %v5001_v23, %v6353_v37  ;;  %v2565_v23 = vld [vmem:[%s6809_s3 + $0x18] sm:$0xff]  ;;  %s6816_s3 = sld [smem:[#allocation60_spill]] }
 0x5a1   : > { %4474 = vmatmul.mubr.msk.f32.vlgmr.msra.gmra.mrb[4].mxu1 %vm1246_vm2, %v2044_v24  ;;  %v4709_v24 = vpack.c.bf16 %v2565_v23, %v2564_v25 }
 0x5a2   : > { %4688 = vmatpush3.bf16.msra.mxu1 %v4685_v11 }
 0x5ec   : > { %v2022_v26 = vpop.xlane.xlu1 %2021 }
 0x5ed   : > { %5002 = vrcp.f32 %v2022_v26 }
 0x5f0   : > { %v2028_v28 = vpop.xlane.xlu1 %2027 }
 0x5f1   : > { %v2019_v27 = vpop.xlane.xlu0 %2018 }
 0x5f2   : > { %5004 = vrcp.f32 %v2019_v27 }
 0x5f3   : > { %5006 = vrcp.f32 %v2028_v28 }
 0x5f4   : > { %v2034_v29 = vpop.xlane.xlu1 %2033 }
 0x5f5   : > { %v2025_v30 = vpop.xlane.xlu0 %2024 }
 0x5f6   : > { %5008 = vrcp.f32 %v2025_v30 }
 0x5f7   : > { %v5003_v35 = vpop.eup %5002 }
 0x5f8   : > { %v1237_v32 = vpop.permute.xlu1 %1236  ;;  %v2046_v39 = vmul.f32 %v5003_v35, %v6358_v57 }
 0x5f9   : > { %1242 = vst.msk [vmem:[#allocation3 + $0x38] sm:$0xff] %vm1101_vm3, %v1237_v32  ;;  %v2031_v34 = vpop.xlane.xlu0 %2030 }
 0x5fa   : > { %5010 = vrcp.f32 %v2031_v34 }
 0x5fb   : > { %5012 = vrcp.f32 %v2034_v29 }
 0x5fc   : > { %v5005_v36 = vpop.eup %5004 }
 0x5fd   : > { %v1235_v37 = vpop.permute.xlu0 %1234  ;;  %v2045_v38 = vmul.f32 %v5005_v36, %v4991_v63  ;;  %v5007_v40 = vpop.eup %5006 }
 0x5fe   : > { %1241 = vst.msk [vmem:[#allocation3 + $0x30] sm:$0xff] %vm1101_vm3, %v1235_v37  ;;  %v2048_v45 = vmul.f32 %v5007_v40, %v6364_v62 }
 0x5ff   : > { %4480 = vmatprep.mubr.msk.f32.mxu1 %vm1246_vm2, %v2045_v38 }
 0x600   : > { %v5009_v43 = vpop.eup %5008  ;;  %4481 = vmatmul.mubr.msk.f32.vlgmr.msra.gmra.mrb[6].mxu1 %vm1246_vm2, %v2046_v39  ;;  %v2058_v50 = vld [vmem:[#allocation3 + $0x38] sm:$0xff] }
 0x601   : > { %v2047_v44 = vmul.f32 %v5009_v43, %v4995_v6 }
 0x603   : > { %4487 = vmatprep.mubr.msk.f32.mxu0 %vm1246_vm2, %v2047_v44 }
 0x604   : > { %v5011_v47 = vpop.eup %5010  ;;  %4488 = vmatmul.mubr.msk.f32.vlgmr.msra.gmra.mrb[14].mxu0 %vm1246_vm2, %v2048_v45 }
 0x605   : > { %4700 = vmatpush3.bf16.msra.mxu0 %v4697_v19  ;;  %v2049_v48 = vmul.f32 %v5011_v47, %v4997_v12  ;;  %v2057_v49 = vld [vmem:[#allocation3 + $0x30] sm:$0xff]  ;;  %v5013_v52 = vpop.eup %5012 }
 0x606   : > { %4702 = vmatprep.subr.bf16.mxu0 %v4701_v46  ;;  %v4693_v51 = vpack.c.bf16 %v2058_v50, %v2057_v49  ;;  %v2050_v54 = vmul.f32 %v5013_v52, %v6370_v5  ;;  %v4224_v50 = vld [vmem:[#allocation16] ss:$0 sm:$0xff] }
 0x607   : > { %4494 = vmatprep.mubr.msk.f32.mxu1 %vm1246_vm2, %v2049_v48  ;;  %v4223_v48 = vld [vmem:[#allocation14] ss:$0 sm:$0xff] }
 0x608   : > { %4694 = vmatprep.subr.bf16.mxu1 %v4693_v51 }
 0x609   : > { %4704 = vmatpush3.bf16.msra.mxu0 %v4701_v46  ;;  %4696 = vmatpush3.bf16.msra.mxu1 %v4693_v51 }
 0x60a   : > { %4519 = vmatprep.subr.msk.mxu0 %vm1101_vm3, %v2685_v53  ;;  %4706 = vmatprep.subr.bf16.mxu1 %v4705_v22 }
 0x60c   : > { %4495 = vmatmul.mubr.msk.f32.vlgmr.msra.gmra.mrb[8].mxu1 %vm1246_vm2, %v2050_v54 }
 0x60d   : > { %4708 = vmatpush3.bf16.msra.mxu1 %v4705_v22 }
 0x60e   : > { %4710 = vmatprep.subr.bf16.mxu1 %v4709_v24 }
 0x611   : > { %4712 = vmatpush3.bf16.msra.mxu1 %v4709_v24 }
 0x674   : > { %v4475_v55 = vpop.f32.mrb[4].mxu1 }
 0x675   : > { %2384 = vst.msk [vmem:[#allocation7 + $0x8] sm:$0xff] %vm1101_vm3, %v4475_v55  ;;  %v2131_v56 = vpop.f32.mrb[5].mxu1 }
 0x676   : > { %2383 = vst.msk [vmem:[#allocation7] sm:$0xff] %vm1101_vm3, %v2131_v56 }
 0x6d3   : > { %v4482_v57 = vpop.f32.mrb[6].mxu1 }
 0x6d4   : > { %2389 = vrot.lane.b32.xlu1 %v4482_v57, %s6742_s14  ;;  %v2212_v58 = vpop.f32.mrb[7].mxu1 }
 0x6d5   : > { %2387 = vrot.lane.b32.xlu0 %v2212_v58, %s6742_s14  ;;  %s4265_s14 = sshll.u32 %s5554_s28, 8  ;;  %s3910_s28 = scalar_lea.sflag [#allocation10], %s6148_s16 }
 0x6d6   : > { %s6632_s15 = scalar_lea.hbm %s6819_s7, %s4265_s14 }
 0x6d7   : > { %v4489_v59 = vpop.f32.mrb[14].mxu0 }
 0x6d8   : > { %2400 = vrot.lane.b32.xlu1 %v4489_v59, %s6740_s8  ;;  %v2293_v60 = vpop.f32.mrb[15].mxu0 }
 0x6d9   : > { %2398 = vrot.lane.b32.xlu0 %v2293_v60, %s6740_s8 }
 0x6df   : > { %v4496_v61 = vpop.f32.mrb[8].mxu1 }
 0x6e0   : > { %2411 = vrot.lane.b32.xlu1 %v4496_v61, %s6738_s23  ;;  %v2374_v62 = vpop.f32.mrb[9].mxu1 }
 0x6e1   : > { %2409 = vrot.lane.b32.xlu0 %v2374_v62, %s6738_s23  ;;  %s6815_s23 = sld [smem:[#allocation61_spill]] }
 0x746   : > { %v2390_v63 = vpop.permute.xlu1 %2389 }
 0x747   : > { %2395 = vst.msk [vmem:[#allocation7 + $0x8] sm:$0xff] %vm2393_vm5, %v2390_v63  ;;  %v2388_v2 = vpop.permute.xlu0 %2387 }
 0x748   : > { %2394 = vst.msk [vmem:[#allocation7] sm:$0xff] %vm2393_vm5, %v2388_v2 }
 0x74a   : > { %v2401_v3 = vpop.permute.xlu1 %2400 }
 0x74b   : > { %2406 = vst.msk [vmem:[#allocation7 + $0x8] sm:$0xff] %vm2404_vm6, %v2401_v3  ;;  %v2399_v4 = vpop.permute.xlu0 %2398  ;;  %v3113_v3 = vld [vmem:[#allocation5] sm:$0xff] }
 0x74c   : > { %2405 = vst.msk [vmem:[#allocation7] sm:$0xff] %vm2404_vm6, %v2399_v4 }
 0x752   : > { %v2412_v5 = vpop.permute.xlu1 %2411 }
 0x753   : > { %2417 = vst.msk [vmem:[#allocation7 + $0x8] sm:$0xff] %vm2415_vm7, %v2412_v5  ;;  %v2410_v6 = vpop.permute.xlu0 %2409 }
 0x754   : > { %2416 = vst.msk [vmem:[#allocation7] sm:$0xff] %vm2415_vm7, %v2410_v6 }
 0x75a   : > { %v2419_v8 = vld [vmem:[#allocation7 + $0x8] sm:$0xff] }
 0x75b   : > { %v2418_v7 = vld [vmem:[#allocation7] sm:$0xff] }
 0x75c   : > { %4505 = vmatprep.mubr.msk.f32.mxu0 %vm967_vm0, %v2418_v7 }
 0x75d   : > { %4506 = vmatmul.mubr.msk.f32.vlgmr.msra.gmra.mrb[16].mxu0 %vm967_vm0, %v2419_v8 }
 0x75e   : > { %4520 = vmatpush3.xpose.msk.msra.mxu0 %vm1101_vm3, %v2685_v53 }
 0x830   : > { %v4507_v10 = vpop.f32.mrb[16].mxu0 }
 0x831   : > { %v2509_v11 = vadd.f32 %v4507_v10, %v4220_v9  ;;  %v2503_v12 = vpop.f32.mrb[17].mxu0 }
 0x832   : > { %v2504_v13 = vadd.f32 %v4220_v9, %v2503_v12 }
 0x833   : > { %v6426_v14 = vadd.f32 %v2509_v11, %v6193_v1 }
 0x834   : > { %v6429_v15 = vadd.f32 %v2504_v13, %v6191_v0 }
 0x835   : > { %v2517_v16 = vsel %vm967_vm0, %v6426_v14, 0.0  ;;  %v2521_v1 = vmul.f32 %v6426_v14, %v6426_v14 }
 0x836   : > { %2518 = vadd.xlane.f32.xlu1 %v2517_v16  ;;  %v2514_v17 = vsel %vm967_vm0, %v6429_v15, 0.0  ;;  %v2520_v18 = vmul.f32 %v6429_v15, %v6429_v15 }
 0x837   : > { %2515 = vadd.xlane.f32.xlu0 %v2514_v17  ;;  %v2525_v0 = vsel %vm967_vm0, %v2521_v1, 0.0 }
 0x838   : > { %v2522_v19 = vsel %vm967_vm0, %v2520_v18, 0.0 }
 0x83b   : > { %2523 = vadd.xlane.f32.xlu0 %v2522_v19 }
 0x83f   : > { %2526 = vadd.xlane.f32.xlu0 %v2525_v0 }
 0x847   : > { %1327 = vrot.lane.b32.xlu1 %v6280_v31, %s5584_s10 }
 0x84b   : > { %1332 = vrot.lane.b32.xlu1 %v6280_v31, %s6747_s21  ;;  %s6810_s21 = smov 120  }
 0x855   : > { %1322 = vrot.lane.b32.xlu0 %v6280_v31, %s6810_s21 }
 0x8c3   : > { %v2519_v26 = vpop.xlane.xlu1 %2518 }
 0x8c4   : > { %v2516_v28 = vpop.xlane.xlu0 %2515  ;;  %v2529_v32 = vmul.f32 0.03125, %v2519_v26 }
 0x8c5   : > { %v2528_v27 = vmul.f32 0.03125, %v2516_v28 }
 0x8c6   : > { %v2533_v39 = vmul.f32 %v2529_v32, %v2529_v32  ;;  %v2537_v51 = vsub.f32 %v6426_v14, %v2529_v32 }
 0x8c7   : > { %v1328_v29 = vpop.permute.xlu1 %1327  ;;  %v2532_v34 = vmul.f32 %v2528_v27, %v2528_v27  ;;  %v2536_v45 = vsub.f32 %v6429_v15, %v2528_v27 }
 0x8c8   : > { %1331 = vst.msk [vmem:[#allocation4 + $0x10] sm:$0xff] %vm1101_vm3, %v1328_v29  ;;  %v2524_v30 = vpop.xlane.xlu0 %2523 }
 0x8c9   : > { %v2530_v35 = vmul.f32 0.03125, %v2524_v30 }
 0x8cb   : > { %v2534_v36 = vsub.f32 %v2530_v35, %v2532_v34  ;;  %v1333_v37 = vpop.permute.xlu1 %1332 }
 0x8cc   : > { %1336 = vst.msk [vmem:[#allocation4 + $0x18] sm:$0xff] %vm1101_vm3, %v1333_v37  ;;  %v2527_v38 = vpop.xlane.xlu0 %2526 }
 0x8cd   : > { %v2538_v31 = vadd.f32 1e-05, %v2534_v36  ;;  %v2531_v40 = vmul.f32 0.03125, %v2527_v38 }
 0x8cf   : > { %5014 = vrsqrt.f32 %v2538_v31  ;;  %v2535_v41 = vsub.f32 %v2531_v40, %v2533_v39  ;;  %v2687_v42 = vld [vmem:[#allocation4 + $0x10] sm:$0xff] }
 0x8d0   : > { %4529 = vmatprep.subr.msk.mxu0 %vm1101_vm3, %v2687_v42  ;;  %v1323_v43 = vpop.permute.xlu0 %1322 }
 0x8d1   : > { %v2539_v44 = vadd.f32 1e-05, %v2535_v41  ;;  %1326 = vst.msk [vmem:[#allocation4 + $0x8] sm:$0xff] %vm1101_vm3, %v1323_v43 }
 0x8d3   : > { %5016 = vrsqrt.f32 %v2539_v44  ;;  %v2688_v58 = vld [vmem:[#allocation4 + $0x18] sm:$0xff] }
 0x8d8   : > { %v2686_v46 = vld [vmem:[#allocation4 + $0x8] sm:$0xff] }
 0x8d9   : > { %v5015_v47 = vpop.eup %5014  ;;  %4524 = vmatprep.subr.msk.mxu1 %vm1101_vm3, %v2686_v46 }
 0x8da   : > { %v2542_v49 = vmul.f32 %v5015_v47, %v2536_v45 }
 0x8dc   : > { %v2551_v52 = vmul.f32 %v4223_v48, %v2542_v49 }
 0x8dd   : > { %v5017_v53 = vpop.eup %5016 }
 0x8de   : > { %v2543_v54 = vmul.f32 %v5017_v53, %v2537_v51  ;;  %v2560_v55 = vadd.f32 %v4224_v50, %v2551_v52 }
 0x8e0   : > { %v2552_v56 = vmul.f32 %v4223_v48, %v2543_v54  ;;  %4516 = vmatprep.mubr.msk.f32.mxu1 %vm967_vm0, %v2560_v55 }
 0x8e2   : > { %v2561_v57 = vadd.f32 %v4224_v50, %v2552_v56 }
 0x8e4   : > { %4517 = vmatmul.mubr.msk.f32.vlgmr.msra.gmra.mrb[10].mxu1 %vm967_vm0, %v2561_v57 }
 0x8e5   : > { %4525 = vmatpush3.xpose.msk.msra.mxu1 %vm1101_vm3, %v2686_v46 }
 0x8e6   : > { %4534 = vmatprep.subr.msk.mxu1 %vm1101_vm3, %v2688_v58 }
 0x9b7   : > { %v4518_v59 = vpop.f32.mrb[10].mxu1 }
 0x9b8   : > { %v2648_v60 = vmul.f32 0.35355338, %v4518_v59  ;;  %v2638_v61 = vpop.f32.mrb[11].mxu1 }
 0x9b9   : > { %v2647_v62 = vmul.f32 0.35355338, %v2638_v61 }
 0x9ba   : > { %2650 = vst.msk [vmem:[#allocation6 + $0x8] sm:$0xff] %vm1101_vm3, %v2648_v60  ;;  %2655 = vrot.lane.b32.xlu0 %v2648_v60, %s6810_s21 }
 0x9bb   : > { %2649 = vst.msk [vmem:[#allocation6] sm:$0xff] %vm1101_vm3, %v2647_v62  ;;  %2653 = vrot.lane.b32.xlu1 %v2647_v62, %s6810_s21 }
 0x9be   : > { %2663 = vrot.lane.b32.xlu0 %v2648_v60, %s5584_s10 }
 0x9bf   : > { %2661 = vrot.lane.b32.xlu1 %v2647_v62, %s5584_s10 }
 0x9c1   : > { %v2678_v2 = vld [vmem:[#allocation6 + $0x8] sm:$0xff] }
 0x9c2   : > { %2671 = vrot.lane.b32.xlu0 %v2648_v60, %s6811_s4  ;;  %v2677_v63 = vld [vmem:[#allocation6] sm:$0xff] }
 0x9c3   : > { %2669 = vrot.lane.b32.xlu1 %v2647_v62, %s6811_s4  ;;  %4521 = vmatprep.mubr.msk.f32.mxu0 %vm1101_vm3, %v2677_v63 }
 0x9c4   : > { %4522 = vmatmul.mubr.msk.f32.vlgmr.msra.gmra.mrb[18].mxu0 %vm1101_vm3, %v2678_v2 }
 0x9c5   : > { %4530 = vmatpush3.xpose.msk.msra.mxu0 %vm1101_vm3, %v2687_v42 }
 0x9c6   : > { %4539 = vmatprep.subr.mxu0 %v3113_v3 }
 0xa2c   : > { %v2656_v4 = vpop.permute.xlu0 %2655 }
 0xa2d   : > { %2660 = vst.msk [vmem:[#allocation6 + $0x18] sm:$0xff] %vm1101_vm3, %v2656_v4  ;;  %v2654_v5 = vpop.permute.xlu1 %2653 }
 0xa2e   : > { %2659 = vst.msk [vmem:[#allocation6 + $0x10] sm:$0xff] %vm1101_vm3, %v2654_v5 }
 0xa30   : > { %v2664_v6 = vpop.permute.xlu0 %2663 }
 0xa31   : > { %2668 = vst.msk [vmem:[#allocation6 + $0x28] sm:$0xff] %vm1101_vm3, %v2664_v6  ;;  %v2662_v7 = vpop.permute.xlu1 %2661 }
 0xa32   : > { %2667 = vst.msk [vmem:[#allocation6 + $0x20] sm:$0xff] %vm1101_vm3, %v2662_v7 }
 0xa34   : > { %v2672_v8 = vpop.permute.xlu0 %2671  ;;  %v2680_v11 = vld [vmem:[#allocation6 + $0x18] sm:$0xff] }
 0xa35   : > { %2676 = vst.msk [vmem:[#allocation6 + $0x38] sm:$0xff] %vm1101_vm3, %v2672_v8  ;;  %v2670_v9 = vpop.permute.xlu1 %2669  ;;  %v2679_v10 = vld [vmem:[#allocation6 + $0x10] sm:$0xff] }
 0xa36   : > { %2675 = vst.msk [vmem:[#allocation6 + $0x30] sm:$0xff] %vm1101_vm3, %v2670_v9  ;;  %4526 = vmatprep.mubr.msk.f32.mxu1 %vm1101_vm3, %v2679_v10 }
 0xa37   : > { %4527 = vmatmul.mubr.msk.f32.vlgmr.msra.gmra.mrb[12].mxu1 %vm1101_vm3, %v2680_v11 }
 0xa38   : > { %4535 = vmatpush3.xpose.msk.msra.mxu1 %vm1101_vm3, %v2688_v58  ;;  %v2682_v13 = vld [vmem:[#allocation6 + $0x28] sm:$0xff] }
 0xa39   : > { %v2681_v12 = vld [vmem:[#allocation6 + $0x20] sm:$0xff] }
 0xa3a   : > { %4531 = vmatprep.mubr.msk.f32.mxu0 %vm1101_vm3, %v2681_v12 }
 0xa3b   : > { %4532 = vmatmul.mubr.msk.f32.vlgmr.msra.gmra.mrb[20].mxu0 %vm1101_vm3, %v2682_v13 }
 0xa3c   : > { %4540 = vmatpush3.msra.mxu0 %v3113_v3  ;;  %v2684_v17 = vld [vmem:[#allocation6 + $0x38] sm:$0xff] }
 0xa3d   : > { %v2683_v16 = vld [vmem:[#allocation6 + $0x30] sm:$0xff] }
 0xa3e   : > { %4536 = vmatprep.mubr.msk.f32.mxu1 %vm1101_vm3, %v2683_v16 }
 0xa3f   : > { %4537 = vmatmul.mubr.msk.f32.vlgmr.msra.gmra.mrb[14].mxu1 %vm1101_vm3, %v2684_v17 }
 0xa97   : > { %v4523_v18 = vpop.f32.mrb[18].mxu0 }
 0xa98   : > { %v2764_v19 = vpop.f32.mrb[19].mxu0  ;;  %v3028_v1 = vsel %vm1101_vm3, %v4523_v18, -inf }
 0xa99   : > { %3029 = vmax.xlane.f32.xlu0 %v3028_v1  ;;  %v3025_v0 = vsel %vm1101_vm3, %v2764_v19, -inf }
 0xa9a   : > { %3026 = vmax.xlane.f32.xlu1 %v3025_v0 }
 0xb0a   : > { %v4528_v20 = vpop.f32.mrb[12].mxu1 }
 0xb0b   : > { %v2848_v21 = vpop.f32.mrb[13].mxu1  ;;  %v3034_v22 = vsel %vm1101_vm3, %v4528_v20, -inf }
 0xb0c   : > { %3035 = vmax.xlane.f32.xlu0 %v3034_v22  ;;  %v3031_v24 = vsel %vm1101_vm3, %v2848_v21, -inf }
 0xb0e   : > { %v4533_v25 = vpop.f32.mrb[20].mxu0 }
 0xb0f   : > { %v2932_v23 = vpop.f32.mrb[21].mxu0  ;;  %v3040_v29 = vsel %vm1101_vm3, %v4533_v25, -inf }
 0xb10   : > { %3032 = vmax.xlane.f32.xlu0 %v3031_v24  ;;  %v3037_v26 = vsel %vm1101_vm3, %v2932_v23, -inf }
 0xb11   : > { %3038 = vmax.xlane.f32.xlu1 %v3037_v26 }
 0xb12   : > { %v4538_v28 = vpop.f32.mrb[14].mxu1 }
 0xb13   : > { %v3016_v27 = vpop.f32.mrb[15].mxu1  ;;  %v3046_v32 = vsel %vm1101_vm3, %v4538_v28, -inf }
 0xb14   : > { %3041 = vmax.xlane.f32.xlu0 %v3040_v29  ;;  %v3043_v30 = vsel %vm1101_vm3, %v3016_v27, -inf }
 0xb15   : > { %3044 = vmax.xlane.f32.xlu1 %v3043_v30 }
 0xb18   : > { %3047 = vmax.xlane.f32.xlu0 %v3046_v32 }
 0xb26   : > { %1411 = vrot.lane.b32.xlu1 %v6289_v33, %s6810_s21  ;;  %v3030_v34 = vpop.xlane.xlu0 %3029  ;;  %s6814_s21 = smov 24  }
 0xb27   : > { %v3050_v35 = vsub.f32 %v4523_v18, %v3030_v34  ;;  %v3027_v37 = vpop.xlane.xlu1 %3026 }
 0xb28   : > { %v3049_v38 = vsub.f32 %v2764_v19, %v3027_v37 }
 0xb29   : > { %v3059_v36 = vmul.f32 1.442695, %v3050_v35 }
 0xb2a   : > { %v3057_v40 = vmul.f32 1.442695, %v3049_v38 }
 0xb2b   : > { %5018 = vpow2.f32 %v3059_v36 }
 0xb2c   : > { %5020 = vpow2.f32 %v3057_v40 }
 0xb35   : > { %v6504_v39 = vpop.eup %5018 }
 0xb36   : > { %v3076_v31 = vsel %vm1101_vm3, %v6504_v39, 0.0  ;;  %v5021_v41 = vpop.eup %5020 }
 0xb37   : > { %3077 = vadd.xlane.f32.xlu0 %v3076_v31  ;;  %v3073_v42 = vsel %vm1101_vm3, %v5021_v41, 0.0 }
 0xb4a   : > { %3074 = vadd.xlane.f32.xlu1 %v3073_v42 }
 0xb99   : > { %v3036_v43 = vpop.xlane.xlu0 %3035 }
 0xb9a   : > { %v3052_v44 = vsub.f32 %v4528_v20, %v3036_v43 }
 0xb9c   : > { %v3063_v45 = vmul.f32 1.442695, %v3052_v44 }
 0xb9d   : > { %v3033_v46 = vpop.xlane.xlu0 %3032 }
 0xb9e   : > { %5022 = vpow2.f32 %v3063_v45  ;;  %v3051_v47 = vsub.f32 %v2848_v21, %v3033_v46  ;;  %v3039_v48 = vpop.xlane.xlu1 %3038  ;;  %v3475_v45 = vld [vmem:[#allocation25] sm:$0xff]  ;;  %v3476_v46 = vld [vmem:[#allocation25 + $0x8] sm:$0xff] }
 0xb9f   : > { %v3053_v49 = vsub.f32 %v2932_v23, %v3039_v48  ;;  %v3477_v48 = vld [vmem:[#allocation25 + $0x10] sm:$0xff] }
 0xba0   : > { %v3061_v50 = vmul.f32 1.442695, %v3051_v47  ;;  %v4713_v47 = vpack.c.bf16 %v3476_v46, %v3475_v45  ;;  %v4251_v45 = vld [vmem:[#allocation19] ss:$0 sm:$0xff] }
 0xba1   : > { %v3065_v51 = vmul.f32 1.442695, %v3053_v49  ;;  %v3042_v52 = vpop.xlane.xlu0 %3041  ;;  %v3478_v49 = vld [vmem:[#allocation25 + $0x18] sm:$0xff] }
 0xba2   : > { %5024 = vpow2.f32 %v3061_v50  ;;  %v3054_v53 = vsub.f32 %v4533_v25, %v3042_v52  ;;  %v3045_v54 = vpop.xlane.xlu1 %3044  ;;  %v4717_v50 = vpack.c.bf16 %v3478_v49, %v3477_v48 }
 0xba3   : > { %v3055_v55 = vsub.f32 %v3016_v27, %v3045_v54  ;;  %5026 = vpow2.f32 %v3065_v51 }
 0xba4   : > { %v3067_v56 = vmul.f32 1.442695, %v3054_v53 }
 0xba5   : > { %v3069_v57 = vmul.f32 1.442695, %v3055_v55  ;;  %v3048_v58 = vpop.xlane.xlu0 %3047 }
 0xba6   : > { %5028 = vpow2.f32 %v3067_v56  ;;  %v3056_v59 = vsub.f32 %v4538_v28, %v3048_v58  ;;  %v1412_v60 = vpop.permute.xlu1 %1411 }
 0xba7   : > { %1415 = vst.msk [vmem:[#allocation5 + $0x8] sm:$0xff] %vm1101_vm3, %v1412_v60  ;;  %5030 = vpow2.f32 %v3069_v57 }
 0xba8   : > { %v5023_v61 = vpop.eup %5022  ;;  %v3071_v62 = vmul.f32 1.442695, %v3056_v59 }
 0xba9   : > { %v3082_v63 = vsel %vm1101_vm3, %v5023_v61, 0.0 }
 0xbaa   : > { %5032 = vpow2.f32 %v3071_v62  ;;  %3083 = vadd.xlane.f32.xlu0 %v3082_v63  ;;  %v4247_v63 = vld [vmem:[#allocation26] ss:$0 sm:$0xff] }
 0xbac   : > { %v5025_v2 = vpop.eup %5024 }
 0xbad   : > { %v3079_v3 = vsel %vm1101_vm3, %v5025_v2, 0.0  ;;  %v5027_v4 = vpop.eup %5026 }
 0xbae   : > { %3080 = vadd.xlane.f32.xlu1 %v3079_v3  ;;  %v3114_v5 = vld [vmem:[#allocation5 + $0x8] sm:$0xff]  ;;  %v3085_v7 = vsel %vm1101_vm3, %v5027_v4, 0.0 }
 0xbaf   : > { %4544 = vmatprep.subr.mxu1 %v3114_v5 }
 0xbb0   : > { %v5029_v6 = vpop.eup %5028  ;;  %4545 = vmatpush3.msra.mxu1 %v3114_v5 }
 0xbb1   : > { %v3088_v8 = vsel %vm1101_vm3, %v5029_v6, 0.0  ;;  %v5031_v9 = vpop.eup %5030 }
 0xbb2   : > { %3086 = vadd.xlane.f32.xlu1 %v3085_v7  ;;  %3089 = vadd.xlane.f32.xlu0 %v3088_v8  ;;  %v3091_v11 = vsel %vm1101_vm3, %v5031_v9, 0.0 }
 0xbb4   : > { %v5033_v10 = vpop.eup %5032 }
 0xbb5   : > { %v3094_v12 = vsel %vm1101_vm3, %v5033_v10, 0.0 }
 0xbb6   : > { %3092 = vadd.xlane.f32.xlu1 %v3091_v11  ;;  %3095 = vadd.xlane.f32.xlu0 %v3094_v12  ;;  %v3617_v12 = vld [vmem:[#allocation28] sm:$0xff] }
 0xbc4   : > { %v3078_v13 = vpop.xlane.xlu0 %3077 }
 0xbc5   : > { %5034 = vrcp.f32 %v3078_v13  ;;  %v3618_v13 = vld [vmem:[#allocation28 + $0x8] sm:$0xff] }
 0xbc7   : > { %1421 = vrot.lane.b32.xlu1 %v6289_v33, %s6811_s4  ;;  %s5589_s4 = smov [#allocation31]  }
 0xbcc   : > { %1416 = vrot.lane.b32.xlu0 %v6289_v33, %s5584_s10  ;;  %s6813_s10 = smov 16  }
 0xbcf   : > { %v5035_v17 = vpop.eup %5034 }
 0xbd0   : > { %v3106_v1 = vmul.f32 %v5035_v17, %v6504_v39  ;;  %v4721_v17 = vpack.c.bf16 %v3618_v13, %v3617_v12  ;;  %v4255_v12 = vld [vmem:[%s6816_s3] ss:$0 sm:$0xff]  ;;  %s4181_s3 = sshll.u32 %s6148_s16, 4 }
 0xbd1   : > { %s954_s8 = scalar_lea.vmem [#allocation31], %s4181_s3 }
 0xbd2   : > { %s3925_s0 = sshll.u32 %s954_s8, 4  ;;  %s6635_s0 = int_to_ptr.vmem [resolvable:$true] %s3925_s0 }
 0xbd3   : > { %s5452_s3 = scalar_lea.vmem %s6635_s0, 256 }
 0xbd4   : > { %p5453_p2 = scmp.ne.s32.totalorder %s6635_s0, %s5452_s3 }
 0xbd6   : > { %p5454_p7 = pnand %p5453_p2, %p6820_p5 }
 0xbd7   : > { %v3075_v16 = vpop.xlane.xlu1 %3074 }
 0xbd8   : > { %5036 = vrcp.f32 %v3075_v16  ;;  %v3709_v16 = vld [vmem:[#allocation29] sm:$0xff]  ;;  %p5455_p11 = pneg %p5454_p7 }
 0xbe2   : > { %v5037_v18 = vpop.eup %5036 }
 0xbe3   : > { %v3105_v19 = vmul.f32 %v5037_v18, %v5021_v41  ;;  %v3710_v18 = vld [vmem:[#allocation29 + $0x8] sm:$0xff] }
 0xbe5   : > { %4541 = vmatprep.mubr.msk.f32.mxu0 %vm1101_vm3, %v3105_v19  ;;  %v3619_v19 = vld [vmem:[#allocation28 + $0x10] sm:$0xff] }
 0xbe6   : > { %4542 = vmatmul.mubr.msk.f32.vlgmr.msra.gmra.mrb[22].mxu0 %vm1101_vm3, %v3106_v1  ;;  %v3620_v1 = vld [vmem:[#allocation28 + $0x18] sm:$0xff] }
 0xc37   : > { %v3084_v0 = vpop.xlane.xlu0 %3083 }
 0xc38   : > { %5038 = vrcp.f32 %v3084_v0  ;;  %v4729_v0 = vpack.c.bf16 %v3710_v18, %v3709_v16 }
 0xc3b   : > { %v3081_v20 = vpop.xlane.xlu1 %3080 }
 0xc3c   : > { %5040 = vrcp.f32 %v3081_v20  ;;  %v4725_v20 = vpack.c.bf16 %v3620_v1, %v3619_v19 }
 0xc3f   : > { %v3087_v21 = vpop.xlane.xlu1 %3086  ;;  %v3090_v22 = vpop.xlane.xlu0 %3089 }
 0xc40   : > { %5042 = vrcp.f32 %v3087_v21  ;;  %v3711_v21 = vld [vmem:[#allocation29 + $0x10] sm:$0xff] }
 0xc41   : > { %5044 = vrcp.f32 %v3090_v22  ;;  %v3712_v22 = vld [vmem:[#allocation29 + $0x18] sm:$0xff] }
 0xc42   : > { %v5039_v23 = vpop.eup %5038 }
 0xc43   : > { %v3093_v33 = vpop.xlane.xlu1 %3092  ;;  %v3096_v25 = vpop.xlane.xlu0 %3095  ;;  %v3108_v29 = vmul.f32 %v5039_v23, %v5023_v61  ;;  %v3808_v23 = vld [vmem:[%s6815_s23 + $0x8] sm:$0xff] }
 0xc44   : > { %5046 = vrcp.f32 %v3093_v33  ;;  %v4733_v33 = vpack.c.bf16 %v3712_v22, %v3711_v21  ;;  %v4252_v22 = vld [vmem:[%s6817_s1] ss:$0 sm:$0xff] }
 0xc45   : > { %5048 = vrcp.f32 %v3096_v25  ;;  %v3807_v25 = vld [vmem:[%s6815_s23] sm:$0xff] }
 0xc46   : > { %v5041_v24 = vpop.eup %5040 }
 0xc47   : > { %v1422_v26 = vpop.permute.xlu1 %1421  ;;  %v1417_v28 = vpop.permute.xlu0 %1416  ;;  %v3107_v27 = vmul.f32 %v5041_v24, %v5025_v2  ;;  %v4737_v24 = vpack.c.bf16 %v3808_v23, %v3807_v25 }
 0xc48   : > { %1425 = vst.msk [vmem:[#allocation5 + $0x18] sm:$0xff] %vm1101_vm3, %v1422_v26  ;;  %1420 = vst.msk [vmem:[#allocation5 + $0x10] sm:$0xff] %vm1101_vm3, %v1417_v28 }
 0xc49   : > { %4546 = vmatprep.mubr.msk.f32.mxu1 %vm1101_vm3, %v3107_v27 }
 0xc4a   : > { %v5043_v30 = vpop.eup %5042  ;;  %4547 = vmatmul.mubr.msk.f32.vlgmr.msra.gmra.mrb[16].mxu1 %vm1101_vm3, %v3108_v29 }
 0xc4b   : > { %v3109_v32 = vmul.f32 %v5043_v30, %v5027_v4  ;;  %v5045_v34 = vpop.eup %5044 }
 0xc4c   : > { %v3110_v31 = vmul.f32 %v5045_v34, %v5029_v6 }
 0xc4d   : > { %4551 = vmatprep.mubr.msk.f32.mxu0 %vm1101_vm3, %v3109_v32 }
 0xc4e   : > { %v5047_v35 = vpop.eup %5046 }
 0xc4f   : > { %v5049_v36 = vpop.eup %5048  ;;  %v3115_v37 = vld [vmem:[#allocation5 + $0x10] sm:$0xff]  ;;  %v3116_v38 = vld [vmem:[#allocation5 + $0x18] sm:$0xff]  ;;  %v3111_v39 = vmul.f32 %v5047_v35, %v5031_v9 }
 0xc50   : > { %v3112_v40 = vmul.f32 %v5049_v36, %v5033_v10  ;;  %4549 = vmatprep.subr.mxu0 %v3115_v37  ;;  %4554 = vmatprep.subr.mxu1 %v3116_v38 }
 0xc51   : > { %4550 = vmatpush3.msra.mxu0 %v3115_v37  ;;  %4555 = vmatpush3.msra.mxu1 %v3116_v38 }
 0xc52   : > { %4556 = vmatprep.mubr.msk.f32.mxu1 %vm1101_vm3, %v3111_v39  ;;  %4552 = vmatmul.mubr.msk.f32.vlgmr.msra.gmra.mrb[24].mxu0 %vm1101_vm3, %v3110_v31 }
 0xc53   : > { %4557 = vmatmul.mubr.msk.f32.vlgmr.msra.gmra.mrb[18].mxu1 %vm1101_vm3, %v3112_v40  ;;  %4714 = vmatprep.subr.bf16.mxu0 %v4713_v47 }
 0xc54   : > { %4716 = vmatpush3.bf16.msra.mxu0 %v4713_v47  ;;  %4722 = vmatprep.subr.bf16.mxu1 %v4721_v17 }
 0xc55   : > { %4718 = vmatprep.subr.bf16.mxu0 %v4717_v50  ;;  %4724 = vmatpush3.bf16.msra.mxu1 %v4721_v17 }
 0xc56   : > { %4726 = vmatprep.subr.bf16.mxu1 %v4725_v20 }
 0xc58   : > { %4720 = vmatpush3.bf16.msra.mxu0 %v4717_v50 }
 0xc59   : > { %4730 = vmatprep.subr.bf16.mxu0 %v4729_v0  ;;  %4728 = vmatpush3.bf16.msra.mxu1 %v4725_v20 }
 0xc5a   : > { %4738 = vmatprep.subr.bf16.mxu1 %v4737_v24 }
 0xcb9   : > { %v4543_v41 = vpop.f32.mrb[22].mxu0 }
 0xcba   : > { %3442 = vst.msk [vmem:[#allocation7 + $0x8] sm:$0xff] %vm1101_vm3, %v4543_v41  ;;  %v3189_v42 = vpop.f32.mrb[23].mxu0 }
 0xcbb   : > { %3441 = vst.msk [vmem:[#allocation7] sm:$0xff] %vm1101_vm3, %v3189_v42 }
 0xd1d   : > { %v4548_v43 = vpop.f32.mrb[16].mxu1 }
 0xd1e   : > { %3447 = vrot.lane.b32.xlu1 %v4548_v43, %s6812_s12  ;;  %v3270_v44 = vpop.f32.mrb[17].mxu1  ;;  %v4250_v43 = vld [vmem:[#allocation17] ss:$0 sm:$0xff] }
 0xd25   : > { %v4553_v51 = vpop.f32.mrb[24].mxu0 }
 0xd26   : > { %v4558_v52 = vpop.f32.mrb[18].mxu1  ;;  %3457 = vrot.lane.b32.xlu1 %v4553_v51, %s6813_s10  ;;  %v3351_v53 = vpop.f32.mrb[25].mxu0  ;;  %v3809_v51 = vld [vmem:[%s6815_s23 + $0x10] sm:$0xff] }
 0xd27   : > { %v3432_v54 = vpop.f32.mrb[19].mxu1  ;;  %3455 = vrot.lane.b32.xlu0 %v3351_v53, %s6813_s10  ;;  %s5456_s10 = sshll.u32 %s5589_s4, 4  ;;  %s5457_s10 = int_to_ptr.vmem [resolvable:$false] %s5456_s10 }
 0xd28   : > { %p5459_p12 = scmp.lt.s32.totalorder %s6635_s0, %s5457_s10 }
 0xd2a   : > { %3445 = vrot.lane.b32.xlu1 %v3270_v44, %s6812_s12 }
 0xd2b   : > { %3465 = vrot.lane.b32.xlu0 %v3432_v54, %s6814_s21 }
 0xd2e   : > { %3467 = vrot.lane.b32.xlu1 %v4558_v52, %s6814_s21  ;;  %v3810_v52 = vld [vmem:[%s6815_s23 + $0x18] sm:$0xff]  ;;  %s6818_s21 = sld [smem:[#allocation62_spill]] }
 0xd90   : > { %v3448_v55 = vpop.permute.xlu1 %3447 }
 0xd91   : > { %3452 = vst.msk [vmem:[#allocation7 + $0x8] sm:$0xff] %vm2393_vm5, %v3448_v55  ;;  %v4741_v55 = vpack.c.bf16 %v3810_v52, %v3809_v51 }
 0xd98   : > { %v3458_v56 = vpop.permute.xlu1 %3457 }
 0xd99   : > { %3462 = vst.msk [vmem:[#allocation7 + $0x8] sm:$0xff] %vm2404_vm6, %v3458_v56  ;;  %v3456_v57 = vpop.permute.xlu0 %3455  ;;  %v3811_v56 = vld [vmem:[%s6815_s23 + $0x20] sm:$0xff] }
 0xd9c   : > { %v3446_v58 = vpop.permute.xlu1 %3445 }
 0xd9d   : > { %3451 = vst.msk [vmem:[#allocation7] sm:$0xff] %vm2393_vm5, %v3446_v58  ;;  %v3466_v59 = vpop.permute.xlu0 %3465 }
 0xd9e   : > { %3461 = vst.msk [vmem:[#allocation7] sm:$0xff] %vm2404_vm6, %v3456_v57  ;;  %v3812_v57 = vld [vmem:[%s6815_s23 + $0x28] sm:$0xff] }
 0xd9f   : > { %3471 = vst.msk [vmem:[#allocation7] sm:$0xff] %vm2415_vm7, %v3466_v59  ;;  %v4745_v58 = vpack.c.bf16 %v3812_v57, %v3811_v56  ;;  %v3813_v59 = vld [vmem:[%s6815_s23 + $0x30] sm:$0xff] }
 0xda0   : > { %v3468_v60 = vpop.permute.xlu1 %3467 }
 0xda1   : > { %3472 = vst.msk [vmem:[#allocation7 + $0x8] sm:$0xff] %vm2415_vm7, %v3468_v60  ;;  %v3814_v60 = vld [vmem:[%s6815_s23 + $0x38] sm:$0xff] }
 0xda6   : > { %v3473_v61 = vld [vmem:[#allocation7] sm:$0xff] }
 0xda7   : > { %4567 = vmatprep.mubr.msk.f32.mxu0 %vm967_vm0, %v3473_v61  ;;  %v4749_v61 = vpack.c.bf16 %v3814_v60, %v3813_v59 }
 0xda8   : > { %v3474_v62 = vld [vmem:[#allocation7 + $0x8] sm:$0xff] }
 0xda9   : > { %4568 = vmatmul.mubr.msk.f32.vlgmr.msra.gmra.mrb[26].mxu0 %vm967_vm0, %v3474_v62  ;;  %v3815_v62 = vld [vmem:[%s6815_s23 + $0x40] sm:$0xff] }
 0xdaa   : > { %4732 = vmatpush3.bf16.msra.mxu0 %v4729_v0 }
 0xdab   : > { %4734 = vmatprep.subr.bf16.mxu0 %v4733_v33 }
 0xdae   : > { %4736 = vmatpush3.bf16.msra.mxu0 %v4733_v33 }
 0xe7c   : > { %v4569_v2 = vpop.f32.mrb[26].mxu0 }
 0xe7d   : > { %v3564_v3 = vadd.f32 %v4569_v2, %v4247_v63  ;;  %v3558_v4 = vpop.f32.mrb[27].mxu0 }
 0xe7e   : > { %v3559_v5 = vadd.f32 %v4247_v63, %v3558_v4  ;;  %v3816_v63 = vld [vmem:[%s6815_s23 + $0x48] sm:$0xff]  ;;  %v3818_v4 = vld [vmem:[%s6815_s23 + $0x58] sm:$0xff] }
 0xe7f   : > { %v6548_v6 = vadd.f32 %v3564_v3, %v6426_v14  ;;  %v4753_v2 = vpack.c.bf16 %v3816_v63, %v3815_v62  ;;  %v3817_v3 = vld [vmem:[%s6815_s23 + $0x50] sm:$0xff] }
 0xe80   : > { %v6551_v7 = vadd.f32 %v3559_v5, %v6429_v15  ;;  %v4757_v5 = vpack.c.bf16 %v3818_v4, %v3817_v3 }
 0xe81   : > { %v3572_v8 = vsel %vm967_vm0, %v6548_v6, 0.0  ;;  %v3576_v14 = vmul.f32 %v6548_v6, %v6548_v6 }
 0xe82   : > { %3573 = vadd.xlane.f32.xlu1 %v3572_v8  ;;  %v3569_v9 = vsel %vm967_vm0, %v6551_v7, 0.0  ;;  %v3575_v10 = vmul.f32 %v6551_v7, %v6551_v7  ;;  %v3819_v8 = vld [vmem:[%s6815_s23 + $0x60] sm:$0xff] }
 0xe83   : > { %3570 = vadd.xlane.f32.xlu0 %v3569_v9  ;;  %v3580_v15 = vsel %vm967_vm0, %v3576_v14, 0.0  ;;  %v3820_v9 = vld [vmem:[%s6815_s23 + $0x68] sm:$0xff]  ;;  %v3822_v14 = vld [vmem:[%s6815_s23 + $0x78] sm:$0xff] }
 0xe84   : > { %v3577_v11 = vsel %vm967_vm0, %v3575_v10, 0.0  ;;  %v4761_v10 = vpack.c.bf16 %v3820_v9, %v3819_v8 }
 0xe87   : > { %3578 = vadd.xlane.f32.xlu0 %v3577_v11  ;;  %v3821_v11 = vld [vmem:[%s6815_s23 + $0x70] sm:$0xff] }
 0xe8b   : > { %3581 = vadd.xlane.f32.xlu0 %v3580_v15  ;;  %v4765_v15 = vpack.c.bf16 %v3822_v14, %v3821_v11 }
 0xf0f   : > { %v3574_v27 = vpop.xlane.xlu1 %3573 }
 0xf10   : > { %v3571_v26 = vpop.xlane.xlu0 %3570  ;;  %v3584_v30 = vmul.f32 0.03125, %v3574_v27 }
 0xf11   : > { %v3583_v28 = vmul.f32 0.03125, %v3571_v26 }
 0xf12   : > { %v3588_v37 = vmul.f32 %v3584_v30, %v3584_v30  ;;  %v3592_v46 = vsub.f32 %v6548_v6, %v3584_v30 }
 0xf13   : > { %v3587_v32 = vmul.f32 %v3583_v28, %v3583_v28  ;;  %v3591_v41 = vsub.f32 %v6551_v7, %v3583_v28 }
 0xf14   : > { %v3579_v29 = vpop.xlane.xlu0 %3578 }
 0xf15   : > { %v3585_v34 = vmul.f32 0.03125, %v3579_v29 }
 0xf17   : > { %v3589_v35 = vsub.f32 %v3585_v34, %v3587_v32 }
 0xf18   : > { %v3582_v36 = vpop.xlane.xlu0 %3581 }
 0xf19   : > { %v3593_v38 = vadd.f32 1e-05, %v3589_v35  ;;  %v3586_v39 = vmul.f32 0.03125, %v3582_v36  ;;  %v4258_v35 = vld [vmem:[%s6818_s21] ss:$0 sm:$0xff]  ;;  %s5458_s21 = scalar_lea.vmem %s5457_s10, 512 }
 0xf1a   : > { %p5460_p0 = scmp.lt.s32.totalorder %s5458_s21, %s5452_s3 }
 0xf1b   : > { %5050 = vrsqrt.f32 %v3593_v38  ;;  %v3590_v31 = vsub.f32 %v3586_v39, %v3588_v37 }
 0xf1c   : > { %p5461_p8 = por %p5460_p0, %p5459_p12 }
 0xf1d   : > { %v3594_v40 = vadd.f32 1e-05, %v3590_v31 }
 0xf1e   : > { %p5462_p9 = pnand %p5461_p8, %p5455_p11 }
 0xf1f   : > { %5052 = vrsqrt.f32 %v3594_v40 }
 0xf25   : > { %v5051_v42 = vpop.eup %5050 }
 0xf26   : > { %v3597_v44 = vmul.f32 %v5051_v42, %v3591_v41 }
 0xf28   : > { %v3606_v47 = vmul.f32 %v4250_v43, %v3597_v44 }
 0xf29   : > { %v5053_v48 = vpop.eup %5052 }
 0xf2a   : > { %v3598_v49 = vmul.f32 %v5053_v48, %v3592_v46  ;;  %v3615_v50 = vadd.f32 %v4251_v45, %v3606_v47 }
 0xf2c   : > { %v3607_v53 = vmul.f32 %v4250_v43, %v3598_v49  ;;  %4578 = vmatprep.mubr.msk.f32.mxu1 %vm967_vm0, %v3615_v50  ;;  %4589 = vmatprep.mubr.msk.f32.mxu0 %vm967_vm0, %v3615_v50 }
 0xf2e   : > { %v3616_v54 = vadd.f32 %v4251_v45, %v3607_v53 }
 0xf30   : > { %4579 = vmatmul.mubr.msk.f32.vlgmr.msra.gmra.mrb[20].mxu1 %vm967_vm0, %v3616_v54  ;;  %4590 = vmatmul.mubr.msk.f32.vlgmr.msra.gmra.mrb[28].mxu0 %vm967_vm0, %v3616_v54 }
 0xf31   : > { %4740 = vmatpush3.bf16.msra.mxu1 %v4737_v24 }
 0xf32   : > { %4742 = vmatprep.subr.bf16.mxu1 %v4741_v55 }
 0xf35   : > { %4744 = vmatpush3.bf16.msra.mxu1 %v4741_v55 }
 0xf36   : > { %4746 = vmatprep.subr.bf16.mxu1 %v4745_v58 }
 0xf39   : > { %4748 = vmatpush3.bf16.msra.mxu1 %v4745_v58 }
 0xf3a   : > { %4750 = vmatprep.subr.bf16.mxu1 %v4749_v61 }
 0xf3d   : > { %4752 = vmatpush3.bf16.msra.mxu1 %v4749_v61 }
 0xf3e   : > { %4754 = vmatprep.subr.bf16.mxu1 %v4753_v2 }
 0xf41   : > { %4756 = vmatpush3.bf16.msra.mxu1 %v4753_v2 }
 0xf42   : > { %4758 = vmatprep.subr.bf16.mxu1 %v4757_v5 }
 0xf45   : > { %4760 = vmatpush3.bf16.msra.mxu1 %v4757_v5 }
 0xf46   : > { %4762 = vmatprep.subr.bf16.mxu1 %v4761_v10 }
 0xf49   : > { %4764 = vmatpush3.bf16.msra.mxu1 %v4761_v10 }
 0xf4a   : > { %4766 = vmatprep.subr.bf16.mxu1 %v4765_v15 }
 0xf4d   : > { %4768 = vmatpush3.bf16.msra.mxu1 %v4765_v15 }
0x1003   : > { %v4580_v13 = vpop.f32.mrb[20].mxu1  ;;  %v4591_v16 = vpop.f32.mrb[28].mxu0 }
0x1004   : > { %v3792_v17 = vadd.f32 %v4591_v16, %v4255_v12  ;;  %v3700_v18 = vpop.f32.mrb[21].mxu1  ;;  %v3786_v19 = vpop.f32.mrb[29].mxu0  ;;  %v3706_v28 = vadd.f32 %v4580_v13, %v4252_v22 }
0x1005   : > { %v3787_v1 = vadd.f32 %v4255_v12, %v3786_v19  ;;  %v3701_v29 = vadd.f32 %v4252_v22, %v3700_v18 }
0x1006   : > { %v3798_v0 = vmul.f32 0.70710677, %v3792_v17  ;;  %v3796_v25 = vmul.f32 0.5, %v3792_v17 }
0x1007   : > { %v3797_v20 = vmul.f32 0.70710677, %v3787_v1  ;;  %v3795_v24 = vmul.f32 0.5, %v3787_v1 }
0x1008   : > { %5054 = verf.f32 %v3798_v0 }
0x1009   : > { %5056 = verf.f32 %v3797_v20 }
0x1012   : > { %v5055_v21 = vpop.eup %5054 }
0x1013   : > { %v5057_v33 = vpop.eup %5056  ;;  %v3802_v23 = vadd.f32 1.0, %v5055_v21 }
0x1014   : > { %v3801_v26 = vadd.f32 1.0, %v5057_v33 }
0x1015   : > { %v3804_v27 = vmul.f32 %v3802_v23, %v3796_v25 }
0x1016   : > { %v3803_v30 = vmul.f32 %v3801_v26, %v3795_v24 }
0x1017   : > { %v3806_v32 = vmul.f32 %v3804_v27, %v3706_v28 }
0x1018   : > { %v3805_v34 = vmul.f32 %v3803_v30, %v3701_v29 }
0x101a   : > { %4624 = vmatprep.mubr.f32.mxu1 %v3805_v34 }
0x101b   : > { %4625 = vmatmul.mubr.f32.vlgmr.msra.gmra.mrb[22].mxu1 %v3806_v32 }
0x10ee   : > { %v4626_v36 = vpop.f32.mrb[22].mxu1 }
0x10ef   : > { %v3902_v37 = vadd.f32 %v4626_v36, %v4258_v35  ;;  %v3896_v38 = vpop.f32.mrb[23].mxu1 }
0x10f0   : > { %v3897_v39 = vadd.f32 %v4258_v35, %v3896_v38 }
0x10f1   : > { %v3906_v31 = vadd.f32 %v3902_v37, %v6548_v6 }
0x10f2   : > { %v3905_v40 = vadd.f32 %v3897_v39, %v6551_v7 }
0x10f3   : > { %3908 = vst.msk [vmem:[%s954_s8 + $0x8] sm:$0xff] %vm967_vm0, %v3906_v31 }
0x10f4   : > { %3907 = vst.msk [vmem:[%s954_s8] sm:$0xff] %vm967_vm0, %v3905_v40 }
0x10f5   : > { %5465 = shalt.err (!%p5462_p9)
}
0x10f6   : > { %s5466_s14 = scalar_lea.hbm %s6632_s15, 256  ;;  %s5470_s1 = scalar_lea.hbm %s6819_s7, 512 }
0x10f7   : > { %p5467_p1 = scmp.ne.s32.totalorder %s6632_s15, %s5466_s14  ;;  %p5471_p4 = scmp.lt.u32.totalorder %s6632_s15, %s6819_s7 }
0x10f8   : > { %p5472_p13 = scmp.lt.u32.totalorder %s5470_s1, %s5466_s14  ;;  %p5474_p2 = scmp.lt.u32.totalorder %s5466_s14, %s6632_s15 }
0x10f9   : > { %p5468_p3 = pnand %p5467_p1, %p6820_p5 }
0x10fa   : > { %p5473_p6 = por %p5472_p13, %p5471_p4 }
0x10fb   : > { %p5469_p10 = pneg %p5468_p3 }
0x10fc   : > { %p5475_p7 = por %p5474_p2, %p5473_p6 }
0x10fe   : > { %p5476_p11 = pnand %p5475_p7, %p5469_p10 }
0x1100   : > { %5479 = shalt.err (!%p5476_p11)
}
0x1101   : > { %s5590_s3 = smov 128  }
0x1102   : > { %4823 = dma.vmem_to_hbm [thread:$0]  (%p6820_p5), %s6635_s0, 256, %s6632_s15, %s3910_s28, %s5590_s3, %s5590_s3, %s6812_s12  }
0x1103 PF: > { %s3940_s21 = sand.u32 1, %s5542_s5   ;;  %p6821_p12 = scmp.ne.s32.totalorder %s6797_s9, 0 }
0x1104   : > { %p6822_p0 = scmp.ge.s32.totalorder %s5562_s2, 2  ;;  %s3941_s14 = scalar_lea.sflag [#allocation10], %s3940_s21 }
0x1106   : > { %p4870_p8 = pnand %p6822_p0, %p6821_p12 }
0x1108   : > { %5537 = dma.done.wait (!%p4870_p8), %s3941_s14, 256  }
0x1109   : > { %5539 = vsyncadd (!%p4870_p8), %s3941_s14, 4294967040  ;;  %s47_s2 = sadd.s32 1, %s5562_s2   ;;  %s6823_s5 = smov %s5546_s26 }
0x110a   : > { %p44_p9 = scmp.ge.s32.totalorder %s47_s2, 4   ;;  %s6824_s26 = smov %s5550_s27 }
0x110b   : > { %s6825_s27 = smov %s6099_s11  ;;  %s6826_s28 = smov %s5558_s6 }
0x110c   : > { %s6827_s6 = smov %s6829_s25  ;;  %46 = sbr.rel (!%p44_p9) target bundleno = 37 (0x25), region = 236 }
0x1113   :  { %3946 = vsyncpa [#allocation9], 1 }
0x1114   :  { %3948 = vsyncpa [#allocation9 + $0x1], 1 }
0x1115   :  { %3949 = vsyncpa [#allocation12], 1 }
0x1116   :  { %3950 = vsyncpa [#allocation15], 1 }
0x1117   :  { %3951 = vsyncpa [#allocation18], 1 }
0x1118   :  { %3952 = vsyncpa [#allocation21], 1 }
0x1119   :  { %3953 = vsyncpa [#allocation24], 1 }
0x111a   :  { %3954 = vsyncpa [#allocation27], 1 }
0x111b   :  { %3955 = vsyncpa [#allocation30], 1 }
0x111c   :  { %3956 = vsyncpa [#allocation10], 1 }
0x111d   :  { %3958 = vsyncpa [#allocation10 + $0x1], 1 }

</bundles_post_ra>
